<compile_context>
chip_gen: v7x
topology: tpu7x:2x2x1
jax: 0.10.0
libtpu: 0.0.40
codegen_flags: <defaults>
</compile_context>

<pallas_src>
import jax
import jax.numpy as jnp
import numpy as np
from jax.experimental import pallas as pl
from jax.experimental.pallas import tpu as pltpu

B = 256          # batch
NUM_BLOCKS = 1   # 1 block on v5e/v6e (single TC); set to 2 on v7x and profile
TB = B // NUM_BLOCKS
IN_DIM = 32      # config['in_dim']
HIDDEN = 64      # config['layers'] = [64]
E_DIM = 16       # config['e_dim']
NUM_LEVELS = 3   # len(config['codebook_size'])
K = 32           # codebook entries per level
BETA = 0.25      # config['beta']

# ---- packed parameter slabs (resident in VMEM, one DMA each) ----
SLAB_COLS = 64
# bf16 weight slab row offsets (all multiples of 16 -> bf16 (16,128) tile aligned)
_WE1_R = 0                              # (IN_DIM, HIDDEN)  = (32, 64)
_WE2_R = _WE1_R + IN_DIM                # (HIDDEN, E_DIM)   = (64, 16)
_WD1_R = _WE2_R + HIDDEN                # (E_DIM, HIDDEN)   = (16, 64)
_WD2_R = _WD1_R + E_DIM                 # (HIDDEN, IN_DIM)  = (64, 32)
_CBT_R = _WD2_R + HIDDEN                # (L*E_DIM, K) = (-2*cb)^T per level
W_ROWS = _CBT_R + NUM_LEVELS * E_DIM    # 224
# f32 param slab row offsets (all multiples of 8 -> f32 (8,128) tile aligned)
_BE1_R = 0                              # (1, HIDDEN)
_BE2_R = 8                              # (1, E_DIM)
_BD1_R = 16                             # (1, HIDDEN)
_BD2_R = 24                             # (1, IN_DIM)
_CB_R = 32                              # (L*K, E_DIM) exact f32 codebook (gather)
_CBN_R = _CB_R + NUM_LEVELS * K         # (1, K) per level, ||c||^2, 8 rows apart
P_ROWS = _CBN_R + NUM_LEVELS * 8        # 152


def rqvae_kernel(x_ref, w_ref, p_ref, y_ref, sse_ref):
    bf16 = jnp.bfloat16
    f32 = jnp.float32
    x = x_ref[...]                                           # (TB, IN_DIM) f32

    # zero-cost static views into the two resident slabs
    we1 = w_ref[_WE1_R:_WE1_R + IN_DIM, :]                   # (32, 64) bf16
    we2 = w_ref[_WE2_R:_WE2_R + HIDDEN, 0:E_DIM]             # (64, 16) bf16
    wd1 = w_ref[_WD1_R:_WD1_R + E_DIM, :]                    # (16, 64) bf16
    wd2 = w_ref[_WD2_R:_WD2_R + HIDDEN, 0:IN_DIM]            # (64, 32) bf16
    be1 = p_ref[_BE1_R:_BE1_R + 1, 0:HIDDEN]                 # (1, 64)  f32
    be2 = p_ref[_BE2_R:_BE2_R + 1, 0:E_DIM]                  # (1, 16)  f32
    bd1 = p_ref[_BD1_R:_BD1_R + 1, 0:HIDDEN]                 # (1, 64)  f32
    bd2 = p_ref[_BD2_R:_BD2_R + 1, 0:IN_DIM]                 # (1, 32)  f32

    # ---------------- encoder MLP: Linear -> ReLU -> Linear ----------------
    # dropout_prob=0.0 -> identity, bn=False; bf16 MXU feed, f32 accumulate.
    h = jnp.dot(x.astype(bf16), we1, preferred_element_type=f32) + be1
    h = jnp.maximum(h, 0.0)
    z = jnp.dot(h.astype(bf16), we2, preferred_element_type=f32) + be2

    # ---------------- residual quantizer ----------------
    res = z
    z_q = jnp.zeros_like(z)
    sse = jnp.zeros((TB, 1), f32)                            # per-row sq. residuals
    iota = jax.lax.broadcasted_iota(jnp.int32, (TB, K), 1)

    for lvl in range(NUM_LEVELS):
        cbt = w_ref[_CBT_R + E_DIM * lvl:_CBT_R + E_DIM * (lvl + 1), 0:K]  # (16,32) = (-2*cb_l)^T
        cbn = p_ref[_CBN_R + 8 * lvl:_CBN_R + 8 * lvl + 1, 0:K]            # (1,32) ||c||^2
        cbl = p_ref[_CB_R + K * lvl:_CB_R + K * (lvl + 1), 0:E_DIM]        # (32,16) exact f32

        # argmin_k ||res-c_k||^2 == argmin_k (||c_k||^2 - 2<res,c_k>); -2 folded into cbt.
        score = cbn + jnp.dot(res.astype(bf16), cbt, preferred_element_type=f32)   # (TB,K)
        s_min = jnp.min(score, axis=-1, keepdims=True)                             # (TB,1)
        # first-index argmin (matches torch.argmin tie-breaking)
        idx = jnp.min(jnp.where(score <= s_min, iota, K), axis=-1, keepdims=True)
        onehot = (iota == idx).astype(f32)                                         # (TB,K)
        # exact f32 gather of codebook rows via one-hot matmul (tiny, MXU)
        x_q = jnp.dot(onehot, cbl, preferred_element_type=f32)                     # (TB,E_DIM)

        # new residual first; its squared norm is exactly the per-level MSE sum
        res = res - x_q
        sse = sse + jnp.sum(res * res, axis=-1, keepdims=True)
        z_q = z_q + x_q
        # straight-through estimator is value-preserving in the forward pass

    # ---------------- decoder MLP: Linear -> ReLU -> Linear ----------------
    h2 = jnp.dot(z_q.astype(bf16), wd1, preferred_element_type=f32) + bd1
    h2 = jnp.maximum(h2, 0.0)
    y = jnp.dot(h2.astype(bf16), wd2, preferred_element_type=f32) + bd2

    y_ref[...] = y
    # single scalar per grid block (no lane-sparse (B,1) output stream)
    sse_ref[...] = jnp.sum(sse, axis=0, keepdims=True)


def _pad2d(a, rows, cols=SLAB_COLS):
    return jnp.pad(a, ((0, rows - a.shape[0]), (0, cols - a.shape[1])))


def make_params(key):
    """Deterministic PyTorch-style init: Linear ~ U(+-1/sqrt(fan_in)), codebook ~ N(0,1)."""
    ks = jax.random.split(key, 9)

    def linear(kw, kb, fan_in, fan_out):
        bound = 1.0 / np.sqrt(fan_in)
        w = jax.random.uniform(kw, (fan_in, fan_out), jnp.float32, -bound, bound)
        b = jax.random.uniform(kb, (1, fan_out), jnp.float32, -bound, bound)
        return w, b

    we1, be1 = linear(ks[0], ks[1], IN_DIM, HIDDEN)
    we2, be2 = linear(ks[2], ks[3], HIDDEN, E_DIM)
    cb = jax.random.normal(ks[4], (NUM_LEVELS, K, E_DIM), jnp.float32)
    wd1, bd1 = linear(ks[5], ks[6], E_DIM, HIDDEN)
    wd2, bd2 = linear(ks[7], ks[8], HIDDEN, IN_DIM)
    return (we1, be1, we2, be2, cb, wd1, bd1, wd2, bd2)


@jax.jit
def rqvae_forward(x, params):
    we1, be1, we2, be2, cb, wd1, bd1, wd2, bd2 = params

    # bf16 MXU-operand slab: encoder/decoder weights + (-2*cb)^T (scale by 2 is
    # exact, so the fold does not change bf16 rounding of the codebook).
    cbt = jnp.swapaxes(-2.0 * cb, 1, 2).reshape(NUM_LEVELS * E_DIM, K)   # (48, 32)
    wslab = jnp.concatenate([
        _pad2d(we1, IN_DIM),
        _pad2d(we2, HIDDEN),
        _pad2d(wd1, E_DIM),
        _pad2d(wd2, HIDDEN),
        _pad2d(cbt, NUM_LEVELS * E_DIM),
    ], axis=0).astype(jnp.bfloat16)                                      # (224, 64)

    # f32 slab: biases, exact codebook (gather), precomputed ||c||^2.
    cbn = jnp.sum(cb * cb, axis=-1)                                      # (L, K)
    pslab = jnp.concatenate(
        [_pad2d(be1, 8), _pad2d(be2, 8), _pad2d(bd1, 8), _pad2d(bd2, 8),
         _pad2d(cb.reshape(NUM_LEVELS * K, E_DIM), NUM_LEVELS * K)]
        + [_pad2d(cbn[l:l + 1], 8) for l in range(NUM_LEVELS)],
        axis=0).astype(jnp.float32)                                      # (152, 64)

    y, sse = pl.pallas_call(
        rqvae_kernel,
        grid=(NUM_BLOCKS,),
        in_specs=[
            pl.BlockSpec((TB, IN_DIM), lambda i: (i, 0)),
            pl.BlockSpec((W_ROWS, SLAB_COLS), lambda i: (0, 0)),   # resident, 1 DMA
            pl.BlockSpec((P_ROWS, SLAB_COLS), lambda i: (0, 0)),   # resident, 1 DMA
        ],
        out_specs=(pl.BlockSpec((TB, IN_DIM), lambda i: (i, 0)),
                   pl.BlockSpec((1, 1), lambda i: (i, 0))),
        out_shape=(jax.ShapeDtypeStruct((B, IN_DIM), jnp.float32),
                   jax.ShapeDtypeStruct((NUM_BLOCKS, 1), jnp.float32)),
        compiler_params=pltpu.CompilerParams(
            dimension_semantics=("parallel",)),   # only matters if NUM_BLOCKS=2 (v7x)
    )(x, wslab, pslab)

    # rq_loss = mean over levels of [mse + beta*mse]; constants folded once.
    rq_loss = (1.0 + BETA) * jnp.sum(sse) / (B * E_DIM * NUM_LEVELS)
    return y, rq_loss


def rqvae_reference(x, params):
    """Plain-JAX reference mirroring the forward semantics (same bf16 MXU feed)."""
    we1, be1, we2, be2, cb, wd1, bd1, wd2, bd2 = params
    bf16 = jnp.bfloat16

    def dot(a, b):
        return jnp.dot(a.astype(bf16), b.astype(bf16),
                       preferred_element_type=jnp.float32)

    h = jnp.maximum(dot(x, we1) + be1, 0.0)
    z = dot(h, we2) + be2
    res, z_q, losses = z, jnp.zeros_like(z), []
    for lvl in range(NUM_LEVELS):
        c = cb[lvl]
        score = jnp.sum(c * c, axis=-1)[None, :] - 2.0 * dot(res, c.T)
        idx = jnp.argmin(score, axis=-1)
        x_q = c[idx]
        losses.append((1.0 + BETA) * jnp.mean((x_q - res) ** 2))
        res = res - x_q
        z_q = z_q + x_q
    rq_loss = jnp.mean(jnp.stack(losses))
    h2 = jnp.maximum(dot(z_q, wd1) + bd1, 0.0)
    y = dot(h2, wd2) + bd2
    return y, rq_loss


if __name__ == "__main__":
    key = jax.random.PRNGKey(0)
    kx, kp = jax.random.split(key)
    x = jax.random.normal(kx, (B, IN_DIM), jnp.float32)
    params = make_params(kp)

    y, rq_loss = rqvae_forward(x, params)
    jax.block_until_ready((y, rq_loss))

    y_ref, loss_ref = rqvae_reference(x, params)
    assert y.shape == (B, IN_DIM)
    assert np.allclose(np.asarray(y), np.asarray(y_ref), rtol=1e-2, atol=1e-2)
    assert np.allclose(float(rq_loss), float(loss_ref), rtol=1e-2, atol=1e-2)

    print("KERNEL_OK")
</pallas_src>

<mosaic_0001>
module attributes {stable_mosaic.version = 11 : i64} {
  func.func @rqvae_kernel(%arg0: i32, %arg1: memref<256x32xf32, #tpu.memory_space<vmem>>, %arg2: memref<224x64xbf16, #tpu.memory_space<vmem>>, %arg3: memref<152x64xf32, #tpu.memory_space<vmem>>, %arg4: memref<256x32xf32, #tpu.memory_space<vmem>>, %arg5: memref<1x1xf32, #tpu.memory_space<vmem>>) attributes {dimension_semantics = [#tpu.dimension_semantics<parallel>], iteration_bounds = array<i64: 1>, scalar_prefetch = 0 : i64, scratch_operands = 0 : i64, tpu.core_type = #tpu.core_type<tc>, window_params = [{transform_indices = @transform_0, window_bounds = array<i64: 256, 32>}, {pipeline_mode = #tpu.pipeline_mode<synchronous>, transform_indices = @transform_1, window_bounds = array<i64: 224, 64>}, {pipeline_mode = #tpu.pipeline_mode<synchronous>, transform_indices = @transform_2, window_bounds = array<i64: 152, 64>}, {transform_indices = @transform_3, window_bounds = array<i64: 256, 32>}, {transform_indices = @transform_4, window_bounds = array<i64: 1, 1>}]} {
    %c0 = arith.constant 0 : index
    %c0_0 = arith.constant 0 : index
    %0 = vector.load %arg1[%c0, %c0_0] : memref<256x32xf32, #tpu.memory_space<vmem>>, vector<256x32xf32>
    %c0_1 = arith.constant 0 : index
    %c0_2 = arith.constant 0 : index
    %1 = vector.load %arg2[%c0_1, %c0_2] : memref<224x64xbf16, #tpu.memory_space<vmem>>, vector<32x64xbf16>
    %c32 = arith.constant 32 : index
    %c0_3 = arith.constant 0 : index
    %2 = vector.load %arg2[%c32, %c0_3] : memref<224x64xbf16, #tpu.memory_space<vmem>>, vector<64x16xbf16>
    %c96 = arith.constant 96 : index
    %c0_4 = arith.constant 0 : index
    %3 = vector.load %arg2[%c96, %c0_4] : memref<224x64xbf16, #tpu.memory_space<vmem>>, vector<16x64xbf16>
    %c112 = arith.constant 112 : index
    %c0_5 = arith.constant 0 : index
    %4 = vector.load %arg2[%c112, %c0_5] : memref<224x64xbf16, #tpu.memory_space<vmem>>, vector<64x32xbf16>
    %c0_6 = arith.constant 0 : index
    %c0_7 = arith.constant 0 : index
    %5 = vector.load %arg3[%c0_6, %c0_7] : memref<152x64xf32, #tpu.memory_space<vmem>>, vector<1x64xf32>
    %c8 = arith.constant 8 : index
    %c0_8 = arith.constant 0 : index
    %6 = vector.load %arg3[%c8, %c0_8] : memref<152x64xf32, #tpu.memory_space<vmem>>, vector<1x16xf32>
    %c16 = arith.constant 16 : index
    %c0_9 = arith.constant 0 : index
    %7 = vector.load %arg3[%c16, %c0_9] : memref<152x64xf32, #tpu.memory_space<vmem>>, vector<1x64xf32>
    %c24 = arith.constant 24 : index
    %c0_10 = arith.constant 0 : index
    %8 = vector.load %arg3[%c24, %c0_10] : memref<152x64xf32, #tpu.memory_space<vmem>>, vector<1x32xf32>
    %9 = arith.truncf %0 : vector<256x32xf32> to vector<256x32xbf16>
    %cst = arith.constant dense<0.000000e+00> : vector<256x64xf32>
    %10 = tpu.matmul %9, %1, %cst {dimension_numbers = #tpu.dot_dimension_numbers<[1], [0], [0], [1], [0, 0, 1, 1], [], []>} : vector<256x32xbf16>, vector<32x64xbf16>, vector<256x64xf32> -> vector<256x64xf32>
    %11 = vector.broadcast %5 : vector<1x64xf32> to vector<256x64xf32>
    %12 = arith.addf %10, %11 : vector<256x64xf32>
    %cst_11 = arith.constant 0.000000e+00 : f32
    %13 = vector.broadcast %cst_11 : f32 to vector<256x64xf32>
    %14 = arith.maximumf %12, %13 : vector<256x64xf32>
    %15 = arith.truncf %14 : vector<256x64xf32> to vector<256x64xbf16>
    %cst_12 = arith.constant dense<0.000000e+00> : vector<256x16xf32>
    %16 = tpu.matmul %15, %2, %cst_12 {dimension_numbers = #tpu.dot_dimension_numbers<[1], [0], [0], [1], [0, 0, 1, 1], [], []>} : vector<256x64xbf16>, vector<64x16xbf16>, vector<256x16xf32> -> vector<256x16xf32>
    %17 = vector.broadcast %6 : vector<1x16xf32> to vector<256x16xf32>
    %18 = arith.addf %16, %17 : vector<256x16xf32>
    %cst_13 = arith.constant 0.000000e+00 : f32
    %19 = vector.broadcast %cst_13 : f32 to vector<256x16xf32>
    %cst_14 = arith.constant 0.000000e+00 : f32
    %20 = vector.broadcast %cst_14 : f32 to vector<256x1xf32>
    %21 = tpu.iota {dimensions = array<i32: 1>} : vector<256x32xi32>
    %c176 = arith.constant 176 : index
    %c0_15 = arith.constant 0 : index
    %22 = vector.load %arg2[%c176, %c0_15] : memref<224x64xbf16, #tpu.memory_space<vmem>>, vector<16x32xbf16>
    %c128 = arith.constant 128 : index
    %c0_16 = arith.constant 0 : index
    %23 = vector.load %arg3[%c128, %c0_16] : memref<152x64xf32, #tpu.memory_space<vmem>>, vector<1x32xf32>
    %c32_17 = arith.constant 32 : index
    %c0_18 = arith.constant 0 : index
    %24 = vector.load %arg3[%c32_17, %c0_18] : memref<152x64xf32, #tpu.memory_space<vmem>>, vector<32x16xf32>
    %25 = arith.truncf %18 : vector<256x16xf32> to vector<256x16xbf16>
    %cst_19 = arith.constant dense<0.000000e+00> : vector<256x32xf32>
    %26 = tpu.matmul %25, %22, %cst_19 {dimension_numbers = #tpu.dot_dimension_numbers<[1], [0], [0], [1], [0, 0, 1, 1], [], []>} : vector<256x16xbf16>, vector<16x32xbf16>, vector<256x32xf32> -> vector<256x32xf32>
    %27 = vector.broadcast %23 : vector<1x32xf32> to vector<256x32xf32>
    %28 = arith.addf %27, %26 : vector<256x32xf32>
    %cst_20 = arith.constant dense<0x7F800000> : vector<256xf32>
    %29 = vector.multi_reduction <minimumf>, %28, %cst_20 [1] : vector<256x32xf32> to vector<256xf32>
    %30 = vector.shape_cast %29 : vector<256xf32> to vector<256x1xf32>
    %31 = vector.broadcast %30 : vector<256x1xf32> to vector<256x32xf32>
    %32 = arith.cmpf ole, %28, %31 : vector<256x32xf32>
    %c32_i32 = arith.constant 32 : i32
    %33 = vector.broadcast %c32_i32 : i32 to vector<256x32xi32>
    %34 = arith.select %32, %21, %33 : vector<256x32xi1>, vector<256x32xi32>
    %cst_21 = arith.constant dense<2147483647> : vector<256xi32>
    %35 = vector.multi_reduction <minsi>, %34, %cst_21 [1] : vector<256x32xi32> to vector<256xi32>
    %36 = vector.shape_cast %35 : vector<256xi32> to vector<256x1xi32>
    %37 = vector.broadcast %36 : vector<256x1xi32> to vector<256x32xi32>
    %38 = arith.cmpi eq, %21, %37 : vector<256x32xi32>
    %39 = arith.extui %38 : vector<256x32xi1> to vector<256x32xi32>
    %40 = arith.sitofp %39 : vector<256x32xi32> to vector<256x32xf32>
    %cst_22 = arith.constant dense<0.000000e+00> : vector<256x16xf32>
    %41 = tpu.matmul %40, %24, %cst_22 {dimension_numbers = #tpu.dot_dimension_numbers<[1], [0], [0], [1], [0, 0, 1, 1], [], []>} : vector<256x32xf32>, vector<32x16xf32>, vector<256x16xf32> -> vector<256x16xf32>
    %42 = arith.subf %18, %41 : vector<256x16xf32>
    %43 = arith.mulf %42, %42 : vector<256x16xf32>
    %cst_23 = arith.constant dense<0.000000e+00> : vector<256xf32>
    %44 = vector.multi_reduction <add>, %43, %cst_23 [1] : vector<256x16xf32> to vector<256xf32>
    %45 = vector.shape_cast %44 : vector<256xf32> to vector<256x1xf32>
    %46 = arith.addf %20, %45 : vector<256x1xf32>
    %47 = arith.addf %19, %41 : vector<256x16xf32>
    %c192 = arith.constant 192 : index
    %c0_24 = arith.constant 0 : index
    %48 = vector.load %arg2[%c192, %c0_24] : memref<224x64xbf16, #tpu.memory_space<vmem>>, vector<16x32xbf16>
    %c136 = arith.constant 136 : index
    %c0_25 = arith.constant 0 : index
    %49 = vector.load %arg3[%c136, %c0_25] : memref<152x64xf32, #tpu.memory_space<vmem>>, vector<1x32xf32>
    %c64 = arith.constant 64 : index
    %c0_26 = arith.constant 0 : index
    %50 = vector.load %arg3[%c64, %c0_26] : memref<152x64xf32, #tpu.memory_space<vmem>>, vector<32x16xf32>
    %51 = arith.truncf %42 : vector<256x16xf32> to vector<256x16xbf16>
    %cst_27 = arith.constant dense<0.000000e+00> : vector<256x32xf32>
    %52 = tpu.matmul %51, %48, %cst_27 {dimension_numbers = #tpu.dot_dimension_numbers<[1], [0], [0], [1], [0, 0, 1, 1], [], []>} : vector<256x16xbf16>, vector<16x32xbf16>, vector<256x32xf32> -> vector<256x32xf32>
    %53 = vector.broadcast %49 : vector<1x32xf32> to vector<256x32xf32>
    %54 = arith.addf %53, %52 : vector<256x32xf32>
    %cst_28 = arith.constant dense<0x7F800000> : vector<256xf32>
    %55 = vector.multi_reduction <minimumf>, %54, %cst_28 [1] : vector<256x32xf32> to vector<256xf32>
    %56 = vector.shape_cast %55 : vector<256xf32> to vector<256x1xf32>
    %57 = vector.broadcast %56 : vector<256x1xf32> to vector<256x32xf32>
    %58 = arith.cmpf ole, %54, %57 : vector<256x32xf32>
    %c32_i32_29 = arith.constant 32 : i32
    %59 = vector.broadcast %c32_i32_29 : i32 to vector<256x32xi32>
    %60 = arith.select %58, %21, %59 : vector<256x32xi1>, vector<256x32xi32>
    %cst_30 = arith.constant dense<2147483647> : vector<256xi32>
    %61 = vector.multi_reduction <minsi>, %60, %cst_30 [1] : vector<256x32xi32> to vector<256xi32>
    %62 = vector.shape_cast %61 : vector<256xi32> to vector<256x1xi32>
    %63 = vector.broadcast %62 : vector<256x1xi32> to vector<256x32xi32>
    %64 = arith.cmpi eq, %21, %63 : vector<256x32xi32>
    %65 = arith.extui %64 : vector<256x32xi1> to vector<256x32xi32>
    %66 = arith.sitofp %65 : vector<256x32xi32> to vector<256x32xf32>
    %cst_31 = arith.constant dense<0.000000e+00> : vector<256x16xf32>
    %67 = tpu.matmul %66, %50, %cst_31 {dimension_numbers = #tpu.dot_dimension_numbers<[1], [0], [0], [1], [0, 0, 1, 1], [], []>} : vector<256x32xf32>, vector<32x16xf32>, vector<256x16xf32> -> vector<256x16xf32>
    %68 = arith.subf %42, %67 : vector<256x16xf32>
    %69 = arith.mulf %68, %68 : vector<256x16xf32>
    %cst_32 = arith.constant dense<0.000000e+00> : vector<256xf32>
    %70 = vector.multi_reduction <add>, %69, %cst_32 [1] : vector<256x16xf32> to vector<256xf32>
    %71 = vector.shape_cast %70 : vector<256xf32> to vector<256x1xf32>
    %72 = arith.addf %46, %71 : vector<256x1xf32>
    %73 = arith.addf %47, %67 : vector<256x16xf32>
    %c208 = arith.constant 208 : index
    %c0_33 = arith.constant 0 : index
    %74 = vector.load %arg2[%c208, %c0_33] : memref<224x64xbf16, #tpu.memory_space<vmem>>, vector<16x32xbf16>
    %c144 = arith.constant 144 : index
    %c0_34 = arith.constant 0 : index
    %75 = vector.load %arg3[%c144, %c0_34] : memref<152x64xf32, #tpu.memory_space<vmem>>, vector<1x32xf32>
    %c96_35 = arith.constant 96 : index
    %c0_36 = arith.constant 0 : index
    %76 = vector.load %arg3[%c96_35, %c0_36] : memref<152x64xf32, #tpu.memory_space<vmem>>, vector<32x16xf32>
    %77 = arith.truncf %68 : vector<256x16xf32> to vector<256x16xbf16>
    %cst_37 = arith.constant dense<0.000000e+00> : vector<256x32xf32>
    %78 = tpu.matmul %77, %74, %cst_37 {dimension_numbers = #tpu.dot_dimension_numbers<[1], [0], [0], [1], [0, 0, 1, 1], [], []>} : vector<256x16xbf16>, vector<16x32xbf16>, vector<256x32xf32> -> vector<256x32xf32>
    %79 = vector.broadcast %75 : vector<1x32xf32> to vector<256x32xf32>
    %80 = arith.addf %79, %78 : vector<256x32xf32>
    %cst_38 = arith.constant dense<0x7F800000> : vector<256xf32>
    %81 = vector.multi_reduction <minimumf>, %80, %cst_38 [1] : vector<256x32xf32> to vector<256xf32>
    %82 = vector.shape_cast %81 : vector<256xf32> to vector<256x1xf32>
    %83 = vector.broadcast %82 : vector<256x1xf32> to vector<256x32xf32>
    %84 = arith.cmpf ole, %80, %83 : vector<256x32xf32>
    %c32_i32_39 = arith.constant 32 : i32
    %85 = vector.broadcast %c32_i32_39 : i32 to vector<256x32xi32>
    %86 = arith.select %84, %21, %85 : vector<256x32xi1>, vector<256x32xi32>
    %cst_40 = arith.constant dense<2147483647> : vector<256xi32>
    %87 = vector.multi_reduction <minsi>, %86, %cst_40 [1] : vector<256x32xi32> to vector<256xi32>
    %88 = vector.shape_cast %87 : vector<256xi32> to vector<256x1xi32>
    %89 = vector.broadcast %88 : vector<256x1xi32> to vector<256x32xi32>
    %90 = arith.cmpi eq, %21, %89 : vector<256x32xi32>
    %91 = arith.extui %90 : vector<256x32xi1> to vector<256x32xi32>
    %92 = arith.sitofp %91 : vector<256x32xi32> to vector<256x32xf32>
    %cst_41 = arith.constant dense<0.000000e+00> : vector<256x16xf32>
    %93 = tpu.matmul %92, %76, %cst_41 {dimension_numbers = #tpu.dot_dimension_numbers<[1], [0], [0], [1], [0, 0, 1, 1], [], []>} : vector<256x32xf32>, vector<32x16xf32>, vector<256x16xf32> -> vector<256x16xf32>
    %94 = arith.subf %68, %93 : vector<256x16xf32>
    %95 = arith.mulf %94, %94 : vector<256x16xf32>
    %cst_42 = arith.constant dense<0.000000e+00> : vector<256xf32>
    %96 = vector.multi_reduction <add>, %95, %cst_42 [1] : vector<256x16xf32> to vector<256xf32>
    %97 = vector.shape_cast %96 : vector<256xf32> to vector<256x1xf32>
    %98 = arith.addf %72, %97 : vector<256x1xf32>
    %99 = arith.addf %73, %93 : vector<256x16xf32>
    %100 = arith.truncf %99 : vector<256x16xf32> to vector<256x16xbf16>
    %cst_43 = arith.constant dense<0.000000e+00> : vector<256x64xf32>
    %101 = tpu.matmul %100, %3, %cst_43 {dimension_numbers = #tpu.dot_dimension_numbers<[1], [0], [0], [1], [0, 0, 1, 1], [], []>} : vector<256x16xbf16>, vector<16x64xbf16>, vector<256x64xf32> -> vector<256x64xf32>
    %102 = vector.broadcast %7 : vector<1x64xf32> to vector<256x64xf32>
    %103 = arith.addf %101, %102 : vector<256x64xf32>
    %cst_44 = arith.constant 0.000000e+00 : f32
    %104 = vector.broadcast %cst_44 : f32 to vector<256x64xf32>
    %105 = arith.maximumf %103, %104 : vector<256x64xf32>
    %106 = arith.truncf %105 : vector<256x64xf32> to vector<256x64xbf16>
    %cst_45 = arith.constant dense<0.000000e+00> : vector<256x32xf32>
    %107 = tpu.matmul %106, %4, %cst_45 {dimension_numbers = #tpu.dot_dimension_numbers<[1], [0], [0], [1], [0, 0, 1, 1], [], []>} : vector<256x64xbf16>, vector<64x32xbf16>, vector<256x32xf32> -> vector<256x32xf32>
    %108 = vector.broadcast %8 : vector<1x32xf32> to vector<256x32xf32>
    %109 = arith.addf %107, %108 : vector<256x32xf32>
    %c0_46 = arith.constant 0 : index
    %c0_47 = arith.constant 0 : index
    %110 = vector.load %arg4[%c0_46, %c0_47] : memref<256x32xf32, #tpu.memory_space<vmem>>, vector<256x32xf32>
    tpu.vector_store %arg4[%c0_46, %c0_47], %109 {strides = array<i32>} : memref<256x32xf32, #tpu.memory_space<vmem>>, vector<256x32xf32>,
    %cst_48 = arith.constant dense<0.000000e+00> : vector<1xf32>
    %111 = vector.multi_reduction <add>, %98, %cst_48 [0] : vector<256x1xf32> to vector<1xf32>
    %112 = vector.shape_cast %111 : vector<1xf32> to vector<1x1xf32>
    %c0_49 = arith.constant 0 : index
    %c0_50 = arith.constant 0 : index
    %113 = vector.load %arg5[%c0_49, %c0_50] : memref<1x1xf32, #tpu.memory_space<vmem>>, vector<1x1xf32>
    tpu.vector_store %arg5[%c0_49, %c0_50], %112 {strides = array<i32>} : memref<1x1xf32, #tpu.memory_space<vmem>>, vector<1x1xf32>,
    return
  }
  func.func @transform_0(%arg0: i32) -> (i32, i32) {
    %c0_i32 = arith.constant 0 : i32
    %c0_i32_0 = arith.constant 0 : i32
    return %arg0, %c0_i32 : i32, i32
  }
  func.func @transform_1(%arg0: i32) -> (i32, i32) {
    %c0_i32 = arith.constant 0 : i32
    %c0_i32_0 = arith.constant 0 : i32
    %c0_i32_1 = arith.constant 0 : i32
    return %c0_i32, %c0_i32_0 : i32, i32
  }
  func.func @transform_2(%arg0: i32) -> (i32, i32) {
    %c0_i32 = arith.constant 0 : i32
    %c0_i32_0 = arith.constant 0 : i32
    %c0_i32_1 = arith.constant 0 : i32
    return %c0_i32, %c0_i32_0 : i32, i32
  }
  func.func @transform_3(%arg0: i32) -> (i32, i32) {
    %c0_i32 = arith.constant 0 : i32
    %c0_i32_0 = arith.constant 0 : i32
    return %arg0, %c0_i32 : i32, i32
  }
  func.func @transform_4(%arg0: i32) -> (i32, i32) {
    %c0_i32 = arith.constant 0 : i32
    %c0_i32_0 = arith.constant 0 : i32
    return %arg0, %c0_i32 : i32, i32
  }
}

</mosaic_0001>

<bundles_post_ra>
// kernel: rqvae_forward.1
= control target key start
LH: loop header
LB: loop body
LE: loop exit
PB: predicated region body
PF: predicated region fallthrough
CT: control target
= control target key end

     0   :  { %vm108_vm0 = vcmask 261120   ;;  %s10832_s0 = inlined_call_operand.vmem [shape: f32[256,32], index: 0, kind: input, shape index: {}]   ;;  %s10833_s1 = inlined_call_operand.vmem [shape: bf16[224,64], index: 1, kind: input, shape index: {}]   ;;  %s10834_s2 = inlined_call_operand.vmem [shape: f32[152,64], index: 2, kind: input, shape index: {}]   ;;  %s10835_s3 = inlined_call_operand.vmem [shape: f32[256,32], index: 3, kind: output, shape index: {0}]   ;;  %s10836_s4 = inlined_call_operand.hbm [shape: f32[1,1], index: 4, kind: output, shape index: {1}]  }
   0x1   :  { %v6890_v0 = vld [vmem:[%s10833_s1] sm:$0xff]   ;;  %v6891_v1 = vld [vmem:[%s10833_s1 + $0x8] sm:$0xff]   ;;  %v20_v5 = vld [vmem:[%s10832_s0 + $0x10] sm:$0xff] }
   0x2   :  { %6440 = vmatprep.subr.bf16.mxu0 %v6890_v0  ;;  %v18_v2 = vld [vmem:[%s10832_s0] sm:$0xff]  ;;  %v19_v3 = vld [vmem:[%s10832_s0 + $0x8] sm:$0xff]  ;;  %v21_v6 = vld [vmem:[%s10832_s0 + $0x18] sm:$0xff] }
   0x3   :  { %6441 = vmatpush3.bf16.msra.mxu0 %v6890_v0  ;;  %v76_v4 = vpack.c.bf16 %v19_v3, %v18_v2  ;;  %v22_v7 = vld [vmem:[%s10832_s0 + $0x20] sm:$0xff]  ;;  %v23_v8 = vld [vmem:[%s10832_s0 + $0x28] sm:$0xff]  ;;  %v77_v9 = vpack.c.bf16 %v21_v6, %v20_v5  ;;  %v24_v11 = vld [vmem:[%s10832_s0 + $0x30] sm:$0xff] }
   0x4   :  { %6442 = vmatprep.subr.bf16.mxu0 %v6891_v1  ;;  %v78_v10 = vpack.c.bf16 %v23_v8, %v22_v7  ;;  %v25_v12 = vld [vmem:[%s10832_s0 + $0x38] sm:$0xff]  ;;  %v26_v13 = vld [vmem:[%s10832_s0 + $0x40] sm:$0xff]  ;;  %v27_v14 = vld [vmem:[%s10832_s0 + $0x48] sm:$0xff] }
   0x5   :  { %6444 = vmatprep.mubr.msk.bf16.mxu0 %vm108_vm0, %v76_v4  ;;  %v6892_v15 = vld [vmem:[%s10833_s1 + $0x10] sm:$0xff]   ;;  %v79_v16 = vpack.c.bf16 %v25_v12, %v24_v11  ;;  %v6893_v17 = vld [vmem:[%s10833_s1 + $0x18] sm:$0xff]   ;;  %v80_v18 = vpack.c.bf16 %v27_v14, %v26_v13  ;;  %v30_v21 = vld [vmem:[%s10832_s0 + $0x60] sm:$0xff] }
   0x6   :  { %6476 = vmatprep.subr.bf16.mxu1 %v6892_v15  ;;  %v28_v19 = vld [vmem:[%s10832_s0 + $0x50] sm:$0xff]  ;;  %v29_v20 = vld [vmem:[%s10832_s0 + $0x58] sm:$0xff]  ;;  %v31_v22 = vld [vmem:[%s10832_s0 + $0x68] sm:$0xff] }
   0x7   :  { %6443 = vmatpush3.bf16.msra.mxu0 %v6891_v1  ;;  %6477 = vmatpush3.bf16.msra.mxu1 %v6892_v15 }
   0x8   :  { %6478 = vmatprep.subr.bf16.mxu1 %v6893_v17 }
   0xa   :  { %6445 = vmatmul.mubr.msk.bf16.vlgmr.msra.gmra.mrb[0].mxu0 %vm108_vm0, %v77_v9 }
   0xb   :  { %6448 = vmatprep.mubr.msk.bf16.mxu0 %vm108_vm0, %v78_v10  ;;  %6479 = vmatpush3.bf16.msra.mxu1 %v6893_v17 }
  0x12   :  { %6449 = vmatmul.mubr.msk.bf16.gmra.mrb[4].mxu0 %vm108_vm0, %v79_v16 }
  0x13   :  { %6452 = vmatprep.mubr.msk.bf16.mxu0 %vm108_vm0, %v80_v18 }
  0x14   :  { %10 = vsyncpa [#allocation3], 0  ;;  %v81_v23 = vpack.c.bf16 %v29_v20, %v28_v19  ;;  %v82_v24 = vpack.c.bf16 %v31_v22, %v30_v21  ;;  %v32_v25 = vld [vmem:[%s10832_s0 + $0x70] sm:$0xff]  ;;  %v33_v26 = vld [vmem:[%s10832_s0 + $0x78] sm:$0xff]  ;;  %vm394_vm1 = vcmask 523264   ;;  %vm635_vm2 = vcmask 130048  }
  0x15   :  { %v34_v27 = vld [vmem:[%s10832_s0 + $0x80] sm:$0xff]  ;;  %v35_v28 = vld [vmem:[%s10832_s0 + $0x88] sm:$0xff]  ;;  %v83_v29 = vpack.c.bf16 %v33_v26, %v32_v25  ;;  %v36_v31 = vld [vmem:[%s10832_s0 + $0x90] sm:$0xff]  ;;  %s6929_s10 = smov [#allocation2]  }
  0x16   :  { %v84_v30 = vpack.c.bf16 %v35_v28, %v34_v27  ;;  %v37_v32 = vld [vmem:[%s10832_s0 + $0x98] sm:$0xff]  ;;  %v38_v33 = vld [vmem:[%s10832_s0 + $0xa0] sm:$0xff]  ;;  %v39_v34 = vld [vmem:[%s10832_s0 + $0xa8] sm:$0xff]  ;;  %s5871_s11 = sshll.u32 %s6929_s10, 4  ;;  %s5872_s11 = int_to_ptr.vmem [resolvable:$true] %s5871_s11 }
  0x17   :  { %v85_v35 = vpack.c.bf16 %v37_v32, %v36_v31  ;;  %v86_v36 = vpack.c.bf16 %v39_v34, %v38_v33  ;;  %v40_v37 = vld [vmem:[%s10832_s0 + $0xb0] sm:$0xff]  ;;  %v41_v38 = vld [vmem:[%s10832_s0 + $0xb8] sm:$0xff]  ;;  %v42_v39 = vld [vmem:[%s10832_s0 + $0xc0] sm:$0xff]  ;;  %s6904_s12 = scalar_lea.vmem %s5872_s11, 16  ;;  %s6908_s13 = scalar_lea.vmem %s5872_s11, 32 }
  0x18   :  { %v43_v40 = vld [vmem:[%s10832_s0 + $0xc8] sm:$0xff]  ;;  %v87_v41 = vpack.c.bf16 %v41_v38, %v40_v37  ;;  %v44_v43 = vld [vmem:[%s10832_s0 + $0xd0] sm:$0xff]  ;;  %v45_v44 = vld [vmem:[%s10832_s0 + $0xd8] sm:$0xff]  ;;  %p6905_p0 = scmp.ne.s32.totalorder %s5872_s11, %s6904_s12  ;;  %p6909_p1 = scmp.lt.s32.totalorder %s5872_s11, %s5872_s11 }
  0x19   :  { %v88_v42 = vpack.c.bf16 %v43_v40, %v42_v39  ;;  %v46_v45 = vld [vmem:[%s10832_s0 + $0xe0] sm:$0xff]  ;;  %v47_v46 = vld [vmem:[%s10832_s0 + $0xe8] sm:$0xff]  ;;  %v89_v47 = vpack.c.bf16 %v45_v44, %v44_v43  ;;  %v48_v49 = vld [vmem:[%s10832_s0 + $0xf0] sm:$0xff]  ;;  %p6910_p2 = scmp.lt.s32.totalorder %s6908_s13, %s6904_s12 }
  0x1a   :  { %6453 = vmatmul.mubr.msk.bf16.gmra.mrb[8].mxu0 %vm108_vm0, %v81_v23  ;;  %v90_v48 = vpack.c.bf16 %v47_v46, %v46_v45  ;;  %v49_v50 = vld [vmem:[%s10832_s0 + $0xf8] sm:$0xff]  ;;  %v6894_v52 = vld [vmem:[%s10833_s1 + $0x20] sm:$0xff]   ;;  %v6895_v53 = vld [vmem:[%s10833_s1 + $0x28] sm:$0xff]  }
  0x1b   :  { %6456 = vmatprep.mubr.msk.bf16.mxu0 %vm108_vm0, %v82_v24  ;;  %v91_v51 = vpack.c.bf16 %v49_v50, %v48_v49  ;;  %6480 = vmatprep.subr.bf16.mxu1 %v6894_v52  ;;  %v6896_v54 = vld [vmem:[%s10833_s1 + $0x58] sm:$0xff]   ;;  %v7091_v55 = vld [vmem:[%s10834_s2] ss:$0 sm:$0xff]  ;;  %p6911_p3 = por %p6910_p2, %p6909_p1 }
  0x1c   :  { %6481 = vmatpush3.bf16.msra.mxu1 %v6894_v52  ;;  %6516 = vmatprep.subr.bf16.mxu0 %v6896_v54 }
  0x1d   :  { %6482 = vmatprep.subr.bf16.mxu1 %v6895_v53  ;;  %6517 = vmatpush3.bf16.msra.mxu0 %v6896_v54  ;;  %p6912_p4 = pnand %p6911_p3, %p6905_p0 }
  0x20   :  { %6483 = vmatpush3.bf16.msra.mxu1 %v6895_v53 }
  0x22   :  { %6457 = vmatmul.mubr.msk.bf16.gmra.mrb[12].mxu0 %vm108_vm0, %v83_v29 }
  0x23   :  { %6460 = vmatprep.mubr.msk.bf16.mxu0 %vm108_vm0, %v84_v30 }
  0x2a   :  { %6461 = vmatmul.mubr.msk.bf16.gmra.mrb[16].mxu0 %vm108_vm0, %v85_v35 }
  0x2b   :  { %6464 = vmatprep.mubr.msk.bf16.mxu0 %vm108_vm0, %v86_v36 }
  0x32   :  { %6465 = vmatmul.mubr.msk.bf16.gmra.mrb[20].mxu0 %vm108_vm0, %v87_v41 }
  0x33   :  { %6468 = vmatprep.mubr.msk.bf16.mxu0 %vm108_vm0, %v88_v42 }
  0x3a   :  { %6469 = vmatmul.mubr.msk.bf16.gmra.mrb[24].mxu0 %vm108_vm0, %v89_v47 }
  0x3b   :  { %6472 = vmatprep.mubr.msk.bf16.mxu0 %vm108_vm0, %v90_v48 }
  0x42   :  { %6473 = vmatmul.mubr.msk.bf16.gmra.mrb[28].mxu0 %vm108_vm0, %v91_v51 }
  0xdd   :  { %v6446_v56 = vpop.f32.mrb[0].mxu0 }
  0xde   :  { %v200_v57 = vadd.f32 %v6446_v56, %v7091_v55  ;;  %v191_v58 = vpop.f32.mrb[1].mxu0 }
  0xdf   :  { %v192_v59 = vadd.f32 %v7091_v55, %v191_v58  ;;  %v6447_v60 = vpop.f32.mrb[2].mxu0 }
  0xe0   :  { %v203_v61 = vadd.f32 %v6447_v60, %v7091_v55  ;;  %v194_v62 = vpop.f32.mrb[3].mxu0  ;;  %v320_v0 = vmax.f32 %v200_v57, 0.0 }
  0xe1   :  { %v195_v63 = vadd.f32 %v7091_v55, %v194_v62  ;;  %v318_v2 = vmax.f32 %v192_v59, 0.0 }
  0xe2   :  { %v321_v1 = vmax.f32 %v203_v61, 0.0 }
  0xe3   :  { %v319_v3 = vmax.f32 %v195_v63, 0.0 }
  0xe4   :  { %v351_v4 = vpack.c.bf16 %v321_v1, %v320_v0 }
  0xe5   :  { %v6450_v5 = vpop.f32.mrb[4].mxu0  ;;  %v350_v6 = vpack.c.bf16 %v319_v3, %v318_v2 }
  0xe6   :  { %v216_v7 = vadd.f32 %v6450_v5, %v7091_v55  ;;  %v207_v8 = vpop.f32.mrb[5].mxu0 }
  0xe7   :  { %v208_v9 = vadd.f32 %v7091_v55, %v207_v8  ;;  %v6451_v10 = vpop.f32.mrb[6].mxu0  ;;  %6484 = vmatprep.mubr.msk.bf16.mxu1 %vm394_vm1, %v350_v6 }
  0xe8   :  { %v324_v11 = vmax.f32 %v216_v7, 0.0  ;;  %v219_v12 = vadd.f32 %v6451_v10, %v7091_v55  ;;  %v210_v13 = vpop.f32.mrb[7].mxu0  ;;  %6485 = vmatmul.mubr.msk.bf16.vlgmr.msra.gmra.mrb[0].mxu1 %vm394_vm1, %v351_v4 }
  0xe9   :  { %v322_v14 = vmax.f32 %v208_v9, 0.0  ;;  %v211_v15 = vadd.f32 %v7091_v55, %v210_v13 }
  0xea   :  { %v325_v16 = vmax.f32 %v219_v12, 0.0 }
  0xeb   :  { %v323_v17 = vmax.f32 %v211_v15, 0.0 }
  0xec   :  { %v353_v18 = vpack.c.bf16 %v325_v16, %v324_v11 }
  0xed   :  { %v352_v19 = vpack.c.bf16 %v323_v17, %v322_v14  ;;  %v6454_v20 = vpop.f32.mrb[8].mxu0 }
  0xee   :  { %v232_v21 = vadd.f32 %v6454_v20, %v7091_v55  ;;  %v223_v22 = vpop.f32.mrb[9].mxu0 }
  0xef   :  { %v224_v23 = vadd.f32 %v7091_v55, %v223_v22  ;;  %v6455_v24 = vpop.f32.mrb[10].mxu0  ;;  %6488 = vmatprep.mubr.msk.bf16.mxu1 %vm394_vm1, %v352_v19 }
  0xf0   :  { %v328_v25 = vmax.f32 %v232_v21, 0.0  ;;  %v235_v26 = vadd.f32 %v6455_v24, %v7091_v55  ;;  %v226_v27 = vpop.f32.mrb[11].mxu0  ;;  %6489 = vmatmul.mubr.msk.bf16.gmra.mrb[4].mxu1 %vm394_vm1, %v353_v18 }
  0xf1   :  { %v326_v28 = vmax.f32 %v224_v23, 0.0  ;;  %v227_v29 = vadd.f32 %v7091_v55, %v226_v27 }
  0xf2   :  { %v329_v30 = vmax.f32 %v235_v26, 0.0 }
  0xf3   :  { %v327_v31 = vmax.f32 %v227_v29, 0.0 }
  0xf4   :  { %v355_v32 = vpack.c.bf16 %v329_v30, %v328_v25 }
  0xf5   :  { %v354_v33 = vpack.c.bf16 %v327_v31, %v326_v28  ;;  %v6458_v34 = vpop.f32.mrb[12].mxu0 }
  0xf6   :  { %v248_v35 = vadd.f32 %v6458_v34, %v7091_v55  ;;  %v239_v36 = vpop.f32.mrb[13].mxu0 }
  0xf7   :  { %v240_v37 = vadd.f32 %v7091_v55, %v239_v36  ;;  %v6459_v38 = vpop.f32.mrb[14].mxu0  ;;  %6492 = vmatprep.mubr.msk.bf16.mxu1 %vm394_vm1, %v354_v33 }
  0xf8   :  { %v332_v39 = vmax.f32 %v248_v35, 0.0  ;;  %v251_v40 = vadd.f32 %v6459_v38, %v7091_v55  ;;  %v242_v41 = vpop.f32.mrb[15].mxu0  ;;  %6493 = vmatmul.mubr.msk.bf16.gmra.mrb[8].mxu1 %vm394_vm1, %v355_v32 }
  0xf9   :  { %v330_v42 = vmax.f32 %v240_v37, 0.0  ;;  %v243_v43 = vadd.f32 %v7091_v55, %v242_v41 }
  0xfa   :  { %v333_v44 = vmax.f32 %v251_v40, 0.0 }
  0xfb   :  { %v331_v45 = vmax.f32 %v243_v43, 0.0 }
  0xfc   :  { %v357_v46 = vpack.c.bf16 %v333_v44, %v332_v39 }
  0xfd   :  { %v356_v47 = vpack.c.bf16 %v331_v45, %v330_v42  ;;  %v6462_v48 = vpop.f32.mrb[16].mxu0  ;;  %v7144_v42 = vld [vmem:[%s10834_s2 + $0x8] ss:$0 sm:$0xff] }
  0xfe   :  { %v264_v49 = vadd.f32 %v6462_v48, %v7091_v55  ;;  %v255_v50 = vpop.f32.mrb[17].mxu0 }
  0xff   :  { %v256_v51 = vadd.f32 %v7091_v55, %v255_v50  ;;  %v6463_v52 = vpop.f32.mrb[18].mxu0  ;;  %6496 = vmatprep.mubr.msk.bf16.mxu1 %vm394_vm1, %v356_v47 }
 0x100   :  { %v336_v53 = vmax.f32 %v264_v49, 0.0  ;;  %v267_v54 = vadd.f32 %v6463_v52, %v7091_v55  ;;  %v258_v56 = vpop.f32.mrb[19].mxu0  ;;  %6497 = vmatmul.mubr.msk.bf16.gmra.mrb[12].mxu1 %vm394_vm1, %v357_v46 }
 0x101   :  { %v334_v57 = vmax.f32 %v256_v51, 0.0  ;;  %v259_v58 = vadd.f32 %v7091_v55, %v258_v56 }
 0x102   :  { %v337_v59 = vmax.f32 %v267_v54, 0.0 }
 0x103   :  { %v335_v60 = vmax.f32 %v259_v58, 0.0 }
 0x104   :  { %v359_v61 = vpack.c.bf16 %v337_v59, %v336_v53 }
 0x105   :  { %v358_v62 = vpack.c.bf16 %v335_v60, %v334_v57  ;;  %v6466_v63 = vpop.f32.mrb[20].mxu0 }
 0x106   :  { %v280_v0 = vadd.f32 %v6466_v63, %v7091_v55  ;;  %v271_v1 = vpop.f32.mrb[21].mxu0 }
 0x107   :  { %v272_v2 = vadd.f32 %v7091_v55, %v271_v1  ;;  %v6467_v3 = vpop.f32.mrb[22].mxu0  ;;  %6500 = vmatprep.mubr.msk.bf16.mxu1 %vm394_vm1, %v358_v62 }
 0x108   :  { %v340_v4 = vmax.f32 %v280_v0, 0.0  ;;  %v283_v5 = vadd.f32 %v6467_v3, %v7091_v55  ;;  %v274_v6 = vpop.f32.mrb[23].mxu0  ;;  %6501 = vmatmul.mubr.msk.bf16.gmra.mrb[16].mxu1 %vm394_vm1, %v359_v61 }
 0x109   :  { %v338_v7 = vmax.f32 %v272_v2, 0.0  ;;  %v275_v8 = vadd.f32 %v7091_v55, %v274_v6 }
 0x10a   :  { %v341_v9 = vmax.f32 %v283_v5, 0.0 }
 0x10b   :  { %v339_v10 = vmax.f32 %v275_v8, 0.0 }
 0x10c   :  { %v361_v11 = vpack.c.bf16 %v341_v9, %v340_v4 }
 0x10d   :  { %v360_v12 = vpack.c.bf16 %v339_v10, %v338_v7  ;;  %v6470_v13 = vpop.f32.mrb[24].mxu0 }
 0x10e   :  { %v296_v14 = vadd.f32 %v6470_v13, %v7091_v55  ;;  %v287_v15 = vpop.f32.mrb[25].mxu0 }
 0x10f   :  { %v288_v16 = vadd.f32 %v7091_v55, %v287_v15  ;;  %v6471_v17 = vpop.f32.mrb[26].mxu0  ;;  %6504 = vmatprep.mubr.msk.bf16.mxu1 %vm394_vm1, %v360_v12 }
 0x110   :  { %v344_v18 = vmax.f32 %v296_v14, 0.0  ;;  %v299_v19 = vadd.f32 %v6471_v17, %v7091_v55  ;;  %v290_v20 = vpop.f32.mrb[27].mxu0  ;;  %6505 = vmatmul.mubr.msk.bf16.gmra.mrb[20].mxu1 %vm394_vm1, %v361_v11 }
 0x111   :  { %v342_v21 = vmax.f32 %v288_v16, 0.0  ;;  %v291_v22 = vadd.f32 %v7091_v55, %v290_v20 }
 0x112   :  { %v345_v23 = vmax.f32 %v299_v19, 0.0 }
 0x113   :  { %v343_v24 = vmax.f32 %v291_v22, 0.0 }
 0x114   :  { %v363_v25 = vpack.c.bf16 %v345_v23, %v344_v18 }
 0x115   :  { %v362_v26 = vpack.c.bf16 %v343_v24, %v342_v21  ;;  %v6474_v27 = vpop.f32.mrb[28].mxu0 }
 0x116   :  { %v312_v28 = vadd.f32 %v6474_v27, %v7091_v55  ;;  %v303_v29 = vpop.f32.mrb[29].mxu0 }
 0x117   :  { %v304_v30 = vadd.f32 %v7091_v55, %v303_v29  ;;  %v6475_v31 = vpop.f32.mrb[30].mxu0  ;;  %6508 = vmatprep.mubr.msk.bf16.mxu1 %vm394_vm1, %v362_v26 }
 0x118   :  { %v348_v32 = vmax.f32 %v312_v28, 0.0  ;;  %v315_v33 = vadd.f32 %v6475_v31, %v7091_v55  ;;  %v306_v34 = vpop.f32.mrb[31].mxu0  ;;  %6509 = vmatmul.mubr.msk.bf16.gmra.mrb[24].mxu1 %vm394_vm1, %v363_v25 }
 0x119   :  { %v346_v35 = vmax.f32 %v304_v30, 0.0  ;;  %v307_v36 = vadd.f32 %v7091_v55, %v306_v34 }
 0x11a   :  { %v349_v37 = vmax.f32 %v315_v33, 0.0 }
 0x11b   :  { %v347_v38 = vmax.f32 %v307_v36, 0.0 }
 0x11c   :  { %v365_v39 = vpack.c.bf16 %v349_v37, %v348_v32 }
 0x11d   :  { %v364_v40 = vpack.c.bf16 %v347_v38, %v346_v35 }
 0x11f   :  { %6512 = vmatprep.mubr.msk.bf16.mxu1 %vm394_vm1, %v364_v40 }
 0x120   :  { %6513 = vmatmul.mubr.msk.bf16.gmra.mrb[28].mxu1 %vm394_vm1, %v365_v39 }
 0x1bb   :  { %v6486_v41 = vpop.f32.mrb[0].mxu1 }
 0x1bc   :  { %v477_v43 = vpop.f32.mrb[1].mxu1  ;;  %v7156_v48 = vadd.f32 %v6486_v41, %v7144_v42 }
 0x1bd   :  { %v6487_v44 = vpop.f32.mrb[2].mxu1  ;;  %v7150_v46 = vadd.f32 %v7144_v42, %v477_v43 }
 0x1be   :  { %v7147_v45 = vadd.f32 %v6487_v44, %v7144_v42  ;;  %v480_v55 = vpop.f32.mrb[3].mxu1  ;;  %11072 = vst [vmem:[#allocation8_spill] sm:$0xff] %v7156_v48 }
 0x1bf   :  { %11070 = vst [vmem:[#allocation6_spill] sm:$0xff] %v7150_v46  ;;  %v7153_v47 = vadd.f32 %v7144_v42, %v480_v55 }
 0x1c0   :  { %11069 = vst [vmem:[#allocation5_spill] sm:$0xff] %v7147_v45  ;;  %v614_v50 = vpack.c.bf16 %v7147_v45, %v7156_v48 }
 0x1c1   :  { %11071 = vst [vmem:[#allocation7_spill] sm:$0xff] %v7153_v47  ;;  %v613_v49 = vpack.c.bf16 %v7153_v47, %v7150_v46 }
 0x1c3   :  { %v6490_v51 = vpop.f32.mrb[4].mxu1  ;;  %6518 = vmatprep.mubr.msk.bf16.mxu0 %vm635_vm2, %v613_v49 }
 0x1c4   :  { %v493_v52 = vpop.f32.mrb[5].mxu1  ;;  %6519 = vmatmul.mubr.msk.bf16.vlgmr.msra.gmra.mrb[32].mxu0 %vm635_vm2, %v614_v50  ;;  %v7174_v59 = vadd.f32 %v6490_v51, %v7144_v42 }
 0x1c5   :  { %v6491_v53 = vpop.f32.mrb[6].mxu1  ;;  %v7168_v57 = vadd.f32 %v7144_v42, %v493_v52 }
 0x1c6   :  { %v7165_v54 = vadd.f32 %v6491_v53, %v7144_v42  ;;  %v496_v56 = vpop.f32.mrb[7].mxu1  ;;  %11076 = vst [vmem:[#allocation12_spill] sm:$0xff] %v7174_v59 }
 0x1c7   :  { %11074 = vst [vmem:[#allocation10_spill] sm:$0xff] %v7168_v57  ;;  %v7171_v58 = vadd.f32 %v7144_v42, %v496_v56 }
 0x1c8   :  { %11073 = vst [vmem:[#allocation9_spill] sm:$0xff] %v7165_v54  ;;  %v616_v61 = vpack.c.bf16 %v7165_v54, %v7174_v59 }
 0x1c9   :  { %11075 = vst [vmem:[#allocation11_spill] sm:$0xff] %v7171_v58  ;;  %v615_v60 = vpack.c.bf16 %v7171_v58, %v7168_v57 }
 0x1cb   :  { %v6494_v62 = vpop.f32.mrb[8].mxu1  ;;  %6522 = vmatprep.mubr.msk.bf16.mxu0 %vm635_vm2, %v615_v60 }
 0x1cc   :  { %v509_v63 = vpop.f32.mrb[9].mxu1  ;;  %6523 = vmatmul.mubr.msk.bf16.gmra.mrb[36].mxu0 %vm635_vm2, %v616_v61  ;;  %v7192_v5 = vadd.f32 %v6494_v62, %v7144_v42 }
 0x1cd   :  { %v6495_v0 = vpop.f32.mrb[10].mxu1  ;;  %v7186_v3 = vadd.f32 %v7144_v42, %v509_v63 }
 0x1ce   :  { %v7183_v1 = vadd.f32 %v6495_v0, %v7144_v42  ;;  %v512_v2 = vpop.f32.mrb[11].mxu1  ;;  %11080 = vst [vmem:[#allocation16_spill] sm:$0xff] %v7192_v5 }
 0x1cf   :  { %11078 = vst [vmem:[#allocation14_spill] sm:$0xff] %v7186_v3  ;;  %v7189_v4 = vadd.f32 %v7144_v42, %v512_v2 }
 0x1d0   :  { %11077 = vst [vmem:[#allocation13_spill] sm:$0xff] %v7183_v1  ;;  %v618_v7 = vpack.c.bf16 %v7183_v1, %v7192_v5 }
 0x1d1   :  { %11079 = vst [vmem:[#allocation15_spill] sm:$0xff] %v7189_v4  ;;  %v617_v6 = vpack.c.bf16 %v7189_v4, %v7186_v3 }
 0x1d3   :  { %v6498_v8 = vpop.f32.mrb[12].mxu1  ;;  %6526 = vmatprep.mubr.msk.bf16.mxu0 %vm635_vm2, %v617_v6 }
 0x1d4   :  { %v525_v9 = vpop.f32.mrb[13].mxu1  ;;  %6527 = vmatmul.mubr.msk.bf16.gmra.mrb[40].mxu0 %vm635_vm2, %v618_v7  ;;  %v7210_v15 = vadd.f32 %v6498_v8, %v7144_v42  ;;  %v7293_v7 = vld [vmem:[%s10834_s2 + $0x80] ss:$0 sm:$0xff] }
 0x1d5   :  { %v6499_v10 = vpop.f32.mrb[14].mxu1  ;;  %v7204_v13 = vadd.f32 %v7144_v42, %v525_v9 }
 0x1d6   :  { %v7201_v11 = vadd.f32 %v6499_v10, %v7144_v42  ;;  %v528_v12 = vpop.f32.mrb[15].mxu1  ;;  %11084 = vst [vmem:[#allocation20_spill] sm:$0xff] %v7210_v15 }
 0x1d7   :  { %11082 = vst [vmem:[#allocation18_spill] sm:$0xff] %v7204_v13  ;;  %v7207_v14 = vadd.f32 %v7144_v42, %v528_v12 }
 0x1d8   :  { %11081 = vst [vmem:[#allocation17_spill] sm:$0xff] %v7201_v11  ;;  %v620_v17 = vpack.c.bf16 %v7201_v11, %v7210_v15 }
 0x1d9   :  { %11083 = vst [vmem:[#allocation19_spill] sm:$0xff] %v7207_v14  ;;  %v619_v16 = vpack.c.bf16 %v7207_v14, %v7204_v13 }
 0x1db   :  { %v6502_v18 = vpop.f32.mrb[16].mxu1  ;;  %6530 = vmatprep.mubr.msk.bf16.mxu0 %vm635_vm2, %v619_v16 }
 0x1dc   :  { %v541_v19 = vpop.f32.mrb[17].mxu1  ;;  %6531 = vmatmul.mubr.msk.bf16.gmra.mrb[44].mxu0 %vm635_vm2, %v620_v17  ;;  %v7228_v25 = vadd.f32 %v6502_v18, %v7144_v42 }
 0x1dd   :  { %v6503_v20 = vpop.f32.mrb[18].mxu1  ;;  %v7222_v23 = vadd.f32 %v7144_v42, %v541_v19 }
 0x1de   :  { %v7219_v21 = vadd.f32 %v6503_v20, %v7144_v42  ;;  %v544_v22 = vpop.f32.mrb[19].mxu1  ;;  %11088 = vst [vmem:[#allocation24_spill] sm:$0xff] %v7228_v25 }
 0x1df   :  { %11086 = vst [vmem:[#allocation22_spill] sm:$0xff] %v7222_v23  ;;  %v7225_v24 = vadd.f32 %v7144_v42, %v544_v22 }
 0x1e0   :  { %11085 = vst [vmem:[#allocation21_spill] sm:$0xff] %v7219_v21  ;;  %v622_v27 = vpack.c.bf16 %v7219_v21, %v7228_v25 }
 0x1e1   :  { %11087 = vst [vmem:[#allocation23_spill] sm:$0xff] %v7225_v24  ;;  %v621_v26 = vpack.c.bf16 %v7225_v24, %v7222_v23 }
 0x1e3   :  { %v6506_v28 = vpop.f32.mrb[20].mxu1  ;;  %6534 = vmatprep.mubr.msk.bf16.mxu0 %vm635_vm2, %v621_v26 }
 0x1e4   :  { %v557_v29 = vpop.f32.mrb[21].mxu1  ;;  %6535 = vmatmul.mubr.msk.bf16.gmra.mrb[48].mxu0 %vm635_vm2, %v622_v27  ;;  %v7246_v35 = vadd.f32 %v6506_v28, %v7144_v42 }
 0x1e5   :  { %v6507_v30 = vpop.f32.mrb[22].mxu1  ;;  %v7240_v33 = vadd.f32 %v7144_v42, %v557_v29 }
 0x1e6   :  { %v7237_v31 = vadd.f32 %v6507_v30, %v7144_v42  ;;  %v560_v32 = vpop.f32.mrb[23].mxu1  ;;  %11092 = vst [vmem:[#allocation28_spill] sm:$0xff] %v7246_v35 }
 0x1e7   :  { %11090 = vst [vmem:[#allocation26_spill] sm:$0xff] %v7240_v33  ;;  %v7243_v34 = vadd.f32 %v7144_v42, %v560_v32 }
 0x1e8   :  { %11089 = vst [vmem:[#allocation25_spill] sm:$0xff] %v7237_v31  ;;  %v624_v37 = vpack.c.bf16 %v7237_v31, %v7246_v35 }
 0x1e9   :  { %11091 = vst [vmem:[#allocation27_spill] sm:$0xff] %v7243_v34  ;;  %v623_v36 = vpack.c.bf16 %v7243_v34, %v7240_v33 }
 0x1eb   :  { %v6510_v38 = vpop.f32.mrb[24].mxu1  ;;  %6538 = vmatprep.mubr.msk.bf16.mxu0 %vm635_vm2, %v623_v36 }
 0x1ec   :  { %v573_v39 = vpop.f32.mrb[25].mxu1  ;;  %6539 = vmatmul.mubr.msk.bf16.gmra.mrb[52].mxu0 %vm635_vm2, %v624_v37  ;;  %v7264_v49 = vadd.f32 %v6510_v38, %v7144_v42 }
 0x1ed   :  { %v6511_v40 = vpop.f32.mrb[26].mxu1  ;;  %v7258_v44 = vadd.f32 %v7144_v42, %v573_v39 }
 0x1ee   :  { %v7255_v41 = vadd.f32 %v6511_v40, %v7144_v42  ;;  %v576_v43 = vpop.f32.mrb[27].mxu1  ;;  %11096 = vst [vmem:[#allocation32_spill] sm:$0xff] %v7264_v49 }
 0x1ef   :  { %11094 = vst [vmem:[#allocation30_spill] sm:$0xff] %v7258_v44  ;;  %v7261_v55 = vadd.f32 %v7144_v42, %v576_v43 }
 0x1f0   :  { %11093 = vst [vmem:[#allocation29_spill] sm:$0xff] %v7255_v41  ;;  %v626_v51 = vpack.c.bf16 %v7255_v41, %v7264_v49 }
 0x1f1   :  { %11095 = vst [vmem:[#allocation31_spill] sm:$0xff] %v7261_v55  ;;  %v625_v50 = vpack.c.bf16 %v7261_v55, %v7258_v44 }
 0x1f3   :  { %v6514_v52 = vpop.f32.mrb[28].mxu1  ;;  %6542 = vmatprep.mubr.msk.bf16.mxu0 %vm635_vm2, %v625_v50 }
 0x1f4   :  { %v589_v53 = vpop.f32.mrb[29].mxu1  ;;  %6543 = vmatmul.mubr.msk.bf16.gmra.mrb[56].mxu0 %vm635_vm2, %v626_v51  ;;  %v7282_v0 = vadd.f32 %v6514_v52, %v7144_v42 }
 0x1f5   :  { %v6515_v56 = vpop.f32.mrb[30].mxu1  ;;  %v7276_v62 = vadd.f32 %v7144_v42, %v589_v53 }
 0x1f6   :  { %v7273_v60 = vadd.f32 %v6515_v56, %v7144_v42  ;;  %v592_v61 = vpop.f32.mrb[31].mxu1  ;;  %11100 = vst [vmem:[#allocation36_spill] sm:$0xff] %v7282_v0 }
 0x1f7   :  { %11098 = vst [vmem:[#allocation34_spill] sm:$0xff] %v7276_v62  ;;  %v7279_v63 = vadd.f32 %v7144_v42, %v592_v61 }
 0x1f8   :  { %11097 = vst [vmem:[#allocation33_spill] sm:$0xff] %v7273_v60  ;;  %v628_v6 = vpack.c.bf16 %v7273_v60, %v7282_v0 }
 0x1f9   :  { %11099 = vst [vmem:[#allocation35_spill] sm:$0xff] %v7279_v63  ;;  %v627_v2 = vpack.c.bf16 %v7279_v63, %v7276_v62 }
 0x1fb   :  { %6546 = vmatprep.mubr.msk.bf16.mxu0 %vm635_vm2, %v627_v2 }
 0x1fc   :  { %6547 = vmatmul.mubr.msk.bf16.gmra.mrb[60].mxu0 %vm635_vm2, %v628_v6 }
 0x297   :  { %v6520_v8 = vpop.f32.mrb[32].mxu0 }
 0x298   :  { %v7296_v9 = vadd.f32 %v6520_v8, %v7293_v7  ;;  %v718_v42 = vpop.f32.mrb[33].mxu0 }
 0x299   :  { %v7299_v10 = vadd.f32 %v7293_v7, %v718_v42  ;;  %v6521_v12 = vpop.f32.mrb[34].mxu0 }
 0x29a   :  { %v7302_v16 = vadd.f32 %v6521_v12, %v7293_v7  ;;  %v721_v17 = vpop.f32.mrb[35].mxu0  ;;  %v887_v18 = vsel %vm108_vm0, %v7296_v9, inf }
 0x29b   :  { %v7307_v19 = vadd.f32 %v7293_v7, %v721_v17  ;;  %888 = vmin.xlane.f32.xlu1 %v887_v18  ;;  %v881_v20 = vsel %vm108_vm0, %v7299_v10, inf }
 0x29c   :  { %882 = vmin.xlane.f32.xlu0 %v881_v20  ;;  %v890_v22 = vsel %vm108_vm0, %v7302_v16, inf }
 0x29d   :  { %v884_v27 = vsel %vm108_vm0, %v7307_v19, inf }
 0x29f   :  { %891 = vmin.xlane.f32.xlu1 %v890_v22  ;;  %v6524_v26 = vpop.f32.mrb[36].mxu0 }
 0x2a0   :  { %885 = vmin.xlane.f32.xlu0 %v884_v27  ;;  %v734_v28 = vpop.f32.mrb[37].mxu0  ;;  %v7319_v36 = vadd.f32 %v6524_v26, %v7293_v7 }
 0x2a1   :  { %v7316_v29 = vadd.f32 %v7293_v7, %v734_v28  ;;  %v6525_v30 = vpop.f32.mrb[38].mxu0 }
 0x2a2   :  { %v737_v32 = vpop.f32.mrb[39].mxu0  ;;  %v7327_v39 = vadd.f32 %v6525_v30, %v7293_v7  ;;  %v899_v50 = vsel %vm108_vm0, %v7319_v36, inf }
 0x2a3   :  { %v7322_v37 = vadd.f32 %v7293_v7, %v737_v32  ;;  %v893_v38 = vsel %vm108_vm0, %v7316_v29, inf }
 0x2a4   :  { %894 = vmin.xlane.f32.xlu0 %v893_v38  ;;  %v902_v56 = vsel %vm108_vm0, %v7327_v39, inf }
 0x2a5   :  { %v896_v40 = vsel %vm108_vm0, %v7322_v37, inf }
 0x2a6   :  { %897 = vmin.xlane.f32.xlu1 %v896_v40 }
 0x2a7   :  { %v6528_v43 = vpop.f32.mrb[40].mxu0 }
 0x2a8   :  { %900 = vmin.xlane.f32.xlu0 %v899_v50  ;;  %v750_v51 = vpop.f32.mrb[41].mxu0  ;;  %v7339_v2 = vadd.f32 %v6528_v43, %v7293_v7 }
 0x2a9   :  { %v7334_v52 = vadd.f32 %v7293_v7, %v750_v51  ;;  %v6529_v53 = vpop.f32.mrb[42].mxu0 }
 0x2aa   :  { %903 = vmin.xlane.f32.xlu1 %v902_v56  ;;  %v753_v61 = vpop.f32.mrb[43].mxu0  ;;  %v7347_v42 = vadd.f32 %v6529_v53, %v7293_v7  ;;  %v911_v18 = vsel %vm108_vm0, %v7339_v2, inf }
 0x2ab   :  { %v7342_v6 = vadd.f32 %v7293_v7, %v753_v61  ;;  %v905_v8 = vsel %vm108_vm0, %v7334_v52, inf }
 0x2ac   :  { %906 = vmin.xlane.f32.xlu0 %v905_v8  ;;  %v914_v27 = vsel %vm108_vm0, %v7347_v42, inf }
 0x2ad   :  { %v908_v12 = vsel %vm108_vm0, %v7342_v6, inf }
 0x2ae   :  { %909 = vmin.xlane.f32.xlu1 %v908_v12 }
 0x2af   :  { %v6532_v17 = vpop.f32.mrb[44].mxu0 }
 0x2b0   :  { %912 = vmin.xlane.f32.xlu0 %v911_v18  ;;  %v766_v20 = vpop.f32.mrb[45].mxu0  ;;  %v7359_v30 = vadd.f32 %v6532_v17, %v7293_v7 }
 0x2b1   :  { %v7354_v22 = vadd.f32 %v7293_v7, %v766_v20  ;;  %v6533_v26 = vpop.f32.mrb[46].mxu0 }
 0x2b2   :  { %915 = vmin.xlane.f32.xlu1 %v914_v27  ;;  %v769_v28 = vpop.f32.mrb[47].mxu0  ;;  %v7367_v40 = vadd.f32 %v6533_v26, %v7293_v7  ;;  %v923_v51 = vsel %vm108_vm0, %v7359_v30, inf }
 0x2b3   :  { %v7362_v32 = vadd.f32 %v7293_v7, %v769_v28  ;;  %v917_v38 = vsel %vm108_vm0, %v7354_v22, inf }
 0x2b4   :  { %918 = vmin.xlane.f32.xlu0 %v917_v38  ;;  %v926_v8 = vsel %vm108_vm0, %v7367_v40, inf }
 0x2b5   :  { %v920_v43 = vsel %vm108_vm0, %v7362_v32, inf }
 0x2b6   :  { %921 = vmin.xlane.f32.xlu1 %v920_v43 }
 0x2b7   :  { %v6536_v50 = vpop.f32.mrb[48].mxu0 }
 0x2b8   :  { %924 = vmin.xlane.f32.xlu0 %v923_v51  ;;  %v782_v53 = vpop.f32.mrb[49].mxu0  ;;  %v7379_v17 = vadd.f32 %v6536_v50, %v7293_v7 }
 0x2b9   :  { %v7374_v56 = vadd.f32 %v7293_v7, %v782_v53  ;;  %v6537_v61 = vpop.f32.mrb[50].mxu0 }
 0x2ba   :  { %927 = vmin.xlane.f32.xlu1 %v926_v8  ;;  %v785_v12 = vpop.f32.mrb[51].mxu0  ;;  %v7387_v26 = vadd.f32 %v6537_v61, %v7293_v7  ;;  %v935_v38 = vsel %vm108_vm0, %v7379_v17, inf }
 0x2bb   :  { %v7382_v18 = vadd.f32 %v7293_v7, %v785_v12  ;;  %v929_v20 = vsel %vm108_vm0, %v7374_v56, inf }
 0x2bc   :  { %930 = vmin.xlane.f32.xlu0 %v929_v20  ;;  %v938_v53 = vsel %vm108_vm0, %v7387_v26, inf }
 0x2bd   :  { %v932_v27 = vsel %vm108_vm0, %v7382_v18, inf }
 0x2be   :  { %933 = vmin.xlane.f32.xlu1 %v932_v27 }
 0x2bf   :  { %v6540_v28 = vpop.f32.mrb[52].mxu0 }
 0x2c0   :  { %936 = vmin.xlane.f32.xlu0 %v935_v38  ;;  %v798_v43 = vpop.f32.mrb[53].mxu0  ;;  %v7399_v8 = vadd.f32 %v6540_v28, %v7293_v7 }
 0x2c1   :  { %v7394_v50 = vadd.f32 %v7293_v7, %v798_v43  ;;  %v6541_v51 = vpop.f32.mrb[54].mxu0 }
 0x2c2   :  { %939 = vmin.xlane.f32.xlu1 %v938_v53  ;;  %v801_v61 = vpop.f32.mrb[55].mxu0  ;;  %v7407_v27 = vadd.f32 %v6541_v51, %v7293_v7  ;;  %v947_v53 = vsel %vm108_vm0, %v7399_v8, inf }
 0x2c3   :  { %v7402_v12 = vadd.f32 %v7293_v7, %v801_v61  ;;  %v941_v20 = vsel %vm108_vm0, %v7394_v50, inf }
 0x2c4   :  { %942 = vmin.xlane.f32.xlu0 %v941_v20  ;;  %v950_v20 = vsel %vm108_vm0, %v7407_v27, inf }
 0x2c5   :  { %v944_v38 = vsel %vm108_vm0, %v7402_v12, inf }
 0x2c6   :  { %945 = vmin.xlane.f32.xlu1 %v944_v38 }
 0x2c7   :  { %v6544_v43 = vpop.f32.mrb[56].mxu0 }
 0x2c8   :  { %948 = vmin.xlane.f32.xlu0 %v947_v53  ;;  %v814_v28 = vpop.f32.mrb[57].mxu0  ;;  %v7419_v60 = vadd.f32 %v6544_v43, %v7293_v7 }
 0x2c9   :  { %v7414_v61 = vadd.f32 %v7293_v7, %v814_v28  ;;  %v6545_v0 = vpop.f32.mrb[58].mxu0 }
 0x2ca   :  { %951 = vmin.xlane.f32.xlu1 %v950_v20  ;;  %v817_v51 = vpop.f32.mrb[59].mxu0  ;;  %v7427_v53 = vadd.f32 %v6545_v0, %v7293_v7  ;;  %v959_v20 = vsel %vm108_vm0, %v7419_v60, inf }
 0x2cb   :  { %v7422_v38 = vadd.f32 %v7293_v7, %v817_v51  ;;  %v953_v62 = vsel %vm108_vm0, %v7414_v61, inf }
 0x2cc   :  { %954 = vmin.xlane.f32.xlu0 %v953_v62  ;;  %v962_v62 = vsel %vm108_vm0, %v7427_v53, inf }
 0x2cd   :  { %v956_v28 = vsel %vm108_vm0, %v7422_v38, inf }
 0x2ce   :  { %957 = vmin.xlane.f32.xlu1 %v956_v28 }
 0x2cf   :  { %v6548_v63 = vpop.f32.mrb[60].mxu0 }
 0x2d0   :  { %960 = vmin.xlane.f32.xlu0 %v959_v20  ;;  %v830_v43 = vpop.f32.mrb[61].mxu0  ;;  %v7439_v41 = vadd.f32 %v6548_v63, %v7293_v7 }
 0x2d1   :  { %v7434_v51 = vadd.f32 %v7293_v7, %v830_v43  ;;  %v6549_v49 = vpop.f32.mrb[62].mxu0 }
 0x2d2   :  { %963 = vmin.xlane.f32.xlu1 %v962_v62  ;;  %v833_v0 = vpop.f32.mrb[63].mxu0  ;;  %v7447_v20 = vadd.f32 %v6549_v49, %v7293_v7  ;;  %v971_v62 = vsel %vm108_vm0, %v7439_v41, inf }
 0x2d3   :  { %v7442_v28 = vadd.f32 %v7293_v7, %v833_v0  ;;  %v965_v44 = vsel %vm108_vm0, %v7434_v51, inf  ;;  %v604_v0 = vlaneseq }
 0x2d4   :  { %966 = vmin.xlane.f32.xlu0 %v965_v44  ;;  %v974_v63 = vsel %vm108_vm0, %v7447_v20, inf }
 0x2d5   :  { %v968_v43 = vsel %vm108_vm0, %v7442_v28, inf  ;;  %v7455_v55 = vand.u32 127, %v604_v0 }
 0x2d6   :  { %969 = vmin.xlane.f32.xlu1 %v968_v43 }
 0x2d7   :  { %11101 = vst [vmem:[#allocation37_spill] sm:$0xff] %v7455_v55 }
 0x2d8   :  { %972 = vmin.xlane.f32.xlu0 %v971_v62 }
 0x2da   :  { %975 = vmin.xlane.f32.xlu1 %v974_v63 }
 0x328   :  { %v889_v35 = vpop.xlane.xlu1 %888 }
 0x329   :  { %vm979_vm3 = vcmp.le.f32.partialorder %v7296_v9, %v889_v35  ;;  %v883_v44 = vpop.xlane.xlu0 %882 }
 0x32a   :  { %v1011_v49 = vsel %vm979_vm3, %v7455_v55, 32  ;;  %vm977_vm4 = vcmp.le.f32.partialorder %v7299_v10, %v883_v44 }
 0x32b   :  { %v1009_v7 = vsel %vm977_vm4, %v7455_v55, 32  ;;  %v7465_v31 = vsel %vm108_vm0, %v1011_v49, 2147483647 }
 0x32c   :  { %v892_v43 = vpop.xlane.xlu1 %891  ;;  %v7462_v62 = vsel %vm108_vm0, %v1009_v7, 2147483647  ;;  %v1073_v44 = vshra.s32 %v7465_v31, 16 }
 0x32d   :  { %vm980_vm5 = vcmp.le.f32.partialorder %v7302_v16, %v892_v43  ;;  %v886_v63 = vpop.xlane.xlu0 %885  ;;  %v1043_v0 = vshra.s32 %v7462_v62, 16 }
 0x32e   :  { %v1012_v35 = vsel %vm980_vm5, %v7455_v55, 32  ;;  %vm978_vm6 = vcmp.le.f32.partialorder %v7307_v19, %v886_v63 }
 0x32f   :  { %v1010_v9 = vsel %vm978_vm6, %v7455_v55, 32  ;;  %v7472_v10 = vcvt.s32.f32 %v1043_v0  ;;  %v7479_v49 = vsel %vm108_vm0, %v1012_v35, 2147483647  ;;  %v7485_v0 = vcvt.s32.f32 %v1073_v44 }
 0x330   :  { %v7476_v7 = vsel %vm108_vm0, %v1010_v9, 2147483647  ;;  %v1088_v9 = vshra.s32 %v7479_v49, 16 }
 0x331   :  { %v895_v16 = vpop.xlane.xlu0 %894  ;;  %1046 = vmin.xlane.f32.xlu0 %v7472_v10  ;;  %v1058_v43 = vshra.s32 %v7476_v7, 16 }
 0x332   :  { %vm981_vm7 = vcmp.le.f32.partialorder %v7316_v29, %v895_v16 }
 0x333   :  { %v1013_v19 = vsel %vm981_vm7, %v7455_v55, 32  ;;  %v898_v63 = vpop.xlane.xlu1 %897  ;;  %v7487_v33 = vcvt.s32.f32 %v1058_v43 }
 0x334   :  { %vm982_vm8 = vcmp.le.f32.partialorder %v7322_v37, %v898_v63  ;;  %v7492_v35 = vsel %vm108_vm0, %v1013_v19, 2147483647  ;;  %v7505_v19 = vcvt.s32.f32 %v1088_v9 }
 0x335   :  { %v1014_v34 = vsel %vm982_vm8, %v7455_v55, 32  ;;  %v901_v25 = vpop.xlane.xlu0 %900  ;;  %1076 = vmin.xlane.f32.xlu0 %v7485_v0  ;;  %1061 = vmin.xlane.f32.xlu1 %v7487_v33  ;;  %v1103_v29 = vshra.s32 %v7492_v35, 16 }
 0x336   :  { %vm983_vm9 = vcmp.le.f32.partialorder %v7319_v36, %v901_v25  ;;  %v7500_v44 = vsel %vm108_vm0, %v1014_v34, 2147483647 }
 0x337   :  { %v1015_v16 = vsel %vm983_vm9, %v7455_v55, 32  ;;  %v904_v37 = vpop.xlane.xlu1 %903  ;;  %v7503_v43 = vcvt.s32.f32 %v1103_v29  ;;  %v1118_v63 = vshra.s32 %v7500_v44, 16 }
 0x338   :  { %vm984_vm10 = vcmp.le.f32.partialorder %v7327_v39, %v904_v37  ;;  %v7510_v21 = vsel %vm108_vm0, %v1015_v16, 2147483647 }
 0x339   :  { %v1016_v23 = vsel %vm984_vm10, %v7455_v55, 32  ;;  %v907_v25 = vpop.xlane.xlu0 %906  ;;  %1106 = vmin.xlane.f32.xlu0 %v7503_v43  ;;  %1091 = vmin.xlane.f32.xlu1 %v7505_v19  ;;  %v1133_v34 = vshra.s32 %v7510_v21, 16  ;;  %v7523_v16 = vcvt.s32.f32 %v1118_v63 }
 0x33a   :  { %vm985_vm11 = vcmp.le.f32.partialorder %v7334_v52, %v907_v25  ;;  %v7518_v36 = vsel %vm108_vm0, %v1016_v23, 2147483647 }
 0x33b   :  { %v1017_v9 = vsel %vm985_vm11, %v7455_v55, 32  ;;  %v910_v39 = vpop.xlane.xlu1 %909  ;;  %v7521_v29 = vcvt.s32.f32 %v1133_v34  ;;  %v1148_v37 = vshra.s32 %v7518_v36, 16 }
 0x33c   :  { %vm986_vm12 = vcmp.le.f32.partialorder %v7342_v6, %v910_v39  ;;  %v7528_v24 = vsel %vm108_vm0, %v1017_v9, 2147483647 }
 0x33d   :  { %v1018_v15 = vsel %vm986_vm12, %v7455_v55, 32  ;;  %v913_v52 = vpop.xlane.xlu0 %912  ;;  %1136 = vmin.xlane.f32.xlu0 %v7521_v29  ;;  %1121 = vmin.xlane.f32.xlu1 %v7523_v16  ;;  %v1163_v23 = vshra.s32 %v7528_v24, 16  ;;  %v7541_v9 = vcvt.s32.f32 %v1148_v37 }
 0x33e   :  { %vm987_vm13 = vcmp.le.f32.partialorder %v7339_v2, %v913_v52  ;;  %v7536_v63 = vsel %vm108_vm0, %v1018_v15, 2147483647 }
 0x33f   :  { %v1019_v25 = vsel %vm987_vm13, %v7455_v55, 32  ;;  %v916_v6 = vpop.xlane.xlu1 %915  ;;  %v7539_v34 = vcvt.s32.f32 %v1163_v23  ;;  %v1178_v39 = vshra.s32 %v7536_v63, 16 }
 0x340   :  { %vm988_vm14 = vcmp.le.f32.partialorder %v7347_v42, %v916_v6  ;;  %v7546_v11 = vsel %vm108_vm0, %v1019_v25, 2147483647 }
 0x341   :  { %v1020_v13 = vsel %vm988_vm14, %v7455_v55, 32  ;;  %v919_v2 = vpop.xlane.xlu0 %918  ;;  %1166 = vmin.xlane.f32.xlu0 %v7539_v34  ;;  %1151 = vmin.xlane.f32.xlu1 %v7541_v9  ;;  %v1193_v15 = vshra.s32 %v7546_v11, 16  ;;  %v7559_v25 = vcvt.s32.f32 %v1178_v39 }
 0x342   :  { %vm989_vm15 = vcmp.le.f32.partialorder %v7354_v22, %v919_v2  ;;  %v7554_v37 = vsel %vm108_vm0, %v1020_v13, 2147483647 }
 0x343   :  { %v1021_v52 = vsel %vm989_vm15, %v7455_v55, 32  ;;  %v922_v42 = vpop.xlane.xlu1 %921  ;;  %v7557_v23 = vcvt.s32.f32 %v1193_v15  ;;  %v1208_v6 = vshra.s32 %v7554_v37, 16 }
 0x344   :  { %vm990_vm3 = vcmp.le.f32.partialorder %v7362_v32, %v922_v42  ;;  %v7564_v14 = vsel %vm108_vm0, %v1021_v52, 2147483647 }
 0x345   :  { %v1022_v5 = vsel %vm990_vm3, %v7455_v55, 32  ;;  %v925_v22 = vpop.xlane.xlu0 %924  ;;  %1196 = vmin.xlane.f32.xlu0 %v7557_v23  ;;  %1181 = vmin.xlane.f32.xlu1 %v7559_v25  ;;  %v1223_v13 = vshra.s32 %v7564_v14, 16  ;;  %v7577_v52 = vcvt.s32.f32 %v1208_v6 }
 0x346   :  { %vm991_vm4 = vcmp.le.f32.partialorder %v7359_v30, %v925_v22  ;;  %v7572_v39 = vsel %vm108_vm0, %v1022_v5, 2147483647 }
 0x347   :  { %v1023_v2 = vsel %vm991_vm4, %v7455_v55, 32  ;;  %v928_v32 = vpop.xlane.xlu1 %927  ;;  %v7575_v15 = vcvt.s32.f32 %v1223_v13  ;;  %v1238_v42 = vshra.s32 %v7572_v39, 16 }
 0x348   :  { %vm992_vm5 = vcmp.le.f32.partialorder %v7367_v40, %v928_v32  ;;  %v7582_v1 = vsel %vm108_vm0, %v1023_v2, 2147483647 }
 0x349   :  { %v1024_v3 = vsel %vm992_vm5, %v7455_v55, 32  ;;  %v931_v30 = vpop.xlane.xlu0 %930  ;;  %1226 = vmin.xlane.f32.xlu0 %v7575_v15  ;;  %1211 = vmin.xlane.f32.xlu1 %v7577_v52  ;;  %v1253_v5 = vshra.s32 %v7582_v1, 16  ;;  %v7595_v2 = vcvt.s32.f32 %v1238_v42 }
 0x34a   :  { %vm993_vm6 = vcmp.le.f32.partialorder %v7374_v56, %v931_v30  ;;  %v7590_v6 = vsel %vm108_vm0, %v1024_v3, 2147483647 }
 0x34b   :  { %v1025_v22 = vsel %vm993_vm6, %v7455_v55, 32  ;;  %v934_v40 = vpop.xlane.xlu1 %933  ;;  %v7593_v13 = vcvt.s32.f32 %v1253_v5  ;;  %v1268_v32 = vshra.s32 %v7590_v6, 16 }
 0x34c   :  { %vm994_vm7 = vcmp.le.f32.partialorder %v7382_v18, %v934_v40  ;;  %v7600_v4 = vsel %vm108_vm0, %v1025_v22, 2147483647 }
 0x34d   :  { %v1026_v59 = vsel %vm994_vm7, %v7455_v55, 32  ;;  %v937_v56 = vpop.xlane.xlu0 %936  ;;  %1256 = vmin.xlane.f32.xlu0 %v7593_v13  ;;  %1241 = vmin.xlane.f32.xlu1 %v7595_v2  ;;  %v1283_v3 = vshra.s32 %v7600_v4, 16  ;;  %v7613_v22 = vcvt.s32.f32 %v1268_v32 }
 0x34e   :  { %vm995_vm8 = vcmp.le.f32.partialorder %v7379_v17, %v937_v56  ;;  %v7608_v42 = vsel %vm108_vm0, %v1026_v59, 2147483647 }
 0x34f   :  { %v1027_v30 = vsel %vm995_vm8, %v7455_v55, 32  ;;  %v940_v18 = vpop.xlane.xlu1 %939  ;;  %v7611_v5 = vcvt.s32.f32 %v1283_v3  ;;  %v1298_v40 = vshra.s32 %v7608_v42, 16 }
 0x350   :  { %vm996_vm9 = vcmp.le.f32.partialorder %v7387_v26, %v940_v18  ;;  %v7618_v54 = vsel %vm108_vm0, %v1027_v30, 2147483647 }
 0x351   :  { %v1028_v57 = vsel %vm996_vm9, %v7455_v55, 32  ;;  %v943_v17 = vpop.xlane.xlu0 %942  ;;  %1286 = vmin.xlane.f32.xlu0 %v7611_v5  ;;  %1271 = vmin.xlane.f32.xlu1 %v7613_v22  ;;  %v1313_v59 = vshra.s32 %v7618_v54, 16  ;;  %v7631_v30 = vcvt.s32.f32 %v1298_v40 }
 0x352   :  { %vm997_vm10 = vcmp.le.f32.partialorder %v7394_v50, %v943_v17  ;;  %v7626_v32 = vsel %vm108_vm0, %v1028_v57, 2147483647 }
 0x353   :  { %v1029_v56 = vsel %vm997_vm10, %v7455_v55, 32  ;;  %v946_v26 = vpop.xlane.xlu1 %945  ;;  %v7629_v3 = vcvt.s32.f32 %v1313_v59  ;;  %v1328_v18 = vshra.s32 %v7626_v32, 16 }
 0x354   :  { %vm998_vm11 = vcmp.le.f32.partialorder %v7402_v12, %v946_v26  ;;  %v7636_v58 = vsel %vm108_vm0, %v1029_v56, 2147483647 }
 0x355   :  { %v1030_v48 = vsel %vm998_vm11, %v7455_v55, 32  ;;  %v949_v50 = vpop.xlane.xlu0 %948  ;;  %1316 = vmin.xlane.f32.xlu0 %v7629_v3  ;;  %1301 = vmin.xlane.f32.xlu1 %v7631_v30  ;;  %v1343_v57 = vshra.s32 %v7636_v58, 16  ;;  %v7649_v56 = vcvt.s32.f32 %v1328_v18 }
 0x356   :  { %vm999_vm12 = vcmp.le.f32.partialorder %v7399_v8, %v949_v50  ;;  %v7644_v40 = vsel %vm108_vm0, %v1030_v48, 2147483647 }
 0x357   :  { %v1031_v17 = vsel %vm999_vm12, %v7455_v55, 32  ;;  %v952_v12 = vpop.xlane.xlu1 %951  ;;  %v7647_v59 = vcvt.s32.f32 %v1343_v57  ;;  %11102 = vst [vmem:[#allocation38_spill] sm:$0xff] %v7649_v56  ;;  %v1358_v26 = vshra.s32 %v7644_v40, 16 }
 0x358   :  { %vm1000_vm13 = vcmp.le.f32.partialorder %v7407_v27, %v952_v12  ;;  %v7654_v45 = vsel %vm108_vm0, %v1031_v17, 2147483647 }
 0x359   :  { %v1032_v46 = vsel %vm1000_vm13, %v7455_v55, 32  ;;  %v955_v8 = vpop.xlane.xlu0 %954  ;;  %1346 = vmin.xlane.f32.xlu0 %v7647_v59  ;;  %1331 = vmin.xlane.f32.xlu1 %v7649_v56  ;;  %v1373_v48 = vshra.s32 %v7654_v45, 16  ;;  %v7667_v17 = vcvt.s32.f32 %v1358_v26 }
 0x35a   :  { %vm1001_vm14 = vcmp.le.f32.partialorder %v7414_v61, %v955_v8  ;;  %v7662_v18 = vsel %vm108_vm0, %v1032_v46, 2147483647 }
 0x35b   :  { %v1033_v50 = vsel %vm1001_vm14, %v7455_v55, 32  ;;  %v958_v27 = vpop.xlane.xlu1 %957  ;;  %v7665_v57 = vcvt.s32.f32 %v1373_v48  ;;  %11104 = vst [vmem:[#allocation40_spill] sm:$0xff] %v7667_v17  ;;  %v1388_v12 = vshra.s32 %v7662_v18, 16 }
 0x35c   :  { %vm1002_vm15 = vcmp.le.f32.partialorder %v7422_v38, %v958_v27  ;;  %v7672_v47 = vsel %vm108_vm0, %v1033_v50, 2147483647 }
 0x35d   :  { %11103 = vst [vmem:[#allocation39_spill] sm:$0xff] %v7665_v57  ;;  %v1034_v56 = vsel %vm1002_vm15, %v7455_v55, 32  ;;  %v961_v61 = vpop.xlane.xlu0 %960  ;;  %1376 = vmin.xlane.f32.xlu0 %v7665_v57  ;;  %1361 = vmin.xlane.f32.xlu1 %v7667_v17  ;;  %v1403_v46 = vshra.s32 %v7672_v47, 16  ;;  %v7685_v50 = vcvt.s32.f32 %v1388_v12 }
 0x35e   :  { %vm1003_vm3 = vcmp.le.f32.partialorder %v7419_v60, %v961_v61  ;;  %v7680_v26 = vsel %vm108_vm0, %v1034_v56, 2147483647 }
 0x35f   :  { %v1035_v8 = vsel %vm1003_vm3, %v7455_v55, 32  ;;  %v964_v38 = vpop.xlane.xlu1 %963  ;;  %v7683_v48 = vcvt.s32.f32 %v1403_v46  ;;  %11106 = vst [vmem:[#allocation42_spill] sm:$0xff] %v7685_v50  ;;  %v1418_v27 = vshra.s32 %v7680_v26, 16 }
 0x360   :  { %vm1004_vm4 = vcmp.le.f32.partialorder %v7427_v53, %v964_v38  ;;  %v7690_v17 = vsel %vm108_vm0, %v1035_v8, 2147483647 }
 0x361   :  { %11105 = vst [vmem:[#allocation41_spill] sm:$0xff] %v7683_v48  ;;  %v1036_v57 = vsel %vm1004_vm4, %v7455_v55, 32  ;;  %1406 = vmin.xlane.f32.xlu0 %v7683_v48  ;;  %v967_v60 = vpop.xlane.xlu0 %966  ;;  %1391 = vmin.xlane.f32.xlu1 %v7685_v50  ;;  %v1433_v56 = vshra.s32 %v7690_v17, 16  ;;  %v7703_v8 = vcvt.s32.f32 %v1418_v27 }
 0x362   :  { %vm1005_vm5 = vcmp.le.f32.partialorder %v7434_v51, %v967_v60  ;;  %v7698_v12 = vsel %vm108_vm0, %v1036_v57, 2147483647 }
 0x363   :  { %v1037_v61 = vsel %vm1005_vm5, %v7455_v55, 32  ;;  %v970_v53 = vpop.xlane.xlu1 %969  ;;  %v7701_v46 = vcvt.s32.f32 %v1433_v56  ;;  %11108 = vst [vmem:[#allocation44_spill] sm:$0xff] %v7703_v8  ;;  %v1448_v38 = vshra.s32 %v7698_v12, 16 }
 0x364   :  { %vm1006_vm6 = vcmp.le.f32.partialorder %v7442_v28, %v970_v53  ;;  %v7708_v50 = vsel %vm108_vm0, %v1037_v61, 2147483647 }
 0x365   :  { %11107 = vst [vmem:[#allocation43_spill] sm:$0xff] %v7701_v46  ;;  %v1038_v48 = vsel %vm1006_vm6, %v7455_v55, 32  ;;  %1436 = vmin.xlane.f32.xlu0 %v7701_v46  ;;  %v973_v51 = vpop.xlane.xlu0 %972  ;;  %1421 = vmin.xlane.f32.xlu1 %v7703_v8  ;;  %v1463_v57 = vshra.s32 %v7708_v50, 16  ;;  %v7721_v61 = vcvt.s32.f32 %v1448_v38 }
 0x366   :  { %vm1007_vm7 = vcmp.le.f32.partialorder %v7439_v41, %v973_v51  ;;  %v7716_v27 = vsel %vm108_vm0, %v1038_v48, 2147483647 }
 0x367   :  { %v1039_v60 = vsel %vm1007_vm7, %v7455_v55, 32  ;;  %v976_v28 = vpop.xlane.xlu1 %975  ;;  %v7719_v56 = vcvt.s32.f32 %v1463_v57  ;;  %v1478_v53 = vshra.s32 %v7716_v27, 16 }
 0x368   :  { %vm1008_vm8 = vcmp.le.f32.partialorder %v7447_v20, %v976_v28  ;;  %v7726_v8 = vsel %vm108_vm0, %v1039_v60, 2147483647  ;;  %v609_v60 = vld [vmem:[%s10834_s2 + $0x20] sm:$0xff]  ;;  %v611_v28 = vld [vmem:[%s10834_s2 + $0x30] sm:$0xff] }
 0x369   :  { %v1040_v46 = vsel %vm1008_vm8, %v7455_v55, 32  ;;  %1466 = vmin.xlane.f32.xlu0 %v7719_v56  ;;  %1451 = vmin.xlane.f32.xlu1 %v7721_v61  ;;  %v1493_v41 = vshra.s32 %v7726_v8, 16  ;;  %v7737_v51 = vcvt.s32.f32 %v1478_v53  ;;  %v1042_v55 = vand.u32 65535, %v7462_v62 }
 0x36a   :  { %v7733_v48 = vsel %vm108_vm0, %v1040_v46, 2147483647  ;;  %v610_v46 = vld [vmem:[%s10834_s2 + $0x28] sm:$0xff]  ;;  %v1102_v62 = vand.u32 65535, %v7492_v35  ;;  %v1132_v35 = vand.u32 65535, %v7510_v21  ;;  %v1162_v21 = vand.u32 65535, %v7528_v24 }
 0x36b   :  { %11109 = vst [vmem:[#allocation45_spill] sm:$0xff] %v7733_v48  ;;  %v7735_v38 = vcvt.s32.f32 %v1493_v41  ;;  %11111 = vst [vmem:[#allocation47_spill] sm:$0xff] %v7737_v51  ;;  %v1508_v20 = vshra.s32 %v7733_v48, 16  ;;  %v6860_v53 = vpack.c.bf16 %v610_v46, %v609_v60  ;;  %v612_v41 = vld [vmem:[%s10834_s2 + $0x38] sm:$0xff]  ;;  %v1072_v60 = vand.u32 65535, %v7465_v31 }
 0x36c   :  { %v1057_v46 = vand.u32 65535, %v7476_v7  ;;  %v1087_v48 = vand.u32 65535, %v7479_v49  ;;  %v1117_v49 = vand.u32 65535, %v7500_v44  ;;  %v1147_v44 = vand.u32 65535, %v7518_v36 }
 0x36d   :  { %11110 = vst [vmem:[#allocation46_spill] sm:$0xff] %v7735_v38  ;;  %1496 = vmin.xlane.f32.xlu0 %v7735_v38  ;;  %1481 = vmin.xlane.f32.xlu1 %v7737_v51  ;;  %v7742_v57 = vcvt.s32.f32 %v1508_v20  ;;  %v6864_v20 = vpack.c.bf16 %v612_v41, %v611_v28  ;;  %v1044_v51 = vcvt.s32.f32 %v1042_v55  ;;  %v1074_v38 = vcvt.s32.f32 %v1072_v60 }
 0x36e   :  { %6861 = vmatprep.subr.bf16.mxu0 %v6860_v53  ;;  %6884 = vmatprep.subr.bf16.mxu1 %v6860_v53  ;;  %v1089_v60 = vcvt.s32.f32 %v1087_v48  ;;  %v1119_v48 = vcvt.s32.f32 %v1117_v49  ;;  %v1192_v24 = vand.u32 65535, %v7546_v11  ;;  %v1177_v36 = vand.u32 65535, %v7536_v63 }
 0x36f   :  { %11112 = vst [vmem:[#allocation48_spill] sm:$0xff] %v7742_v57  ;;  %6863 = vmatpush3.bf16.msra.mxu0 %v6860_v53  ;;  %6886 = vmatpush3.bf16.msra.mxu1 %v6860_v53  ;;  %v1222_v11 = vand.u32 65535, %v7564_v14  ;;  %v1207_v63 = vand.u32 65535, %v7554_v37  ;;  %v1252_v14 = vand.u32 65535, %v7582_v1  ;;  %v1237_v37 = vand.u32 65535, %v7572_v39 }
 0x370   :  { %6865 = vmatprep.subr.bf16.mxu0 %v6864_v20  ;;  %6885 = vmatprep.subr.bf16.mxu1 %v6864_v20  ;;  %v1179_v49 = vcvt.s32.f32 %v1177_v36  ;;  %v1282_v1 = vand.u32 65535, %v7600_v4  ;;  %v1267_v39 = vand.u32 65535, %v7590_v6  ;;  %v1312_v4 = vand.u32 65535, %v7618_v54 }
 0x371   :  { %1511 = vmin.xlane.f32.xlu1 %v7742_v57  ;;  %v1297_v6 = vand.u32 65535, %v7608_v42  ;;  %v1342_v54 = vand.u32 65535, %v7636_v58  ;;  %v1327_v42 = vand.u32 65535, %v7626_v32  ;;  %v1372_v58 = vand.u32 65535, %v7654_v45 }
 0x372   :  { %v1269_v36 = vcvt.s32.f32 %v1267_v39  ;;  %v1357_v32 = vand.u32 65535, %v7644_v40  ;;  %v1402_v45 = vand.u32 65535, %v7672_v47  ;;  %v1387_v40 = vand.u32 65535, %v7662_v18 }
 0x373   :  { %6867 = vmatpush3.bf16.msra.mxu0 %v6864_v20  ;;  %6887 = vmatpush3.bf16.msra.mxu1 %v6864_v20  ;;  %v1059_v20 = vcvt.s32.f32 %v1057_v46  ;;  %v1432_v47 = vand.u32 65535, %v7690_v17  ;;  %v1417_v18 = vand.u32 65535, %v7680_v26  ;;  %v1462_v17 = vand.u32 65535, %v7708_v50 }
 0x374   :  { %v1447_v26 = vand.u32 65535, %v7698_v12  ;;  %v1492_v50 = vand.u32 65535, %v7726_v8  ;;  %v1477_v12 = vand.u32 65535, %v7716_v27  ;;  %v11121_v27 = vld [vmem:[#allocation46_spill] sm:$0xff] }
 0x3be   :  { %v7758_v57 = vpop.xlane.xlu0 %1046 }
 0x3bf   :  { %vm1048_vm9 = vcmp.eq.f32.partialorder %v7472_v10, %v7758_v57 }
 0x3c0   :  { %v1049_v28 = vsel %vm1048_vm9, %v1044_v51, inf  ;;  %v1104_v51 = vcvt.s32.f32 %v1102_v62 }
 0x3c1   :  { %1050 = vmin.xlane.f32.xlu0 %v1049_v28  ;;  %v1134_v28 = vcvt.s32.f32 %v1132_v35  ;;  %v1194_v35 = vcvt.s32.f32 %v1192_v24  ;;  %v1284_v24 = vcvt.s32.f32 %v1282_v1 }
 0x3c2   :  { %v7764_v41 = vpop.xlane.xlu0 %1076  ;;  %v7766_v53 = vpop.xlane.xlu1 %1061 }
 0x3c3   :  { %vm1078_vm10 = vcmp.eq.f32.partialorder %v7485_v0, %v7764_v41  ;;  %vm1063_vm11 = vcmp.eq.f32.partialorder %v7487_v33, %v7766_v53 }
 0x3c4   :  { %v1079_v31 = vsel %vm1078_vm10, %v1074_v38, inf  ;;  %v1064_v55 = vsel %vm1063_vm11, %v1059_v20, inf }
 0x3c5   :  { %1080 = vmin.xlane.f32.xlu0 %v1079_v31  ;;  %1065 = vmin.xlane.f32.xlu1 %v1064_v55  ;;  %v1164_v31 = vcvt.s32.f32 %v1162_v21  ;;  %v1149_v55 = vcvt.s32.f32 %v1147_v44 }
 0x3c6   :  { %v7774_v10 = vpop.xlane.xlu0 %1106  ;;  %v7776_v7 = vpop.xlane.xlu1 %1091 }
 0x3c7   :  { %vm1108_vm12 = vcmp.eq.f32.partialorder %v7503_v43, %v7774_v10  ;;  %vm1093_vm13 = vcmp.eq.f32.partialorder %v7505_v19, %v7776_v7 }
 0x3c8   :  { %v1109_v33 = vsel %vm1108_vm12, %v1104_v51, inf  ;;  %v1094_v0 = vsel %vm1093_vm13, %v1089_v60, inf }
 0x3c9   :  { %1110 = vmin.xlane.f32.xlu0 %v1109_v33  ;;  %1095 = vmin.xlane.f32.xlu1 %v1094_v0 }
 0x3ca   :  { %v7784_v38 = vpop.xlane.xlu0 %1136  ;;  %v7786_v46 = vpop.xlane.xlu1 %1121 }
 0x3cb   :  { %vm1138_vm14 = vcmp.eq.f32.partialorder %v7521_v29, %v7784_v38  ;;  %vm1123_vm15 = vcmp.eq.f32.partialorder %v7523_v16, %v7786_v46 }
 0x3cc   :  { %v1139_v43 = vsel %vm1138_vm14, %v1134_v28, inf  ;;  %v1124_v19 = vsel %vm1123_vm15, %v1119_v48, inf  ;;  %v1224_v28 = vcvt.s32.f32 %v1222_v11  ;;  %v1209_v48 = vcvt.s32.f32 %v1207_v63 }
 0x3cd   :  { %1140 = vmin.xlane.f32.xlu0 %v1139_v43  ;;  %1125 = vmin.xlane.f32.xlu1 %v1124_v19  ;;  %v1254_v43 = vcvt.s32.f32 %v1252_v14  ;;  %v1239_v19 = vcvt.s32.f32 %v1237_v37  ;;  %v1374_v37 = vcvt.s32.f32 %v1372_v58  ;;  %v1464_v58 = vcvt.s32.f32 %v1462_v17 }
 0x3ce   :  { %v7794_v20 = vpop.xlane.xlu0 %1166  ;;  %v7796_v62 = vpop.xlane.xlu1 %1151  ;;  %v1098_v17 = vcvt.f32.s32 %v7776_v7  ;;  %v1128_v7 = vcvt.f32.s32 %v7786_v46 }
 0x3cf   :  { %vm1168_vm3 = vcmp.eq.f32.partialorder %v7539_v34, %v7794_v20  ;;  %vm1153_vm4 = vcmp.eq.f32.partialorder %v7541_v9, %v7796_v62 }
 0x3d0   :  { %v1169_v29 = vsel %vm1168_vm3, %v1164_v31, inf  ;;  %v1154_v16 = vsel %vm1153_vm4, %v1149_v55, inf  ;;  %v1129_v46 = vshll.u32 %v1128_v7, 16 }
 0x3d1   :  { %1170 = vmin.xlane.f32.xlu0 %v1169_v29  ;;  %1155 = vmin.xlane.f32.xlu1 %v1154_v16 }
 0x3d2   :  { %v7804_v51 = vpop.xlane.xlu0 %1196  ;;  %v7806_v60 = vpop.xlane.xlu1 %1181 }
 0x3d3   :  { %vm1198_vm5 = vcmp.eq.f32.partialorder %v7557_v23, %v7804_v51  ;;  %vm1183_vm6 = vcmp.eq.f32.partialorder %v7559_v25, %v7806_v60 }
 0x3d4   :  { %v1199_v34 = vsel %vm1198_vm5, %v1194_v35, inf  ;;  %v1184_v9 = vsel %vm1183_vm6, %v1179_v49, inf  ;;  %v1314_v35 = vcvt.s32.f32 %v1312_v4  ;;  %v1299_v49 = vcvt.s32.f32 %v1297_v6 }
 0x3d5   :  { %1200 = vmin.xlane.f32.xlu0 %v1199_v34  ;;  %1185 = vmin.xlane.f32.xlu1 %v1184_v9  ;;  %v1344_v34 = vcvt.s32.f32 %v1342_v54  ;;  %v1329_v9 = vcvt.s32.f32 %v1327_v42  ;;  %v11118_v54 = vld [vmem:[#allocation43_spill] sm:$0xff]  ;;  %v11119_v42 = vld [vmem:[#allocation44_spill] sm:$0xff] }
 0x3d6   :  { %v7814_v33 = vpop.xlane.xlu0 %1226  ;;  %v7816_v0 = vpop.xlane.xlu1 %1211 }
 0x3d7   :  { %vm1228_vm7 = vcmp.eq.f32.partialorder %v7575_v15, %v7814_v33  ;;  %vm1213_vm8 = vcmp.eq.f32.partialorder %v7577_v52, %v7816_v0 }
 0x3d8   :  { %v1229_v23 = vsel %vm1228_vm7, %v1224_v28, inf  ;;  %v1214_v25 = vsel %vm1213_vm8, %v1209_v48, inf }
 0x3d9   :  { %1230 = vmin.xlane.f32.xlu0 %v1229_v23  ;;  %1215 = vmin.xlane.f32.xlu1 %v1214_v25  ;;  %v1359_v23 = vcvt.s32.f32 %v1357_v32  ;;  %v11114_v25 = vld [vmem:[#allocation39_spill] sm:$0xff]  ;;  %v1449_v32 = vcvt.s32.f32 %v1447_v26 }
 0x3da   :  { %v7824_v21 = vpop.xlane.xlu0 %1256  ;;  %v7826_v44 = vpop.xlane.xlu1 %1241 }
 0x3db   :  { %vm1258_vm9 = vcmp.eq.f32.partialorder %v7593_v13, %v7824_v21  ;;  %vm1243_vm10 = vcmp.eq.f32.partialorder %v7595_v2, %v7826_v44 }
 0x3dc   :  { %v1259_v15 = vsel %vm1258_vm9, %v1254_v43, inf  ;;  %v1244_v52 = vsel %vm1243_vm10, %v1239_v19, inf }
 0x3dd   :  { %1260 = vmin.xlane.f32.xlu0 %v1259_v15  ;;  %1245 = vmin.xlane.f32.xlu1 %v1244_v52  ;;  %v1404_v15 = vcvt.s32.f32 %v1402_v45  ;;  %v1389_v52 = vcvt.s32.f32 %v1387_v40  ;;  %v1479_v45 = vcvt.s32.f32 %v1477_v12  ;;  %v11120_v40 = vld [vmem:[#allocation45_spill] sm:$0xff]  ;;  %v1099_v12 = vshll.u32 %v1098_v17, 16 }
 0x3de   :  { %v7834_v31 = vpop.xlane.xlu0 %1286  ;;  %v7836_v55 = vpop.xlane.xlu1 %1271  ;;  %v1507_v8 = vand.u32 65535, %v11120_v40 }
 0x3df   :  { %vm1288_vm11 = vcmp.eq.f32.partialorder %v7611_v5, %v7834_v31  ;;  %vm1273_vm12 = vcmp.eq.f32.partialorder %v7613_v22, %v7836_v55 }
 0x3e0   :  { %v1289_v13 = vsel %vm1288_vm11, %v1284_v24, inf  ;;  %v1274_v2 = vsel %vm1273_vm12, %v1269_v36, inf  ;;  %v11116_v24 = vld [vmem:[#allocation41_spill] sm:$0xff]  ;;  %v11117_v36 = vld [vmem:[#allocation42_spill] sm:$0xff] }
 0x3e1   :  { %1290 = vmin.xlane.f32.xlu0 %v1289_v13  ;;  %1275 = vmin.xlane.f32.xlu1 %v1274_v2 }
 0x3e2   :  { %v7844_v29 = vpop.xlane.xlu0 %1316  ;;  %v7846_v16 = vpop.xlane.xlu1 %1301 }
 0x3e3   :  { %vm1318_vm13 = vcmp.eq.f32.partialorder %v7629_v3, %v7844_v29  ;;  %vm1303_vm14 = vcmp.eq.f32.partialorder %v7631_v30, %v7846_v16  ;;  %v11113_v3 = vld [vmem:[#allocation38_spill] sm:$0xff] }
 0x3e4   :  { %v1319_v5 = vsel %vm1318_vm13, %v1314_v35, inf  ;;  %v1304_v22 = vsel %vm1303_vm14, %v1299_v49, inf  ;;  %v1434_v35 = vcvt.s32.f32 %v1432_v47  ;;  %v1419_v49 = vcvt.s32.f32 %v1417_v18 }
 0x3e5   :  { %1320 = vmin.xlane.f32.xlu0 %v1319_v5  ;;  %1305 = vmin.xlane.f32.xlu1 %v1304_v22  ;;  %v1083_v47 = vcvt.f32.s32 %v7764_v41 }
 0x3e6   :  { %v7854_v11 = vpop.xlane.xlu0 %1346  ;;  %v7856_v63 = vpop.xlane.xlu1 %1331 }
 0x3e7   :  { %vm1348_vm15 = vcmp.eq.f32.partialorder %v7647_v59, %v7854_v11  ;;  %vm1333_vm3 = vcmp.eq.f32.partialorder %v11113_v3, %v7856_v63  ;;  %v11115_v59 = vld [vmem:[#allocation40_spill] sm:$0xff] }
 0x3e8   :  { %v1349_v30 = vsel %vm1348_vm15, %v1344_v34, inf  ;;  %v1334_v28 = vsel %vm1333_vm3, %v1329_v9, inf }
 0x3e9   :  { %1350 = vmin.xlane.f32.xlu0 %v1349_v30  ;;  %1335 = vmin.xlane.f32.xlu1 %v1334_v28 }
 0x3ea   :  { %v7864_v48 = vpop.xlane.xlu0 %1376  ;;  %v7866_v14 = vpop.xlane.xlu1 %1361 }
 0x3eb   :  { %vm1378_vm4 = vcmp.eq.f32.partialorder %v11114_v25, %v7864_v48  ;;  %vm1363_vm5 = vcmp.eq.f32.partialorder %v11115_v59, %v7866_v14 }
 0x3ec   :  { %v1379_v43 = vsel %vm1378_vm4, %v1374_v37, inf  ;;  %v1364_v19 = vsel %vm1363_vm5, %v1359_v23, inf  ;;  %v1494_v23 = vcvt.s32.f32 %v1492_v50 }
 0x3ed   :  { %1380 = vmin.xlane.f32.xlu0 %v1379_v43  ;;  %1365 = vmin.xlane.f32.xlu1 %v1364_v19  ;;  %v1509_v43 = vcvt.s32.f32 %v1507_v8  ;;  %v11123_v19 = vld [vmem:[#allocation48_spill] sm:$0xff] }
 0x3ee   :  { %v7874_v1 = vpop.xlane.xlu0 %1406  ;;  %v7876_v39 = vpop.xlane.xlu1 %1391 }
 0x3ef   :  { %vm1408_vm6 = vcmp.eq.f32.partialorder %v11116_v24, %v7874_v1  ;;  %vm1393_vm7 = vcmp.eq.f32.partialorder %v11117_v36, %v7876_v39  ;;  %v1068_v36 = vcvt.f32.s32 %v7766_v53 }
 0x3f0   :  { %v1409_v4 = vsel %vm1408_vm6, %v1404_v15, inf  ;;  %v1394_v6 = vsel %vm1393_vm7, %v1389_v52, inf  ;;  %v1053_v52 = vcvt.f32.s32 %v7758_v57  ;;  %v10882_v57 = vmov 0.0  }
 0x3f1   :  { %1410 = vmin.xlane.f32.xlu0 %v1409_v4  ;;  %1395 = vmin.xlane.f32.xlu1 %v1394_v6 }
 0x3f2   :  { %v7884_v13 = vpop.xlane.xlu0 %1436  ;;  %v7886_v2 = vpop.xlane.xlu1 %1421  ;;  %v1054_v24 = vshll.u32 %v1053_v52, 16 }
 0x3f3   :  { %vm1438_vm8 = vcmp.eq.f32.partialorder %v11118_v54, %v7884_v13  ;;  %vm1423_vm9 = vcmp.eq.f32.partialorder %v11119_v42, %v7886_v2  ;;  %v1069_v42 = vshll.u32 %v1068_v36, 16 }
 0x3f4   :  { %v1439_v5 = vsel %vm1438_vm8, %v1434_v35, inf  ;;  %v1424_v22 = vsel %vm1423_vm9, %v1419_v49, inf  ;;  %v1084_v35 = vshll.u32 %v1083_v47, 16  ;;  %v1113_v49 = vcvt.f32.s32 %v7774_v10 }
 0x3f5   :  { %1440 = vmin.xlane.f32.xlu0 %v1439_v5  ;;  %1425 = vmin.xlane.f32.xlu1 %v1424_v22  ;;  %v1143_v10 = vcvt.f32.s32 %v7784_v38 }
 0x3f6   :  { %v7894_v34 = vpop.xlane.xlu0 %1466  ;;  %v7896_v9 = vpop.xlane.xlu1 %1451  ;;  %v1114_v53 = vshll.u32 %v1113_v49, 16 }
 0x3f7   :  { %vm1468_vm10 = vcmp.eq.f32.partialorder %v7719_v56, %v7894_v34  ;;  %vm1453_vm11 = vcmp.eq.f32.partialorder %v7721_v61, %v7896_v9  ;;  %v11122_v56 = vld [vmem:[#allocation47_spill] sm:$0xff]  ;;  %v1144_v38 = vshll.u32 %v1143_v10, 16 }
 0x3f8   :  { %v1469_v3 = vsel %vm1468_vm10, %v1464_v58, inf  ;;  %v1454_v30 = vsel %vm1453_vm11, %v1449_v32, inf  ;;  %v11124_v58 = vld [vmem:[#allocation37_spill] sm:$0xff] }
 0x3f9   :  { %1470 = vmin.xlane.f32.xlu0 %v1469_v3  ;;  %1455 = vmin.xlane.f32.xlu1 %v1454_v30 }
 0x3fa   :  { %v7904_v28 = vpop.xlane.xlu0 %1496  ;;  %v7906_v37 = vpop.xlane.xlu1 %1481 }
 0x3fb   :  { %vm1498_vm12 = vcmp.eq.f32.partialorder %v11121_v27, %v7904_v28  ;;  %vm1483_vm13 = vcmp.eq.f32.partialorder %v11122_v56, %v7906_v37 }
 0x3fc   :  { %v1499_v25 = vsel %vm1498_vm12, %v1494_v23, inf  ;;  %v1484_v61 = vsel %vm1483_vm13, %v1479_v45, inf }
 0x3fd   :  { %1500 = vmin.xlane.f32.xlu0 %v1499_v25  ;;  %1485 = vmin.xlane.f32.xlu1 %v1484_v61  ;;  %v1173_v25 = vcvt.f32.s32 %v7794_v20  ;;  %v1158_v61 = vcvt.f32.s32 %v7796_v62  ;;  %v1203_v62 = vcvt.f32.s32 %v7804_v51 }
 0x3fe   :  { %v7913_v59 = vpop.xlane.xlu1 %1511 }
 0x3ff   :  { %vm1513_vm14 = vcmp.eq.f32.partialorder %v11123_v19, %v7913_v59  ;;  %v1159_v20 = vshll.u32 %v1158_v61, 16  ;;  %v1204_v51 = vshll.u32 %v1203_v62, 16 }
 0x400   :  { %v1514_v15 = vsel %vm1513_vm14, %v1509_v43, inf }
 0x401   :  { %1515 = vmin.xlane.f32.xlu1 %v1514_v15 }
 0x44e   :  { %v1051_v18 = vpop.xlane.xlu0 %1050 }
 0x44f   :  { %v1052_v4 = vcvt.f32.s32 %v1051_v18 }
 0x451   :  { %v1055_v6 = vadd.s32 %v1054_v24, %v1052_v4  ;;  %v1174_v4 = vshll.u32 %v1173_v25, 16 }
 0x452   :  { %v1081_v26 = vpop.xlane.xlu0 %1080  ;;  %v1066_v54 = vpop.xlane.xlu1 %1065 }
 0x453   :  { %v1082_v5 = vcvt.f32.s32 %v1081_v26  ;;  %v1067_v22 = vcvt.f32.s32 %v1066_v54  ;;  %vm1521_vm15 = vcmp.eq.s32.totalorder %v11124_v58, %v1055_v6  ;;  %v1188_v6 = vcvt.f32.s32 %v7806_v60 }
 0x454   :  { %v5939_v41 = vsel %vm1521_vm15, 1.0, %v10882_v57 }
 0x455   :  { %v1085_v32 = vadd.s32 %v1084_v35, %v1082_v5  ;;  %v1070_v50 = vadd.s32 %v1069_v42, %v1067_v22  ;;  %6558 = vmatprep.mubr.msk.f32.mxu0 %vm108_vm0, %v5939_v41  ;;  %v1189_v60 = vshll.u32 %v1188_v6, 16  ;;  %v1233_v41 = vcvt.f32.s32 %v7814_v33 }
 0x456   :  { %v1111_v3 = vpop.xlane.xlu0 %1110  ;;  %v1096_v30 = vpop.xlane.xlu1 %1095  ;;  %v1323_v6 = vcvt.f32.s32 %v7844_v29 }
 0x457   :  { %vm1522_vm3 = vcmp.eq.s32.totalorder %v11124_v58, %v1070_v50  ;;  %v1112_v23 = vcvt.f32.s32 %v1111_v3  ;;  %v1097_v45 = vcvt.f32.s32 %v1096_v30  ;;  %vm1523_vm4 = vcmp.eq.s32.totalorder %v11124_v58, %v1085_v32 }
 0x458   :  { %v5940_v40 = vsel %vm1522_vm3, 1.0, %v10882_v57  ;;  %v5941_v8 = vsel %vm1523_vm4, 1.0, %v10882_v57  ;;  %v1218_v32 = vcvt.f32.s32 %v7816_v0  ;;  %v1234_v33 = vshll.u32 %v1233_v41, 16 }
 0x459   :  { %v1115_v27 = vadd.s32 %v1114_v53, %v1112_v23  ;;  %v1100_v56 = vadd.s32 %v1099_v12, %v1097_v45  ;;  %6559 = vmatmul.mubr.msk.f32.vlgmr.msra.gmra.mrb[64].mxu0 %vm108_vm0, %v5940_v40  ;;  %6561 = vmatprep.mubr.msk.f32.mxu1 %vm108_vm0, %v5941_v8  ;;  %v1263_v45 = vcvt.f32.s32 %v7824_v21  ;;  %v1248_v40 = vcvt.f32.s32 %v7826_v44 }
 0x45a   :  { %v1141_v43 = vpop.xlane.xlu0 %1140  ;;  %v1126_v19 = vpop.xlane.xlu1 %1125  ;;  %v1219_v0 = vshll.u32 %v1218_v32, 16  ;;  %v1324_v29 = vshll.u32 %v1323_v6, 16  ;;  %v1338_v41 = vcvt.f32.s32 %v7856_v63 }
 0x45b   :  { %vm1524_vm5 = vcmp.eq.s32.totalorder %v11124_v58, %v1100_v56  ;;  %v1142_v15 = vcvt.f32.s32 %v1141_v43  ;;  %v1127_v52 = vcvt.f32.s32 %v1126_v19  ;;  %vm1525_vm6 = vcmp.eq.s32.totalorder %v11124_v58, %v1115_v27 }
 0x45c   :  { %v5942_v47 = vsel %vm1524_vm5, 1.0, %v10882_v57  ;;  %v5943_v18 = vsel %vm1525_vm6, 1.0, %v10882_v57  ;;  %v1264_v21 = vshll.u32 %v1263_v45, 16  ;;  %v1249_v44 = vshll.u32 %v1248_v40, 16 }
 0x45d   :  { %v1145_v24 = vadd.s32 %v1144_v38, %v1142_v15  ;;  %v1130_v36 = vadd.s32 %v1129_v46, %v1127_v52  ;;  %6562 = vmatmul.mubr.msk.f32.vlgmr.msra.gmra.mrb[32].mxu1 %vm108_vm0, %v5942_v47  ;;  %v1293_v19 = vcvt.f32.s32 %v7834_v31  ;;  %v1278_v15 = vcvt.f32.s32 %v7836_v55 }
 0x45e   :  { %v1171_v35 = vpop.xlane.xlu0 %1170  ;;  %6564 = vmatprep.mubr.msk.f32.mxu1 %vm108_vm0, %v5943_v18  ;;  %v1156_v49 = vpop.xlane.xlu1 %1155  ;;  %v1339_v63 = vshll.u32 %v1338_v41, 16  ;;  %v1503_v41 = vcvt.f32.s32 %v7904_v28 }
 0x45f   :  { %v1172_v17 = vcvt.f32.s32 %v1171_v35  ;;  %v1157_v26 = vcvt.f32.s32 %v1156_v49  ;;  %vm1526_vm7 = vcmp.eq.s32.totalorder %v11124_v58, %v1130_v36  ;;  %vm1527_vm8 = vcmp.eq.s32.totalorder %v11124_v58, %v1145_v24 }
 0x460   :  { %v5944_v54 = vsel %vm1526_vm7, 1.0, %v10882_v57  ;;  %v5945_v42 = vsel %vm1527_vm8, 1.0, %v10882_v57  ;;  %v1294_v31 = vshll.u32 %v1293_v19, 16  ;;  %v1279_v55 = vshll.u32 %v1278_v15, 16 }
 0x461   :  { %v1175_v5 = vadd.s32 %v1174_v4, %v1172_v17  ;;  %v1160_v22 = vadd.s32 %v1159_v20, %v1157_v26  ;;  %6565 = vmatmul.mubr.msk.f32.gmra.mrb[34].mxu1 %vm108_vm0, %v5944_v54  ;;  %v1308_v35 = vcvt.f32.s32 %v7846_v16  ;;  %v1504_v28 = vshll.u32 %v1503_v41, 16 }
 0x462   :  { %v1201_v50 = vpop.xlane.xlu0 %1200  ;;  %6567 = vmatprep.mubr.msk.f32.mxu1 %vm108_vm0, %v5945_v42  ;;  %v1186_v53 = vpop.xlane.xlu1 %1185 }
 0x463   :  { %v1202_v12 = vcvt.f32.s32 %v1201_v50  ;;  %v1187_v10 = vcvt.f32.s32 %v1186_v53  ;;  %vm1528_vm9 = vcmp.eq.s32.totalorder %v11124_v58, %v1160_v22  ;;  %vm1529_vm10 = vcmp.eq.s32.totalorder %v11124_v58, %v1175_v5 }
 0x464   :  { %v5946_v7 = vsel %vm1528_vm9, 1.0, %v10882_v57  ;;  %v5947_v3 = vsel %vm1529_vm10, 1.0, %v10882_v57  ;;  %v1309_v16 = vshll.u32 %v1308_v35, 16 }
 0x465   :  { %v1205_v30 = vadd.s32 %v1204_v51, %v1202_v12  ;;  %v1190_v23 = vadd.s32 %v1189_v60, %v1187_v10  ;;  %6568 = vmatmul.mubr.msk.f32.gmra.mrb[36].mxu1 %vm108_vm0, %v5946_v7  ;;  %v1353_v60 = vcvt.f32.s32 %v7854_v11 }
 0x466   :  { %v1231_v8 = vpop.xlane.xlu0 %1230  ;;  %6570 = vmatprep.mubr.msk.f32.mxu1 %vm108_vm0, %v5947_v3  ;;  %v1216_v27 = vpop.xlane.xlu1 %1215 }
 0x467   :  { %v1232_v56 = vcvt.f32.s32 %v1231_v8  ;;  %v1217_v38 = vcvt.f32.s32 %v1216_v27  ;;  %vm1530_vm11 = vcmp.eq.s32.totalorder %v11124_v58, %v1190_v23  ;;  %vm1531_vm12 = vcmp.eq.s32.totalorder %v11124_v58, %v1205_v30 }
 0x468   :  { %v5948_v46 = vsel %vm1530_vm11, 1.0, %v10882_v57  ;;  %v5949_v25 = vsel %vm1531_vm12, 1.0, %v10882_v57  ;;  %v1354_v11 = vshll.u32 %v1353_v60, 16  ;;  %v1383_v23 = vcvt.f32.s32 %v7864_v48 }
 0x469   :  { %v1235_v61 = vadd.s32 %v1234_v33, %v1232_v56  ;;  %v1220_v43 = vadd.s32 %v1219_v0, %v1217_v38  ;;  %6571 = vmatmul.mubr.msk.f32.gmra.mrb[38].mxu1 %vm108_vm0, %v5948_v46  ;;  %v1368_v33 = vcvt.f32.s32 %v7866_v14 }
 0x46a   :  { %v1261_v52 = vpop.xlane.xlu0 %1260  ;;  %6573 = vmatprep.mubr.msk.f32.mxu1 %vm108_vm0, %v5949_v25  ;;  %v1246_v47 = vpop.xlane.xlu1 %1245  ;;  %v1384_v48 = vshll.u32 %v1383_v23, 16  ;;  %v1413_v25 = vcvt.f32.s32 %v7874_v1 }
 0x46b   :  { %v1262_v18 = vcvt.f32.s32 %v1261_v52  ;;  %v1247_v24 = vcvt.f32.s32 %v1246_v47  ;;  %vm1532_vm13 = vcmp.eq.s32.totalorder %v11124_v58, %v1220_v43  ;;  %vm1533_vm14 = vcmp.eq.s32.totalorder %v11124_v58, %v1235_v61 }
 0x46c   :  { %v5950_v36 = vsel %vm1532_vm13, 1.0, %v10882_v57  ;;  %v5951_v4 = vsel %vm1533_vm14, 1.0, %v10882_v57  ;;  %v1369_v14 = vshll.u32 %v1368_v33, 16  ;;  %v1398_v61 = vcvt.f32.s32 %v7876_v39 }
 0x46d   :  { %v1265_v20 = vadd.s32 %v1264_v21, %v1262_v18  ;;  %v1250_v62 = vadd.s32 %v1249_v44, %v1247_v24  ;;  %6574 = vmatmul.mubr.msk.f32.gmra.mrb[40].mxu1 %vm108_vm0, %v5950_v36  ;;  %v1414_v1 = vshll.u32 %v1413_v25, 16  ;;  %v1443_v24 = vcvt.f32.s32 %v7884_v13 }
 0x46e   :  { %v1291_v49 = vpop.xlane.xlu0 %1290  ;;  %6576 = vmatprep.mubr.msk.f32.mxu1 %vm108_vm0, %v5951_v4  ;;  %v1276_v17 = vpop.xlane.xlu1 %1275  ;;  %v1399_v39 = vshll.u32 %v1398_v61, 16  ;;  %v1428_v36 = vcvt.f32.s32 %v7886_v2 }
 0x46f   :  { %v1292_v26 = vcvt.f32.s32 %v1291_v49  ;;  %v1277_v54 = vcvt.f32.s32 %v1276_v17  ;;  %vm1534_vm15 = vcmp.eq.s32.totalorder %v11124_v58, %v1250_v62  ;;  %vm1535_vm3 = vcmp.eq.s32.totalorder %v11124_v58, %v1265_v20 }
 0x470   :  { %v5952_v42 = vsel %vm1534_vm15, 1.0, %v10882_v57  ;;  %v5953_v5 = vsel %vm1535_vm3, 1.0, %v10882_v57  ;;  %v1444_v13 = vshll.u32 %v1443_v24, 16  ;;  %v1429_v2 = vshll.u32 %v1428_v36, 16 }
 0x471   :  { %v1295_v22 = vadd.s32 %v1294_v31, %v1292_v26  ;;  %v1280_v51 = vadd.s32 %v1279_v55, %v1277_v54  ;;  %6577 = vmatmul.mubr.msk.f32.gmra.mrb[42].mxu1 %vm108_vm0, %v5952_v42  ;;  %v1473_v17 = vcvt.f32.s32 %v7894_v34  ;;  %v1458_v26 = vcvt.f32.s32 %v7896_v9 }
 0x472   :  { %v1321_v32 = vpop.xlane.xlu0 %1320  ;;  %6579 = vmatprep.mubr.msk.f32.mxu1 %vm108_vm0, %v5953_v5  ;;  %v1306_v50 = vpop.xlane.xlu1 %1305 }
 0x473   :  { %v1322_v53 = vcvt.f32.s32 %v1321_v32  ;;  %v1307_v12 = vcvt.f32.s32 %v1306_v50  ;;  %vm1536_vm4 = vcmp.eq.s32.totalorder %v11124_v58, %v1280_v51  ;;  %vm1537_vm5 = vcmp.eq.s32.totalorder %v11124_v58, %v1295_v22 }
 0x474   :  { %v5954_v10 = vsel %vm1536_vm4, 1.0, %v10882_v57  ;;  %v5955_v7 = vsel %vm1537_vm5, 1.0, %v10882_v57  ;;  %v1474_v34 = vshll.u32 %v1473_v17, 16  ;;  %v1459_v9 = vshll.u32 %v1458_v26, 16  ;;  %v11144_v26 = vld [vmem:[#allocation9_spill] sm:$0xff] }
 0x475   :  { %v1325_v3 = vadd.s32 %v1324_v29, %v1322_v53  ;;  %v1310_v30 = vadd.s32 %v1309_v16, %v1307_v12  ;;  %6580 = vmatmul.mubr.msk.f32.gmra.mrb[44].mxu1 %vm108_vm0, %v5954_v10  ;;  %v1488_v32 = vcvt.f32.s32 %v7906_v37 }
 0x476   :  { %v1351_v0 = vpop.xlane.xlu0 %1350  ;;  %6582 = vmatprep.mubr.msk.f32.mxu1 %vm108_vm0, %v5955_v7  ;;  %v1336_v45 = vpop.xlane.xlu1 %1335 }
 0x477   :  { %v1352_v40 = vcvt.f32.s32 %v1351_v0  ;;  %v1337_v8 = vcvt.f32.s32 %v1336_v45  ;;  %vm1538_vm6 = vcmp.eq.s32.totalorder %v11124_v58, %v1310_v30  ;;  %vm1539_vm7 = vcmp.eq.s32.totalorder %v11124_v58, %v1325_v3 }
 0x478   :  { %v5956_v27 = vsel %vm1538_vm6, 1.0, %v10882_v57  ;;  %v5957_v56 = vsel %vm1539_vm7, 1.0, %v10882_v57  ;;  %v1489_v37 = vshll.u32 %v1488_v32, 16 }
 0x479   :  { %v1355_v38 = vadd.s32 %v1354_v11, %v1352_v40  ;;  %v1340_v46 = vadd.s32 %v1339_v63, %v1337_v8  ;;  %6583 = vmatmul.mubr.msk.f32.gmra.mrb[46].mxu1 %vm108_vm0, %v5956_v27  ;;  %v1518_v63 = vcvt.f32.s32 %v7913_v59 }
 0x47a   :  { %v1381_v43 = vpop.xlane.xlu0 %1380  ;;  %6585 = vmatprep.mubr.msk.f32.mxu1 %vm108_vm0, %v5957_v56  ;;  %v1366_v21 = vpop.xlane.xlu1 %1365 }
 0x47b   :  { %v1382_v44 = vcvt.f32.s32 %v1381_v43  ;;  %v1367_v19 = vcvt.f32.s32 %v1366_v21  ;;  %vm1540_vm8 = vcmp.eq.s32.totalorder %v11124_v58, %v1340_v46  ;;  %vm1541_vm9 = vcmp.eq.s32.totalorder %v11124_v58, %v1355_v38  ;;  %v6897_v43 = vld [vmem:[%s10833_s1 + $0x60] sm:$0xff]  }
 0x47c   :  { %v5958_v15 = vsel %vm1540_vm8, 1.0, %v10882_v57  ;;  %v5959_v52 = vsel %vm1541_vm9, 1.0, %v10882_v57  ;;  %v1519_v38 = vshll.u32 %v1518_v63, 16  ;;  %6606 = vmatprep.subr.bf16.mxu0 %v6897_v43 }
 0x47d   :  { %v1385_v47 = vadd.s32 %v1384_v48, %v1382_v44  ;;  %v1370_v18 = vadd.s32 %v1369_v14, %v1367_v19  ;;  %6586 = vmatmul.mubr.msk.f32.gmra.mrb[48].mxu1 %vm108_vm0, %v5958_v15  ;;  %6607 = vmatpush3.bf16.msra.mxu0 %v6897_v43  ;;  %v11126_v44 = vld [vmem:[#allocation7_spill] sm:$0xff] }
 0x47e   :  { %v1411_v4 = vpop.xlane.xlu0 %1410  ;;  %6588 = vmatprep.mubr.msk.f32.mxu1 %vm108_vm0, %v5959_v52  ;;  %v1396_v20 = vpop.xlane.xlu1 %1395  ;;  %v11129_v52 = vld [vmem:[#allocation6_spill] sm:$0xff] }
 0x47f   :  { %v1412_v62 = vcvt.f32.s32 %v1411_v4  ;;  %v1397_v31 = vcvt.f32.s32 %v1396_v20  ;;  %vm1542_vm10 = vcmp.eq.s32.totalorder %v11124_v58, %v1370_v18  ;;  %vm1543_vm11 = vcmp.eq.s32.totalorder %v11124_v58, %v1385_v47  ;;  %v11135_v4 = vld [vmem:[#allocation8_spill] sm:$0xff] }
 0x480   :  { %v5960_v55 = vsel %vm1542_vm10, 1.0, %v10882_v57  ;;  %v5961_v6 = vsel %vm1543_vm11, 1.0, %v10882_v57 }
 0x481   :  { %v1415_v35 = vadd.s32 %v1414_v1, %v1412_v62  ;;  %v1400_v49 = vadd.s32 %v1399_v39, %v1397_v31  ;;  %6589 = vmatmul.mubr.msk.f32.gmra.mrb[50].mxu1 %vm108_vm0, %v5960_v55  ;;  %v11132_v39 = vld [vmem:[#allocation5_spill] sm:$0xff]  ;;  %v11138_v55 = vld [vmem:[#allocation11_spill] sm:$0xff] }
 0x482   :  { %v1441_v54 = vpop.xlane.xlu0 %1440  ;;  %6591 = vmatprep.mubr.msk.f32.mxu1 %vm108_vm0, %v5961_v6  ;;  %v1426_v42 = vpop.xlane.xlu1 %1425 }
 0x483   :  { %v1442_v5 = vcvt.f32.s32 %v1441_v54  ;;  %v1427_v22 = vcvt.f32.s32 %v1426_v42  ;;  %vm1544_vm12 = vcmp.eq.s32.totalorder %v11124_v58, %v1400_v49  ;;  %vm1545_vm13 = vcmp.eq.s32.totalorder %v11124_v58, %v1415_v35  ;;  %v11141_v49 = vld [vmem:[#allocation10_spill] sm:$0xff] }
 0x484   :  { %v5962_v51 = vsel %vm1544_vm12, 1.0, %v10882_v57  ;;  %v5963_v29 = vsel %vm1545_vm13, 1.0, %v10882_v57 }
 0x485   :  { %v1445_v16 = vadd.s32 %v1444_v13, %v1442_v5  ;;  %v1430_v60 = vadd.s32 %v1429_v2, %v1427_v22  ;;  %6592 = vmatmul.mubr.msk.f32.gmra.mrb[52].mxu1 %vm108_vm0, %v5962_v51  ;;  %v11147_v5 = vld [vmem:[#allocation12_spill] sm:$0xff] }
 0x486   :  { %v1471_v50 = vpop.xlane.xlu0 %1470  ;;  %6594 = vmatprep.mubr.msk.f32.mxu1 %vm108_vm0, %v5963_v29  ;;  %v1456_v53 = vpop.xlane.xlu1 %1455 }
 0x487   :  { %v1472_v12 = vcvt.f32.s32 %v1471_v50  ;;  %v1457_v10 = vcvt.f32.s32 %v1456_v53  ;;  %vm1546_vm14 = vcmp.eq.s32.totalorder %v11124_v58, %v1430_v60  ;;  %vm1547_vm15 = vcmp.eq.s32.totalorder %v11124_v58, %v1445_v16  ;;  %v11150_v16 = vld [vmem:[#allocation15_spill] sm:$0xff]  ;;  %v11156_v53 = vld [vmem:[#allocation13_spill] sm:$0xff] }
 0x488   :  { %v5964_v7 = vsel %vm1546_vm14, 1.0, %v10882_v57  ;;  %v5965_v3 = vsel %vm1547_vm15, 1.0, %v10882_v57 }
 0x489   :  { %v1475_v30 = vadd.s32 %v1474_v34, %v1472_v12  ;;  %v1460_v11 = vadd.s32 %v1459_v9, %v1457_v10  ;;  %6595 = vmatmul.mubr.msk.f32.gmra.mrb[54].mxu1 %vm108_vm0, %v5964_v7  ;;  %v11153_v9 = vld [vmem:[#allocation14_spill] sm:$0xff]  ;;  %v11159_v7 = vld [vmem:[#allocation16_spill] sm:$0xff] }
 0x48a   :  { %v1501_v23 = vpop.xlane.xlu0 %1500  ;;  %6597 = vmatprep.mubr.msk.f32.mxu1 %vm108_vm0, %v5965_v3  ;;  %v1486_v33 = vpop.xlane.xlu1 %1485 }
 0x48b   :  { %v1502_v0 = vcvt.f32.s32 %v1501_v23  ;;  %v1487_v45 = vcvt.f32.s32 %v1486_v33  ;;  %vm1548_vm3 = vcmp.eq.s32.totalorder %v11124_v58, %v1460_v11  ;;  %vm1549_vm4 = vcmp.eq.s32.totalorder %v11124_v58, %v1475_v30  ;;  %v11165_v23 = vld [vmem:[#allocation18_spill] sm:$0xff] }
 0x48c   :  { %v5966_v40 = vsel %vm1548_vm3, 1.0, %v10882_v57  ;;  %v5967_v8 = vsel %vm1549_vm4, 1.0, %v10882_v57 }
 0x48d   :  { %v1505_v27 = vadd.s32 %v1504_v28, %v1502_v0  ;;  %v1490_v56 = vadd.s32 %v1489_v37, %v1487_v45  ;;  %6598 = vmatmul.mubr.msk.f32.gmra.mrb[56].mxu1 %vm108_vm0, %v5966_v40  ;;  %v11162_v28 = vld [vmem:[#allocation19_spill] sm:$0xff]  ;;  %v11168_v40 = vld [vmem:[#allocation17_spill] sm:$0xff] }
 0x48e   :  { %6600 = vmatprep.mubr.msk.f32.mxu1 %vm108_vm0, %v5967_v8  ;;  %v1516_v59 = vpop.xlane.xlu1 %1515 }
 0x48f   :  { %v1517_v46 = vcvt.f32.s32 %v1516_v59  ;;  %vm1550_vm5 = vcmp.eq.s32.totalorder %v11124_v58, %v1490_v56  ;;  %vm1551_vm6 = vcmp.eq.s32.totalorder %v11124_v58, %v1505_v27  ;;  %v11171_v56 = vld [vmem:[#allocation20_spill] sm:$0xff] }
 0x490   :  { %v5968_v48 = vsel %vm1550_vm5, 1.0, %v10882_v57  ;;  %v5969_v14 = vsel %vm1551_vm6, 1.0, %v10882_v57 }
 0x491   :  { %v1520_v25 = vadd.s32 %v1519_v38, %v1517_v46  ;;  %6601 = vmatmul.mubr.msk.f32.gmra.mrb[58].mxu1 %vm108_vm0, %v5968_v48  ;;  %v11174_v48 = vld [vmem:[#allocation23_spill] sm:$0xff] }
 0x492   :  { %6603 = vmatprep.mubr.msk.f32.mxu1 %vm108_vm0, %v5969_v14 }
 0x493   :  { %vm1552_vm7 = vcmp.eq.s32.totalorder %v11124_v58, %v1520_v25 }
 0x494   :  { %v5970_v61 = vsel %vm1552_vm7, 1.0, %v10882_v57 }
 0x495   :  { %6604 = vmatmul.mubr.msk.f32.gmra.mrb[60].mxu1 %vm108_vm0, %v5970_v61  ;;  %v11177_v61 = vld [vmem:[#allocation22_spill] sm:$0xff] }
 0x52c   :  { %v8048_v21 = vpop.f32.mrb[64].mxu0 }
 0x52d   :  { %11125 = vst [vmem:[#allocation38_spill] sm:$0xff] %v8048_v21  ;;  %v8052_v19 = vsub.f32 %v11126_v44, %v8048_v21  ;;  %v8054_v15 = vpop.f32.mrb[65].mxu0 }
 0x52e   :  { %11128 = vst [vmem:[#allocation40_spill] sm:$0xff] %v8054_v15  ;;  %v8058_v47 = vsub.f32 %v11129_v52, %v8054_v15 }
 0x52f   :  { %11127 = vst [vmem:[#allocation39_spill] sm:$0xff] %v8052_v19 }
 0x530   :  { %11130 = vst [vmem:[#allocation41_spill] sm:$0xff] %v8058_v47  ;;  %v2169_v18 = vpack.c.bf16 %v8052_v19, %v8058_v47  ;;  %v8062_v1 = vpop.f32.mrb[32].mxu1 }
 0x531   :  { %11131 = vst [vmem:[#allocation42_spill] sm:$0xff] %v8062_v1  ;;  %v8066_v24 = vsub.f32 %v11132_v39, %v8062_v1  ;;  %v8068_v36 = vpop.f32.mrb[33].mxu1 }
 0x532   :  { %11134 = vst [vmem:[#allocation44_spill] sm:$0xff] %v8068_v36  ;;  %v8072_v20 = vsub.f32 %v11135_v4, %v8068_v36  ;;  %6608 = vmatprep.mubr.msk.bf16.mxu0 %vm635_vm2, %v2169_v18  ;;  %v11180_v18 = vld [vmem:[#allocation21_spill] sm:$0xff] }
 0x533   :  { %11133 = vst [vmem:[#allocation43_spill] sm:$0xff] %v8066_v24 }
 0x534   :  { %11136 = vst [vmem:[#allocation45_spill] sm:$0xff] %v8072_v20  ;;  %v2170_v62 = vpack.c.bf16 %v8066_v24, %v8072_v20  ;;  %v8077_v31 = vpop.f32.mrb[34].mxu1 }
 0x535   :  { %11137 = vst [vmem:[#allocation46_spill] sm:$0xff] %v8077_v31  ;;  %v8081_v6 = vsub.f32 %v11138_v55, %v8077_v31  ;;  %v8083_v35 = vpop.f32.mrb[35].mxu1 }
 0x536   :  { %11140 = vst [vmem:[#allocation48_spill] sm:$0xff] %v8083_v35  ;;  %v8087_v13 = vsub.f32 %v11141_v49, %v8083_v35  ;;  %6609 = vmatmul.mubr.msk.bf16.vlgmr.msra.gmra.mrb[68].mxu0 %vm635_vm2, %v2170_v62  ;;  %v11183_v62 = vld [vmem:[#allocation24_spill] sm:$0xff] }
 0x537   :  { %11139 = vst [vmem:[#allocation47_spill] sm:$0xff] %v8081_v6 }
 0x538   :  { %11142 = vst [vmem:[#allocation7_spill] sm:$0xff] %v8087_v13  ;;  %v2171_v2 = vpack.c.bf16 %v8081_v6, %v8087_v13  ;;  %v8092_v17 = vpop.f32.mrb[36].mxu1 }
 0x539   :  { %11143 = vst [vmem:[#allocation6_spill] sm:$0xff] %v8092_v17  ;;  %v8096_v54 = vsub.f32 %v11144_v26, %v8092_v17  ;;  %v8098_v42 = vpop.f32.mrb[37].mxu1  ;;  %v11186_v26 = vld [vmem:[#allocation27_spill] sm:$0xff] }
 0x53a   :  { %11146 = vst [vmem:[#allocation8_spill] sm:$0xff] %v8098_v42  ;;  %v8102_v22 = vsub.f32 %v11147_v5, %v8098_v42  ;;  %6612 = vmatprep.mubr.msk.bf16.mxu0 %vm635_vm2, %v2171_v2 }
 0x53b   :  { %11145 = vst [vmem:[#allocation5_spill] sm:$0xff] %v8096_v54 }
 0x53c   :  { %11148 = vst [vmem:[#allocation11_spill] sm:$0xff] %v8102_v22  ;;  %v2172_v51 = vpack.c.bf16 %v8096_v54, %v8102_v22  ;;  %v8107_v29 = vpop.f32.mrb[38].mxu1 }
 0x53d   :  { %11149 = vst [vmem:[#allocation10_spill] sm:$0xff] %v8107_v29  ;;  %v8111_v60 = vsub.f32 %v11150_v16, %v8107_v29  ;;  %v8113_v34 = vpop.f32.mrb[39].mxu1  ;;  %v11189_v16 = vld [vmem:[#allocation26_spill] sm:$0xff] }
 0x53e   :  { %11152 = vst [vmem:[#allocation12_spill] sm:$0xff] %v8113_v34  ;;  %v8117_v41 = vsub.f32 %v11153_v9, %v8113_v34  ;;  %6613 = vmatmul.mubr.msk.bf16.gmra.mrb[72].mxu0 %vm635_vm2, %v2172_v51 }
 0x53f   :  { %11151 = vst [vmem:[#allocation9_spill] sm:$0xff] %v8111_v60 }
 0x540   :  { %11154 = vst [vmem:[#allocation15_spill] sm:$0xff] %v8117_v41  ;;  %v2173_v32 = vpack.c.bf16 %v8111_v60, %v8117_v41  ;;  %v8122_v50 = vpop.f32.mrb[40].mxu1 }
 0x541   :  { %11155 = vst [vmem:[#allocation14_spill] sm:$0xff] %v8122_v50  ;;  %v8126_v12 = vsub.f32 %v11156_v53, %v8122_v50  ;;  %v8128_v10 = vpop.f32.mrb[41].mxu1 }
 0x542   :  { %11158 = vst [vmem:[#allocation49_spill] sm:$0xff] %v8128_v10  ;;  %v8132_v3 = vsub.f32 %v11159_v7, %v8128_v10  ;;  %6616 = vmatprep.mubr.msk.bf16.mxu0 %vm635_vm2, %v2173_v32  ;;  %v11192_v7 = vld [vmem:[#allocation25_spill] sm:$0xff] }
 0x543   :  { %11157 = vst [vmem:[#allocation13_spill] sm:$0xff] %v8126_v12 }
 0x544   :  { %11160 = vst [vmem:[#allocation16_spill] sm:$0xff] %v8132_v3  ;;  %v2174_v30 = vpack.c.bf16 %v8126_v12, %v8132_v3  ;;  %v8137_v11 = vpop.f32.mrb[42].mxu1 }
 0x545   :  { %11161 = vst [vmem:[#allocation50_spill] sm:$0xff] %v8137_v11  ;;  %v8141_v37 = vsub.f32 %v11162_v28, %v8137_v11  ;;  %v8143_v63 = vpop.f32.mrb[43].mxu1 }
 0x546   :  { %11164 = vst [vmem:[#allocation51_spill] sm:$0xff] %v8143_v63  ;;  %v8147_v33 = vsub.f32 %v11165_v23, %v8143_v63  ;;  %6617 = vmatmul.mubr.msk.bf16.gmra.mrb[76].mxu0 %vm635_vm2, %v2174_v30  ;;  %v11195_v23 = vld [vmem:[#allocation28_spill] sm:$0xff] }
 0x547   :  { %11163 = vst [vmem:[#allocation19_spill] sm:$0xff] %v8141_v37 }
 0x548   :  { %11166 = vst [vmem:[#allocation18_spill] sm:$0xff] %v8147_v33  ;;  %v2175_v0 = vpack.c.bf16 %v8141_v37, %v8147_v33  ;;  %v8152_v45 = vpop.f32.mrb[44].mxu1 }
 0x549   :  { %11167 = vst [vmem:[#allocation52_spill] sm:$0xff] %v8152_v45  ;;  %v8156_v8 = vsub.f32 %v11168_v40, %v8152_v45  ;;  %v8158_v27 = vpop.f32.mrb[45].mxu1 }
 0x54a   :  { %11170 = vst [vmem:[#allocation53_spill] sm:$0xff] %v8158_v27  ;;  %v8162_v59 = vsub.f32 %v11171_v56, %v8158_v27  ;;  %6620 = vmatprep.mubr.msk.bf16.mxu0 %vm635_vm2, %v2175_v0 }
 0x54b   :  { %11169 = vst [vmem:[#allocation17_spill] sm:$0xff] %v8156_v8 }
 0x54c   :  { %11172 = vst [vmem:[#allocation20_spill] sm:$0xff] %v8162_v59  ;;  %v2176_v38 = vpack.c.bf16 %v8156_v8, %v8162_v59  ;;  %v8167_v46 = vpop.f32.mrb[46].mxu1 }
 0x54d   :  { %11173 = vst [vmem:[#allocation54_spill] sm:$0xff] %v8167_v46  ;;  %v8171_v14 = vsub.f32 %v11174_v48, %v8167_v46  ;;  %v8173_v25 = vpop.f32.mrb[47].mxu1 }
 0x54e   :  { %11176 = vst [vmem:[#allocation55_spill] sm:$0xff] %v8173_v25  ;;  %v8177_v43 = vsub.f32 %v11177_v61, %v8173_v25  ;;  %6621 = vmatmul.mubr.msk.bf16.gmra.mrb[80].mxu0 %vm635_vm2, %v2176_v38  ;;  %v11198_v38 = vld [vmem:[#allocation31_spill] sm:$0xff] }
 0x54f   :  { %11175 = vst [vmem:[#allocation23_spill] sm:$0xff] %v8171_v14 }
 0x550   :  { %11178 = vst [vmem:[#allocation22_spill] sm:$0xff] %v8177_v43  ;;  %v2177_v44 = vpack.c.bf16 %v8171_v14, %v8177_v43  ;;  %v8182_v52 = vpop.f32.mrb[48].mxu1 }
 0x551   :  { %11179 = vst [vmem:[#allocation56_spill] sm:$0xff] %v8182_v52  ;;  %v8186_v39 = vsub.f32 %v11180_v18, %v8182_v52  ;;  %v8188_v4 = vpop.f32.mrb[49].mxu1 }
 0x552   :  { %11182 = vst [vmem:[#allocation57_spill] sm:$0xff] %v8188_v4  ;;  %v8192_v55 = vsub.f32 %v11183_v62, %v8188_v4  ;;  %6624 = vmatprep.mubr.msk.bf16.mxu0 %vm635_vm2, %v2177_v44  ;;  %v11201_v44 = vld [vmem:[#allocation30_spill] sm:$0xff] }
 0x553   :  { %11181 = vst [vmem:[#allocation21_spill] sm:$0xff] %v8186_v39 }
 0x554   :  { %11184 = vst [vmem:[#allocation24_spill] sm:$0xff] %v8192_v55  ;;  %v2178_v49 = vpack.c.bf16 %v8186_v39, %v8192_v55  ;;  %v8197_v2 = vpop.f32.mrb[50].mxu1 }
 0x555   :  { %11185 = vst [vmem:[#allocation58_spill] sm:$0xff] %v8197_v2  ;;  %v8201_v5 = vsub.f32 %v11186_v26, %v8197_v2  ;;  %v8203_v51 = vpop.f32.mrb[51].mxu1  ;;  %v11204_v26 = vld [vmem:[#allocation29_spill] sm:$0xff] }
 0x556   :  { %11188 = vst [vmem:[#allocation59_spill] sm:$0xff] %v8203_v51  ;;  %v8207_v9 = vsub.f32 %v11189_v16, %v8203_v51  ;;  %6625 = vmatmul.mubr.msk.bf16.gmra.mrb[84].mxu0 %vm635_vm2, %v2178_v49 }
 0x557   :  { %11187 = vst [vmem:[#allocation27_spill] sm:$0xff] %v8201_v5 }
 0x558   :  { %11190 = vst [vmem:[#allocation26_spill] sm:$0xff] %v8207_v9  ;;  %v2179_v32 = vpack.c.bf16 %v8201_v5, %v8207_v9  ;;  %v8212_v53 = vpop.f32.mrb[52].mxu1 }
 0x559   :  { %11191 = vst [vmem:[#allocation60_spill] sm:$0xff] %v8212_v53  ;;  %v8216_v30 = vsub.f32 %v11192_v7, %v8212_v53  ;;  %v8218_v28 = vpop.f32.mrb[53].mxu1  ;;  %v11207_v7 = vld [vmem:[#allocation32_spill] sm:$0xff] }
 0x55a   :  { %11194 = vst [vmem:[#allocation61_spill] sm:$0xff] %v8218_v28  ;;  %v8222_v0 = vsub.f32 %v11195_v23, %v8218_v28  ;;  %6628 = vmatprep.mubr.msk.bf16.mxu0 %vm635_vm2, %v2179_v32 }
 0x55b   :  { %11193 = vst [vmem:[#allocation25_spill] sm:$0xff] %v8216_v30 }
 0x55c   :  { %11196 = vst [vmem:[#allocation28_spill] sm:$0xff] %v8222_v0  ;;  %v2180_v40 = vpack.c.bf16 %v8216_v30, %v8222_v0  ;;  %v8227_v56 = vpop.f32.mrb[54].mxu1 }
 0x55d   :  { %11197 = vst [vmem:[#allocation62_spill] sm:$0xff] %v8227_v56  ;;  %v8231_v48 = vsub.f32 %v11198_v38, %v8227_v56  ;;  %v8233_v61 = vpop.f32.mrb[55].mxu1 }
 0x55e   :  { %11200 = vst [vmem:[#allocation63_spill] sm:$0xff] %v8233_v61  ;;  %v8237_v18 = vsub.f32 %v11201_v44, %v8233_v61  ;;  %6629 = vmatmul.mubr.msk.bf16.gmra.mrb[88].mxu0 %vm635_vm2, %v2180_v40  ;;  %v11210_v44 = vld [vmem:[#allocation35_spill] sm:$0xff] }
 0x55f   :  { %11199 = vst [vmem:[#allocation31_spill] sm:$0xff] %v8231_v48 }
 0x560   :  { %11202 = vst [vmem:[#allocation30_spill] sm:$0xff] %v8237_v18  ;;  %v2181_v62 = vpack.c.bf16 %v8231_v48, %v8237_v18  ;;  %v8242_v49 = vpop.f32.mrb[56].mxu1 }
 0x561   :  { %11203 = vst [vmem:[#allocation64_spill] sm:$0xff] %v8242_v49  ;;  %v8246_v16 = vsub.f32 %v11204_v26, %v8242_v49  ;;  %v8248_v32 = vpop.f32.mrb[57].mxu1  ;;  %v11213_v26 = vld [vmem:[#allocation34_spill] sm:$0xff] }
 0x562   :  { %11206 = vst [vmem:[#allocation65_spill] sm:$0xff] %v8248_v32  ;;  %v8252_v23 = vsub.f32 %v11207_v7, %v8248_v32  ;;  %6632 = vmatprep.mubr.msk.bf16.mxu0 %vm635_vm2, %v2181_v62  ;;  %v11216_v32 = vld [vmem:[#allocation33_spill] sm:$0xff] }
 0x563   :  { %11205 = vst [vmem:[#allocation29_spill] sm:$0xff] %v8246_v16 }
 0x564   :  { %11208 = vst [vmem:[#allocation32_spill] sm:$0xff] %v8252_v23  ;;  %v2182_v40 = vpack.c.bf16 %v8246_v16, %v8252_v23  ;;  %v8257_v38 = vpop.f32.mrb[58].mxu1 }
 0x565   :  { %11209 = vst [vmem:[#allocation66_spill] sm:$0xff] %v8257_v38  ;;  %v8261_v57 = vsub.f32 %v11210_v44, %v8257_v38  ;;  %v8263_v61 = vpop.f32.mrb[59].mxu1  ;;  %v11219_v44 = vld [vmem:[#allocation36_spill] sm:$0xff] }
 0x566   :  { %11212 = vst [vmem:[#allocation67_spill] sm:$0xff] %v8263_v61  ;;  %v8267_v49 = vsub.f32 %v11213_v26, %v8263_v61  ;;  %6633 = vmatmul.mubr.msk.bf16.gmra.mrb[92].mxu0 %vm635_vm2, %v2182_v40  ;;  %v8291_v26 = vld [vmem:[%s10834_s2 + $0x88] ss:$0 sm:$0xff] }
 0x567   :  { %11211 = vst [vmem:[#allocation35_spill] sm:$0xff] %v8261_v57 }
 0x568   :  { %11214 = vst [vmem:[#allocation34_spill] sm:$0xff] %v8267_v49  ;;  %v2183_v62 = vpack.c.bf16 %v8261_v57, %v8267_v49  ;;  %v8272_v7 = vpop.f32.mrb[60].mxu1 }
 0x569   :  { %11215 = vst [vmem:[#allocation68_spill] sm:$0xff] %v8272_v7  ;;  %v8276_v23 = vsub.f32 %v11216_v32, %v8272_v7  ;;  %v8278_v16 = vpop.f32.mrb[61].mxu1 }
 0x56a   :  { %11218 = vst [vmem:[#allocation69_spill] sm:$0xff] %v8278_v16  ;;  %v8282_v38 = vsub.f32 %v11219_v44, %v8278_v16  ;;  %6636 = vmatprep.mubr.msk.bf16.mxu0 %vm635_vm2, %v2183_v62 }
 0x56b   :  { %11217 = vst [vmem:[#allocation33_spill] sm:$0xff] %v8276_v23 }
 0x56c   :  { %11220 = vst [vmem:[#allocation36_spill] sm:$0xff] %v8282_v38  ;;  %v2184_v40 = vpack.c.bf16 %v8276_v23, %v8282_v38 }
 0x56e   :  { %6637 = vmatmul.mubr.msk.bf16.gmra.mrb[96].mxu0 %vm635_vm2, %v2184_v40 }
 0x609   :  { %v6610_v32 = vpop.f32.mrb[68].mxu0 }
 0x60a   :  { %v2273_v7 = vpop.f32.mrb[69].mxu0  ;;  %v8297_v16 = vadd.f32 %v6610_v32, %v8291_v26 }
 0x60b   :  { %v8294_v61 = vadd.f32 %v8291_v26, %v2273_v7  ;;  %v6611_v49 = vpop.f32.mrb[70].mxu0 }
 0x60c   :  { %v2276_v44 = vpop.f32.mrb[71].mxu0  ;;  %v8305_v38 = vadd.f32 %v6611_v49, %v8291_v26  ;;  %v2442_v57 = vsel %vm108_vm0, %v8297_v16, inf }
 0x60d   :  { %v8300_v62 = vadd.f32 %v8291_v26, %v2276_v44  ;;  %v2436_v40 = vsel %vm108_vm0, %v8294_v61, inf }
 0x60e   :  { %2437 = vmin.xlane.f32.xlu0 %v2436_v40  ;;  %v2445_v40 = vsel %vm108_vm0, %v8305_v38, inf }
 0x60f   :  { %v2439_v23 = vsel %vm108_vm0, %v8300_v62, inf }
 0x610   :  { %2440 = vmin.xlane.f32.xlu1 %v2439_v23 }
 0x611   :  { %v6614_v7 = vpop.f32.mrb[72].mxu0 }
 0x612   :  { %2443 = vmin.xlane.f32.xlu0 %v2442_v57  ;;  %v2289_v32 = vpop.f32.mrb[73].mxu0  ;;  %v8317_v56 = vadd.f32 %v6614_v7, %v8291_v26 }
 0x613   :  { %v8312_v44 = vadd.f32 %v8291_v26, %v2289_v32  ;;  %v6615_v18 = vpop.f32.mrb[74].mxu0 }
 0x614   :  { %2446 = vmin.xlane.f32.xlu1 %v2445_v40  ;;  %v2292_v49 = vpop.f32.mrb[75].mxu0  ;;  %v8325_v57 = vadd.f32 %v6615_v18, %v8291_v26  ;;  %v2454_v40 = vsel %vm108_vm0, %v8317_v56, inf }
 0x615   :  { %v8320_v23 = vadd.f32 %v8291_v26, %v2292_v49  ;;  %v2448_v48 = vsel %vm108_vm0, %v8312_v44, inf }
 0x616   :  { %2449 = vmin.xlane.f32.xlu0 %v2448_v48  ;;  %v2457_v48 = vsel %vm108_vm0, %v8325_v57, inf }
 0x617   :  { %v2451_v32 = vsel %vm108_vm0, %v8320_v23, inf }
 0x618   :  { %2452 = vmin.xlane.f32.xlu1 %v2451_v32 }
 0x619   :  { %v6618_v28 = vpop.f32.mrb[76].mxu0 }
 0x61a   :  { %2455 = vmin.xlane.f32.xlu0 %v2454_v40  ;;  %v2305_v7 = vpop.f32.mrb[77].mxu0  ;;  %v8337_v53 = vadd.f32 %v6618_v28, %v8291_v26 }
 0x61b   :  { %v8332_v49 = vadd.f32 %v8291_v26, %v2305_v7  ;;  %v6619_v0 = vpop.f32.mrb[78].mxu0 }
 0x61c   :  { %2458 = vmin.xlane.f32.xlu1 %v2457_v48  ;;  %v2308_v18 = vpop.f32.mrb[79].mxu0  ;;  %v8345_v40 = vadd.f32 %v6619_v0, %v8291_v26  ;;  %v2466_v48 = vsel %vm108_vm0, %v8337_v53, inf }
 0x61d   :  { %v8340_v32 = vadd.f32 %v8291_v26, %v2308_v18  ;;  %v2460_v30 = vsel %vm108_vm0, %v8332_v49, inf }
 0x61e   :  { %2461 = vmin.xlane.f32.xlu0 %v2460_v30  ;;  %v2469_v30 = vsel %vm108_vm0, %v8345_v40, inf }
 0x61f   :  { %v2463_v7 = vsel %vm108_vm0, %v8340_v32, inf }
 0x620   :  { %2464 = vmin.xlane.f32.xlu1 %v2463_v7 }
 0x621   :  { %v6622_v51 = vpop.f32.mrb[80].mxu0 }
 0x622   :  { %2467 = vmin.xlane.f32.xlu0 %v2466_v48  ;;  %v2321_v28 = vpop.f32.mrb[81].mxu0  ;;  %v8357_v2 = vadd.f32 %v6622_v51, %v8291_v26 }
 0x623   :  { %v8352_v18 = vadd.f32 %v8291_v26, %v2321_v28  ;;  %v6623_v9 = vpop.f32.mrb[82].mxu0 }
 0x624   :  { %2470 = vmin.xlane.f32.xlu1 %v2469_v30  ;;  %v2324_v0 = vpop.f32.mrb[83].mxu0  ;;  %v8365_v48 = vadd.f32 %v6623_v9, %v8291_v26  ;;  %v2478_v30 = vsel %vm108_vm0, %v8357_v2, inf }
 0x625   :  { %v8360_v7 = vadd.f32 %v8291_v26, %v2324_v0  ;;  %v2472_v5 = vsel %vm108_vm0, %v8352_v18, inf }
 0x626   :  { %2473 = vmin.xlane.f32.xlu0 %v2472_v5  ;;  %v2481_v5 = vsel %vm108_vm0, %v8365_v48, inf }
 0x627   :  { %v2475_v28 = vsel %vm108_vm0, %v8360_v7, inf }
 0x628   :  { %2476 = vmin.xlane.f32.xlu1 %v2475_v28 }
 0x629   :  { %v6626_v4 = vpop.f32.mrb[84].mxu0 }
 0x62a   :  { %2479 = vmin.xlane.f32.xlu0 %v2478_v30  ;;  %v2337_v51 = vpop.f32.mrb[85].mxu0  ;;  %v8377_v52 = vadd.f32 %v6626_v4, %v8291_v26 }
 0x62b   :  { %v8372_v0 = vadd.f32 %v8291_v26, %v2337_v51  ;;  %v6627_v55 = vpop.f32.mrb[86].mxu0 }
 0x62c   :  { %2482 = vmin.xlane.f32.xlu1 %v2481_v5  ;;  %v2340_v9 = vpop.f32.mrb[87].mxu0  ;;  %v8385_v30 = vadd.f32 %v6627_v55, %v8291_v26  ;;  %v2490_v5 = vsel %vm108_vm0, %v8377_v52, inf }
 0x62d   :  { %v8380_v28 = vadd.f32 %v8291_v26, %v2340_v9  ;;  %v2484_v39 = vsel %vm108_vm0, %v8372_v0, inf }
 0x62e   :  { %2485 = vmin.xlane.f32.xlu0 %v2484_v39  ;;  %v2493_v39 = vsel %vm108_vm0, %v8385_v30, inf }
 0x62f   :  { %v2487_v51 = vsel %vm108_vm0, %v8380_v28, inf }
 0x630   :  { %2488 = vmin.xlane.f32.xlu1 %v2487_v51 }
 0x631   :  { %v6630_v25 = vpop.f32.mrb[88].mxu0 }
 0x632   :  { %2491 = vmin.xlane.f32.xlu0 %v2490_v5  ;;  %v2353_v4 = vpop.f32.mrb[89].mxu0  ;;  %v8397_v46 = vadd.f32 %v6630_v25, %v8291_v26 }
 0x633   :  { %v8392_v9 = vadd.f32 %v8291_v26, %v2353_v4  ;;  %v6631_v43 = vpop.f32.mrb[90].mxu0 }
 0x634   :  { %2494 = vmin.xlane.f32.xlu1 %v2493_v39  ;;  %v2356_v55 = vpop.f32.mrb[91].mxu0  ;;  %v8405_v5 = vadd.f32 %v6631_v43, %v8291_v26  ;;  %v2502_v39 = vsel %vm108_vm0, %v8397_v46, inf }
 0x635   :  { %v8400_v51 = vadd.f32 %v8291_v26, %v2356_v55  ;;  %v2496_v14 = vsel %vm108_vm0, %v8392_v9, inf }
 0x636   :  { %2497 = vmin.xlane.f32.xlu0 %v2496_v14  ;;  %v2505_v14 = vsel %vm108_vm0, %v8405_v5, inf }
 0x637   :  { %v2499_v4 = vsel %vm108_vm0, %v8400_v51, inf }
 0x638   :  { %2500 = vmin.xlane.f32.xlu1 %v2499_v4 }
 0x639   :  { %v6634_v27 = vpop.f32.mrb[92].mxu0 }
 0x63a   :  { %2503 = vmin.xlane.f32.xlu0 %v2502_v39  ;;  %v2369_v25 = vpop.f32.mrb[93].mxu0  ;;  %v8417_v45 = vadd.f32 %v6634_v27, %v8291_v26 }
 0x63b   :  { %v8412_v55 = vadd.f32 %v8291_v26, %v2369_v25  ;;  %v6635_v59 = vpop.f32.mrb[94].mxu0 }
 0x63c   :  { %2506 = vmin.xlane.f32.xlu1 %v2505_v14  ;;  %v2372_v43 = vpop.f32.mrb[95].mxu0  ;;  %v8425_v39 = vadd.f32 %v6635_v59, %v8291_v26  ;;  %v2514_v14 = vsel %vm108_vm0, %v8417_v45, inf }
 0x63d   :  { %v8420_v4 = vadd.f32 %v8291_v26, %v2372_v43  ;;  %v2508_v8 = vsel %vm108_vm0, %v8412_v55, inf }
 0x63e   :  { %2509 = vmin.xlane.f32.xlu0 %v2508_v8  ;;  %v2517_v8 = vsel %vm108_vm0, %v8425_v39, inf }
 0x63f   :  { %v2511_v25 = vsel %vm108_vm0, %v8420_v4, inf }
 0x640   :  { %2512 = vmin.xlane.f32.xlu1 %v2511_v25 }
 0x641   :  { %v6638_v63 = vpop.f32.mrb[96].mxu0 }
 0x642   :  { %2515 = vmin.xlane.f32.xlu0 %v2514_v14  ;;  %v2385_v27 = vpop.f32.mrb[97].mxu0  ;;  %v8437_v11 = vadd.f32 %v6638_v63, %v8291_v26 }
 0x643   :  { %v8432_v43 = vadd.f32 %v8291_v26, %v2385_v27  ;;  %v6639_v33 = vpop.f32.mrb[98].mxu0 }
 0x644   :  { %2518 = vmin.xlane.f32.xlu1 %v2517_v8  ;;  %v2388_v59 = vpop.f32.mrb[99].mxu0  ;;  %v8445_v14 = vadd.f32 %v6639_v33, %v8291_v26  ;;  %v2526_v8 = vsel %vm108_vm0, %v8437_v11, inf }
 0x645   :  { %v8440_v25 = vadd.f32 %v8291_v26, %v2388_v59  ;;  %v2520_v37 = vsel %vm108_vm0, %v8432_v43, inf }
 0x646   :  { %2521 = vmin.xlane.f32.xlu0 %v2520_v37  ;;  %v2529_v63 = vsel %vm108_vm0, %v8445_v14, inf }
 0x647   :  { %v2523_v27 = vsel %vm108_vm0, %v8440_v25, inf }
 0x648   :  { %2524 = vmin.xlane.f32.xlu1 %v2523_v27 }
 0x64a   :  { %2527 = vmin.xlane.f32.xlu0 %v2526_v8 }
 0x64c   :  { %2530 = vmin.xlane.f32.xlu1 %v2529_v63 }
 0x69b   :  { %v2438_v59 = vpop.xlane.xlu0 %2437 }
 0x69c   :  { %vm2532_vm8 = vcmp.le.f32.partialorder %v8294_v61, %v2438_v59 }
 0x69d   :  { %v2564_v37 = vsel %vm2532_vm8, %v11124_v58, 32  ;;  %v2441_v10 = vpop.xlane.xlu1 %2440 }
 0x69e   :  { %v8456_v33 = vsel %vm108_vm0, %v2564_v37, 2147483647  ;;  %vm2533_vm9 = vcmp.le.f32.partialorder %v8300_v62, %v2441_v10 }
 0x69f   :  { %v2565_v26 = vsel %vm2533_vm9, %v11124_v58, 32  ;;  %v2444_v27 = vpop.xlane.xlu0 %2443  ;;  %v2598_v8 = vshra.s32 %v8456_v33, 16 }
 0x6a0   :  { %v8462_v3 = vsel %vm108_vm0, %v2565_v26, 2147483647  ;;  %vm2534_vm10 = vcmp.le.f32.partialorder %v8297_v16, %v2444_v27 }
 0x6a1   :  { %v2566_v61 = vsel %vm2534_vm10, %v11124_v58, 32  ;;  %v2447_v63 = vpop.xlane.xlu1 %2446  ;;  %v8466_v59 = vcvt.s32.f32 %v2598_v8  ;;  %v2613_v37 = vshra.s32 %v8462_v3, 16 }
 0x6a2   :  { %v8470_v50 = vsel %vm108_vm0, %v2566_v61, 2147483647  ;;  %vm2535_vm11 = vcmp.le.f32.partialorder %v8305_v38, %v2447_v63 }
 0x6a3   :  { %v2567_v10 = vsel %vm2535_vm11, %v11124_v58, 32  ;;  %v2450_v62 = vpop.xlane.xlu0 %2449  ;;  %2601 = vmin.xlane.f32.xlu0 %v8466_v59  ;;  %v8475_v26 = vcvt.s32.f32 %v2613_v37  ;;  %v2628_v16 = vshra.s32 %v8470_v50, 16 }
 0x6a4   :  { %v8479_v27 = vsel %vm108_vm0, %v2567_v10, 2147483647  ;;  %vm2536_vm12 = vcmp.le.f32.partialorder %v8312_v44, %v2450_v62 }
 0x6a5   :  { %v2568_v8 = vsel %vm2536_vm12, %v11124_v58, 32  ;;  %2616 = vmin.xlane.f32.xlu1 %v8475_v26  ;;  %v2453_v61 = vpop.xlane.xlu1 %2452  ;;  %v8484_v38 = vcvt.s32.f32 %v2628_v16  ;;  %v2643_v63 = vshra.s32 %v8479_v27, 16 }
 0x6a6   :  { %v8488_v12 = vsel %vm108_vm0, %v2568_v8, 2147483647  ;;  %vm2537_vm13 = vcmp.le.f32.partialorder %v8320_v23, %v2453_v61 }
 0x6a7   :  { %v2569_v37 = vsel %vm2537_vm13, %v11124_v58, 32  ;;  %v2456_v10 = vpop.xlane.xlu0 %2455  ;;  %2631 = vmin.xlane.f32.xlu0 %v8484_v38  ;;  %v8493_v44 = vcvt.s32.f32 %v2643_v63  ;;  %v2658_v62 = vshra.s32 %v8488_v12, 16 }
 0x6a8   :  { %v8497_v34 = vsel %vm108_vm0, %v2569_v37, 2147483647  ;;  %vm2538_vm14 = vcmp.le.f32.partialorder %v8317_v56, %v2456_v10 }
 0x6a9   :  { %v2570_v16 = vsel %vm2538_vm14, %v11124_v58, 32  ;;  %2646 = vmin.xlane.f32.xlu1 %v8493_v44  ;;  %v2459_v8 = vpop.xlane.xlu1 %2458  ;;  %v8502_v23 = vcvt.s32.f32 %v2658_v62  ;;  %v2673_v61 = vshra.s32 %v8497_v34, 16 }
 0x6aa   :  { %v8506_v41 = vsel %vm108_vm0, %v2570_v16, 2147483647  ;;  %vm2539_vm15 = vcmp.le.f32.partialorder %v8325_v57, %v2459_v8 }
 0x6ab   :  { %v2571_v63 = vsel %vm2539_vm15, %v11124_v58, 32  ;;  %v2462_v37 = vpop.xlane.xlu0 %2461  ;;  %2661 = vmin.xlane.f32.xlu0 %v8502_v23  ;;  %v8511_v56 = vcvt.s32.f32 %v2673_v61  ;;  %v2688_v10 = vshra.s32 %v8506_v41, 16 }
 0x6ac   :  { %v8515_v29 = vsel %vm108_vm0, %v2571_v63, 2147483647  ;;  %vm2540_vm3 = vcmp.le.f32.partialorder %v8332_v49, %v2462_v37 }
 0x6ad   :  { %v2572_v62 = vsel %vm2540_vm3, %v11124_v58, 32  ;;  %2676 = vmin.xlane.f32.xlu1 %v8511_v56  ;;  %v2465_v16 = vpop.xlane.xlu1 %2464  ;;  %v8520_v57 = vcvt.s32.f32 %v2688_v10  ;;  %v2703_v8 = vshra.s32 %v8515_v29, 16 }
 0x6ae   :  { %v8524_v60 = vsel %vm108_vm0, %v2572_v62, 2147483647  ;;  %vm2541_vm4 = vcmp.le.f32.partialorder %v8340_v32, %v2465_v16 }
 0x6af   :  { %v2573_v61 = vsel %vm2541_vm4, %v11124_v58, 32  ;;  %v2468_v63 = vpop.xlane.xlu0 %2467  ;;  %2691 = vmin.xlane.f32.xlu0 %v8520_v57  ;;  %v8529_v49 = vcvt.s32.f32 %v2703_v8  ;;  %v2718_v37 = vshra.s32 %v8524_v60, 16 }
 0x6b0   :  { %v8533_v42 = vsel %vm108_vm0, %v2573_v61, 2147483647  ;;  %vm2542_vm5 = vcmp.le.f32.partialorder %v8337_v53, %v2468_v63 }
 0x6b1   :  { %v2574_v10 = vsel %vm2542_vm5, %v11124_v58, 32  ;;  %2706 = vmin.xlane.f32.xlu1 %v8529_v49  ;;  %v2471_v62 = vpop.xlane.xlu1 %2470  ;;  %v8538_v32 = vcvt.s32.f32 %v2718_v37  ;;  %v2733_v16 = vshra.s32 %v8533_v42, 16 }
 0x6b2   :  { %v8542_v22 = vsel %vm108_vm0, %v2574_v10, 2147483647  ;;  %vm2543_vm6 = vcmp.le.f32.partialorder %v8345_v40, %v2471_v62 }
 0x6b3   :  { %v2575_v8 = vsel %vm2543_vm6, %v11124_v58, 32  ;;  %v2474_v61 = vpop.xlane.xlu0 %2473  ;;  %2721 = vmin.xlane.f32.xlu0 %v8538_v32  ;;  %v8547_v53 = vcvt.s32.f32 %v2733_v16  ;;  %v2748_v63 = vshra.s32 %v8542_v22, 16 }
 0x6b4   :  { %v8551_v17 = vsel %vm108_vm0, %v2575_v8, 2147483647  ;;  %vm2544_vm7 = vcmp.le.f32.partialorder %v8352_v18, %v2474_v61 }
 0x6b5   :  { %v2576_v37 = vsel %vm2544_vm7, %v11124_v58, 32  ;;  %2736 = vmin.xlane.f32.xlu1 %v8547_v53  ;;  %v2477_v10 = vpop.xlane.xlu1 %2476  ;;  %v8556_v40 = vcvt.s32.f32 %v2748_v63  ;;  %v2763_v62 = vshra.s32 %v8551_v17, 16 }
 0x6b6   :  { %v8560_v54 = vsel %vm108_vm0, %v2576_v37, 2147483647  ;;  %vm2545_vm8 = vcmp.le.f32.partialorder %v8360_v7, %v2477_v10 }
 0x6b7   :  { %v2577_v16 = vsel %vm2545_vm8, %v11124_v58, 32  ;;  %v2480_v8 = vpop.xlane.xlu0 %2479  ;;  %2751 = vmin.xlane.f32.xlu0 %v8556_v40  ;;  %v8565_v18 = vcvt.s32.f32 %v2763_v62  ;;  %v2778_v61 = vshra.s32 %v8560_v54, 16 }
 0x6b8   :  { %v8569_v35 = vsel %vm108_vm0, %v2577_v16, 2147483647  ;;  %vm2546_vm9 = vcmp.le.f32.partialorder %v8357_v2, %v2480_v8 }
 0x6b9   :  { %v2578_v63 = vsel %vm2546_vm9, %v11124_v58, 32  ;;  %2766 = vmin.xlane.f32.xlu1 %v8565_v18  ;;  %v2483_v37 = vpop.xlane.xlu1 %2482  ;;  %v8574_v7 = vcvt.s32.f32 %v2778_v61  ;;  %v2793_v10 = vshra.s32 %v8569_v35, 16 }
 0x6ba   :  { %v8578_v13 = vsel %vm108_vm0, %v2578_v63, 2147483647  ;;  %vm2547_vm10 = vcmp.le.f32.partialorder %v8365_v48, %v2483_v37 }
 0x6bb   :  { %v2579_v62 = vsel %vm2547_vm10, %v11124_v58, 32  ;;  %v2486_v16 = vpop.xlane.xlu0 %2485  ;;  %2781 = vmin.xlane.f32.xlu0 %v8574_v7  ;;  %v8583_v2 = vcvt.s32.f32 %v2793_v10  ;;  %v2808_v8 = vshra.s32 %v8578_v13, 16 }
 0x6bc   :  { %v8587_v31 = vsel %vm108_vm0, %v2579_v62, 2147483647  ;;  %vm2548_vm11 = vcmp.le.f32.partialorder %v8372_v0, %v2486_v16 }
 0x6bd   :  { %v2580_v61 = vsel %vm2548_vm11, %v11124_v58, 32  ;;  %2796 = vmin.xlane.f32.xlu1 %v8583_v2  ;;  %v2489_v63 = vpop.xlane.xlu1 %2488  ;;  %v8592_v48 = vcvt.s32.f32 %v2808_v8  ;;  %v2823_v37 = vshra.s32 %v8587_v31, 16 }
 0x6be   :  { %v8596_v6 = vsel %vm108_vm0, %v2580_v61, 2147483647  ;;  %vm2549_vm12 = vcmp.le.f32.partialorder %v8380_v28, %v2489_v63 }
 0x6bf   :  { %v2581_v10 = vsel %vm2549_vm12, %v11124_v58, 32  ;;  %v2492_v62 = vpop.xlane.xlu0 %2491  ;;  %2811 = vmin.xlane.f32.xlu0 %v8592_v48  ;;  %v8601_v0 = vcvt.s32.f32 %v2823_v37  ;;  %v2838_v16 = vshra.s32 %v8596_v6, 16 }
 0x6c0   :  { %v8605_v36 = vsel %vm108_vm0, %v2581_v10, 2147483647  ;;  %vm2550_vm13 = vcmp.le.f32.partialorder %v8377_v52, %v2492_v62 }
 0x6c1   :  { %v2582_v8 = vsel %vm2550_vm13, %v11124_v58, 32  ;;  %2826 = vmin.xlane.f32.xlu1 %v8601_v0  ;;  %v2495_v61 = vpop.xlane.xlu1 %2494  ;;  %v8610_v28 = vcvt.s32.f32 %v2838_v16  ;;  %v2853_v63 = vshra.s32 %v8605_v36, 16 }
 0x6c2   :  { %v8614_v20 = vsel %vm108_vm0, %v2582_v8, 2147483647  ;;  %vm2551_vm14 = vcmp.le.f32.partialorder %v8385_v30, %v2495_v61 }
 0x6c3   :  { %v2583_v37 = vsel %vm2551_vm14, %v11124_v58, 32  ;;  %v2498_v10 = vpop.xlane.xlu0 %2497  ;;  %2841 = vmin.xlane.f32.xlu0 %v8610_v28  ;;  %v8619_v52 = vcvt.s32.f32 %v2853_v63  ;;  %v2868_v62 = vshra.s32 %v8614_v20, 16 }
 0x6c4   :  { %v8623_v1 = vsel %vm108_vm0, %v2583_v37, 2147483647  ;;  %vm2552_vm15 = vcmp.le.f32.partialorder %v8392_v9, %v2498_v10 }
 0x6c5   :  { %v2584_v16 = vsel %vm2552_vm15, %v11124_v58, 32  ;;  %2856 = vmin.xlane.f32.xlu1 %v8619_v52  ;;  %v2501_v8 = vpop.xlane.xlu1 %2500  ;;  %v8628_v30 = vcvt.s32.f32 %v2868_v62  ;;  %v2883_v61 = vshra.s32 %v8623_v1, 16 }
 0x6c6   :  { %v8632_v24 = vsel %vm108_vm0, %v2584_v16, 2147483647  ;;  %vm2553_vm3 = vcmp.le.f32.partialorder %v8400_v51, %v2501_v8 }
 0x6c7   :  { %v2585_v63 = vsel %vm2553_vm3, %v11124_v58, 32  ;;  %v2504_v37 = vpop.xlane.xlu0 %2503  ;;  %2871 = vmin.xlane.f32.xlu0 %v8628_v30  ;;  %v8637_v9 = vcvt.s32.f32 %v2883_v61  ;;  %v2898_v10 = vshra.s32 %v8632_v24, 16 }
 0x6c8   :  { %v8641_v15 = vsel %vm108_vm0, %v2585_v63, 2147483647  ;;  %vm2554_vm4 = vcmp.le.f32.partialorder %v8397_v46, %v2504_v37 }
 0x6c9   :  { %v2586_v62 = vsel %vm2554_vm4, %v11124_v58, 32  ;;  %2886 = vmin.xlane.f32.xlu1 %v8637_v9  ;;  %v2507_v16 = vpop.xlane.xlu1 %2506  ;;  %v8646_v51 = vcvt.s32.f32 %v2898_v10  ;;  %v2913_v8 = vshra.s32 %v8641_v15, 16 }
 0x6ca   :  { %v8650_v47 = vsel %vm108_vm0, %v2586_v62, 2147483647  ;;  %vm2555_vm5 = vcmp.le.f32.partialorder %v8405_v5, %v2507_v16 }
 0x6cb   :  { %v2587_v61 = vsel %vm2555_vm5, %v11124_v58, 32  ;;  %v2510_v63 = vpop.xlane.xlu0 %2509  ;;  %2901 = vmin.xlane.f32.xlu0 %v8646_v51  ;;  %v8655_v46 = vcvt.s32.f32 %v2913_v8  ;;  %v2928_v37 = vshra.s32 %v8650_v47, 16 }
 0x6cc   :  { %v8659_v21 = vsel %vm108_vm0, %v2587_v61, 2147483647  ;;  %vm2556_vm6 = vcmp.le.f32.partialorder %v8412_v55, %v2510_v63 }
 0x6cd   :  { %11221 = vst [vmem:[#allocation70_spill] sm:$0xff] %v8655_v46  ;;  %v2588_v10 = vsel %vm2556_vm6, %v11124_v58, 32  ;;  %2916 = vmin.xlane.f32.xlu1 %v8655_v46  ;;  %v2513_v62 = vpop.xlane.xlu1 %2512  ;;  %v8664_v5 = vcvt.s32.f32 %v2928_v37  ;;  %v2943_v16 = vshra.s32 %v8659_v21, 16 }
 0x6ce   :  { %v8668_v19 = vsel %vm108_vm0, %v2588_v10, 2147483647  ;;  %vm2557_vm7 = vcmp.le.f32.partialorder %v8420_v4, %v2513_v62 }
 0x6cf   :  { %11222 = vst [vmem:[#allocation71_spill] sm:$0xff] %v8664_v5  ;;  %v2589_v8 = vsel %vm2557_vm7, %v11124_v58, 32  ;;  %v2516_v61 = vpop.xlane.xlu0 %2515  ;;  %2931 = vmin.xlane.f32.xlu0 %v8664_v5  ;;  %v8673_v55 = vcvt.s32.f32 %v2943_v16  ;;  %v2958_v63 = vshra.s32 %v8668_v19, 16 }
 0x6d0   :  { %v8677_v46 = vsel %vm108_vm0, %v2589_v8, 2147483647  ;;  %vm2558_vm8 = vcmp.le.f32.partialorder %v8417_v45, %v2516_v61 }
 0x6d1   :  { %11223 = vst [vmem:[#allocation72_spill] sm:$0xff] %v8673_v55  ;;  %v2590_v37 = vsel %vm2558_vm8, %v11124_v58, 32  ;;  %2946 = vmin.xlane.f32.xlu1 %v8673_v55  ;;  %v2519_v10 = vpop.xlane.xlu1 %2518  ;;  %v8682_v4 = vcvt.s32.f32 %v2958_v63  ;;  %v2973_v62 = vshra.s32 %v8677_v46, 16 }
 0x6d2   :  { %v8686_v5 = vsel %vm108_vm0, %v2590_v37, 2147483647  ;;  %vm2559_vm9 = vcmp.le.f32.partialorder %v8425_v39, %v2519_v10 }
 0x6d3   :  { %11224 = vst [vmem:[#allocation73_spill] sm:$0xff] %v8682_v4  ;;  %v2591_v16 = vsel %vm2559_vm9, %v11124_v58, 32  ;;  %2961 = vmin.xlane.f32.xlu0 %v8682_v4  ;;  %v2522_v8 = vpop.xlane.xlu0 %2521  ;;  %v8691_v45 = vcvt.s32.f32 %v2973_v62  ;;  %v2988_v61 = vshra.s32 %v8686_v5, 16 }
 0x6d4   :  { %v8695_v55 = vsel %vm108_vm0, %v2591_v16, 2147483647  ;;  %vm2560_vm10 = vcmp.le.f32.partialorder %v8432_v43, %v2522_v8 }
 0x6d5   :  { %11225 = vst [vmem:[#allocation74_spill] sm:$0xff] %v8691_v45  ;;  %v2592_v63 = vsel %vm2560_vm10, %v11124_v58, 32  ;;  %2976 = vmin.xlane.f32.xlu1 %v8691_v45  ;;  %v2525_v37 = vpop.xlane.xlu1 %2524  ;;  %v8700_v39 = vcvt.s32.f32 %v2988_v61  ;;  %v3003_v10 = vshra.s32 %v8695_v55, 16 }
 0x6d6   :  { %v8704_v4 = vsel %vm108_vm0, %v2592_v63, 2147483647  ;;  %vm2561_vm11 = vcmp.le.f32.partialorder %v8440_v25, %v2525_v37 }
 0x6d7   :  { %11226 = vst [vmem:[#allocation75_spill] sm:$0xff] %v8700_v39  ;;  %v2593_v62 = vsel %vm2561_vm11, %v11124_v58, 32  ;;  %2991 = vmin.xlane.f32.xlu0 %v8700_v39  ;;  %v2528_v16 = vpop.xlane.xlu0 %2527  ;;  %v8709_v43 = vcvt.s32.f32 %v3003_v10  ;;  %v3018_v8 = vshra.s32 %v8704_v4, 16 }
 0x6d8   :  { %v8713_v45 = vsel %vm108_vm0, %v2593_v62, 2147483647  ;;  %vm2562_vm12 = vcmp.le.f32.partialorder %v8437_v11, %v2528_v16 }
 0x6d9   :  { %v2594_v61 = vsel %vm2562_vm12, %v11124_v58, 32  ;;  %3006 = vmin.xlane.f32.xlu1 %v8709_v43  ;;  %v2531_v63 = vpop.xlane.xlu1 %2530  ;;  %v8718_v25 = vcvt.s32.f32 %v3018_v8  ;;  %v3033_v37 = vshra.s32 %v8713_v45, 16 }
 0x6da   :  { %v8722_v39 = vsel %vm108_vm0, %v2594_v61, 2147483647  ;;  %vm2563_vm13 = vcmp.le.f32.partialorder %v8445_v14, %v2531_v63  ;;  %v2165_v63 = vld [vmem:[%s10834_s2 + $0x40] sm:$0xff] }
 0x6db   :  { %11227 = vst [vmem:[#allocation76_spill] sm:$0xff] %v8718_v25  ;;  %v2595_v10 = vsel %vm2563_vm13, %v11124_v58, 32  ;;  %3021 = vmin.xlane.f32.xlu0 %v8718_v25  ;;  %v8727_v62 = vcvt.s32.f32 %v3033_v37  ;;  %v3048_v11 = vshra.s32 %v8722_v39, 16  ;;  %v2166_v37 = vld [vmem:[%s10834_s2 + $0x48] sm:$0xff]  ;;  %v2627_v25 = vand.u32 65535, %v8470_v50 }
 0x6dc   :  { %v8731_v16 = vsel %vm108_vm0, %v2595_v10, 2147483647  ;;  %v2167_v10 = vld [vmem:[%s10834_s2 + $0x50] sm:$0xff] }
 0x6dd   :  { %11228 = vst [vmem:[#allocation77_spill] sm:$0xff] %v8727_v62  ;;  %11229 = vst [vmem:[#allocation78_spill] sm:$0xff] %v8731_v16  ;;  %3036 = vmin.xlane.f32.xlu1 %v8727_v62  ;;  %v8734_v8 = vcvt.s32.f32 %v3048_v11  ;;  %v3063_v61 = vshra.s32 %v8731_v16, 16  ;;  %v6868_v11 = vpack.c.bf16 %v2166_v37, %v2165_v63 }
 0x6df   :  { %11230 = vst [vmem:[#allocation79_spill] sm:$0xff] %v8734_v8  ;;  %3051 = vmin.xlane.f32.xlu0 %v8734_v8  ;;  %v8738_v14 = vcvt.s32.f32 %v3063_v61  ;;  %v2168_v61 = vld [vmem:[%s10834_s2 + $0x58] sm:$0xff]  ;;  %6869 = vmatprep.subr.bf16.mxu1 %v6868_v11  ;;  %v2612_v8 = vand.u32 65535, %v8462_v3 }
 0x6e0   :  { %v6872_v58 = vpack.c.bf16 %v2168_v61, %v2167_v10  ;;  %6871 = vmatpush3.bf16.msra.mxu1 %v6868_v11  ;;  %v2642_v11 = vand.u32 65535, %v8479_v27  ;;  %v2672_v27 = vand.u32 65535, %v8497_v34  ;;  %v2702_v34 = vand.u32 65535, %v8515_v29 }
 0x6e1   :  { %11231 = vst [vmem:[#allocation80_spill] sm:$0xff] %v8738_v14  ;;  %3066 = vmin.xlane.f32.xlu1 %v8738_v14  ;;  %v2597_v14 = vand.u32 65535, %v8456_v33  ;;  %v2614_v10 = vcvt.s32.f32 %v2612_v8  ;;  %v2629_v33 = vcvt.s32.f32 %v2627_v25  ;;  %v2732_v29 = vand.u32 65535, %v8533_v42 }
 0x6e2   :  { %6873 = vmatprep.subr.bf16.mxu1 %v6872_v58  ;;  %v2762_v42 = vand.u32 65535, %v8551_v17  ;;  %v2792_v17 = vand.u32 65535, %v8569_v35  ;;  %v2822_v35 = vand.u32 65535, %v8587_v31  ;;  %v2852_v31 = vand.u32 65535, %v8605_v36 }
 0x6e3   :  { %v2599_v16 = vcvt.s32.f32 %v2597_v14  ;;  %v2657_v14 = vand.u32 65535, %v8488_v12  ;;  %v2687_v12 = vand.u32 65535, %v8506_v41  ;;  %v2717_v41 = vand.u32 65535, %v8524_v60 }
 0x6e4   :  { %6875 = vmatpush3.bf16.msra.mxu1 %v6872_v58  ;;  %v2747_v60 = vand.u32 65535, %v8542_v22  ;;  %v2777_v22 = vand.u32 65535, %v8560_v54  ;;  %v2807_v54 = vand.u32 65535, %v8578_v13  ;;  %v2837_v13 = vand.u32 65535, %v8596_v6 }
 0x6e5   :  { %v2659_v25 = vcvt.s32.f32 %v2657_v14  ;;  %v2867_v6 = vand.u32 65535, %v8614_v20  ;;  %v2882_v36 = vand.u32 65535, %v8623_v1  ;;  %v2897_v20 = vand.u32 65535, %v8632_v24 }
 0x6e6   :  { %v2912_v1 = vand.u32 65535, %v8641_v15  ;;  %v2927_v24 = vand.u32 65535, %v8650_v47  ;;  %v2942_v15 = vand.u32 65535, %v8659_v21  ;;  %v2957_v47 = vand.u32 65535, %v8668_v19 }
 0x6e7   :  { %v2972_v21 = vand.u32 65535, %v8677_v46  ;;  %v2987_v19 = vand.u32 65535, %v8686_v5  ;;  %v3002_v46 = vand.u32 65535, %v8695_v55  ;;  %v3017_v5 = vand.u32 65535, %v8704_v4 }
 0x6e8   :  { %v3032_v55 = vand.u32 65535, %v8713_v45  ;;  %v3047_v4 = vand.u32 65535, %v8722_v39  ;;  %v11241_v39 = vld [vmem:[#allocation79_spill] sm:$0xff] }
 0x730   :  { %v8755_v62 = vpop.xlane.xlu0 %2601 }
 0x731   :  { %vm2603_vm14 = vcmp.eq.f32.partialorder %v8466_v59, %v8755_v62 }
 0x732   :  { %v8760_v63 = vpop.xlane.xlu1 %2616  ;;  %v2604_v37 = vsel %vm2603_vm14, %v2599_v16, inf  ;;  %v2644_v16 = vcvt.s32.f32 %v2642_v11  ;;  %v2689_v11 = vcvt.s32.f32 %v2687_v12 }
 0x733   :  { %2605 = vmin.xlane.f32.xlu0 %v2604_v37  ;;  %vm2618_vm15 = vcmp.eq.f32.partialorder %v8475_v26, %v8760_v63  ;;  %v2674_v37 = vcvt.s32.f32 %v2672_v27  ;;  %v2734_v27 = vcvt.s32.f32 %v2732_v29  ;;  %v2824_v29 = vcvt.s32.f32 %v2822_v35 }
 0x734   :  { %v8765_v58 = vpop.xlane.xlu0 %2631  ;;  %v2619_v3 = vsel %vm2618_vm15, %v2614_v10, inf  ;;  %v2944_v35 = vcvt.s32.f32 %v2942_v15  ;;  %v11239_v15 = vld [vmem:[#allocation78_spill] sm:$0xff] }
 0x735   :  { %2620 = vmin.xlane.f32.xlu1 %v2619_v3  ;;  %vm2633_vm3 = vcmp.eq.f32.partialorder %v8484_v38, %v8765_v58  ;;  %v3062_v45 = vand.u32 65535, %v11239_v15 }
 0x736   :  { %v8770_v50 = vpop.xlane.xlu1 %2646  ;;  %v2634_v59 = vsel %vm2633_vm3, %v2629_v33, inf  ;;  %v2704_v33 = vcvt.s32.f32 %v2702_v34  ;;  %v2779_v34 = vcvt.s32.f32 %v2777_v22 }
 0x737   :  { %2635 = vmin.xlane.f32.xlu0 %v2634_v59  ;;  %vm2648_vm4 = vcmp.eq.f32.partialorder %v8493_v44, %v8770_v50  ;;  %v2719_v59 = vcvt.s32.f32 %v2717_v41 }
 0x738   :  { %v8775_v26 = vpop.xlane.xlu0 %2661  ;;  %v2649_v8 = vsel %vm2648_vm4, %v2644_v16, inf }
 0x739   :  { %2650 = vmin.xlane.f32.xlu1 %v2649_v8  ;;  %vm2663_vm5 = vcmp.eq.f32.partialorder %v8502_v23, %v8775_v26 }
 0x73a   :  { %v8780_v38 = vpop.xlane.xlu1 %2676  ;;  %v2664_v61 = vsel %vm2663_vm5, %v2659_v25, inf  ;;  %v2749_v25 = vcvt.s32.f32 %v2747_v60 }
 0x73b   :  { %2665 = vmin.xlane.f32.xlu0 %v2664_v61  ;;  %vm2678_vm6 = vcmp.eq.f32.partialorder %v8511_v56, %v8780_v38  ;;  %v2764_v61 = vcvt.s32.f32 %v2762_v42  ;;  %v2869_v42 = vcvt.s32.f32 %v2867_v6  ;;  %v11236_v6 = vld [vmem:[#allocation74_spill] sm:$0xff] }
 0x73c   :  { %v8785_v44 = vpop.xlane.xlu0 %2691  ;;  %v2679_v10 = vsel %vm2678_vm6, %v2674_v37, inf }
 0x73d   :  { %2680 = vmin.xlane.f32.xlu1 %v2679_v10  ;;  %vm2693_vm7 = vcmp.eq.f32.partialorder %v8520_v57, %v8785_v44 }
 0x73e   :  { %v8790_v23 = vpop.xlane.xlu1 %2706  ;;  %v2694_v3 = vsel %vm2693_vm7, %v2689_v11, inf  ;;  %v2794_v11 = vcvt.s32.f32 %v2792_v17  ;;  %v2914_v17 = vcvt.s32.f32 %v2912_v1 }
 0x73f   :  { %2695 = vmin.xlane.f32.xlu0 %v2694_v3  ;;  %vm2708_vm8 = vcmp.eq.f32.partialorder %v8529_v49, %v8790_v23  ;;  %v2809_v3 = vcvt.s32.f32 %v2807_v54  ;;  %v2929_v54 = vcvt.s32.f32 %v2927_v24 }
 0x740   :  { %v8795_v56 = vpop.xlane.xlu0 %2721  ;;  %v2709_v14 = vsel %vm2708_vm8, %v2704_v33, inf }
 0x741   :  { %2710 = vmin.xlane.f32.xlu1 %v2709_v14  ;;  %vm2723_vm9 = vcmp.eq.f32.partialorder %v8538_v32, %v8795_v56 }
 0x742   :  { %v8800_v57 = vpop.xlane.xlu1 %2736  ;;  %v2724_v16 = vsel %vm2723_vm9, %v2719_v59, inf  ;;  %v2839_v59 = vcvt.s32.f32 %v2837_v13 }
 0x743   :  { %2725 = vmin.xlane.f32.xlu0 %v2724_v16  ;;  %vm2738_vm10 = vcmp.eq.f32.partialorder %v8547_v53, %v8800_v57  ;;  %v2854_v16 = vcvt.s32.f32 %v2852_v31 }
 0x744   :  { %v8805_v49 = vpop.xlane.xlu0 %2751  ;;  %v2739_v8 = vsel %vm2738_vm10, %v2734_v27, inf }
 0x745   :  { %2740 = vmin.xlane.f32.xlu1 %v2739_v8  ;;  %vm2753_vm11 = vcmp.eq.f32.partialorder %v8556_v40, %v8805_v49 }
 0x746   :  { %v8810_v32 = vpop.xlane.xlu1 %2766  ;;  %v2754_v12 = vsel %vm2753_vm11, %v2749_v25, inf  ;;  %v2884_v25 = vcvt.s32.f32 %v2882_v36  ;;  %v2989_v36 = vcvt.s32.f32 %v2987_v19 }
 0x747   :  { %2755 = vmin.xlane.f32.xlu0 %v2754_v12  ;;  %vm2768_vm12 = vcmp.eq.f32.partialorder %v8565_v18, %v8810_v32  ;;  %v2899_v12 = vcvt.s32.f32 %v2897_v20 }
 0x748   :  { %v8815_v53 = vpop.xlane.xlu0 %2781  ;;  %v2769_v37 = vsel %vm2768_vm12, %v2764_v61, inf }
 0x749   :  { %2770 = vmin.xlane.f32.xlu1 %v2769_v37  ;;  %vm2783_vm13 = vcmp.eq.f32.partialorder %v8574_v7, %v8815_v53  ;;  %v11232_v37 = vld [vmem:[#allocation70_spill] sm:$0xff] }
 0x74a   :  { %v8820_v40 = vpop.xlane.xlu1 %2796  ;;  %v2784_v10 = vsel %vm2783_vm13, %v2779_v34, inf }
 0x74b   :  { %2785 = vmin.xlane.f32.xlu0 %v2784_v10  ;;  %vm2798_vm14 = vcmp.eq.f32.partialorder %v8583_v2, %v8820_v40  ;;  %v11233_v10 = vld [vmem:[#allocation71_spill] sm:$0xff] }
 0x74c   :  { %v8825_v18 = vpop.xlane.xlu0 %2811  ;;  %v2799_v41 = vsel %vm2798_vm14, %v2794_v11, inf }
 0x74d   :  { %2800 = vmin.xlane.f32.xlu1 %v2799_v41  ;;  %vm2813_vm15 = vcmp.eq.f32.partialorder %v8592_v48, %v8825_v18  ;;  %v11234_v41 = vld [vmem:[#allocation72_spill] sm:$0xff] }
 0x74e   :  { %v8830_v7 = vpop.xlane.xlu1 %2826  ;;  %v2814_v33 = vsel %vm2813_vm15, %v2809_v3, inf }
 0x74f   :  { %2815 = vmin.xlane.f32.xlu0 %v2814_v33  ;;  %vm2828_vm3 = vcmp.eq.f32.partialorder %v8601_v0, %v8830_v7  ;;  %v2959_v33 = vcvt.s32.f32 %v2957_v47 }
 0x750   :  { %v8835_v2 = vpop.xlane.xlu0 %2841  ;;  %v2829_v14 = vsel %vm2828_vm3, %v2824_v29, inf  ;;  %v11235_v29 = vld [vmem:[#allocation73_spill] sm:$0xff] }
 0x751   :  { %2830 = vmin.xlane.f32.xlu1 %v2829_v14  ;;  %vm2843_vm4 = vcmp.eq.f32.partialorder %v8610_v28, %v8835_v2 }
 0x752   :  { %v8840_v48 = vpop.xlane.xlu1 %2856  ;;  %v2844_v60 = vsel %vm2843_vm4, %v2839_v59, inf  ;;  %v2974_v59 = vcvt.s32.f32 %v2972_v21 }
 0x753   :  { %2845 = vmin.xlane.f32.xlu0 %v2844_v60  ;;  %vm2858_vm5 = vcmp.eq.f32.partialorder %v8619_v52, %v8840_v48 }
 0x754   :  { %v8845_v0 = vpop.xlane.xlu0 %2871  ;;  %v2859_v27 = vsel %vm2858_vm5, %v2854_v16, inf }
 0x755   :  { %2860 = vmin.xlane.f32.xlu1 %v2859_v27  ;;  %vm2873_vm6 = vcmp.eq.f32.partialorder %v8628_v30, %v8845_v0  ;;  %v11237_v27 = vld [vmem:[#allocation75_spill] sm:$0xff] }
 0x756   :  { %v8850_v28 = vpop.xlane.xlu1 %2886  ;;  %v2874_v8 = vsel %vm2873_vm6, %v2869_v42, inf }
 0x757   :  { %2875 = vmin.xlane.f32.xlu0 %v2874_v8  ;;  %vm2888_vm7 = vcmp.eq.f32.partialorder %v8637_v9, %v8850_v28  ;;  %v3004_v8 = vcvt.s32.f32 %v3002_v46 }
 0x758   :  { %v8855_v52 = vpop.xlane.xlu0 %2901  ;;  %v2889_v22 = vsel %vm2888_vm7, %v2884_v25, inf }
 0x759   :  { %2890 = vmin.xlane.f32.xlu1 %v2889_v22  ;;  %vm2903_vm8 = vcmp.eq.f32.partialorder %v8646_v51, %v8855_v52  ;;  %v3019_v22 = vcvt.s32.f32 %v3017_v5 }
 0x75a   :  { %v8860_v30 = vpop.xlane.xlu1 %2916  ;;  %v2904_v61 = vsel %vm2903_vm8, %v2899_v12, inf  ;;  %v11238_v12 = vld [vmem:[#allocation76_spill] sm:$0xff] }
 0x75b   :  { %2905 = vmin.xlane.f32.xlu0 %v2904_v61  ;;  %vm2918_vm9 = vcmp.eq.f32.partialorder %v11232_v37, %v8860_v30  ;;  %v11240_v37 = vld [vmem:[#allocation77_spill] sm:$0xff] }
 0x75c   :  { %v8865_v9 = vpop.xlane.xlu0 %2931  ;;  %v2919_v34 = vsel %vm2918_vm9, %v2914_v17, inf  ;;  %v3034_v17 = vcvt.s32.f32 %v3032_v55 }
 0x75d   :  { %2920 = vmin.xlane.f32.xlu1 %v2919_v34  ;;  %vm2933_vm10 = vcmp.eq.f32.partialorder %v11233_v10, %v8865_v9 }
 0x75e   :  { %v8870_v51 = vpop.xlane.xlu1 %2946  ;;  %v2934_v11 = vsel %vm2933_vm10, %v2929_v54, inf  ;;  %v3049_v54 = vcvt.s32.f32 %v3047_v4  ;;  %v11244_v4 = vmov 0.0  }
 0x75f   :  { %2935 = vmin.xlane.f32.xlu0 %v2934_v11  ;;  %vm2948_vm11 = vcmp.eq.f32.partialorder %v11234_v41, %v8870_v51  ;;  %v3064_v11 = vcvt.s32.f32 %v3062_v45  ;;  %v6898_v41 = vld [vmem:[%s10833_s1 + $0x68] sm:$0xff]   ;;  %v2698_v45 = vcvt.f32.s32 %v8785_v44  ;;  %v2728_v44 = vcvt.f32.s32 %v8795_v56 }
 0x760   :  { %v8875_v3 = vpop.xlane.xlu0 %2961  ;;  %v2949_v13 = vsel %vm2948_vm11, %v2944_v35, inf  ;;  %v11242_v35 = vld [vmem:[#allocation80_spill] sm:$0xff]  ;;  %6696 = vmatprep.subr.bf16.mxu0 %v6898_v41 }
 0x761   :  { %2950 = vmin.xlane.f32.xlu1 %v2949_v13  ;;  %vm2963_vm12 = vcmp.eq.f32.partialorder %v11235_v29, %v8875_v3  ;;  %6697 = vmatpush3.bf16.msra.mxu0 %v6898_v41  ;;  %v2608_v13 = vcvt.f32.s32 %v8755_v62  ;;  %v11243_v62 = vld [vmem:[#allocation37_spill] sm:$0xff]  ;;  %v2729_v56 = vshll.u32 %v2728_v44, 16 }
 0x762   :  { %v8880_v31 = vpop.xlane.xlu1 %2976  ;;  %v2964_v14 = vsel %vm2963_vm12, %v2959_v33, inf  ;;  %v2623_v33 = vcvt.f32.s32 %v8760_v63  ;;  %v2683_v63 = vcvt.f32.s32 %v8780_v38 }
 0x763   :  { %2965 = vmin.xlane.f32.xlu0 %v2964_v14  ;;  %vm2978_vm13 = vcmp.eq.f32.partialorder %v11236_v6, %v8880_v31  ;;  %v2609_v29 = vshll.u32 %v2608_v13, 16  ;;  %v2638_v14 = vcvt.f32.s32 %v8765_v58  ;;  %v2699_v13 = vshll.u32 %v2698_v45, 16 }
 0x764   :  { %v8885_v60 = vpop.xlane.xlu0 %2991  ;;  %v2979_v16 = vsel %vm2978_vm13, %v2974_v59, inf  ;;  %v2624_v6 = vshll.u32 %v2623_v33, 16  ;;  %v2684_v38 = vshll.u32 %v2683_v63, 16 }
 0x765   :  { %2980 = vmin.xlane.f32.xlu1 %v2979_v16  ;;  %vm2993_vm14 = vcmp.eq.f32.partialorder %v11237_v27, %v8885_v60  ;;  %v2653_v16 = vcvt.f32.s32 %v8770_v50  ;;  %v2668_v27 = vcvt.f32.s32 %v8775_v26 }
 0x766   :  { %v8890_v42 = vpop.xlane.xlu1 %3006  ;;  %v2994_v20 = vsel %vm2993_vm14, %v2989_v36, inf }
 0x767   :  { %2995 = vmin.xlane.f32.xlu0 %v2994_v20  ;;  %vm3008_vm15 = vcmp.eq.f32.partialorder %v8709_v43, %v8890_v42 }
 0x768   :  { %v8895_v25 = vpop.xlane.xlu0 %3021  ;;  %v3009_v1 = vsel %vm3008_vm15, %v3004_v8, inf  ;;  %v2639_v8 = vshll.u32 %v2638_v14, 16 }
 0x769   :  { %3010 = vmin.xlane.f32.xlu1 %v3009_v1  ;;  %vm3023_vm3 = vcmp.eq.f32.partialorder %v11238_v12, %v8895_v25  ;;  %v2654_v12 = vshll.u32 %v2653_v16, 16 }
 0x76a   :  { %v8900_v24 = vpop.xlane.xlu1 %3036  ;;  %v3024_v61 = vsel %vm3023_vm3, %v3019_v22, inf }
 0x76b   :  { %3025 = vmin.xlane.f32.xlu0 %v3024_v61  ;;  %vm3038_vm4 = vcmp.eq.f32.partialorder %v11240_v37, %v8900_v24 }
 0x76c   :  { %v8905_v43 = vpop.xlane.xlu0 %3051  ;;  %v3039_v34 = vsel %vm3038_vm4, %v3034_v17, inf  ;;  %v2669_v17 = vshll.u32 %v2668_v27, 16 }
 0x76d   :  { %3040 = vmin.xlane.f32.xlu1 %v3039_v34  ;;  %vm3053_vm5 = vcmp.eq.f32.partialorder %v11241_v39, %v8905_v43 }
 0x76e   :  { %v8909_v47 = vpop.xlane.xlu1 %3066  ;;  %v3054_v10 = vsel %vm3053_vm5, %v3049_v54, inf }
 0x76f   :  { %3055 = vmin.xlane.f32.xlu0 %v3054_v10  ;;  %vm3068_vm6 = vcmp.eq.f32.partialorder %v11242_v35, %v8909_v47  ;;  %v2713_v10 = vcvt.f32.s32 %v8790_v23  ;;  %v2743_v23 = vcvt.f32.s32 %v8800_v57 }
 0x770   :  { %v3069_v21 = vsel %vm3068_vm6, %v3064_v11, inf }
 0x771   :  { %3070 = vmin.xlane.f32.xlu1 %v3069_v21  ;;  %v2744_v57 = vshll.u32 %v2743_v23, 16 }
 0x7c0   :  { %v2606_v19 = vpop.xlane.xlu0 %2605 }
 0x7c1   :  { %v2607_v59 = vcvt.f32.s32 %v2606_v19 }
 0x7c2   :  { %v2621_v46 = vpop.xlane.xlu1 %2620 }
 0x7c3   :  { %v2610_v36 = vadd.s32 %v2609_v29, %v2607_v59  ;;  %v2622_v5 = vcvt.f32.s32 %v2621_v46  ;;  %v2714_v59 = vshll.u32 %v2713_v10, 16 }
 0x7c4   :  { %v2636_v20 = vpop.xlane.xlu0 %2635 }
 0x7c5   :  { %v2625_v55 = vadd.s32 %v2624_v6, %v2622_v5  ;;  %v2637_v1 = vcvt.f32.s32 %v2636_v20  ;;  %vm3076_vm7 = vcmp.eq.s32.totalorder %v11243_v62, %v2610_v36  ;;  %v2758_v5 = vcvt.f32.s32 %v8805_v49 }
 0x7c6   :  { %v2651_v22 = vpop.xlane.xlu1 %2650  ;;  %v6021_v58 = vsel %vm3076_vm7, 1.0, %v11244_v4  ;;  %v2788_v49 = vcvt.f32.s32 %v8815_v53 }
 0x7c7   :  { %vm3077_vm8 = vcmp.eq.s32.totalorder %v11243_v62, %v2625_v55  ;;  %v2640_v61 = vadd.s32 %v2639_v8, %v2637_v1  ;;  %v2652_v50 = vcvt.f32.s32 %v2651_v22  ;;  %6648 = vmatprep.mubr.msk.f32.mxu1 %vm108_vm0, %v6021_v58  ;;  %v2773_v1 = vcvt.f32.s32 %v8810_v32 }
 0x7c8   :  { %v6022_v26 = vsel %vm3077_vm8, 1.0, %v11244_v4  ;;  %v2666_v15 = vpop.xlane.xlu0 %2665  ;;  %v2803_v32 = vcvt.f32.s32 %v8820_v40  ;;  %v2789_v53 = vshll.u32 %v2788_v49, 16 }
 0x7c9   :  { %v2655_v37 = vadd.s32 %v2654_v12, %v2652_v50  ;;  %v2667_v34 = vcvt.f32.s32 %v2666_v15  ;;  %6649 = vmatmul.mubr.msk.f32.vlgmr.msra.gmra.mrb[62].mxu1 %vm108_vm0, %v6022_v26  ;;  %vm3078_vm9 = vcmp.eq.s32.totalorder %v11243_v62, %v2640_v61  ;;  %v2759_v61 = vshll.u32 %v2758_v5, 16 }
 0x7ca   :  { %v2681_v54 = vpop.xlane.xlu1 %2680  ;;  %v6023_v39 = vsel %vm3078_vm9, 1.0, %v11244_v4  ;;  %v2774_v45 = vshll.u32 %v2773_v1, 16  ;;  %v2804_v40 = vshll.u32 %v2803_v32, 16  ;;  %v2893_v1 = vcvt.f32.s32 %v8850_v28 }
 0x7cb   :  { %v2670_v11 = vadd.s32 %v2669_v17, %v2667_v34  ;;  %v2682_v35 = vcvt.f32.s32 %v2681_v54  ;;  %6651 = vmatprep.mubr.msk.f32.mxu1 %vm108_vm0, %v6023_v39  ;;  %vm3079_vm10 = vcmp.eq.s32.totalorder %v11243_v62, %v2655_v37  ;;  %v2818_v39 = vcvt.f32.s32 %v8825_v18 }
 0x7cc   :  { %v2696_v21 = vpop.xlane.xlu0 %2695  ;;  %v6024_v41 = vsel %vm3079_vm10, 1.0, %v11244_v4  ;;  %v2848_v18 = vcvt.f32.s32 %v8835_v2  ;;  %v2923_v28 = vcvt.f32.s32 %v8860_v30 }
 0x7cd   :  { %v2685_v33 = vadd.s32 %v2684_v38, %v2682_v35  ;;  %v2697_v19 = vcvt.f32.s32 %v2696_v21  ;;  %6652 = vmatmul.mubr.msk.f32.gmra.mrb[64].mxu1 %vm108_vm0, %v6024_v41  ;;  %vm3080_vm11 = vcmp.eq.s32.totalorder %v11243_v62, %v2670_v11  ;;  %v2833_v21 = vcvt.f32.s32 %v8830_v7 }
 0x7ce   :  { %v2711_v29 = vpop.xlane.xlu1 %2710  ;;  %v6025_v14 = vsel %vm3080_vm11, 1.0, %v11244_v4  ;;  %v2819_v23 = vshll.u32 %v2818_v39, 16  ;;  %v2863_v7 = vcvt.f32.s32 %v8840_v48  ;;  %v2849_v2 = vshll.u32 %v2848_v18, 16 }
 0x7cf   :  { %v2700_v46 = vadd.s32 %v2699_v13, %v2697_v19  ;;  %v2712_v6 = vcvt.f32.s32 %v2711_v29  ;;  %6654 = vmatprep.mubr.msk.f32.mxu1 %vm108_vm0, %v6025_v14  ;;  %vm3081_vm12 = vcmp.eq.s32.totalorder %v11243_v62, %v2685_v33  ;;  %v2924_v30 = vshll.u32 %v2923_v28, 16 }
 0x7d0   :  { %v2726_v16 = vpop.xlane.xlu0 %2725  ;;  %v6026_v36 = vsel %vm3081_vm12, 1.0, %v11244_v4  ;;  %v2864_v48 = vshll.u32 %v2863_v7, 16 }
 0x7d1   :  { %v2715_v27 = vadd.s32 %v2714_v59, %v2712_v6  ;;  %v2727_v20 = vcvt.f32.s32 %v2726_v16  ;;  %6655 = vmatmul.mubr.msk.f32.gmra.mrb[66].mxu1 %vm108_vm0, %v6026_v36  ;;  %vm3082_vm13 = vcmp.eq.s32.totalorder %v11243_v62, %v2700_v46  ;;  %v2834_v6 = vshll.u32 %v2833_v21, 16 }
 0x7d2   :  { %v2741_v8 = vpop.xlane.xlu1 %2740  ;;  %v6027_v55 = vsel %vm3082_vm13, 1.0, %v11244_v4 }
 0x7d3   :  { %v2730_v63 = vadd.s32 %v2729_v56, %v2727_v20  ;;  %v2742_v22 = vcvt.f32.s32 %v2741_v8  ;;  %6657 = vmatprep.mubr.msk.f32.mxu1 %vm108_vm0, %v6027_v55  ;;  %vm3083_vm14 = vcmp.eq.s32.totalorder %v11243_v62, %v2715_v27  ;;  %v2878_v27 = vcvt.f32.s32 %v8845_v0 }
 0x7d4   :  { %v2756_v58 = vpop.xlane.xlu0 %2755  ;;  %v6028_v12 = vsel %vm3083_vm14, 1.0, %v11244_v4  ;;  %v2908_v0 = vcvt.f32.s32 %v8855_v52 }
 0x7d5   :  { %v2745_v50 = vadd.s32 %v2744_v57, %v2742_v22  ;;  %v2757_v17 = vcvt.f32.s32 %v2756_v58  ;;  %6658 = vmatmul.mubr.msk.f32.gmra.mrb[68].mxu1 %vm108_vm0, %v6028_v12  ;;  %vm3084_vm15 = vcmp.eq.s32.totalorder %v11243_v62, %v2730_v63  ;;  %v2879_v12 = vshll.u32 %v2878_v27, 16 }
 0x7d6   :  { %v2771_v26 = vpop.xlane.xlu1 %2770  ;;  %v6029_v15 = vsel %vm3084_vm15, 1.0, %v11244_v4  ;;  %v2909_v52 = vshll.u32 %v2908_v0, 16 }
 0x7d7   :  { %v2760_v37 = vadd.s32 %v2759_v61, %v2757_v17  ;;  %v2772_v34 = vcvt.f32.s32 %v2771_v26  ;;  %6660 = vmatprep.mubr.msk.f32.mxu1 %vm108_vm0, %v6029_v15  ;;  %vm3085_vm3 = vcmp.eq.s32.totalorder %v11243_v62, %v2745_v50  ;;  %v2894_v26 = vshll.u32 %v2893_v1, 16 }
 0x7d8   :  { %v2786_v38 = vpop.xlane.xlu0 %2785  ;;  %v6030_v54 = vsel %vm3085_vm3, 1.0, %v11244_v4 }
 0x7d9   :  { %v2775_v10 = vadd.s32 %v2774_v45, %v2772_v34  ;;  %v2787_v11 = vcvt.f32.s32 %v2786_v38  ;;  %6661 = vmatmul.mubr.msk.f32.gmra.mrb[70].mxu1 %vm108_vm0, %v6030_v54  ;;  %vm3086_vm4 = vcmp.eq.s32.totalorder %v11243_v62, %v2760_v37 }
 0x7da   :  { %v2801_v35 = vpop.xlane.xlu1 %2800  ;;  %v6031_v44 = vsel %vm3086_vm4, 1.0, %v11244_v4 }
 0x7db   :  { %v2790_v41 = vadd.s32 %v2789_v53, %v2787_v11  ;;  %v2802_v13 = vcvt.f32.s32 %v2801_v35  ;;  %6663 = vmatprep.mubr.msk.f32.mxu1 %vm108_vm0, %v6031_v44  ;;  %vm3087_vm5 = vcmp.eq.s32.totalorder %v11243_v62, %v2775_v10  ;;  %v2938_v53 = vcvt.f32.s32 %v8865_v9 }
 0x7dc   :  { %v2816_v33 = vpop.xlane.xlu0 %2815  ;;  %v6032_v19 = vsel %vm3087_vm5, 1.0, %v11244_v4  ;;  %v2953_v11 = vcvt.f32.s32 %v8870_v51  ;;  %v2968_v9 = vcvt.f32.s32 %v8875_v3  ;;  %v2983_v51 = vcvt.f32.s32 %v8880_v31 }
 0x7dd   :  { %v2805_v29 = vadd.s32 %v2804_v40, %v2802_v13  ;;  %v2817_v14 = vcvt.f32.s32 %v2816_v33  ;;  %6664 = vmatmul.mubr.msk.f32.gmra.mrb[72].mxu1 %vm108_vm0, %v6032_v19  ;;  %vm3088_vm6 = vcmp.eq.s32.totalorder %v11243_v62, %v2790_v41  ;;  %v2939_v41 = vshll.u32 %v2938_v53, 16 }
 0x7de   :  { %v2831_v59 = vpop.xlane.xlu1 %2830  ;;  %v6033_v46 = vsel %vm3088_vm6, 1.0, %v11244_v4  ;;  %v2969_v3 = vshll.u32 %v2968_v9, 16  ;;  %v2984_v31 = vshll.u32 %v2983_v51, 16  ;;  %v11249_v51 = vld [vmem:[#allocation41_spill] sm:$0xff] }
 0x7df   :  { %v2820_v56 = vadd.s32 %v2819_v23, %v2817_v14  ;;  %v2832_v16 = vcvt.f32.s32 %v2831_v59  ;;  %6666 = vmatprep.mubr.msk.f32.mxu1 %vm108_vm0, %v6033_v46  ;;  %vm3089_vm7 = vcmp.eq.s32.totalorder %v11243_v62, %v2805_v29  ;;  %v2954_v23 = vshll.u32 %v2953_v11, 16 }
 0x7e0   :  { %v2846_v36 = vpop.xlane.xlu0 %2845  ;;  %v6034_v5 = vsel %vm3089_vm7, 1.0, %v11244_v4  ;;  %v2998_v46 = vcvt.f32.s32 %v8885_v60  ;;  %v3028_v60 = vcvt.f32.s32 %v8895_v25 }
 0x7e1   :  { %v2835_v20 = vadd.s32 %v2834_v6, %v2832_v16  ;;  %v2847_v57 = vcvt.f32.s32 %v2846_v36  ;;  %6667 = vmatmul.mubr.msk.f32.gmra.mrb[74].mxu1 %vm108_vm0, %v6034_v5  ;;  %vm3090_vm8 = vcmp.eq.s32.totalorder %v11243_v62, %v2820_v56  ;;  %v3013_v36 = vcvt.f32.s32 %v8890_v42 }
 0x7e2   :  { %v2861_v8 = vpop.xlane.xlu1 %2860  ;;  %v6035_v55 = vsel %vm3090_vm8, 1.0, %v11244_v4  ;;  %v3043_v42 = vcvt.f32.s32 %v8900_v24  ;;  %v3029_v25 = vshll.u32 %v3028_v60, 16 }
 0x7e3   :  { %v2850_v63 = vadd.s32 %v2849_v2, %v2847_v57  ;;  %v2862_v22 = vcvt.f32.s32 %v2861_v8  ;;  %6669 = vmatprep.mubr.msk.f32.mxu1 %vm108_vm0, %v6035_v55  ;;  %vm3091_vm9 = vcmp.eq.s32.totalorder %v11243_v62, %v2835_v20 }
 0x7e4   :  { %v2876_v49 = vpop.xlane.xlu0 %2875  ;;  %v6036_v58 = vsel %vm3091_vm9, 1.0, %v11244_v4  ;;  %v3044_v24 = vshll.u32 %v3043_v42, 16  ;;  %v11267_v42 = vld [vmem:[#allocation48_spill] sm:$0xff] }
 0x7e5   :  { %v2865_v61 = vadd.s32 %v2864_v48, %v2862_v22  ;;  %v2877_v50 = vcvt.f32.s32 %v2876_v49  ;;  %6670 = vmatmul.mubr.msk.f32.gmra.mrb[76].mxu1 %vm108_vm0, %v6036_v58  ;;  %vm3092_vm10 = vcmp.eq.s32.totalorder %v11243_v62, %v2850_v63  ;;  %v2999_v48 = vshll.u32 %v2998_v46, 16 }
 0x7e6   :  { %v2891_v17 = vpop.xlane.xlu1 %2890  ;;  %v6037_v32 = vsel %vm3092_vm10, 1.0, %v11244_v4  ;;  %v3014_v22 = vshll.u32 %v3013_v36, 16 }
 0x7e7   :  { %v2880_v15 = vadd.s32 %v2879_v12, %v2877_v50  ;;  %v2892_v45 = vcvt.f32.s32 %v2891_v17  ;;  %6672 = vmatprep.mubr.msk.f32.mxu1 %vm108_vm0, %v6037_v32  ;;  %vm3093_vm11 = vcmp.eq.s32.totalorder %v11243_v62, %v2865_v61  ;;  %v3058_v61 = vcvt.f32.s32 %v8905_v43 }
 0x7e8   :  { %v2906_v37 = vpop.xlane.xlu0 %2905  ;;  %v6038_v34 = vsel %vm3093_vm11, 1.0, %v11244_v4 }
 0x7e9   :  { %v2895_v38 = vadd.s32 %v2894_v26, %v2892_v45  ;;  %v2907_v54 = vcvt.f32.s32 %v2906_v37  ;;  %6673 = vmatmul.mubr.msk.f32.gmra.mrb[78].mxu1 %vm108_vm0, %v6038_v34  ;;  %vm3094_vm12 = vcmp.eq.s32.totalorder %v11243_v62, %v2880_v15  ;;  %v3073_v26 = vcvt.f32.s32 %v8909_v47 }
 0x7ea   :  { %v2921_v39 = vpop.xlane.xlu1 %2920  ;;  %v6039_v10 = vsel %vm3094_vm12, 1.0, %v11244_v4  ;;  %v3059_v37 = vshll.u32 %v3058_v61, 16  ;;  %v11273_v61 = vld [vmem:[#allocation11_spill] sm:$0xff] }
 0x7eb   :  { %v2910_v40 = vadd.s32 %v2909_v52, %v2907_v54  ;;  %v2922_v35 = vcvt.f32.s32 %v2921_v39  ;;  %6675 = vmatprep.mubr.msk.f32.mxu1 %vm108_vm0, %v6039_v10  ;;  %vm3095_vm13 = vcmp.eq.s32.totalorder %v11243_v62, %v2895_v38  ;;  %v3074_v47 = vshll.u32 %v3073_v26, 16  ;;  %v11277_v26 = vld [vmem:[#allocation9_spill] sm:$0xff] }
 0x7ec   :  { %v2936_v44 = vpop.xlane.xlu0 %2935  ;;  %v6040_v21 = vsel %vm3095_vm13, 1.0, %v11244_v4 }
 0x7ed   :  { %v2925_v13 = vadd.s32 %v2924_v30, %v2922_v35  ;;  %v2937_v18 = vcvt.f32.s32 %v2936_v44  ;;  %6676 = vmatmul.mubr.msk.f32.gmra.mrb[80].mxu1 %vm108_vm0, %v6040_v21  ;;  %vm3096_vm14 = vcmp.eq.s32.totalorder %v11243_v62, %v2910_v40  ;;  %v11245_v44 = vld [vmem:[#allocation39_spill] sm:$0xff] }
 0x7ee   :  { %v2951_v33 = vpop.xlane.xlu1 %2950  ;;  %v6041_v19 = vsel %vm3096_vm14, 1.0, %v11244_v4 }
 0x7ef   :  { %v2940_v29 = vadd.s32 %v2939_v41, %v2937_v18  ;;  %v2952_v14 = vcvt.f32.s32 %v2951_v33  ;;  %6678 = vmatprep.mubr.msk.f32.mxu1 %vm108_vm0, %v6041_v19  ;;  %vm3097_vm15 = vcmp.eq.s32.totalorder %v11243_v62, %v2925_v13  ;;  %v11247_v41 = vld [vmem:[#allocation38_spill] sm:$0xff]  ;;  %v11251_v19 = vld [vmem:[#allocation40_spill] sm:$0xff] }
 0x7f0   :  { %v2966_v7 = vpop.xlane.xlu0 %2965  ;;  %v6042_v59 = vsel %vm3097_vm15, 1.0, %v11244_v4 }
 0x7f1   :  { %v2955_v6 = vadd.s32 %v2954_v23, %v2952_v14  ;;  %v2967_v56 = vcvt.f32.s32 %v2966_v7  ;;  %6679 = vmatmul.mubr.msk.f32.gmra.mrb[82].mxu1 %vm108_vm0, %v6042_v59  ;;  %vm3098_vm3 = vcmp.eq.s32.totalorder %v11243_v62, %v2940_v29  ;;  %v11255_v59 = vld [vmem:[#allocation42_spill] sm:$0xff] }
 0x7f2   :  { %v2981_v16 = vpop.xlane.xlu1 %2980  ;;  %v6043_v2 = vsel %vm3098_vm3, 1.0, %v11244_v4 }
 0x7f3   :  { %v2970_v5 = vadd.s32 %v2969_v3, %v2967_v56  ;;  %v2982_v27 = vcvt.f32.s32 %v2981_v16  ;;  %6681 = vmatprep.mubr.msk.f32.mxu1 %vm108_vm0, %v6043_v2  ;;  %vm3099_vm4 = vcmp.eq.s32.totalorder %v11243_v62, %v2955_v6  ;;  %v11253_v3 = vld [vmem:[#allocation43_spill] sm:$0xff]  ;;  %v11257_v56 = vld [vmem:[#allocation45_spill] sm:$0xff]  ;;  %v11259_v16 = vld [vmem:[#allocation44_spill] sm:$0xff] }
 0x7f4   :  { %v2996_v20 = vpop.xlane.xlu0 %2995  ;;  %v6044_v57 = vsel %vm3099_vm4, 1.0, %v11244_v4 }
 0x7f5   :  { %v2985_v8 = vadd.s32 %v2984_v31, %v2982_v27  ;;  %v2997_v55 = vcvt.f32.s32 %v2996_v20  ;;  %6682 = vmatmul.mubr.msk.f32.gmra.mrb[84].mxu1 %vm108_vm0, %v6044_v57  ;;  %vm3100_vm5 = vcmp.eq.s32.totalorder %v11243_v62, %v2970_v5  ;;  %v11261_v27 = vld [vmem:[#allocation47_spill] sm:$0xff]  ;;  %v11263_v20 = vld [vmem:[#allocation46_spill] sm:$0xff] }
 0x7f6   :  { %v3011_v1 = vpop.xlane.xlu1 %3010  ;;  %v6045_v63 = vsel %vm3100_vm5, 1.0, %v11244_v4 }
 0x7f7   :  { %v3000_v0 = vadd.s32 %v2999_v48, %v2997_v55  ;;  %v3012_v49 = vcvt.f32.s32 %v3011_v1  ;;  %6684 = vmatprep.mubr.msk.f32.mxu1 %vm108_vm0, %v6045_v63  ;;  %vm3101_vm6 = vcmp.eq.s32.totalorder %v11243_v62, %v2985_v8  ;;  %v11265_v8 = vld [vmem:[#allocation7_spill] sm:$0xff] }
 0x7f8   :  { %v3026_v58 = vpop.xlane.xlu0 %3025  ;;  %v6046_v12 = vsel %vm3101_vm6, 1.0, %v11244_v4 }
 0x7f9   :  { %v3015_v50 = vadd.s32 %v3014_v22, %v3012_v49  ;;  %v3027_v28 = vcvt.f32.s32 %v3026_v58  ;;  %6685 = vmatmul.mubr.msk.f32.gmra.mrb[86].mxu1 %vm108_vm0, %v6046_v12  ;;  %vm3102_vm7 = vcmp.eq.s32.totalorder %v11243_v62, %v3000_v0  ;;  %v11269_v0 = vld [vmem:[#allocation5_spill] sm:$0xff] }
 0x7fa   :  { %v3041_v17 = vpop.xlane.xlu1 %3040  ;;  %v6047_v32 = vsel %vm3102_vm7, 1.0, %v11244_v4 }
 0x7fb   :  { %v3030_v15 = vadd.s32 %v3029_v25, %v3027_v28  ;;  %v3042_v45 = vcvt.f32.s32 %v3041_v17  ;;  %6687 = vmatprep.mubr.msk.f32.mxu1 %vm108_vm0, %v6047_v32  ;;  %vm3103_vm8 = vcmp.eq.s32.totalorder %v11243_v62, %v3015_v50  ;;  %v11271_v25 = vld [vmem:[#allocation6_spill] sm:$0xff]  ;;  %v11275_v28 = vld [vmem:[#allocation8_spill] sm:$0xff] }
 0x7fc   :  { %v3056_v52 = vpop.xlane.xlu0 %3055  ;;  %v6048_v43 = vsel %vm3103_vm8, 1.0, %v11244_v4 }
 0x7fd   :  { %v3045_v34 = vadd.s32 %v3044_v24, %v3042_v45  ;;  %v3057_v53 = vcvt.f32.s32 %v3056_v52  ;;  %6688 = vmatmul.mubr.msk.f32.gmra.mrb[88].mxu1 %vm108_vm0, %v6048_v43  ;;  %vm3104_vm9 = vcmp.eq.s32.totalorder %v11243_v62, %v3030_v15  ;;  %v11279_v45 = vld [vmem:[#allocation10_spill] sm:$0xff] }
 0x7fe   :  { %v3071_v38 = vpop.xlane.xlu1 %3070  ;;  %v6049_v54 = vsel %vm3104_vm9, 1.0, %v11244_v4 }
 0x7ff   :  { %v3060_v30 = vadd.s32 %v3059_v37, %v3057_v53  ;;  %v3072_v39 = vcvt.f32.s32 %v3071_v38  ;;  %6690 = vmatprep.mubr.msk.f32.mxu1 %vm108_vm0, %v6049_v54  ;;  %vm3105_vm10 = vcmp.eq.s32.totalorder %v11243_v62, %v3045_v34  ;;  %v11281_v37 = vld [vmem:[#allocation15_spill] sm:$0xff]  ;;  %v11283_v53 = vld [vmem:[#allocation12_spill] sm:$0xff] }
 0x800   :  { %v6050_v10 = vsel %vm3105_vm10, 1.0, %v11244_v4 }
 0x801   :  { %v3075_v11 = vadd.s32 %v3074_v47, %v3072_v39  ;;  %6691 = vmatmul.mubr.msk.f32.gmra.mrb[90].mxu1 %vm108_vm0, %v6050_v10  ;;  %vm3106_vm11 = vcmp.eq.s32.totalorder %v11243_v62, %v3060_v30  ;;  %v11285_v30 = vld [vmem:[#allocation13_spill] sm:$0xff]  ;;  %v11287_v10 = vld [vmem:[#allocation14_spill] sm:$0xff] }
 0x802   :  { %v6051_v40 = vsel %vm3106_vm11, 1.0, %v11244_v4 }
 0x803   :  { %6693 = vmatprep.mubr.msk.f32.mxu1 %vm108_vm0, %v6051_v40  ;;  %vm3107_vm12 = vcmp.eq.s32.totalorder %v11243_v62, %v3075_v11 }
 0x804   :  { %v6052_v35 = vsel %vm3107_vm12, 1.0, %v11244_v4 }
 0x805   :  { %6694 = vmatmul.mubr.msk.f32.gmra.mrb[92].mxu1 %vm108_vm0, %v6052_v35  ;;  %v11289_v35 = vld [vmem:[#allocation16_spill] sm:$0xff] }
 0x89c   :  { %v6650_v9 = vpop.f32.mrb[62].mxu1 }
 0x89d   :  { %v9045_v21 = vsub.f32 %v11245_v44, %v6650_v9  ;;  %v9048_v13 = vadd.f32 %v6650_v9, %v11247_v41  ;;  %v3334_v18 = vpop.f32.mrb[63].mxu1  ;;  %v11291_v41 = vld [vmem:[#allocation49_spill] sm:$0xff] }
 0x89e   :  { %v9051_v33 = vsub.f32 %v11249_v51, %v3334_v18  ;;  %v9054_v23 = vadd.f32 %v3334_v18, %v11251_v19 }
 0x89f   :  { %11246 = vst [vmem:[#allocation70_spill] sm:$0xff] %v9045_v21  ;;  %11248 = vst [vmem:[#allocation71_spill] sm:$0xff] %v9048_v13 }
 0x8a0   :  { %11250 = vst [vmem:[#allocation72_spill] sm:$0xff] %v9051_v33  ;;  %11252 = vst [vmem:[#allocation73_spill] sm:$0xff] %v9054_v23  ;;  %v3724_v29 = vpack.c.bf16 %v9045_v21, %v9051_v33  ;;  %v6653_v14 = vpop.f32.mrb[64].mxu1  ;;  %v11347_v23 = vld [vmem:[#allocation63_spill] sm:$0xff] }
 0x8a1   :  { %v9059_v7 = vsub.f32 %v11253_v3, %v6653_v14  ;;  %v9062_v46 = vadd.f32 %v6653_v14, %v11255_v59  ;;  %v3344_v6 = vpop.f32.mrb[65].mxu1  ;;  %v11293_v14 = vld [vmem:[#allocation19_spill] sm:$0xff] }
 0x8a2   :  { %v9065_v31 = vsub.f32 %v11257_v56, %v3344_v6  ;;  %v9068_v2 = vadd.f32 %v3344_v6, %v11259_v16  ;;  %6698 = vmatprep.mubr.msk.bf16.mxu0 %vm635_vm2, %v3724_v29  ;;  %v11295_v6 = vld [vmem:[#allocation50_spill] sm:$0xff] }
 0x8a3   :  { %11254 = vst [vmem:[#allocation74_spill] sm:$0xff] %v9059_v7  ;;  %11256 = vst [vmem:[#allocation75_spill] sm:$0xff] %v9062_v46 }
 0x8a4   :  { %11258 = vst [vmem:[#allocation76_spill] sm:$0xff] %v9065_v31  ;;  %11260 = vst [vmem:[#allocation78_spill] sm:$0xff] %v9068_v2  ;;  %v3725_v36 = vpack.c.bf16 %v9059_v7, %v9065_v31  ;;  %v6656_v5 = vpop.f32.mrb[66].mxu1 }
 0x8a5   :  { %v9074_v60 = vsub.f32 %v11261_v27, %v6656_v5  ;;  %v9077_v57 = vadd.f32 %v6656_v5, %v11263_v20  ;;  %v3354_v48 = vpop.f32.mrb[67].mxu1  ;;  %v11297_v5 = vld [vmem:[#allocation18_spill] sm:$0xff] }
 0x8a6   :  { %v9080_v55 = vsub.f32 %v11265_v8, %v3354_v48  ;;  %v9083_v1 = vadd.f32 %v3354_v48, %v11267_v42  ;;  %6699 = vmatmul.mubr.msk.bf16.vlgmr.msra.gmra.mrb[100].mxu0 %vm635_vm2, %v3725_v36  ;;  %v11299_v48 = vld [vmem:[#allocation51_spill] sm:$0xff] }
 0x8a7   :  { %11262 = vst [vmem:[#allocation77_spill] sm:$0xff] %v9074_v60  ;;  %11264 = vst [vmem:[#allocation79_spill] sm:$0xff] %v9077_v57  ;;  %v11339_v57 = vld [vmem:[#allocation61_spill] sm:$0xff] }
 0x8a8   :  { %11266 = vst [vmem:[#allocation80_spill] sm:$0xff] %v9080_v55  ;;  %11268 = vst [vmem:[#allocation38_spill] sm:$0xff] %v9083_v1  ;;  %v3726_v63 = vpack.c.bf16 %v9074_v60, %v9080_v55  ;;  %v6659_v22 = vpop.f32.mrb[68].mxu1 }
 0x8a9   :  { %v9089_v49 = vsub.f32 %v11269_v0, %v6659_v22  ;;  %v9092_v58 = vadd.f32 %v6659_v22, %v11271_v25  ;;  %v3364_v12 = vpop.f32.mrb[69].mxu1  ;;  %v11301_v25 = vld [vmem:[#allocation17_spill] sm:$0xff] }
 0x8aa   :  { %v9095_v50 = vsub.f32 %v11273_v61, %v3364_v12  ;;  %v9098_v24 = vadd.f32 %v3364_v12, %v11275_v28  ;;  %6702 = vmatprep.mubr.msk.bf16.mxu0 %vm635_vm2, %v3726_v63  ;;  %v11303_v28 = vld [vmem:[#allocation52_spill] sm:$0xff] }
 0x8ab   :  { %11270 = vst [vmem:[#allocation40_spill] sm:$0xff] %v9089_v49  ;;  %11272 = vst [vmem:[#allocation42_spill] sm:$0xff] %v9092_v58  ;;  %v11335_v58 = vld [vmem:[#allocation60_spill] sm:$0xff] }
 0x8ac   :  { %11274 = vst [vmem:[#allocation44_spill] sm:$0xff] %v9095_v50  ;;  %11276 = vst [vmem:[#allocation46_spill] sm:$0xff] %v9098_v24  ;;  %v3727_v17 = vpack.c.bf16 %v9089_v49, %v9095_v50  ;;  %v6662_v32 = vpop.f32.mrb[70].mxu1 }
 0x8ad   :  { %v9104_v15 = vsub.f32 %v11277_v26, %v6662_v32  ;;  %v9107_v52 = vadd.f32 %v6662_v32, %v11279_v45  ;;  %v3374_v43 = vpop.f32.mrb[71].mxu1  ;;  %v11305_v45 = vld [vmem:[#allocation20_spill] sm:$0xff] }
 0x8ae   :  { %v9110_v34 = vsub.f32 %v11281_v37, %v3374_v43  ;;  %v9113_v38 = vadd.f32 %v3374_v43, %v11283_v53  ;;  %6703 = vmatmul.mubr.msk.bf16.gmra.mrb[104].mxu0 %vm635_vm2, %v3727_v17  ;;  %v11307_v53 = vld [vmem:[#allocation53_spill] sm:$0xff] }
 0x8af   :  { %11278 = vst [vmem:[#allocation48_spill] sm:$0xff] %v9104_v15  ;;  %11280 = vst [vmem:[#allocation6_spill] sm:$0xff] %v9107_v52  ;;  %v11331_v52 = vld [vmem:[#allocation59_spill] sm:$0xff] }
 0x8b0   :  { %11282 = vst [vmem:[#allocation8_spill] sm:$0xff] %v9110_v34  ;;  %11284 = vst [vmem:[#allocation10_spill] sm:$0xff] %v9113_v38  ;;  %v3728_v54 = vpack.c.bf16 %v9104_v15, %v9110_v34  ;;  %v6665_v47 = vpop.f32.mrb[72].mxu1 }
 0x8b1   :  { %v9119_v39 = vsub.f32 %v11285_v30, %v6665_v47  ;;  %v9122_v11 = vadd.f32 %v6665_v47, %v11287_v10  ;;  %v3384_v40 = vpop.f32.mrb[73].mxu1 }
 0x8b2   :  { %v9125_v9 = vsub.f32 %v11289_v35, %v3384_v40  ;;  %v9128_v18 = vadd.f32 %v3384_v40, %v11291_v41  ;;  %6706 = vmatprep.mubr.msk.bf16.mxu0 %vm635_vm2, %v3728_v54  ;;  %v11309_v40 = vld [vmem:[#allocation23_spill] sm:$0xff] }
 0x8b3   :  { %11286 = vst [vmem:[#allocation12_spill] sm:$0xff] %v9119_v39  ;;  %11288 = vst [vmem:[#allocation14_spill] sm:$0xff] %v9122_v11  ;;  %v11327_v11 = vld [vmem:[#allocation58_spill] sm:$0xff] }
 0x8b4   :  { %11290 = vst [vmem:[#allocation81_spill] sm:$0xff] %v9125_v9  ;;  %11292 = vst [vmem:[#allocation49_spill] sm:$0xff] %v9128_v18  ;;  %v3729_v19 = vpack.c.bf16 %v9119_v39, %v9125_v9  ;;  %v6668_v29 = vpop.f32.mrb[74].mxu1 }
 0x8b5   :  { %v9134_v59 = vsub.f32 %v11293_v14, %v6668_v29  ;;  %v9137_v16 = vadd.f32 %v6668_v29, %v11295_v6  ;;  %v3394_v36 = vpop.f32.mrb[75].mxu1 }
 0x8b6   :  { %v9140_v20 = vsub.f32 %v11297_v5, %v3394_v36  ;;  %v9143_v42 = vadd.f32 %v3394_v36, %v11299_v48  ;;  %6707 = vmatmul.mubr.msk.bf16.gmra.mrb[108].mxu0 %vm635_vm2, %v3729_v19  ;;  %v11311_v19 = vld [vmem:[#allocation54_spill] sm:$0xff] }
 0x8b7   :  { %11294 = vst [vmem:[#allocation82_spill] sm:$0xff] %v9134_v59  ;;  %11296 = vst [vmem:[#allocation50_spill] sm:$0xff] %v9137_v16  ;;  %v11313_v36 = vld [vmem:[#allocation22_spill] sm:$0xff]  ;;  %v11323_v16 = vld [vmem:[#allocation57_spill] sm:$0xff] }
 0x8b8   :  { %11298 = vst [vmem:[#allocation83_spill] sm:$0xff] %v9140_v20  ;;  %11300 = vst [vmem:[#allocation51_spill] sm:$0xff] %v9143_v42  ;;  %v3730_v63 = vpack.c.bf16 %v9134_v59, %v9140_v20  ;;  %v6671_v22 = vpop.f32.mrb[76].mxu1 }
 0x8b9   :  { %v9149_v12 = vsub.f32 %v11301_v25, %v6671_v22  ;;  %v9152_v17 = vadd.f32 %v6671_v22, %v11303_v28  ;;  %v3404_v32 = vpop.f32.mrb[77].mxu1  ;;  %v11315_v22 = vld [vmem:[#allocation55_spill] sm:$0xff] }
 0x8ba   :  { %v9155_v43 = vsub.f32 %v11305_v45, %v3404_v32  ;;  %v9158_v54 = vadd.f32 %v3404_v32, %v11307_v53  ;;  %6710 = vmatprep.mubr.msk.bf16.mxu0 %vm635_vm2, %v3730_v63  ;;  %v11317_v53 = vld [vmem:[#allocation21_spill] sm:$0xff] }
 0x8bb   :  { %11302 = vst [vmem:[#allocation84_spill] sm:$0xff] %v9149_v12  ;;  %11304 = vst [vmem:[#allocation52_spill] sm:$0xff] %v9152_v17  ;;  %v11319_v17 = vld [vmem:[#allocation56_spill] sm:$0xff] }
 0x8bc   :  { %11306 = vst [vmem:[#allocation85_spill] sm:$0xff] %v9155_v43  ;;  %11308 = vst [vmem:[#allocation53_spill] sm:$0xff] %v9158_v54  ;;  %v3731_v47 = vpack.c.bf16 %v9149_v12, %v9155_v43  ;;  %v6674_v10 = vpop.f32.mrb[78].mxu1 }
 0x8bd   :  { %v9164_v41 = vsub.f32 %v11309_v40, %v6674_v10  ;;  %v9167_v29 = vadd.f32 %v6674_v10, %v11311_v19  ;;  %v3414_v6 = vpop.f32.mrb[79].mxu1  ;;  %v11321_v19 = vld [vmem:[#allocation24_spill] sm:$0xff] }
 0x8be   :  { %v9170_v48 = vsub.f32 %v11313_v36, %v3414_v6  ;;  %v9173_v28 = vadd.f32 %v3414_v6, %v11315_v22  ;;  %6711 = vmatmul.mubr.msk.bf16.gmra.mrb[112].mxu0 %vm635_vm2, %v3731_v47  ;;  %v11325_v22 = vld [vmem:[#allocation27_spill] sm:$0xff] }
 0x8bf   :  { %11310 = vst [vmem:[#allocation86_spill] sm:$0xff] %v9164_v41  ;;  %11312 = vst [vmem:[#allocation54_spill] sm:$0xff] %v9167_v29 }
 0x8c0   :  { %11314 = vst [vmem:[#allocation87_spill] sm:$0xff] %v9170_v48  ;;  %11316 = vst [vmem:[#allocation55_spill] sm:$0xff] %v9173_v28  ;;  %v3732_v63 = vpack.c.bf16 %v9164_v41, %v9170_v48  ;;  %v6677_v32 = vpop.f32.mrb[80].mxu1 }
 0x8c1   :  { %v9179_v54 = vsub.f32 %v11317_v53, %v6677_v32  ;;  %v9182_v42 = vadd.f32 %v6677_v32, %v11319_v17  ;;  %v3424_v10 = vpop.f32.mrb[81].mxu1  ;;  %v11329_v32 = vld [vmem:[#allocation26_spill] sm:$0xff] }
 0x8c2   :  { %v9185_v29 = vsub.f32 %v11321_v19, %v3424_v10  ;;  %v9188_v18 = vadd.f32 %v3424_v10, %v11323_v16  ;;  %6714 = vmatprep.mubr.msk.bf16.mxu0 %vm635_vm2, %v3732_v63  ;;  %v11333_v10 = vld [vmem:[#allocation25_spill] sm:$0xff] }
 0x8c3   :  { %11318 = vst [vmem:[#allocation88_spill] sm:$0xff] %v9179_v54  ;;  %11320 = vst [vmem:[#allocation56_spill] sm:$0xff] %v9182_v42 }
 0x8c4   :  { %11322 = vst [vmem:[#allocation89_spill] sm:$0xff] %v9185_v29  ;;  %11324 = vst [vmem:[#allocation57_spill] sm:$0xff] %v9188_v18  ;;  %v3733_v47 = vpack.c.bf16 %v9179_v54, %v9185_v29  ;;  %v6680_v6 = vpop.f32.mrb[82].mxu1 }
 0x8c5   :  { %v9194_v28 = vsub.f32 %v11325_v22, %v6680_v6  ;;  %v9197_v38 = vadd.f32 %v6680_v6, %v11327_v11  ;;  %v3434_v17 = vpop.f32.mrb[83].mxu1  ;;  %v11337_v6 = vld [vmem:[#allocation28_spill] sm:$0xff] }
 0x8c6   :  { %v9200_v42 = vsub.f32 %v11329_v32, %v3434_v17  ;;  %v9203_v24 = vadd.f32 %v3434_v17, %v11331_v52  ;;  %6715 = vmatmul.mubr.msk.bf16.gmra.mrb[116].mxu0 %vm635_vm2, %v3733_v47  ;;  %v11341_v17 = vld [vmem:[#allocation31_spill] sm:$0xff] }
 0x8c7   :  { %11326 = vst [vmem:[#allocation90_spill] sm:$0xff] %v9194_v28  ;;  %11328 = vst [vmem:[#allocation58_spill] sm:$0xff] %v9197_v38 }
 0x8c8   :  { %11330 = vst [vmem:[#allocation91_spill] sm:$0xff] %v9200_v42  ;;  %11332 = vst [vmem:[#allocation59_spill] sm:$0xff] %v9203_v24  ;;  %v3734_v16 = vpack.c.bf16 %v9194_v28, %v9200_v42  ;;  %v6683_v63 = vpop.f32.mrb[84].mxu1 }
 0x8c9   :  { %v9209_v18 = vsub.f32 %v11333_v10, %v6683_v63  ;;  %v9212_v1 = vadd.f32 %v6683_v63, %v11335_v58  ;;  %v3444_v11 = vpop.f32.mrb[85].mxu1  ;;  %v11343_v10 = vld [vmem:[#allocation62_spill] sm:$0xff] }
 0x8ca   :  { %v9215_v38 = vsub.f32 %v11337_v6, %v3444_v11  ;;  %v9218_v2 = vadd.f32 %v3444_v11, %v11339_v57  ;;  %6718 = vmatprep.mubr.msk.bf16.mxu0 %vm635_vm2, %v3734_v16  ;;  %v11345_v63 = vld [vmem:[#allocation30_spill] sm:$0xff]  ;;  %v11349_v11 = vld [vmem:[#allocation29_spill] sm:$0xff] }
 0x8cb   :  { %11334 = vst [vmem:[#allocation92_spill] sm:$0xff] %v9209_v18  ;;  %11336 = vst [vmem:[#allocation60_spill] sm:$0xff] %v9212_v1 }
 0x8cc   :  { %11338 = vst [vmem:[#allocation93_spill] sm:$0xff] %v9215_v38  ;;  %11340 = vst [vmem:[#allocation61_spill] sm:$0xff] %v9218_v2  ;;  %v3735_v52 = vpack.c.bf16 %v9209_v18, %v9215_v38  ;;  %v6686_v47 = vpop.f32.mrb[86].mxu1 }
 0x8cd   :  { %v9224_v24 = vsub.f32 %v11341_v17, %v6686_v47  ;;  %v9227_v46 = vadd.f32 %v6686_v47, %v11343_v10  ;;  %v3454_v58 = vpop.f32.mrb[87].mxu1  ;;  %v11351_v17 = vld [vmem:[#allocation64_spill] sm:$0xff] }
 0x8ce   :  { %v9230_v1 = vsub.f32 %v11345_v63, %v3454_v58  ;;  %v9233_v13 = vadd.f32 %v3454_v58, %v11347_v23  ;;  %6719 = vmatmul.mubr.msk.bf16.gmra.mrb[120].mxu0 %vm635_vm2, %v3735_v52  ;;  %v11353_v47 = vld [vmem:[#allocation32_spill] sm:$0xff]  ;;  %v11355_v63 = vld [vmem:[#allocation65_spill] sm:$0xff]  ;;  %v11357_v58 = vld [vmem:[#allocation35_spill] sm:$0xff] }
 0x8cf   :  { %11342 = vst [vmem:[#allocation94_spill] sm:$0xff] %v9224_v24  ;;  %11344 = vst [vmem:[#allocation62_spill] sm:$0xff] %v9227_v46 }
 0x8d0   :  { %11346 = vst [vmem:[#allocation95_spill] sm:$0xff] %v9230_v1  ;;  %11348 = vst [vmem:[#allocation63_spill] sm:$0xff] %v9233_v13  ;;  %v3736_v57 = vpack.c.bf16 %v9224_v24, %v9230_v1  ;;  %v6689_v16 = vpop.f32.mrb[88].mxu1 }
 0x8d1   :  { %v9239_v2 = vsub.f32 %v11349_v11, %v6689_v16  ;;  %v9242_v18 = vadd.f32 %v6689_v16, %v11351_v17  ;;  %v3464_v10 = vpop.f32.mrb[89].mxu1  ;;  %v11359_v11 = vld [vmem:[#allocation66_spill] sm:$0xff] }
 0x8d2   :  { %v9245_v46 = vsub.f32 %v11353_v47, %v3464_v10  ;;  %v9248_v38 = vadd.f32 %v3464_v10, %v11355_v63  ;;  %6722 = vmatprep.mubr.msk.bf16.mxu0 %vm635_vm2, %v3736_v57  ;;  %v11361_v16 = vld [vmem:[#allocation34_spill] sm:$0xff]  ;;  %v11363_v47 = vld [vmem:[#allocation67_spill] sm:$0xff]  ;;  %v11365_v10 = vld [vmem:[#allocation33_spill] sm:$0xff] }
 0x8d3   :  { %11350 = vst [vmem:[#allocation96_spill] sm:$0xff] %v9239_v2  ;;  %11352 = vst [vmem:[#allocation64_spill] sm:$0xff] %v9242_v18 }
 0x8d4   :  { %11354 = vst [vmem:[#allocation97_spill] sm:$0xff] %v9245_v46  ;;  %11356 = vst [vmem:[#allocation65_spill] sm:$0xff] %v9248_v38  ;;  %v3737_v23 = vpack.c.bf16 %v9239_v2, %v9245_v46  ;;  %v6692_v52 = vpop.f32.mrb[90].mxu1 }
 0x8d5   :  { %v9254_v13 = vsub.f32 %v11357_v58, %v6692_v52  ;;  %v9257_v24 = vadd.f32 %v6692_v52, %v11359_v11  ;;  %v3474_v17 = vpop.f32.mrb[91].mxu1  ;;  %v11367_v58 = vld [vmem:[#allocation68_spill] sm:$0xff] }
 0x8d6   :  { %v9260_v18 = vsub.f32 %v11361_v16, %v3474_v17  ;;  %v9263_v1 = vadd.f32 %v3474_v17, %v11363_v47  ;;  %6723 = vmatmul.mubr.msk.bf16.gmra.mrb[124].mxu0 %vm635_vm2, %v3737_v23  ;;  %v11369_v52 = vld [vmem:[#allocation36_spill] sm:$0xff]  ;;  %v11371_v16 = vld [vmem:[#allocation69_spill] sm:$0xff]  ;;  %v9287_v23 = vld [vmem:[%s10834_s2 + $0x90] ss:$0 sm:$0xff] }
 0x8d7   :  { %11358 = vst [vmem:[#allocation98_spill] sm:$0xff] %v9254_v13  ;;  %11360 = vst [vmem:[#allocation66_spill] sm:$0xff] %v9257_v24 }
 0x8d8   :  { %11362 = vst [vmem:[#allocation99_spill] sm:$0xff] %v9260_v18  ;;  %11364 = vst [vmem:[#allocation67_spill] sm:$0xff] %v9263_v1  ;;  %v3738_v63 = vpack.c.bf16 %v9254_v13, %v9260_v18  ;;  %v6695_v57 = vpop.f32.mrb[92].mxu1 }
 0x8d9   :  { %v9269_v38 = vsub.f32 %v11365_v10, %v6695_v57  ;;  %v9272_v2 = vadd.f32 %v6695_v57, %v11367_v58  ;;  %v3484_v11 = vpop.f32.mrb[93].mxu1 }
 0x8da   :  { %v9275_v24 = vsub.f32 %v11369_v52, %v3484_v11  ;;  %v9278_v46 = vadd.f32 %v3484_v11, %v11371_v16  ;;  %6726 = vmatprep.mubr.msk.bf16.mxu0 %vm635_vm2, %v3738_v63 }
 0x8db   :  { %11366 = vst [vmem:[#allocation100_spill] sm:$0xff] %v9269_v38  ;;  %11368 = vst [vmem:[#allocation68_spill] sm:$0xff] %v9272_v2 }
 0x8dc   :  { %11370 = vst [vmem:[#allocation101_spill] sm:$0xff] %v9275_v24  ;;  %11372 = vst [vmem:[#allocation69_spill] sm:$0xff] %v9278_v46  ;;  %v3739_v47 = vpack.c.bf16 %v9269_v38, %v9275_v24 }
 0x8de   :  { %6727 = vmatmul.mubr.msk.bf16.gmra.mrb[128].mxu0 %vm635_vm2, %v3739_v47 }
 0x979   :  { %v6700_v58 = vpop.f32.mrb[100].mxu0 }
 0x97a   :  { %v3828_v17 = vpop.f32.mrb[101].mxu0  ;;  %v9293_v11 = vadd.f32 %v6700_v58, %v9287_v23 }
 0x97b   :  { %v9290_v57 = vadd.f32 %v9287_v23, %v3828_v17  ;;  %v6701_v2 = vpop.f32.mrb[102].mxu0 }
 0x97c   :  { %v3831_v16 = vpop.f32.mrb[103].mxu0  ;;  %v9301_v38 = vadd.f32 %v6701_v2, %v9287_v23  ;;  %v3997_v1 = vsel %vm108_vm0, %v9293_v11, inf }
 0x97d   :  { %v9296_v63 = vadd.f32 %v9287_v23, %v3831_v16  ;;  %v3991_v47 = vsel %vm108_vm0, %v9290_v57, inf }
 0x97e   :  { %3992 = vmin.xlane.f32.xlu0 %v3991_v47  ;;  %v4000_v47 = vsel %vm108_vm0, %v9301_v38, inf }
 0x97f   :  { %v3994_v46 = vsel %vm108_vm0, %v9296_v63, inf }
 0x980   :  { %3995 = vmin.xlane.f32.xlu1 %v3994_v46 }
 0x981   :  { %v6704_v17 = vpop.f32.mrb[104].mxu0 }
 0x982   :  { %3998 = vmin.xlane.f32.xlu0 %v3997_v1  ;;  %v3844_v58 = vpop.f32.mrb[105].mxu0  ;;  %v9313_v24 = vadd.f32 %v6704_v17, %v9287_v23 }
 0x983   :  { %v9308_v16 = vadd.f32 %v9287_v23, %v3844_v58  ;;  %v6705_v10 = vpop.f32.mrb[106].mxu0 }
 0x984   :  { %4001 = vmin.xlane.f32.xlu1 %v4000_v47  ;;  %v3847_v2 = vpop.f32.mrb[107].mxu0  ;;  %v9321_v1 = vadd.f32 %v6705_v10, %v9287_v23  ;;  %v4009_v47 = vsel %vm108_vm0, %v9313_v24, inf }
 0x985   :  { %v9316_v46 = vadd.f32 %v9287_v23, %v3847_v2  ;;  %v4003_v52 = vsel %vm108_vm0, %v9308_v16, inf }
 0x986   :  { %4004 = vmin.xlane.f32.xlu0 %v4003_v52  ;;  %v4012_v52 = vsel %vm108_vm0, %v9321_v1, inf }
 0x987   :  { %v4006_v58 = vsel %vm108_vm0, %v9316_v46, inf }
 0x988   :  { %4007 = vmin.xlane.f32.xlu1 %v4006_v58 }
 0x989   :  { %v6708_v13 = vpop.f32.mrb[108].mxu0 }
 0x98a   :  { %4010 = vmin.xlane.f32.xlu0 %v4009_v47  ;;  %v3860_v17 = vpop.f32.mrb[109].mxu0  ;;  %v9333_v22 = vadd.f32 %v6708_v13, %v9287_v23 }
 0x98b   :  { %v9328_v2 = vadd.f32 %v9287_v23, %v3860_v17  ;;  %v6709_v18 = vpop.f32.mrb[110].mxu0 }
 0x98c   :  { %4013 = vmin.xlane.f32.xlu1 %v4012_v52  ;;  %v3863_v10 = vpop.f32.mrb[111].mxu0  ;;  %v9341_v47 = vadd.f32 %v6709_v18, %v9287_v23  ;;  %v4021_v52 = vsel %vm108_vm0, %v9333_v22, inf }
 0x98d   :  { %v9336_v58 = vadd.f32 %v9287_v23, %v3863_v10  ;;  %v4015_v42 = vsel %vm108_vm0, %v9328_v2, inf }
 0x98e   :  { %4016 = vmin.xlane.f32.xlu0 %v4015_v42  ;;  %v4024_v42 = vsel %vm108_vm0, %v9341_v47, inf }
 0x98f   :  { %v4018_v17 = vsel %vm108_vm0, %v9336_v58, inf }
 0x990   :  { %4019 = vmin.xlane.f32.xlu1 %v4018_v17 }
 0x991   :  { %v6712_v54 = vpop.f32.mrb[112].mxu0 }
 0x992   :  { %4022 = vmin.xlane.f32.xlu0 %v4021_v52  ;;  %v3876_v13 = vpop.f32.mrb[113].mxu0  ;;  %v9353_v41 = vadd.f32 %v6712_v54, %v9287_v23 }
 0x993   :  { %v9348_v10 = vadd.f32 %v9287_v23, %v3876_v13  ;;  %v6713_v29 = vpop.f32.mrb[114].mxu0 }
 0x994   :  { %4025 = vmin.xlane.f32.xlu1 %v4024_v42  ;;  %v3879_v18 = vpop.f32.mrb[115].mxu0  ;;  %v9361_v52 = vadd.f32 %v6713_v29, %v9287_v23  ;;  %v4033_v42 = vsel %vm108_vm0, %v9353_v41, inf }
 0x995   :  { %v9356_v17 = vadd.f32 %v9287_v23, %v3879_v18  ;;  %v4027_v48 = vsel %vm108_vm0, %v9348_v10, inf }
 0x996   :  { %4028 = vmin.xlane.f32.xlu0 %v4027_v48  ;;  %v4036_v48 = vsel %vm108_vm0, %v9361_v52, inf }
 0x997   :  { %v4030_v13 = vsel %vm108_vm0, %v9356_v17, inf }
 0x998   :  { %4031 = vmin.xlane.f32.xlu1 %v4030_v13 }
 0x999   :  { %v6716_v12 = vpop.f32.mrb[116].mxu0 }
 0x99a   :  { %4034 = vmin.xlane.f32.xlu0 %v4033_v42  ;;  %v3892_v54 = vpop.f32.mrb[117].mxu0  ;;  %v9373_v59 = vadd.f32 %v6716_v12, %v9287_v23 }
 0x99b   :  { %v9368_v18 = vadd.f32 %v9287_v23, %v3892_v54  ;;  %v6717_v43 = vpop.f32.mrb[118].mxu0 }
 0x99c   :  { %4037 = vmin.xlane.f32.xlu1 %v4036_v48  ;;  %v3895_v29 = vpop.f32.mrb[119].mxu0  ;;  %v9381_v42 = vadd.f32 %v6717_v43, %v9287_v23  ;;  %v4045_v48 = vsel %vm108_vm0, %v9373_v59, inf }
 0x99d   :  { %v9376_v13 = vadd.f32 %v9287_v23, %v3895_v29  ;;  %v4039_v4 = vsel %vm108_vm0, %v9368_v18, inf }
 0x99e   :  { %4040 = vmin.xlane.f32.xlu0 %v4039_v4  ;;  %v4048_v4 = vsel %vm108_vm0, %v9381_v42, inf }
 0x99f   :  { %v4042_v54 = vsel %vm108_vm0, %v9376_v13, inf }
 0x9a0   :  { %4043 = vmin.xlane.f32.xlu1 %v4042_v54 }
 0x9a1   :  { %v6720_v20 = vpop.f32.mrb[120].mxu0 }
 0x9a2   :  { %4046 = vmin.xlane.f32.xlu0 %v4045_v48  ;;  %v3908_v12 = vpop.f32.mrb[121].mxu0  ;;  %v9393_v9 = vadd.f32 %v6720_v20, %v9287_v23 }
 0x9a3   :  { %v9388_v29 = vadd.f32 %v9287_v23, %v3908_v12  ;;  %v6721_v39 = vpop.f32.mrb[122].mxu0 }
 0x9a4   :  { %4049 = vmin.xlane.f32.xlu1 %v4048_v4  ;;  %v3911_v43 = vpop.f32.mrb[123].mxu0  ;;  %v9401_v48 = vadd.f32 %v6721_v39, %v9287_v23  ;;  %v4057_v4 = vsel %vm108_vm0, %v9393_v9, inf }
 0x9a5   :  { %v9396_v54 = vadd.f32 %v9287_v23, %v3911_v43  ;;  %v4051_v15 = vsel %vm108_vm0, %v9388_v29, inf }
 0x9a6   :  { %4052 = vmin.xlane.f32.xlu0 %v4051_v15  ;;  %v4060_v15 = vsel %vm108_vm0, %v9401_v48, inf }
 0x9a7   :  { %v4054_v12 = vsel %vm108_vm0, %v9396_v54, inf }
 0x9a8   :  { %4055 = vmin.xlane.f32.xlu1 %v4054_v12 }
 0x9a9   :  { %v6724_v34 = vpop.f32.mrb[124].mxu0 }
 0x9aa   :  { %4058 = vmin.xlane.f32.xlu0 %v4057_v4  ;;  %v3924_v20 = vpop.f32.mrb[125].mxu0  ;;  %v9413_v50 = vadd.f32 %v6724_v34, %v9287_v23 }
 0x9ab   :  { %v9408_v43 = vadd.f32 %v9287_v23, %v3924_v20  ;;  %v6725_v49 = vpop.f32.mrb[126].mxu0 }
 0x9ac   :  { %4061 = vmin.xlane.f32.xlu1 %v4060_v15  ;;  %v3927_v39 = vpop.f32.mrb[127].mxu0  ;;  %v9421_v4 = vadd.f32 %v6725_v49, %v9287_v23  ;;  %v4069_v15 = vsel %vm108_vm0, %v9413_v50, inf }
 0x9ad   :  { %v9416_v12 = vadd.f32 %v9287_v23, %v3927_v39  ;;  %v4063_v60 = vsel %vm108_vm0, %v9408_v43, inf }
 0x9ae   :  { %4064 = vmin.xlane.f32.xlu0 %v4063_v60  ;;  %v4072_v60 = vsel %vm108_vm0, %v9421_v4, inf }
 0x9af   :  { %v4066_v20 = vsel %vm108_vm0, %v9416_v12, inf }
 0x9b0   :  { %4067 = vmin.xlane.f32.xlu1 %v4066_v20 }
 0x9b1   :  { %v6728_v6 = vpop.f32.mrb[128].mxu0 }
 0x9b2   :  { %4070 = vmin.xlane.f32.xlu0 %v4069_v15  ;;  %v3940_v34 = vpop.f32.mrb[129].mxu0  ;;  %v9433_v28 = vadd.f32 %v6728_v6, %v9287_v23 }
 0x9b3   :  { %v9428_v39 = vadd.f32 %v9287_v23, %v3940_v34  ;;  %v6729_v55 = vpop.f32.mrb[130].mxu0 }
 0x9b4   :  { %4073 = vmin.xlane.f32.xlu1 %v4072_v60  ;;  %v3943_v49 = vpop.f32.mrb[131].mxu0  ;;  %v9441_v15 = vadd.f32 %v6729_v55, %v9287_v23  ;;  %v4081_v60 = vsel %vm108_vm0, %v9433_v28, inf }
 0x9b5   :  { %v9436_v20 = vadd.f32 %v9287_v23, %v3943_v49  ;;  %v4075_v7 = vsel %vm108_vm0, %v9428_v39, inf }
 0x9b6   :  { %4076 = vmin.xlane.f32.xlu0 %v4075_v7  ;;  %v4084_v6 = vsel %vm108_vm0, %v9441_v15, inf }
 0x9b7   :  { %v4078_v34 = vsel %vm108_vm0, %v9436_v20, inf }
 0x9b8   :  { %4079 = vmin.xlane.f32.xlu1 %v4078_v34 }
 0x9ba   :  { %4082 = vmin.xlane.f32.xlu0 %v4081_v60 }
 0x9bc   :  { %4085 = vmin.xlane.f32.xlu1 %v4084_v6 }
 0xa0b   :  { %v3993_v49 = vpop.xlane.xlu0 %3992 }
 0xa0c   :  { %vm4087_vm13 = vcmp.le.f32.partialorder %v9290_v57, %v3993_v49 }
 0xa0d   :  { %v4119_v7 = vsel %vm4087_vm13, %v11243_v62, 32  ;;  %v3996_v31 = vpop.xlane.xlu1 %3995 }
 0xa0e   :  { %v9452_v55 = vsel %vm108_vm0, %v4119_v7, 2147483647  ;;  %vm4088_vm14 = vcmp.le.f32.partialorder %v9296_v63, %v3996_v31 }
 0xa0f   :  { %v4120_v23 = vsel %vm4088_vm14, %v11243_v62, 32  ;;  %v3999_v34 = vpop.xlane.xlu0 %3998  ;;  %v4153_v60 = vshra.s32 %v9452_v55, 16 }
 0xa10   :  { %v9458_v21 = vsel %vm108_vm0, %v4120_v23, 2147483647  ;;  %vm4089_vm15 = vcmp.le.f32.partialorder %v9293_v11, %v3999_v34 }
 0xa11   :  { %v4121_v57 = vsel %vm4089_vm15, %v11243_v62, 32  ;;  %v4002_v6 = vpop.xlane.xlu1 %4001  ;;  %v9462_v49 = vcvt.s32.f32 %v4153_v60  ;;  %v4168_v7 = vshra.s32 %v9458_v21, 16 }
 0xa12   :  { %v9466_v33 = vsel %vm108_vm0, %v4121_v57, 2147483647  ;;  %vm4090_vm3 = vcmp.le.f32.partialorder %v9301_v38, %v4002_v6 }
 0xa13   :  { %v4122_v31 = vsel %vm4090_vm3, %v11243_v62, 32  ;;  %v4005_v63 = vpop.xlane.xlu0 %4004  ;;  %4156 = vmin.xlane.f32.xlu0 %v9462_v49  ;;  %v9471_v23 = vcvt.s32.f32 %v4168_v7  ;;  %v4183_v11 = vshra.s32 %v9466_v33, 16 }
 0xa14   :  { %v9475_v34 = vsel %vm108_vm0, %v4122_v31, 2147483647  ;;  %vm4091_vm4 = vcmp.le.f32.partialorder %v9308_v16, %v4005_v63 }
 0xa15   :  { %v4123_v60 = vsel %vm4091_vm4, %v11243_v62, 32  ;;  %4171 = vmin.xlane.f32.xlu1 %v9471_v23  ;;  %v4008_v57 = vpop.xlane.xlu1 %4007  ;;  %v9480_v38 = vcvt.s32.f32 %v4183_v11  ;;  %v4198_v6 = vshra.s32 %v9475_v34, 16 }
 0xa16   :  { %v9484_v32 = vsel %vm108_vm0, %v4123_v60, 2147483647  ;;  %vm4092_vm5 = vcmp.le.f32.partialorder %v9316_v46, %v4008_v57 }
 0xa17   :  { %v4124_v7 = vsel %vm4092_vm5, %v11243_v62, 32  ;;  %v4011_v31 = vpop.xlane.xlu0 %4010  ;;  %4186 = vmin.xlane.f32.xlu0 %v9480_v38  ;;  %v9489_v16 = vcvt.s32.f32 %v4198_v6  ;;  %v4213_v63 = vshra.s32 %v9484_v32, 16 }
 0xa18   :  { %v9493_v53 = vsel %vm108_vm0, %v4124_v7, 2147483647  ;;  %vm4093_vm6 = vcmp.le.f32.partialorder %v9313_v24, %v4011_v31 }
 0xa19   :  { %v4125_v11 = vsel %vm4093_vm6, %v11243_v62, 32  ;;  %4201 = vmin.xlane.f32.xlu1 %v9489_v16  ;;  %v4014_v60 = vpop.xlane.xlu1 %4013  ;;  %v9498_v46 = vcvt.s32.f32 %v4213_v63  ;;  %v4228_v57 = vshra.s32 %v9493_v53, 16 }
 0xa1a   :  { %v9502_v19 = vsel %vm108_vm0, %v4125_v11, 2147483647  ;;  %vm4094_vm7 = vcmp.le.f32.partialorder %v9321_v1, %v4014_v60 }
 0xa1b   :  { %v4126_v6 = vsel %vm4094_vm7, %v11243_v62, 32  ;;  %v4017_v7 = vpop.xlane.xlu0 %4016  ;;  %4216 = vmin.xlane.f32.xlu0 %v9498_v46  ;;  %v9507_v24 = vcvt.s32.f32 %v4228_v57  ;;  %v4243_v31 = vshra.s32 %v9502_v19, 16 }
 0xa1c   :  { %v9511_v40 = vsel %vm108_vm0, %v4126_v6, 2147483647  ;;  %vm4095_vm8 = vcmp.le.f32.partialorder %v9328_v2, %v4017_v7 }
 0xa1d   :  { %v4127_v63 = vsel %vm4095_vm8, %v11243_v62, 32  ;;  %4231 = vmin.xlane.f32.xlu1 %v9507_v24  ;;  %v4020_v11 = vpop.xlane.xlu1 %4019  ;;  %v9516_v1 = vcvt.s32.f32 %v4243_v31  ;;  %v4258_v60 = vshra.s32 %v9511_v40, 16 }
 0xa1e   :  { %v9520_v36 = vsel %vm108_vm0, %v4127_v63, 2147483647  ;;  %vm4096_vm9 = vcmp.le.f32.partialorder %v9336_v58, %v4020_v11 }
 0xa1f   :  { %v4128_v57 = vsel %vm4096_vm9, %v11243_v62, 32  ;;  %v4023_v6 = vpop.xlane.xlu0 %4022  ;;  %4246 = vmin.xlane.f32.xlu0 %v9516_v1  ;;  %v9525_v2 = vcvt.s32.f32 %v4258_v60  ;;  %v4273_v7 = vshra.s32 %v9520_v36, 16 }
 0xa20   :  { %v9529_v25 = vsel %vm108_vm0, %v4128_v57, 2147483647  ;;  %vm4097_vm10 = vcmp.le.f32.partialorder %v9333_v22, %v4023_v6 }
 0xa21   :  { %v4129_v31 = vsel %vm4097_vm10, %v11243_v62, 32  ;;  %4261 = vmin.xlane.f32.xlu1 %v9525_v2  ;;  %v4026_v63 = vpop.xlane.xlu1 %4025  ;;  %v9534_v58 = vcvt.s32.f32 %v4273_v7  ;;  %v4288_v11 = vshra.s32 %v9529_v25, 16 }
 0xa22   :  { %v9538_v45 = vsel %vm108_vm0, %v4129_v31, 2147483647  ;;  %vm4098_vm11 = vcmp.le.f32.partialorder %v9341_v47, %v4026_v63 }
 0xa23   :  { %v4130_v60 = vsel %vm4098_vm11, %v11243_v62, 32  ;;  %v4029_v57 = vpop.xlane.xlu0 %4028  ;;  %4276 = vmin.xlane.f32.xlu0 %v9534_v58  ;;  %v9543_v22 = vcvt.s32.f32 %v4288_v11  ;;  %v4303_v6 = vshra.s32 %v9538_v45, 16 }
 0xa24   :  { %v9547_v14 = vsel %vm108_vm0, %v4130_v60, 2147483647  ;;  %vm4099_vm12 = vcmp.le.f32.partialorder %v9348_v10, %v4029_v57 }
 0xa25   :  { %v4131_v7 = vsel %vm4099_vm12, %v11243_v62, 32  ;;  %4291 = vmin.xlane.f32.xlu1 %v9543_v22  ;;  %v4032_v31 = vpop.xlane.xlu1 %4031  ;;  %v9552_v47 = vcvt.s32.f32 %v4303_v6  ;;  %v4318_v63 = vshra.s32 %v9547_v14, 16 }
 0xa26   :  { %v9556_v5 = vsel %vm108_vm0, %v4131_v7, 2147483647  ;;  %vm4100_vm13 = vcmp.le.f32.partialorder %v9356_v17, %v4032_v31 }
 0xa27   :  { %v4132_v11 = vsel %vm4100_vm13, %v11243_v62, 32  ;;  %v4035_v60 = vpop.xlane.xlu0 %4034  ;;  %4306 = vmin.xlane.f32.xlu0 %v9552_v47  ;;  %v9561_v10 = vcvt.s32.f32 %v4318_v63  ;;  %v4333_v57 = vshra.s32 %v9556_v5, 16 }
 0xa28   :  { %v9565_v30 = vsel %vm108_vm0, %v4132_v11, 2147483647  ;;  %vm4101_vm14 = vcmp.le.f32.partialorder %v9353_v41, %v4035_v60 }
 0xa29   :  { %v4133_v6 = vsel %vm4101_vm14, %v11243_v62, 32  ;;  %4321 = vmin.xlane.f32.xlu1 %v9561_v10  ;;  %v4038_v7 = vpop.xlane.xlu1 %4037  ;;  %v9570_v17 = vcvt.s32.f32 %v4333_v57  ;;  %v4348_v31 = vshra.s32 %v9565_v30, 16 }
 0xa2a   :  { %v9574_v35 = vsel %vm108_vm0, %v4133_v6, 2147483647  ;;  %vm4102_vm15 = vcmp.le.f32.partialorder %v9361_v52, %v4038_v7 }
 0xa2b   :  { %v4134_v63 = vsel %vm4102_vm15, %v11243_v62, 32  ;;  %v4041_v11 = vpop.xlane.xlu0 %4040  ;;  %4336 = vmin.xlane.f32.xlu0 %v9570_v17  ;;  %v9579_v41 = vcvt.s32.f32 %v4348_v31  ;;  %v4363_v60 = vshra.s32 %v9574_v35, 16 }
 0xa2c   :  { %v9583_v26 = vsel %vm108_vm0, %v4134_v63, 2147483647  ;;  %vm4103_vm3 = vcmp.le.f32.partialorder %v9368_v18, %v4041_v11 }
 0xa2d   :  { %v4135_v57 = vsel %vm4103_vm3, %v11243_v62, 32  ;;  %4351 = vmin.xlane.f32.xlu1 %v9579_v41  ;;  %v4044_v6 = vpop.xlane.xlu1 %4043  ;;  %v9588_v52 = vcvt.s32.f32 %v4363_v60  ;;  %v4378_v7 = vshra.s32 %v9583_v26, 16 }
 0xa2e   :  { %v9592_v37 = vsel %vm108_vm0, %v4135_v57, 2147483647  ;;  %vm4104_vm4 = vcmp.le.f32.partialorder %v9376_v13, %v4044_v6 }
 0xa2f   :  { %v4136_v31 = vsel %vm4104_vm4, %v11243_v62, 32  ;;  %v4047_v63 = vpop.xlane.xlu0 %4046  ;;  %4366 = vmin.xlane.f32.xlu0 %v9588_v52  ;;  %v9597_v18 = vcvt.s32.f32 %v4378_v7  ;;  %v4393_v11 = vshra.s32 %v9592_v37, 16 }
 0xa30   :  { %v9601_v0 = vsel %vm108_vm0, %v4136_v31, 2147483647  ;;  %vm4105_vm5 = vcmp.le.f32.partialorder %v9373_v59, %v4047_v63 }
 0xa31   :  { %v4137_v60 = vsel %vm4105_vm5, %v11243_v62, 32  ;;  %4381 = vmin.xlane.f32.xlu1 %v9597_v18  ;;  %v4050_v57 = vpop.xlane.xlu1 %4049  ;;  %v9606_v13 = vcvt.s32.f32 %v4393_v11  ;;  %v4408_v6 = vshra.s32 %v9601_v0, 16 }
 0xa32   :  { %v9610_v61 = vsel %vm108_vm0, %v4137_v60, 2147483647  ;;  %vm4106_vm6 = vcmp.le.f32.partialorder %v9381_v42, %v4050_v57 }
 0xa33   :  { %v4138_v7 = vsel %vm4106_vm6, %v11243_v62, 32  ;;  %v4053_v31 = vpop.xlane.xlu0 %4052  ;;  %4396 = vmin.xlane.f32.xlu0 %v9606_v13  ;;  %v9615_v59 = vcvt.s32.f32 %v4408_v6  ;;  %v4423_v63 = vshra.s32 %v9610_v61, 16 }
 0xa34   :  { %v9619_v27 = vsel %vm108_vm0, %v4138_v7, 2147483647  ;;  %vm4107_vm7 = vcmp.le.f32.partialorder %v9388_v29, %v4053_v31 }
 0xa35   :  { %v4139_v11 = vsel %vm4107_vm7, %v11243_v62, 32  ;;  %4411 = vmin.xlane.f32.xlu1 %v9615_v59  ;;  %v4056_v60 = vpop.xlane.xlu1 %4055  ;;  %v9624_v42 = vcvt.s32.f32 %v4423_v63  ;;  %v4438_v57 = vshra.s32 %v9619_v27, 16 }
 0xa36   :  { %v9628_v8 = vsel %vm108_vm0, %v4139_v11, 2147483647  ;;  %vm4108_vm8 = vcmp.le.f32.partialorder %v9396_v54, %v4056_v60 }
 0xa37   :  { %v4140_v6 = vsel %vm4108_vm8, %v11243_v62, 32  ;;  %v4059_v7 = vpop.xlane.xlu0 %4058  ;;  %4426 = vmin.xlane.f32.xlu0 %v9624_v42  ;;  %v9633_v29 = vcvt.s32.f32 %v4438_v57  ;;  %v4453_v31 = vshra.s32 %v9628_v8, 16 }
 0xa38   :  { %v9637_v3 = vsel %vm108_vm0, %v4140_v6, 2147483647  ;;  %vm4109_vm9 = vcmp.le.f32.partialorder %v9393_v9, %v4059_v7 }
 0xa39   :  { %v4141_v63 = vsel %vm4109_vm9, %v11243_v62, 32  ;;  %4441 = vmin.xlane.f32.xlu1 %v9633_v29  ;;  %v4062_v11 = vpop.xlane.xlu1 %4061  ;;  %v9642_v54 = vcvt.s32.f32 %v4453_v31  ;;  %v4468_v60 = vshra.s32 %v9637_v3, 16 }
 0xa3a   :  { %v9646_v56 = vsel %vm108_vm0, %v4141_v63, 2147483647  ;;  %vm4110_vm10 = vcmp.le.f32.partialorder %v9401_v48, %v4062_v11 }
 0xa3b   :  { %v4142_v57 = vsel %vm4110_vm10, %v11243_v62, 32  ;;  %v4065_v6 = vpop.xlane.xlu0 %4064  ;;  %4456 = vmin.xlane.f32.xlu0 %v9642_v54  ;;  %v9651_v9 = vcvt.s32.f32 %v4468_v60  ;;  %v4483_v7 = vshra.s32 %v9646_v56, 16 }
 0xa3c   :  { %v9655_v44 = vsel %vm108_vm0, %v4142_v57, 2147483647  ;;  %vm4111_vm11 = vcmp.le.f32.partialorder %v9408_v43, %v4065_v6 }
 0xa3d   :  { %11373 = vst [vmem:[#allocation102_spill] sm:$0xff] %v9651_v9  ;;  %v4143_v31 = vsel %vm4111_vm11, %v11243_v62, 32  ;;  %4471 = vmin.xlane.f32.xlu1 %v9651_v9  ;;  %v4068_v63 = vpop.xlane.xlu1 %4067  ;;  %v9660_v48 = vcvt.s32.f32 %v4483_v7  ;;  %v4498_v11 = vshra.s32 %v9655_v44, 16 }
 0xa3e   :  { %v9664_v51 = vsel %vm108_vm0, %v4143_v31, 2147483647  ;;  %vm4112_vm12 = vcmp.le.f32.partialorder %v9416_v12, %v4068_v63 }
 0xa3f   :  { %11374 = vst [vmem:[#allocation103_spill] sm:$0xff] %v9660_v48  ;;  %v4144_v60 = vsel %vm4112_vm12, %v11243_v62, 32  ;;  %v4071_v57 = vpop.xlane.xlu0 %4070  ;;  %4486 = vmin.xlane.f32.xlu0 %v9660_v48  ;;  %v9669_v43 = vcvt.s32.f32 %v4498_v11  ;;  %v4513_v6 = vshra.s32 %v9664_v51, 16 }
 0xa40   :  { %v9673_v9 = vsel %vm108_vm0, %v4144_v60, 2147483647  ;;  %vm4113_vm13 = vcmp.le.f32.partialorder %v9413_v50, %v4071_v57 }
 0xa41   :  { %11375 = vst [vmem:[#allocation104_spill] sm:$0xff] %v9669_v43  ;;  %v4145_v7 = vsel %vm4113_vm13, %v11243_v62, 32  ;;  %4501 = vmin.xlane.f32.xlu1 %v9669_v43  ;;  %v4074_v31 = vpop.xlane.xlu1 %4073  ;;  %v9678_v12 = vcvt.s32.f32 %v4513_v6  ;;  %v4528_v63 = vshra.s32 %v9673_v9, 16 }
 0xa42   :  { %v9682_v48 = vsel %vm108_vm0, %v4145_v7, 2147483647  ;;  %vm4114_vm14 = vcmp.le.f32.partialorder %v9421_v4, %v4074_v31 }
 0xa43   :  { %11376 = vst [vmem:[#allocation105_spill] sm:$0xff] %v9678_v12  ;;  %v4146_v11 = vsel %vm4114_vm14, %v11243_v62, 32  ;;  %4516 = vmin.xlane.f32.xlu0 %v9678_v12  ;;  %v4077_v60 = vpop.xlane.xlu0 %4076  ;;  %v9687_v50 = vcvt.s32.f32 %v4528_v63  ;;  %v4543_v57 = vshra.s32 %v9682_v48, 16 }
 0xa44   :  { %v9691_v43 = vsel %vm108_vm0, %v4146_v11, 2147483647  ;;  %vm4115_vm15 = vcmp.le.f32.partialorder %v9428_v39, %v4077_v60 }
 0xa45   :  { %11377 = vst [vmem:[#allocation106_spill] sm:$0xff] %v9687_v50  ;;  %v4147_v6 = vsel %vm4115_vm15, %v11243_v62, 32  ;;  %4531 = vmin.xlane.f32.xlu1 %v9687_v50  ;;  %v4080_v7 = vpop.xlane.xlu1 %4079  ;;  %v9696_v4 = vcvt.s32.f32 %v4543_v57  ;;  %v4558_v31 = vshra.s32 %v9691_v43, 16 }
 0xa46   :  { %v9700_v12 = vsel %vm108_vm0, %v4147_v6, 2147483647  ;;  %vm4116_vm3 = vcmp.le.f32.partialorder %v9436_v20, %v4080_v7 }
 0xa47   :  { %11378 = vst [vmem:[#allocation107_spill] sm:$0xff] %v9696_v4  ;;  %v4148_v63 = vsel %vm4116_vm3, %v11243_v62, 32  ;;  %4546 = vmin.xlane.f32.xlu0 %v9696_v4  ;;  %v4083_v11 = vpop.xlane.xlu0 %4082  ;;  %v9705_v39 = vcvt.s32.f32 %v4558_v31  ;;  %v4573_v60 = vshra.s32 %v9700_v12, 16 }
 0xa48   :  { %v9709_v50 = vsel %vm108_vm0, %v4148_v63, 2147483647  ;;  %vm4117_vm4 = vcmp.le.f32.partialorder %v9433_v28, %v4083_v11 }
 0xa49   :  { %v4149_v57 = vsel %vm4117_vm4, %v11243_v62, 32  ;;  %4561 = vmin.xlane.f32.xlu1 %v9705_v39  ;;  %v4086_v6 = vpop.xlane.xlu1 %4085  ;;  %v9714_v20 = vcvt.s32.f32 %v4573_v60  ;;  %v4588_v7 = vshra.s32 %v9709_v50, 16 }
 0xa4a   :  { %v9718_v4 = vsel %vm108_vm0, %v4149_v57, 2147483647  ;;  %vm4118_vm5 = vcmp.le.f32.partialorder %v9441_v15, %v4086_v6  ;;  %v3720_v6 = vld [vmem:[%s10834_s2 + $0x60] sm:$0xff] }
 0xa4b   :  { %11379 = vst [vmem:[#allocation108_spill] sm:$0xff] %v9714_v20  ;;  %v4150_v31 = vsel %vm4118_vm5, %v11243_v62, 32  ;;  %4576 = vmin.xlane.f32.xlu0 %v9714_v20  ;;  %v9723_v63 = vcvt.s32.f32 %v4588_v7  ;;  %v4603_v28 = vshra.s32 %v9718_v4, 16  ;;  %v3721_v7 = vld [vmem:[%s10834_s2 + $0x68] sm:$0xff] }
 0xa4c   :  { %v9727_v11 = vsel %vm108_vm0, %v4150_v31, 2147483647  ;;  %v6876_v31 = vpack.c.bf16 %v3721_v7, %v3720_v6  ;;  %v4182_v7 = vand.u32 65535, %v9466_v33 }
 0xa4d   :  { %11380 = vst [vmem:[#allocation109_spill] sm:$0xff] %v9723_v63  ;;  %11381 = vst [vmem:[#allocation110_spill] sm:$0xff] %v9727_v11  ;;  %4591 = vmin.xlane.f32.xlu1 %v9723_v63  ;;  %v9730_v60 = vcvt.s32.f32 %v4603_v28  ;;  %v4618_v57 = vshra.s32 %v9727_v11, 16  ;;  %v3722_v28 = vld [vmem:[%s10834_s2 + $0x70] sm:$0xff] }
 0xa4e   :  { %6877 = vmatprep.subr.bf16.mxu1 %v6876_v31 }
 0xa4f   :  { %11382 = vst [vmem:[#allocation111_spill] sm:$0xff] %v9730_v60  ;;  %4606 = vmin.xlane.f32.xlu0 %v9730_v60  ;;  %v9734_v15 = vcvt.s32.f32 %v4618_v57  ;;  %6879 = vmatpush3.bf16.msra.mxu1 %v6876_v31  ;;  %v3723_v57 = vld [vmem:[%s10834_s2 + $0x78] sm:$0xff]  ;;  %v4167_v60 = vand.u32 65535, %v9458_v21 }
 0xa50   :  { %v6880_v62 = vpack.c.bf16 %v3723_v57, %v3722_v28  ;;  %v4197_v28 = vand.u32 65535, %v9475_v34  ;;  %v4227_v34 = vand.u32 65535, %v9493_v53  ;;  %v4257_v53 = vand.u32 65535, %v9511_v40 }
 0xa51   :  { %11383 = vst [vmem:[#allocation112_spill] sm:$0xff] %v9734_v15  ;;  %4621 = vmin.xlane.f32.xlu1 %v9734_v15  ;;  %v4152_v15 = vand.u32 65535, %v9452_v55  ;;  %v4169_v20 = vcvt.s32.f32 %v4167_v60  ;;  %v4184_v55 = vcvt.s32.f32 %v4182_v7  ;;  %v4287_v40 = vand.u32 65535, %v9529_v25 }
 0xa52   :  { %6881 = vmatprep.subr.bf16.mxu1 %v6880_v62  ;;  %v4199_v60 = vcvt.s32.f32 %v4197_v28  ;;  %v4317_v25 = vand.u32 65535, %v9547_v14  ;;  %v4347_v14 = vand.u32 65535, %v9565_v30  ;;  %v4377_v30 = vand.u32 65535, %v9583_v26 }
 0xa53   :  { %6883 = vmatpush3.bf16.msra.mxu1 %v6880_v62  ;;  %v4154_v6 = vcvt.s32.f32 %v4152_v15  ;;  %v4212_v15 = vand.u32 65535, %v9484_v32  ;;  %v4242_v32 = vand.u32 65535, %v9502_v19  ;;  %v4272_v19 = vand.u32 65535, %v9520_v36 }
 0xa54   :  { %v4302_v36 = vand.u32 65535, %v9538_v45  ;;  %v4332_v45 = vand.u32 65535, %v9556_v5  ;;  %v4362_v5 = vand.u32 65535, %v9574_v35  ;;  %v4392_v35 = vand.u32 65535, %v9592_v37 }
 0xa55   :  { %v4244_v28 = vcvt.s32.f32 %v4242_v32  ;;  %v4407_v26 = vand.u32 65535, %v9601_v0  ;;  %v4422_v37 = vand.u32 65535, %v9610_v61  ;;  %v4437_v0 = vand.u32 65535, %v9619_v27 }
 0xa56   :  { %v4452_v61 = vand.u32 65535, %v9628_v8  ;;  %v4467_v27 = vand.u32 65535, %v9637_v3  ;;  %v4482_v8 = vand.u32 65535, %v9646_v56  ;;  %v4497_v3 = vand.u32 65535, %v9655_v44 }
 0xa57   :  { %v4512_v56 = vand.u32 65535, %v9664_v51  ;;  %v4527_v44 = vand.u32 65535, %v9673_v9  ;;  %v4542_v51 = vand.u32 65535, %v9682_v48  ;;  %v4557_v9 = vand.u32 65535, %v9691_v43 }
 0xa58   :  { %v4572_v48 = vand.u32 65535, %v9700_v12  ;;  %v4587_v43 = vand.u32 65535, %v9709_v50  ;;  %v4602_v12 = vand.u32 65535, %v9718_v4  ;;  %v11393_v4 = vld [vmem:[#allocation111_spill] sm:$0xff] }
 0xaa0   :  { %v9751_v63 = vpop.xlane.xlu0 %4156 }
 0xaa1   :  { %vm4158_vm6 = vcmp.eq.f32.partialorder %v9462_v49, %v9751_v63 }
 0xaa2   :  { %v9756_v31 = vpop.xlane.xlu1 %4171  ;;  %v4159_v11 = vsel %vm4158_vm6, %v4154_v6, inf  ;;  %v4229_v6 = vcvt.s32.f32 %v4227_v34  ;;  %v4289_v34 = vcvt.s32.f32 %v4287_v40  ;;  %v4379_v40 = vcvt.s32.f32 %v4377_v30 }
 0xaa3   :  { %4160 = vmin.xlane.f32.xlu0 %v4159_v11  ;;  %vm4173_vm7 = vcmp.eq.f32.partialorder %v9471_v23, %v9756_v31  ;;  %v4214_v11 = vcvt.s32.f32 %v4212_v15  ;;  %v4499_v30 = vcvt.s32.f32 %v4497_v3  ;;  %v11391_v3 = vld [vmem:[#allocation110_spill] sm:$0xff] }
 0xaa4   :  { %v9761_v62 = vpop.xlane.xlu0 %4186  ;;  %v4174_v21 = vsel %vm4173_vm7, %v4169_v20, inf  ;;  %v4617_v50 = vand.u32 65535, %v11391_v3 }
 0xaa5   :  { %4175 = vmin.xlane.f32.xlu1 %v4174_v21  ;;  %vm4188_vm8 = vcmp.eq.f32.partialorder %v9480_v38, %v9761_v62 }
 0xaa6   :  { %v9766_v33 = vpop.xlane.xlu1 %4201  ;;  %v4189_v49 = vsel %vm4188_vm8, %v4184_v55, inf  ;;  %v4259_v55 = vcvt.s32.f32 %v4257_v53  ;;  %v4334_v53 = vcvt.s32.f32 %v4332_v45 }
 0xaa7   :  { %4190 = vmin.xlane.f32.xlu0 %v4189_v49  ;;  %vm4203_vm9 = vcmp.eq.f32.partialorder %v9489_v16, %v9766_v33  ;;  %v4274_v49 = vcvt.s32.f32 %v4272_v19 }
 0xaa8   :  { %v9771_v23 = vpop.xlane.xlu0 %4216  ;;  %v4204_v20 = vsel %vm4203_vm9, %v4199_v60, inf }
 0xaa9   :  { %4205 = vmin.xlane.f32.xlu1 %v4204_v20  ;;  %vm4218_vm10 = vcmp.eq.f32.partialorder %v9498_v46, %v9771_v23 }
 0xaaa   :  { %v9776_v38 = vpop.xlane.xlu1 %4231  ;;  %v4219_v57 = vsel %vm4218_vm10, %v4214_v11, inf  ;;  %v4304_v11 = vcvt.s32.f32 %v4302_v36 }
 0xaab   :  { %4220 = vmin.xlane.f32.xlu0 %v4219_v57  ;;  %vm4233_vm11 = vcmp.eq.f32.partialorder %v9507_v24, %v9776_v38  ;;  %v4319_v57 = vcvt.s32.f32 %v4317_v25  ;;  %v4424_v25 = vcvt.s32.f32 %v4422_v37  ;;  %v11388_v37 = vld [vmem:[#allocation106_spill] sm:$0xff] }
 0xaac   :  { %v9781_v16 = vpop.xlane.xlu0 %4246  ;;  %v4234_v7 = vsel %vm4233_vm11, %v4229_v6, inf }
 0xaad   :  { %4235 = vmin.xlane.f32.xlu1 %v4234_v7  ;;  %vm4248_vm12 = vcmp.eq.f32.partialorder %v9516_v1, %v9781_v16 }
 0xaae   :  { %v9786_v46 = vpop.xlane.xlu1 %4261  ;;  %v4249_v21 = vsel %vm4248_vm12, %v4244_v28, inf  ;;  %v4349_v28 = vcvt.s32.f32 %v4347_v14  ;;  %v4469_v14 = vcvt.s32.f32 %v4467_v27 }
 0xaaf   :  { %4250 = vmin.xlane.f32.xlu0 %v4249_v21  ;;  %vm4263_vm13 = vcmp.eq.f32.partialorder %v9525_v2, %v9786_v46  ;;  %v4364_v21 = vcvt.s32.f32 %v4362_v5  ;;  %v4484_v5 = vcvt.s32.f32 %v4482_v8 }
 0xab0   :  { %v9791_v24 = vpop.xlane.xlu0 %4276  ;;  %v4264_v15 = vsel %vm4263_vm13, %v4259_v55, inf }
 0xab1   :  { %4265 = vmin.xlane.f32.xlu1 %v4264_v15  ;;  %vm4278_vm14 = vcmp.eq.f32.partialorder %v9534_v58, %v9791_v24 }
 0xab2   :  { %v9796_v1 = vpop.xlane.xlu1 %4291  ;;  %v4279_v60 = vsel %vm4278_vm14, %v4274_v49, inf  ;;  %v4394_v49 = vcvt.s32.f32 %v4392_v35 }
 0xab3   :  { %4280 = vmin.xlane.f32.xlu0 %v4279_v60  ;;  %vm4293_vm15 = vcmp.eq.f32.partialorder %v9543_v22, %v9796_v1  ;;  %v4409_v60 = vcvt.s32.f32 %v4407_v26 }
 0xab4   :  { %v9801_v2 = vpop.xlane.xlu0 %4306  ;;  %v4294_v20 = vsel %vm4293_vm15, %v4289_v34, inf }
 0xab5   :  { %4295 = vmin.xlane.f32.xlu1 %v4294_v20  ;;  %vm4308_vm3 = vcmp.eq.f32.partialorder %v9552_v47, %v9801_v2 }
 0xab6   :  { %v9806_v58 = vpop.xlane.xlu1 %4321  ;;  %v4309_v32 = vsel %vm4308_vm3, %v4304_v11, inf  ;;  %v4439_v11 = vcvt.s32.f32 %v4437_v0  ;;  %v4544_v0 = vcvt.s32.f32 %v4542_v51 }
 0xab7   :  { %4310 = vmin.xlane.f32.xlu0 %v4309_v32  ;;  %vm4323_vm4 = vcmp.eq.f32.partialorder %v9561_v10, %v9806_v58  ;;  %v4454_v32 = vcvt.s32.f32 %v4452_v61 }
 0xab8   :  { %v9811_v22 = vpop.xlane.xlu0 %4336  ;;  %v4324_v6 = vsel %vm4323_vm4, %v4319_v57, inf }
 0xab9   :  { %4325 = vmin.xlane.f32.xlu1 %v4324_v6  ;;  %vm4338_vm5 = vcmp.eq.f32.partialorder %v9570_v17, %v9811_v22  ;;  %v11384_v6 = vld [vmem:[#allocation102_spill] sm:$0xff] }
 0xaba   :  { %v9816_v47 = vpop.xlane.xlu1 %4351  ;;  %v4339_v7 = vsel %vm4338_vm5, %v4334_v53, inf }
 0xabb   :  { %4340 = vmin.xlane.f32.xlu0 %v4339_v7  ;;  %vm4353_vm6 = vcmp.eq.f32.partialorder %v9579_v41, %v9816_v47  ;;  %v11385_v7 = vld [vmem:[#allocation103_spill] sm:$0xff] }
 0xabc   :  { %v9821_v10 = vpop.xlane.xlu0 %4366  ;;  %v4354_v19 = vsel %vm4353_vm6, %v4349_v28, inf }
 0xabd   :  { %4355 = vmin.xlane.f32.xlu1 %v4354_v19  ;;  %vm4368_vm7 = vcmp.eq.f32.partialorder %v9588_v52, %v9821_v10  ;;  %v11386_v19 = vld [vmem:[#allocation104_spill] sm:$0xff] }
 0xabe   :  { %v9826_v17 = vpop.xlane.xlu1 %4381  ;;  %v4369_v55 = vsel %vm4368_vm7, %v4364_v21, inf }
 0xabf   :  { %4370 = vmin.xlane.f32.xlu0 %v4369_v55  ;;  %vm4383_vm8 = vcmp.eq.f32.partialorder %v9597_v18, %v9826_v17  ;;  %v4514_v55 = vcvt.s32.f32 %v4512_v56 }
 0xac0   :  { %v9831_v41 = vpop.xlane.xlu0 %4396  ;;  %v4384_v15 = vsel %vm4383_vm8, %v4379_v40, inf  ;;  %v11387_v40 = vld [vmem:[#allocation105_spill] sm:$0xff] }
 0xac1   :  { %4385 = vmin.xlane.f32.xlu1 %v4384_v15  ;;  %vm4398_vm9 = vcmp.eq.f32.partialorder %v9606_v13, %v9831_v41 }
 0xac2   :  { %v9836_v52 = vpop.xlane.xlu1 %4411  ;;  %v4399_v36 = vsel %vm4398_vm9, %v4394_v49, inf  ;;  %v4529_v49 = vcvt.s32.f32 %v4527_v44 }
 0xac3   :  { %4400 = vmin.xlane.f32.xlu0 %v4399_v36  ;;  %vm4413_vm10 = vcmp.eq.f32.partialorder %v9615_v59, %v9836_v52 }
 0xac4   :  { %v9841_v18 = vpop.xlane.xlu0 %4426  ;;  %v4414_v34 = vsel %vm4413_vm10, %v4409_v60, inf }
 0xac5   :  { %4415 = vmin.xlane.f32.xlu1 %v4414_v34  ;;  %vm4428_vm11 = vcmp.eq.f32.partialorder %v9624_v42, %v9841_v18  ;;  %v11389_v34 = vld [vmem:[#allocation107_spill] sm:$0xff] }
 0xac6   :  { %v9846_v13 = vpop.xlane.xlu1 %4441  ;;  %v4429_v20 = vsel %vm4428_vm11, %v4424_v25, inf }
 0xac7   :  { %4430 = vmin.xlane.f32.xlu0 %v4429_v20  ;;  %vm4443_vm12 = vcmp.eq.f32.partialorder %v9633_v29, %v9846_v13  ;;  %v4559_v20 = vcvt.s32.f32 %v4557_v9 }
 0xac8   :  { %v9851_v59 = vpop.xlane.xlu0 %4456  ;;  %v4444_v45 = vsel %vm4443_vm12, %v4439_v11, inf }
 0xac9   :  { %4445 = vmin.xlane.f32.xlu1 %v4444_v45  ;;  %vm4458_vm13 = vcmp.eq.f32.partialorder %v9642_v54, %v9851_v59  ;;  %v4574_v45 = vcvt.s32.f32 %v4572_v48  ;;  %v11399_v48 = vld [vmem:[#allocation7_spill] sm:$0xff] }
 0xaca   :  { %v9856_v42 = vpop.xlane.xlu1 %4471  ;;  %v4459_v57 = vsel %vm4458_vm13, %v4454_v32, inf  ;;  %v11390_v32 = vld [vmem:[#allocation108_spill] sm:$0xff] }
 0xacb   :  { %4460 = vmin.xlane.f32.xlu0 %v4459_v57  ;;  %vm4473_vm14 = vcmp.eq.f32.partialorder %v11384_v6, %v9856_v42  ;;  %v11392_v6 = vld [vmem:[#allocation109_spill] sm:$0xff] }
 0xacc   :  { %v9861_v29 = vpop.xlane.xlu0 %4486  ;;  %v4474_v53 = vsel %vm4473_vm14, %v4469_v14, inf  ;;  %v4589_v14 = vcvt.s32.f32 %v4587_v43 }
 0xacd   :  { %4475 = vmin.xlane.f32.xlu1 %v4474_v53  ;;  %vm4488_vm15 = vcmp.eq.f32.partialorder %v11385_v7, %v9861_v29 }
 0xace   :  { %v9866_v54 = vpop.xlane.xlu1 %4501  ;;  %v4489_v28 = vsel %vm4488_vm15, %v4484_v5, inf  ;;  %v4604_v5 = vcvt.s32.f32 %v4602_v12 }
 0xacf   :  { %4490 = vmin.xlane.f32.xlu0 %v4489_v28  ;;  %vm4503_vm3 = vcmp.eq.f32.partialorder %v11386_v19, %v9866_v54  ;;  %v4619_v28 = vcvt.s32.f32 %v4617_v50  ;;  %v11395_v19 = vld [vmem:[#allocation112_spill] sm:$0xff]  ;;  %v11403_v50 = vld [vmem:[#allocation15_spill] sm:$0xff] }
 0xad0   :  { %v9871_v21 = vpop.xlane.xlu0 %4516  ;;  %v4504_v35 = vsel %vm4503_vm3, %v4499_v30, inf  ;;  %v11394_v30 = vld [vmem:[#allocation41_spill] sm:$0xff] }
 0xad1   :  { %4505 = vmin.xlane.f32.xlu1 %v4504_v35  ;;  %vm4518_vm4 = vcmp.eq.f32.partialorder %v11387_v40, %v9871_v21  ;;  %v1970_v44 = vmul.f32 %v11394_v30, %v11394_v30 }
 0xad2   :  { %v9876_v26 = vpop.xlane.xlu1 %4531  ;;  %v4519_v15 = vsel %vm4518_vm4, %v4514_v55, inf  ;;  %v11396_v55 = vld [vmem:[#allocation39_spill] sm:$0xff] }
 0xad3   :  { %4520 = vmin.xlane.f32.xlu0 %v4519_v15  ;;  %vm4533_vm5 = vcmp.eq.f32.partialorder %v11388_v37, %v9876_v26  ;;  %v1971_v51 = vmul.f32 %v11396_v55, %v11396_v55  ;;  %v2002_v40 = vsel %vm635_vm2, %v1970_v44, 0.0  ;;  %v11397_v15 = vld [vmem:[#allocation45_spill] sm:$0xff]  ;;  %v11398_v37 = vld [vmem:[#allocation43_spill] sm:$0xff] }
 0xad4   :  { %v9881_v36 = vpop.xlane.xlu0 %4546  ;;  %v4534_v60 = vsel %vm4533_vm5, %v4529_v49, inf  ;;  %v1972_v49 = vmul.f32 %v11397_v15, %v11397_v15 }
 0xad5   :  { %4535 = vmin.xlane.f32.xlu1 %v4534_v60  ;;  %vm4548_vm6 = vcmp.eq.f32.partialorder %v11389_v34, %v9881_v36  ;;  %v2005_v9 = vsel %vm635_vm2, %v1971_v51, 0.0  ;;  %v1973_v60 = vmul.f32 %v11398_v37, %v11398_v37  ;;  %v1974_v34 = vmul.f32 %v11399_v48, %v11399_v48  ;;  %v11407_v51 = vld [vmem:[#allocation18_spill] sm:$0xff] }
 0xad6   :  { %v9886_v25 = vpop.xlane.xlu1 %4561  ;;  %v4549_v61 = vsel %vm4548_vm6, %v4544_v0, inf  ;;  %v2008_v0 = vsel %vm635_vm2, %v1972_v49, 0.0  ;;  %v11408_v49 = vld [vmem:[#allocation19_spill] sm:$0xff] }
 0xad7   :  { %4550 = vmin.xlane.f32.xlu0 %v4549_v61  ;;  %vm4563_vm7 = vcmp.eq.f32.partialorder %v9705_v39, %v9886_v25  ;;  %v2011_v61 = vsel %vm635_vm2, %v1973_v60, 0.0  ;;  %v11409_v60 = vld [vmem:[#allocation20_spill] sm:$0xff] }
 0xad8   :  { %v9891_v11 = vpop.xlane.xlu0 %4576  ;;  %v4564_v27 = vsel %vm4563_vm7, %v4559_v20, inf  ;;  %v11400_v20 = vld [vmem:[#allocation47_spill] sm:$0xff] }
 0xad9   :  { %4565 = vmin.xlane.f32.xlu1 %v4564_v27  ;;  %vm4578_vm8 = vcmp.eq.f32.partialorder %v11390_v32, %v9891_v11  ;;  %v1975_v43 = vmul.f32 %v11400_v20, %v11400_v20  ;;  %v2014_v27 = vsel %vm635_vm2, %v1974_v34, 0.0  ;;  %v11410_v34 = vld [vmem:[#allocation17_spill] sm:$0xff] }
 0xada   :  { %v9896_v8 = vpop.xlane.xlu1 %4591  ;;  %v4579_v57 = vsel %vm4578_vm8, %v4574_v45, inf  ;;  %v11401_v45 = vld [vmem:[#allocation11_spill] sm:$0xff] }
 0xadb   :  { %4580 = vmin.xlane.f32.xlu0 %v4579_v57  ;;  %vm4593_vm9 = vcmp.eq.f32.partialorder %v11392_v6, %v9896_v8  ;;  %v1976_v12 = vmul.f32 %v11401_v45, %v11401_v45  ;;  %v2017_v32 = vsel %vm635_vm2, %v1975_v43, 0.0  ;;  %v11402_v57 = vld [vmem:[#allocation5_spill] sm:$0xff]  ;;  %v1978_v6 = vmul.f32 %v11403_v50, %v11403_v50  ;;  %v11411_v43 = vld [vmem:[#allocation22_spill] sm:$0xff] }
 0xadc   :  { %v9901_v39 = vpop.xlane.xlu0 %4606  ;;  %v4594_v53 = vsel %vm4593_vm9, %v4589_v14, inf  ;;  %v1977_v14 = vmul.f32 %v11402_v57, %v11402_v57 }
 0xadd   :  { %4595 = vmin.xlane.f32.xlu1 %v4594_v53  ;;  %vm4608_vm10 = vcmp.eq.f32.partialorder %v11393_v4, %v9901_v39  ;;  %v2020_v3 = vsel %vm635_vm2, %v1976_v12, 0.0  ;;  %v11412_v12 = vld [vmem:[#allocation23_spill] sm:$0xff] }
 0xade   :  { %v9905_v56 = vpop.xlane.xlu1 %4621  ;;  %v4609_v7 = vsel %vm4608_vm10, %v4604_v5, inf  ;;  %v2023_v53 = vsel %vm635_vm2, %v1977_v14, 0.0  ;;  %v11404_v5 = vld [vmem:[#allocation9_spill] sm:$0xff]  ;;  %v11413_v14 = vld [vmem:[#allocation24_spill] sm:$0xff] }
 0xadf   :  { %4610 = vmin.xlane.f32.xlu0 %v4609_v7  ;;  %vm4623_vm11 = vcmp.eq.f32.partialorder %v11395_v19, %v9905_v56  ;;  %v1979_v4 = vmul.f32 %v11404_v5, %v11404_v5  ;;  %v2026_v7 = vsel %vm635_vm2, %v1978_v6, 0.0  ;;  %v11406_v19 = vld [vmem:[#allocation13_spill] sm:$0xff] }
 0xae0   :  { %v4624_v35 = vsel %vm4623_vm11, %v4619_v28, inf  ;;  %v11405_v28 = vld [vmem:[#allocation16_spill] sm:$0xff]  ;;  %v11414_v6 = vld [vmem:[#allocation21_spill] sm:$0xff] }
 0xae1   :  { %4625 = vmin.xlane.f32.xlu1 %v4624_v35  ;;  %v1980_v30 = vmul.f32 %v11405_v28, %v11405_v28  ;;  %v2029_v44 = vsel %vm635_vm2, %v1979_v4, 0.0  ;;  %v1981_v35 = vmul.f32 %v11406_v19, %v11406_v19  ;;  %v11415_v4 = vld [vmem:[#allocation26_spill] sm:$0xff] }
 0xae3   :  { %2003 = vadd.xlane.f32.xlu0 %v2002_v40  ;;  %v2032_v55 = vsel %vm635_vm2, %v1980_v30, 0.0  ;;  %v1982_v40 = vmul.f32 %v11407_v51, %v11407_v51  ;;  %v2035_v15 = vsel %vm635_vm2, %v1981_v35, 0.0  ;;  %v11416_v30 = vld [vmem:[#allocation72_spill] sm:$0xff]  ;;  %v11417_v35 = vld [vmem:[#allocation70_spill] sm:$0xff] }
 0xae5   :  { %2006 = vadd.xlane.f32.xlu1 %v2005_v9  ;;  %v1983_v9 = vmul.f32 %v11408_v49, %v11408_v49  ;;  %v2038_v37 = vsel %vm635_vm2, %v1982_v40, 0.0  ;;  %v11418_v40 = vld [vmem:[#allocation76_spill] sm:$0xff] }
 0xae7   :  { %2009 = vadd.xlane.f32.xlu0 %v2008_v0  ;;  %v1984_v0 = vmul.f32 %v11409_v60, %v11409_v60  ;;  %v2041_v48 = vsel %vm635_vm2, %v1983_v9, 0.0  ;;  %v11419_v9 = vld [vmem:[#allocation74_spill] sm:$0xff] }
 0xae9   :  { %2012 = vadd.xlane.f32.xlu1 %v2011_v61  ;;  %v1985_v61 = vmul.f32 %v11410_v34, %v11410_v34  ;;  %v2044_v20 = vsel %vm635_vm2, %v1984_v0, 0.0  ;;  %v11420_v0 = vld [vmem:[#allocation90_spill] sm:$0xff] }
 0xaeb   :  { %2015 = vadd.xlane.f32.xlu0 %v2014_v27  ;;  %v1986_v27 = vmul.f32 %v11411_v43, %v11411_v43  ;;  %v2047_v45 = vsel %vm635_vm2, %v1985_v61, 0.0  ;;  %v11421_v61 = vld [vmem:[#allocation80_spill] sm:$0xff] }
 0xaed   :  { %2018 = vadd.xlane.f32.xlu1 %v2017_v32  ;;  %v1987_v32 = vmul.f32 %v11412_v12, %v11412_v12  ;;  %v2050_v57 = vsel %vm635_vm2, %v1986_v27, 0.0  ;;  %v11422_v27 = vld [vmem:[#allocation28_spill] sm:$0xff] }
 0xaef   :  { %2021 = vadd.xlane.f32.xlu0 %v2020_v3  ;;  %v1988_v3 = vmul.f32 %v11413_v14, %v11413_v14  ;;  %v2053_v50 = vsel %vm635_vm2, %v1987_v32, 0.0  ;;  %v11423_v32 = vld [vmem:[#allocation77_spill] sm:$0xff] }
 0xaf1   :  { %2024 = vadd.xlane.f32.xlu1 %v2023_v53  ;;  %v1989_v53 = vmul.f32 %v11414_v6, %v11414_v6  ;;  %v2056_v5 = vsel %vm635_vm2, %v1988_v3, 0.0 }
 0xaf3   :  { %2027 = vadd.xlane.f32.xlu0 %v2026_v7  ;;  %v1990_v7 = vmul.f32 %v11415_v4, %v11415_v4  ;;  %v2059_v28 = vsel %vm635_vm2, %v1989_v53, 0.0 }
 0xaf5   :  { %2030 = vadd.xlane.f32.xlu1 %v2029_v44  ;;  %v3525_v44 = vmul.f32 %v11416_v30, %v11416_v30  ;;  %v2062_v19 = vsel %vm635_vm2, %v1990_v7, 0.0 }
 0xaf7   :  { %2033 = vadd.xlane.f32.xlu0 %v2032_v55  ;;  %v3526_v55 = vmul.f32 %v11417_v35, %v11417_v35  ;;  %v3557_v51 = vsel %vm635_vm2, %v3525_v44, 0.0 }
 0xaf9   :  { %2036 = vadd.xlane.f32.xlu1 %v2035_v15  ;;  %v3527_v15 = vmul.f32 %v11418_v40, %v11418_v40  ;;  %v3560_v49 = vsel %vm635_vm2, %v3526_v55, 0.0  ;;  %v11427_v55 = vld [vmem:[#allocation48_spill] sm:$0xff] }
 0xafb   :  { %2039 = vadd.xlane.f32.xlu0 %v2038_v37  ;;  %v3528_v37 = vmul.f32 %v11419_v9, %v11419_v9  ;;  %v3563_v60 = vsel %vm635_vm2, %v3527_v15, 0.0 }
 0xafd   :  { %2042 = vadd.xlane.f32.xlu1 %v2041_v48  ;;  %v3546_v48 = vmul.f32 %v11420_v0, %v11420_v0  ;;  %v3566_v34 = vsel %vm635_vm2, %v3528_v37, 0.0  ;;  %v11433_v0 = vld [vmem:[#allocation82_spill] sm:$0xff] }
 0xaff   :  { %2045 = vadd.xlane.f32.xlu0 %v2044_v20  ;;  %v3529_v20 = vmul.f32 %v11421_v61, %v11421_v61  ;;  %v3620_v43 = vsel %vm635_vm2, %v3546_v48, 0.0 }
 0xb01   :  { %2048 = vadd.xlane.f32.xlu1 %v2047_v45  ;;  %v1992_v45 = vmul.f32 %v11422_v27, %v11422_v27  ;;  %v3569_v12 = vsel %vm635_vm2, %v3529_v20, 0.0 }
 0xb03   :  { %2051 = vadd.xlane.f32.xlu0 %v2050_v57  ;;  %v3530_v57 = vmul.f32 %v11423_v32, %v11423_v32  ;;  %v2068_v14 = vsel %vm635_vm2, %v1992_v45, 0.0 }
 0xb05   :  { %2054 = vadd.xlane.f32.xlu1 %v2053_v50  ;;  %v3572_v3 = vsel %vm635_vm2, %v3530_v57, 0.0  ;;  %v11424_v50 = vld [vmem:[#allocation44_spill] sm:$0xff] }
 0xb06   :  { %v3531_v6 = vmul.f32 %v11424_v50, %v11424_v50 }
 0xb07   :  { %2057 = vadd.xlane.f32.xlu0 %v2056_v5  ;;  %v11425_v5 = vld [vmem:[#allocation40_spill] sm:$0xff] }
 0xb08   :  { %v3575_v53 = vsel %vm635_vm2, %v3531_v6, 0.0  ;;  %v3532_v4 = vmul.f32 %v11425_v5, %v11425_v5  ;;  %v11430_v6 = vld [vmem:[#allocation83_spill] sm:$0xff] }
 0xb09   :  { %2060 = vadd.xlane.f32.xlu1 %v2059_v28  ;;  %v11426_v28 = vld [vmem:[#allocation8_spill] sm:$0xff] }
 0xb0a   :  { %v3578_v7 = vsel %vm635_vm2, %v3532_v4, 0.0  ;;  %v3533_v44 = vmul.f32 %v11426_v28, %v11426_v28  ;;  %v4208_v4 = vcvt.f32.s32 %v9766_v33  ;;  %v3538_v33 = vmul.f32 %v11433_v0, %v11433_v0 }
 0xb0b   :  { %2063 = vadd.xlane.f32.xlu0 %v2062_v19 }
 0xb0c   :  { %v3581_v19 = vsel %vm635_vm2, %v3533_v44, 0.0 }
 0xb0d   :  { %3558 = vadd.xlane.f32.xlu1 %v3557_v51  ;;  %v3534_v51 = vmul.f32 %v11427_v55, %v11427_v55 }
 0xb0f   :  { %3561 = vadd.xlane.f32.xlu0 %v3560_v49  ;;  %v3584_v15 = vsel %vm635_vm2, %v3534_v51, 0.0  ;;  %v11428_v49 = vld [vmem:[#allocation81_spill] sm:$0xff] }
 0xb10   :  { %v3535_v37 = vmul.f32 %v11428_v49, %v11428_v49 }
 0xb11   :  { %3564 = vadd.xlane.f32.xlu1 %v3563_v60  ;;  %v4163_v60 = vcvt.f32.s32 %v9751_v63 }
 0xb12   :  { %v3587_v48 = vsel %vm635_vm2, %v3535_v37, 0.0 }
 0xb13   :  { %3567 = vadd.xlane.f32.xlu0 %v3566_v34  ;;  %v11429_v34 = vld [vmem:[#allocation12_spill] sm:$0xff]  ;;  %v4164_v45 = vshll.u32 %v4163_v60, 16  ;;  %v4238_v60 = vcvt.f32.s32 %v9776_v38 }
 0xb14   :  { %v3536_v20 = vmul.f32 %v11429_v34, %v11429_v34 }
 0xb15   :  { %3621 = vadd.xlane.f32.xlu1 %v3620_v43  ;;  %v4178_v43 = vcvt.f32.s32 %v9756_v31  ;;  %v4223_v31 = vcvt.f32.s32 %v9771_v23 }
 0xb17   :  { %3570 = vadd.xlane.f32.xlu0 %v3569_v12  ;;  %v4193_v12 = vcvt.f32.s32 %v9761_v62  ;;  %v4179_v63 = vshll.u32 %v4178_v43, 16  ;;  %v11431_v62 = vld [vmem:[#allocation37_spill] sm:$0xff] }
 0xb19   :  { %2069 = vadd.xlane.f32.xlu1 %v2068_v14  ;;  %v4194_v51 = vshll.u32 %v4193_v12, 16  ;;  %v4224_v12 = vshll.u32 %v4223_v31, 16 }
 0xb1b   :  { %3573 = vadd.xlane.f32.xlu0 %v3572_v3  ;;  %v3590_v3 = vsel %vm635_vm2, %v3536_v20, 0.0 }
 0xb1f   :  { %3576 = vadd.xlane.f32.xlu0 %v3575_v53  ;;  %v3537_v53 = vmul.f32 %v11430_v6, %v11430_v6 }
 0xb21   :  { %v3593_v20 = vsel %vm635_vm2, %v3537_v53, 0.0 }
 0xb23   :  { %3579 = vadd.xlane.f32.xlu0 %v3578_v7 }
 0xb27   :  { %3582 = vadd.xlane.f32.xlu0 %v3581_v19 }
 0xb2b   :  { %3585 = vadd.xlane.f32.xlu0 %v3584_v15 }
 0xb2f   :  { %3588 = vadd.xlane.f32.xlu0 %v3587_v48 }
 0xb30   :  { %v4161_v27 = vpop.xlane.xlu0 %4160 }
 0xb31   :  { %v4162_v57 = vcvt.f32.s32 %v4161_v27  ;;  %v11432_v27 = vmov 0.0  }
 0xb32   :  { %v4176_v14 = vpop.xlane.xlu1 %4175 }
 0xb33   :  { %v4165_v7 = vadd.s32 %v4164_v45, %v4162_v57  ;;  %v4177_v44 = vcvt.f32.s32 %v4176_v14  ;;  %3591 = vadd.xlane.f32.xlu0 %v3590_v3  ;;  %v4209_v45 = vshll.u32 %v4208_v4, 16  ;;  %v4253_v3 = vcvt.f32.s32 %v9781_v16 }
 0xb34   :  { %v4191_v19 = vpop.xlane.xlu0 %4190  ;;  %v4239_v4 = vshll.u32 %v4238_v60, 16  ;;  %v4283_v16 = vcvt.f32.s32 %v9791_v24 }
 0xb35   :  { %v4180_v15 = vadd.s32 %v4179_v63, %v4177_v44  ;;  %v4192_v37 = vcvt.f32.s32 %v4191_v19  ;;  %vm4631_vm12 = vcmp.eq.s32.totalorder %v11431_v62, %v4165_v7  ;;  %v3596_v44 = vsel %vm635_vm2, %v3538_v33, 0.0 }
 0xb36   :  { %v4206_v48 = vpop.xlane.xlu1 %4205  ;;  %v6103_v43 = vsel %vm4631_vm12, 1.0, %v11432_v27 }
 0xb37   :  { %vm4632_vm13 = vcmp.eq.s32.totalorder %v11431_v62, %v4180_v15  ;;  %v4195_v23 = vadd.s32 %v4194_v51, %v4192_v37  ;;  %v4207_v57 = vcvt.f32.s32 %v4206_v48  ;;  %3594 = vadd.xlane.f32.xlu0 %v3593_v20  ;;  %6738 = vmatprep.mubr.msk.f32.mxu1 %vm108_vm0, %v6103_v43  ;;  %v11434_v51 = vld [vmem:[#allocation85_spill] sm:$0xff]  ;;  %v4268_v15 = vcvt.f32.s32 %v9786_v46 }
 0xb38   :  { %v6104_v14 = vsel %vm4632_vm13, 1.0, %v11432_v27  ;;  %v4221_v38 = vpop.xlane.xlu0 %4220  ;;  %v3539_v31 = vmul.f32 %v11434_v51, %v11434_v51  ;;  %v4254_v43 = vshll.u32 %v4253_v3, 16  ;;  %v4298_v46 = vcvt.f32.s32 %v9796_v1 }
 0xb39   :  { %v4210_v53 = vadd.s32 %v4209_v45, %v4207_v57  ;;  %v4222_v63 = vcvt.f32.s32 %v4221_v38  ;;  %6739 = vmatmul.mubr.msk.f32.vlgmr.msra.gmra.mrb[94].mxu1 %vm108_vm0, %v6104_v14  ;;  %vm4633_vm14 = vcmp.eq.s32.totalorder %v11431_v62, %v4195_v23  ;;  %v11435_v14 = vld [vmem:[#allocation84_spill] sm:$0xff]  ;;  %v4269_v38 = vshll.u32 %v4268_v15, 16 }
 0xb3a   :  { %v4236_v7 = vpop.xlane.xlu1 %4235  ;;  %v6105_v19 = vsel %vm4633_vm14, 1.0, %v11432_v27  ;;  %v3599_v57 = vsel %vm635_vm2, %v3539_v31, 0.0  ;;  %v3540_v24 = vmul.f32 %v11435_v14, %v11435_v14  ;;  %v4284_v3 = vshll.u32 %v4283_v16, 16 }
 0xb3b   :  { %v4225_v37 = vadd.s32 %v4224_v12, %v4222_v63  ;;  %v4237_v48 = vcvt.f32.s32 %v4236_v7  ;;  %3597 = vadd.xlane.f32.xlu0 %v3596_v44  ;;  %6741 = vmatprep.mubr.msk.f32.mxu1 %vm108_vm0, %v6105_v19  ;;  %vm4634_vm15 = vcmp.eq.s32.totalorder %v11431_v62, %v4210_v53  ;;  %v4313_v7 = vcvt.f32.s32 %v9801_v2 }
 0xb3c   :  { %v4251_v60 = vpop.xlane.xlu0 %4250  ;;  %v6106_v20 = vsel %vm4634_vm15, 1.0, %v11432_v27  ;;  %v4299_v31 = vshll.u32 %v4298_v46, 16  ;;  %v4343_v2 = vcvt.f32.s32 %v9811_v22 }
 0xb3d   :  { %v4240_v33 = vadd.s32 %v4239_v4, %v4237_v48  ;;  %v4252_v45 = vcvt.f32.s32 %v4251_v60  ;;  %6742 = vmatmul.mubr.msk.f32.gmra.mrb[96].mxu1 %vm108_vm0, %v6106_v20  ;;  %vm4635_vm3 = vcmp.eq.s32.totalorder %v11431_v62, %v4225_v37  ;;  %v3602_v37 = vsel %vm635_vm2, %v3540_v24, 0.0  ;;  %v11436_v60 = vld [vmem:[#allocation87_spill] sm:$0xff] }
 0xb3e   :  { %v4266_v23 = vpop.xlane.xlu1 %4265  ;;  %v6107_v12 = vsel %vm4635_vm3, 1.0, %v11432_v27  ;;  %v3541_v16 = vmul.f32 %v11436_v60, %v11436_v60  ;;  %v4328_v20 = vcvt.f32.s32 %v9806_v58  ;;  %v4358_v58 = vcvt.f32.s32 %v9816_v47 }
 0xb3f   :  { %v4255_v53 = vadd.s32 %v4254_v43, %v4252_v45  ;;  %v4267_v63 = vcvt.f32.s32 %v4266_v23  ;;  %3600 = vadd.xlane.f32.xlu0 %v3599_v57  ;;  %6744 = vmatprep.mubr.msk.f32.mxu1 %vm108_vm0, %v6107_v12  ;;  %vm4636_vm4 = vcmp.eq.s32.totalorder %v11431_v62, %v4240_v33  ;;  %v4314_v23 = vshll.u32 %v4313_v7, 16 }
 0xb40   :  { %v4281_v4 = vpop.xlane.xlu0 %4280  ;;  %v6108_v1 = vsel %vm4636_vm4, 1.0, %v11432_v27  ;;  %v4344_v7 = vshll.u32 %v4343_v2, 16  ;;  %v4388_v2 = vcvt.f32.s32 %v9826_v17  ;;  %v4418_v17 = vcvt.f32.s32 %v9836_v52 }
 0xb41   :  { %v4270_v44 = vadd.s32 %v4269_v38, %v4267_v63  ;;  %v4282_v19 = vcvt.f32.s32 %v4281_v4  ;;  %6745 = vmatmul.mubr.msk.f32.gmra.mrb[98].mxu1 %vm108_vm0, %v6108_v1  ;;  %vm4637_vm5 = vcmp.eq.s32.totalorder %v11431_v62, %v4255_v53  ;;  %v3605_v38 = vsel %vm635_vm2, %v3541_v16, 0.0  ;;  %v11437_v63 = vld [vmem:[#allocation86_spill] sm:$0xff] }
 0xb42   :  { %v4296_v15 = vpop.xlane.xlu1 %4295  ;;  %v6109_v48 = vsel %vm4637_vm5, 1.0, %v11432_v27  ;;  %v3542_v22 = vmul.f32 %v11437_v63, %v11437_v63 }
 0xb43   :  { %v4285_v43 = vadd.s32 %v4284_v3, %v4282_v19  ;;  %v4297_v33 = vcvt.f32.s32 %v4296_v15  ;;  %3603 = vadd.xlane.f32.xlu0 %v3602_v37  ;;  %6747 = vmatprep.mubr.msk.f32.mxu1 %vm108_vm0, %v6109_v48  ;;  %vm4638_vm6 = vcmp.eq.s32.totalorder %v11431_v62, %v4270_v44  ;;  %v4329_v3 = vshll.u32 %v4328_v20, 16 }
 0xb44   :  { %v4311_v45 = vpop.xlane.xlu0 %4310  ;;  %v6110_v46 = vsel %vm4638_vm6, 1.0, %v11432_v27  ;;  %v4373_v19 = vcvt.f32.s32 %v9821_v10  ;;  %v4359_v37 = vshll.u32 %v4358_v58, 16  ;;  %v3608_v16 = vsel %vm635_vm2, %v3542_v22, 0.0 }
 0xb45   :  { %v4300_v57 = vadd.s32 %v4299_v31, %v4297_v33  ;;  %v4312_v12 = vcvt.f32.s32 %v4311_v45  ;;  %6748 = vmatmul.mubr.msk.f32.gmra.mrb[100].mxu1 %vm108_vm0, %v6110_v46  ;;  %vm4639_vm7 = vcmp.eq.s32.totalorder %v11431_v62, %v4285_v43  ;;  %v11438_v43 = vld [vmem:[#allocation89_spill] sm:$0xff]  ;;  %v4403_v10 = vcvt.f32.s32 %v9831_v41 }
 0xb46   :  { %v4326_v24 = vpop.xlane.xlu1 %4325  ;;  %v6111_v53 = vsel %vm4639_vm7, 1.0, %v11432_v27  ;;  %v3543_v33 = vmul.f32 %v11438_v43, %v11438_v43 }
 0xb47   :  { %v4315_v4 = vadd.s32 %v4314_v23, %v4312_v12  ;;  %v4327_v1 = vcvt.f32.s32 %v4326_v24  ;;  %3606 = vadd.xlane.f32.xlu0 %v3605_v38  ;;  %6750 = vmatprep.mubr.msk.f32.mxu1 %vm108_vm0, %v6111_v53  ;;  %vm4640_vm8 = vcmp.eq.s32.totalorder %v11431_v62, %v4300_v57  ;;  %v4374_v12 = vshll.u32 %v4373_v19, 16 }
 0xb48   :  { %v4341_v44 = vpop.xlane.xlu0 %4340  ;;  %v6112_v47 = vsel %vm4640_vm8, 1.0, %v11432_v27  ;;  %v3611_v53 = vsel %vm635_vm2, %v3543_v33, 0.0  ;;  %v4433_v19 = vcvt.f32.s32 %v9841_v18  ;;  %v11440_v33 = vld [vmem:[#allocation91_spill] sm:$0xff]  ;;  %v4463_v18 = vcvt.f32.s32 %v9851_v59 }
 0xb49   :  { %v4330_v31 = vadd.s32 %v4329_v3, %v4327_v1  ;;  %v4342_v15 = vcvt.f32.s32 %v4341_v44  ;;  %6751 = vmatmul.mubr.msk.f32.gmra.mrb[102].mxu1 %vm108_vm0, %v6112_v47  ;;  %vm4641_vm9 = vcmp.eq.s32.totalorder %v11431_v62, %v4315_v4  ;;  %v11439_v3 = vld [vmem:[#allocation88_spill] sm:$0xff]  ;;  %v4389_v4 = vshll.u32 %v4388_v2, 16 }
 0xb4a   :  { %v4356_v48 = vpop.xlane.xlu1 %4355  ;;  %v6113_v20 = vsel %vm4641_vm9, 1.0, %v11432_v27  ;;  %v3544_v41 = vmul.f32 %v11439_v3, %v11439_v3  ;;  %v4404_v44 = vshll.u32 %v4403_v10, 16  ;;  %v3545_v2 = vmul.f32 %v11440_v33, %v11440_v33 }
 0xb4b   :  { %v4345_v45 = vadd.s32 %v4344_v7, %v4342_v15  ;;  %v4357_v46 = vcvt.f32.s32 %v4356_v48  ;;  %3609 = vadd.xlane.f32.xlu0 %v3608_v16  ;;  %6753 = vmatprep.mubr.msk.f32.mxu1 %vm108_vm0, %v6113_v20  ;;  %vm4642_vm10 = vcmp.eq.s32.totalorder %v11431_v62, %v4330_v31 }
 0xb4c   :  { %v4371_v23 = vpop.xlane.xlu0 %4370  ;;  %v6114_v57 = vsel %vm4642_vm10, 1.0, %v11432_v27  ;;  %v3614_v16 = vsel %vm635_vm2, %v3544_v41, 0.0 }
 0xb4d   :  { %v4360_v58 = vadd.s32 %v4359_v37, %v4357_v46  ;;  %v4372_v24 = vcvt.f32.s32 %v4371_v23  ;;  %6754 = vmatmul.mubr.msk.f32.gmra.mrb[104].mxu1 %vm108_vm0, %v6114_v57  ;;  %vm4643_vm11 = vcmp.eq.s32.totalorder %v11431_v62, %v4345_v45  ;;  %v4419_v37 = vshll.u32 %v4418_v17, 16 }
 0xb4e   :  { %v4386_v38 = vpop.xlane.xlu1 %4385  ;;  %v6115_v22 = vsel %vm4643_vm11, 1.0, %v11432_v27  ;;  %v4448_v45 = vcvt.f32.s32 %v9846_v13  ;;  %v6899_v13 = vld [vmem:[%s10833_s1 + $0x30] sm:$0xff]   ;;  %v4478_v17 = vcvt.f32.s32 %v9856_v42 }
 0xb4f   :  { %v4375_v1 = vadd.s32 %v4374_v12, %v4372_v24  ;;  %v4387_v7 = vcvt.f32.s32 %v4386_v38  ;;  %3612 = vadd.xlane.f32.xlu0 %v3611_v53  ;;  %6756 = vmatprep.mubr.msk.f32.mxu1 %vm108_vm0, %v6115_v22  ;;  %vm4644_vm12 = vcmp.eq.s32.totalorder %v11431_v62, %v4360_v58  ;;  %v4434_v12 = vshll.u32 %v4433_v19, 16  ;;  %v11441_v22 = vld [vmem:[#allocation27_spill] sm:$0xff] }
 0xb50   :  { %v4401_v47 = vpop.xlane.xlu0 %4400  ;;  %v6116_v52 = vsel %vm4644_vm12, 1.0, %v11432_v27  ;;  %v3617_v53 = vsel %vm635_vm2, %v3545_v2, 0.0  ;;  %v1991_v41 = vmul.f32 %v11441_v22, %v11441_v22  ;;  %6786 = vmatprep.subr.bf16.mxu0 %v6899_v13 }
 0xb51   :  { %v4390_v31 = vadd.s32 %v4389_v4, %v4387_v7  ;;  %v4402_v15 = vcvt.f32.s32 %v4401_v47  ;;  %6757 = vmatmul.mubr.msk.f32.gmra.mrb[106].mxu1 %vm108_vm0, %v6116_v52  ;;  %vm4645_vm13 = vcmp.eq.s32.totalorder %v11431_v62, %v4375_v1  ;;  %v4449_v4 = vshll.u32 %v4448_v45, 16  ;;  %6787 = vmatpush3.bf16.msra.mxu0 %v6899_v13 }
 0xb52   :  { %v4416_v48 = vpop.xlane.xlu1 %4415  ;;  %v6117_v20 = vsel %vm4645_vm13, 1.0, %v11432_v27  ;;  %v4493_v52 = vcvt.f32.s32 %v9861_v29  ;;  %v4508_v45 = vcvt.f32.s32 %v9866_v54  ;;  %v4538_v54 = vcvt.f32.s32 %v9876_v26 }
 0xb53   :  { %v4405_v46 = vadd.s32 %v4404_v44, %v4402_v15  ;;  %v4417_v10 = vcvt.f32.s32 %v4416_v48  ;;  %3615 = vadd.xlane.f32.xlu0 %v3614_v16  ;;  %6759 = vmatprep.mubr.msk.f32.mxu1 %vm108_vm0, %v6117_v20  ;;  %vm4646_vm14 = vcmp.eq.s32.totalorder %v11431_v62, %v4390_v31  ;;  %v4464_v44 = vshll.u32 %v4463_v18, 16  ;;  %v11442_v20 = vld [vmem:[#allocation93_spill] sm:$0xff] }
 0xb54   :  { %v4431_v23 = vpop.xlane.xlu0 %4430  ;;  %v6118_v57 = vsel %vm4646_vm14, 1.0, %v11432_v27  ;;  %v4479_v15 = vshll.u32 %v4478_v17, 16  ;;  %v2065_v48 = vsel %vm635_vm2, %v1991_v41, 0.0  ;;  %v3547_v2 = vmul.f32 %v11442_v20, %v11442_v20 }
 0xb55   :  { %v4420_v58 = vadd.s32 %v4419_v37, %v4417_v10  ;;  %v4432_v24 = vcvt.f32.s32 %v4431_v23  ;;  %6760 = vmatmul.mubr.msk.f32.gmra.mrb[108].mxu1 %vm108_vm0, %v6118_v57  ;;  %vm4647_vm15 = vcmp.eq.s32.totalorder %v11431_v62, %v4405_v46  ;;  %v4523_v10 = vcvt.f32.s32 %v9871_v21 }
 0xb56   :  { %v4446_v38 = vpop.xlane.xlu1 %4445  ;;  %v6119_v59 = vsel %vm4647_vm15, 1.0, %v11432_v27  ;;  %v4494_v57 = vshll.u32 %v4493_v52, 16  ;;  %v3623_v13 = vsel %vm635_vm2, %v3547_v2, 0.0 }
 0xb57   :  { %v4435_v1 = vadd.s32 %v4434_v12, %v4432_v24  ;;  %v4447_v7 = vcvt.f32.s32 %v4446_v38  ;;  %3618 = vadd.xlane.f32.xlu0 %v3617_v53  ;;  %6762 = vmatprep.mubr.msk.f32.mxu1 %vm108_vm0, %v6119_v59  ;;  %vm4648_vm3 = vcmp.eq.s32.totalorder %v11431_v62, %v4420_v58  ;;  %v4509_v38 = vshll.u32 %v4508_v45, 16 }
 0xb58   :  { %v4461_v47 = vpop.xlane.xlu0 %4460  ;;  %v6120_v42 = vsel %vm4648_vm3, 1.0, %v11432_v27  ;;  %v4524_v59 = vshll.u32 %v4523_v10, 16 }
 0xb59   :  { %v4450_v19 = vadd.s32 %v4449_v4, %v4447_v7  ;;  %v4462_v31 = vcvt.f32.s32 %v4461_v47  ;;  %6763 = vmatmul.mubr.msk.f32.gmra.mrb[110].mxu1 %vm108_vm0, %v6120_v42  ;;  %vm4649_vm4 = vcmp.eq.s32.totalorder %v11431_v62, %v4435_v1  ;;  %v4553_v4 = vcvt.f32.s32 %v9881_v36 }
 0xb5a   :  { %v4476_v37 = vpop.xlane.xlu1 %4475  ;;  %v6121_v16 = vsel %vm4649_vm4, 1.0, %v11432_v27  ;;  %v4539_v7 = vshll.u32 %v4538_v54, 16  ;;  %v4568_v42 = vcvt.f32.s32 %v9886_v25  ;;  %v4583_v36 = vcvt.f32.s32 %v9891_v11 }
 0xb5b   :  { %v4465_v46 = vadd.s32 %v4464_v44, %v4462_v31  ;;  %v4477_v29 = vcvt.f32.s32 %v4476_v37  ;;  %2066 = vadd.xlane.f32.xlu0 %v2065_v48  ;;  %6765 = vmatprep.mubr.msk.f32.mxu1 %vm108_vm0, %v6121_v16  ;;  %vm4650_vm5 = vcmp.eq.s32.totalorder %v11431_v62, %v4450_v19  ;;  %v4554_v37 = vshll.u32 %v4553_v4, 16 }
 0xb5c   :  { %v4491_v18 = vpop.xlane.xlu0 %4490  ;;  %v6122_v23 = vsel %vm4650_vm5, 1.0, %v11432_v27  ;;  %v4598_v25 = vcvt.f32.s32 %v9896_v8  ;;  %v4584_v11 = vshll.u32 %v4583_v36, 16 }
 0xb5d   :  { %v4480_v12 = vadd.s32 %v4479_v15, %v4477_v29  ;;  %v4492_v58 = vcvt.f32.s32 %v4491_v18  ;;  %6766 = vmatmul.mubr.msk.f32.gmra.mrb[112].mxu1 %vm108_vm0, %v6122_v23  ;;  %vm4651_vm6 = vcmp.eq.s32.totalorder %v11431_v62, %v4465_v46  ;;  %v4569_v46 = vshll.u32 %v4568_v42, 16 }
 0xb5e   :  { %v4506_v24 = vpop.xlane.xlu1 %4505  ;;  %v6123_v17 = vsel %vm4651_vm6, 1.0, %v11432_v27  ;;  %v4599_v8 = vshll.u32 %v4598_v25, 16 }
 0xb5f   :  { %v4495_v53 = vadd.s32 %v4494_v57, %v4492_v58  ;;  %v4507_v21 = vcvt.f32.s32 %v4506_v24  ;;  %3624 = vadd.xlane.f32.xlu0 %v3623_v13  ;;  %6768 = vmatprep.mubr.msk.f32.mxu1 %vm108_vm0, %v6123_v17  ;;  %vm4652_vm7 = vcmp.eq.s32.totalorder %v11431_v62, %v4480_v12  ;;  %v4613_v57 = vcvt.f32.s32 %v9901_v39 }
 0xb60   :  { %v4521_v22 = vpop.xlane.xlu0 %4520  ;;  %v6124_v41 = vsel %vm4652_vm7, 1.0, %v11432_v27  ;;  %v4628_v13 = vcvt.f32.s32 %v9905_v56 }
 0xb61   :  { %v4510_v26 = vadd.s32 %v4509_v38, %v4507_v21  ;;  %v4522_v1 = vcvt.f32.s32 %v4521_v22  ;;  %6769 = vmatmul.mubr.msk.f32.gmra.mrb[114].mxu1 %vm108_vm0, %v6124_v41  ;;  %vm4653_vm8 = vcmp.eq.s32.totalorder %v11431_v62, %v4495_v53  ;;  %v4614_v21 = vshll.u32 %v4613_v57, 16 }
 0xb62   :  { %v4536_v44 = vpop.xlane.xlu1 %4535  ;;  %v6125_v47 = vsel %vm4653_vm8, 1.0, %v11432_v27  ;;  %v4629_v56 = vshll.u32 %v4628_v13, 16 }
 0xb63   :  { %v4525_v52 = vadd.s32 %v4524_v59, %v4522_v1  ;;  %v4537_v19 = vcvt.f32.s32 %v4536_v44  ;;  %6771 = vmatprep.mubr.msk.f32.mxu1 %vm108_vm0, %v6125_v47  ;;  %vm4654_vm9 = vcmp.eq.s32.totalorder %v11431_v62, %v4510_v26 }
 0xb64   :  { %v4551_v31 = vpop.xlane.xlu0 %4550  ;;  %v6126_v15 = vsel %vm4654_vm9, 1.0, %v11432_v27 }
 0xb65   :  { %v4540_v48 = vadd.s32 %v4539_v7, %v4537_v19  ;;  %v4552_v16 = vcvt.f32.s32 %v4551_v31  ;;  %6772 = vmatmul.mubr.msk.f32.gmra.mrb[116].mxu1 %vm108_vm0, %v6126_v15  ;;  %vm4655_vm10 = vcmp.eq.s32.totalorder %v11431_v62, %v4525_v52 }
 0xb66   :  { %v4566_v2 = vpop.xlane.xlu1 %4565  ;;  %v6127_v45 = vsel %vm4655_vm10, 1.0, %v11432_v27 }
 0xb67   :  { %v4555_v29 = vadd.s32 %v4554_v37, %v4552_v16  ;;  %v4567_v10 = vcvt.f32.s32 %v4566_v2  ;;  %6774 = vmatprep.mubr.msk.f32.mxu1 %vm108_vm0, %v6127_v45  ;;  %vm4656_vm11 = vcmp.eq.s32.totalorder %v11431_v62, %v4540_v48 }
 0xb68   :  { %v4581_v18 = vpop.xlane.xlu0 %4580  ;;  %v6128_v23 = vsel %vm4656_vm11, 1.0, %v11432_v27 }
 0xb69   :  { %v4570_v12 = vadd.s32 %v4569_v46, %v4567_v10  ;;  %v4582_v58 = vcvt.f32.s32 %v4581_v18  ;;  %6775 = vmatmul.mubr.msk.f32.gmra.mrb[118].mxu1 %vm108_vm0, %v6128_v23  ;;  %vm4657_vm12 = vcmp.eq.s32.totalorder %v11431_v62, %v4555_v29 }
 0xb6a   :  { %v4596_v54 = vpop.xlane.xlu1 %4595  ;;  %v6129_v24 = vsel %vm4657_vm12, 1.0, %v11432_v27 }
 0xb6b   :  { %v4585_v17 = vadd.s32 %v4584_v11, %v4582_v58  ;;  %v4597_v38 = vcvt.f32.s32 %v4596_v54  ;;  %6777 = vmatprep.mubr.msk.f32.mxu1 %vm108_vm0, %v6129_v24  ;;  %vm4658_vm13 = vcmp.eq.s32.totalorder %v11431_v62, %v4570_v12 }
 0xb6c   :  { %v4611_v53 = vpop.xlane.xlu0 %4610  ;;  %v6130_v39 = vsel %vm4658_vm13, 1.0, %v11432_v27 }
 0xb6d   :  { %v4600_v59 = vadd.s32 %v4599_v8, %v4597_v38  ;;  %v4612_v22 = vcvt.f32.s32 %v4611_v53  ;;  %6778 = vmatmul.mubr.msk.f32.gmra.mrb[120].mxu1 %vm108_vm0, %v6130_v39  ;;  %vm4659_vm14 = vcmp.eq.s32.totalorder %v11431_v62, %v4585_v17 }
 0xb6e   :  { %v4626_v41 = vpop.xlane.xlu1 %4625  ;;  %v6131_v4 = vsel %vm4659_vm14, 1.0, %v11432_v27 }
 0xb6f   :  { %v4615_v26 = vadd.s32 %v4614_v21, %v4612_v22  ;;  %v4627_v1 = vcvt.f32.s32 %v4626_v41  ;;  %6780 = vmatprep.mubr.msk.f32.mxu1 %vm108_vm0, %v6131_v4  ;;  %vm4660_vm15 = vcmp.eq.s32.totalorder %v11431_v62, %v4600_v59 }
 0xb70   :  { %v2004_v7 = vpop.xlane.xlu0 %2003  ;;  %v6132_v44 = vsel %vm4660_vm15, 1.0, %v11432_v27 }
 0xb71   :  { %v4630_v47 = vadd.s32 %v4629_v56, %v4627_v1  ;;  %6781 = vmatmul.mubr.msk.f32.gmra.mrb[122].mxu1 %vm108_vm0, %v6132_v44  ;;  %vm4661_vm3 = vcmp.eq.s32.totalorder %v11431_v62, %v4615_v26 }
 0xb72   :  { %v2007_v42 = vpop.xlane.xlu1 %2006  ;;  %v6133_v52 = vsel %vm4661_vm3, 1.0, %v11432_v27 }
 0xb73   :  { %6783 = vmatprep.mubr.msk.f32.mxu1 %vm108_vm0, %v6133_v52  ;;  %vm4662_vm4 = vcmp.eq.s32.totalorder %v11431_v62, %v4630_v47 }
 0xb74   :  { %v2010_v19 = vpop.xlane.xlu0 %2009  ;;  %v6134_v36 = vsel %vm4662_vm4, 1.0, %v11432_v27 }
 0xb75   :  { %6784 = vmatmul.mubr.msk.f32.gmra.mrb[124].mxu1 %vm108_vm0, %v6134_v36 }
 0xb76   :  { %v2013_v31 = vpop.xlane.xlu1 %2012 }
 0xb78   :  { %v2016_v15 = vpop.xlane.xlu0 %2015 }
 0xb7a   :  { %v2019_v37 = vpop.xlane.xlu1 %2018 }
 0xb7c   :  { %v2022_v48 = vpop.xlane.xlu0 %2021 }
 0xb7e   :  { %v2025_v16 = vpop.xlane.xlu1 %2024 }
 0xb80   :  { %v2028_v25 = vpop.xlane.xlu0 %2027 }
 0xb82   :  { %v2031_v2 = vpop.xlane.xlu1 %2030 }
 0xb84   :  { %v2034_v45 = vpop.xlane.xlu0 %2033 }
 0xb86   :  { %v2037_v46 = vpop.xlane.xlu1 %2036 }
 0xb88   :  { %v2040_v29 = vpop.xlane.xlu0 %2039 }
 0xb8a   :  { %v2043_v10 = vpop.xlane.xlu1 %2042 }
 0xb8c   :  { %v10178_v11 = vpop.xlane.xlu0 %2045 }
 0xb8d   :  { %11443 = vst [vmem:[#allocation102_spill] sm:$0xff] %v10178_v11 }
 0xb8e   :  { %v10180_v18 = vpop.xlane.xlu1 %2048 }
 0xb8f   :  { %11444 = vst [vmem:[#allocation103_spill] sm:$0xff] %v10180_v18  ;;  %v11482_v18 = vld [vmem:[#allocation50_spill] sm:$0xff] }
 0xb90   :  { %v10182_v62 = vpop.xlane.xlu0 %2051 }
 0xb91   :  { %11445 = vst [vmem:[#allocation104_spill] sm:$0xff] %v10182_v62 }
 0xb92   :  { %v10184_v27 = vpop.xlane.xlu1 %2054 }
 0xb93   :  { %11446 = vst [vmem:[#allocation105_spill] sm:$0xff] %v10184_v27 }
 0xb94   :  { %v10186_v23 = vpop.xlane.xlu0 %2057 }
 0xb95   :  { %11447 = vst [vmem:[#allocation106_spill] sm:$0xff] %v10186_v23  ;;  %v11478_v23 = vld [vmem:[#allocation14_spill] sm:$0xff] }
 0xb96   :  { %v10188_v57 = vpop.xlane.xlu1 %2060 }
 0xb97   :  { %11448 = vst [vmem:[#allocation107_spill] sm:$0xff] %v10188_v57 }
 0xb98   :  { %v10190_v12 = vpop.xlane.xlu0 %2063 }
 0xb99   :  { %11449 = vst [vmem:[#allocation108_spill] sm:$0xff] %v10190_v12 }
 0xb9a   :  { %v3559_v58 = vpop.xlane.xlu1 %3558 }
 0xb9b   :  { %v10192_v8 = vadd.f32 %v3559_v58, %v2004_v7 }
 0xb9c   :  { %v3562_v54 = vpop.xlane.xlu0 %3561 }
 0xb9d   :  { %v10194_v24 = vadd.f32 %v3562_v54, %v2007_v42 }
 0xb9e   :  { %v3565_v13 = vpop.xlane.xlu1 %3564 }
 0xb9f   :  { %v10196_v17 = vadd.f32 %v3565_v13, %v2010_v19 }
 0xba0   :  { %v3568_v38 = vpop.xlane.xlu0 %3567 }
 0xba1   :  { %v10198_v53 = vadd.f32 %v3568_v38, %v2013_v31  ;;  %v11461_v38 = vld [vmem:[#allocation73_spill] sm:$0xff] }
 0xba4   :  { %v3571_v39 = vpop.xlane.xlu0 %3570 }
 0xba5   :  { %v10200_v21 = vadd.f32 %v3571_v39, %v2016_v15 }
 0xba7   :  { %11450 = vst [vmem:[#allocation110_spill] sm:$0xff] %v10200_v21  ;;  %v11498_v21 = vld [vmem:[#allocation59_spill] sm:$0xff] }
 0xba8   :  { %v3574_v59 = vpop.xlane.xlu0 %3573 }
 0xba9   :  { %v10202_v22 = vadd.f32 %v3574_v59, %v2019_v37 }
 0xbab   :  { %11451 = vst [vmem:[#allocation109_spill] sm:$0xff] %v10202_v22  ;;  %v11497_v22 = vld [vmem:[#allocation58_spill] sm:$0xff] }
 0xbac   :  { %v3577_v41 = vpop.xlane.xlu0 %3576 }
 0xbad   :  { %v10204_v4 = vadd.f32 %v3577_v41, %v2022_v48 }
 0xbaf   :  { %11452 = vst [vmem:[#allocation111_spill] sm:$0xff] %v10204_v4 }
 0xbb0   :  { %v3580_v56 = vpop.xlane.xlu0 %3579 }
 0xbb1   :  { %v10206_v26 = vadd.f32 %v3580_v56, %v2025_v16 }
 0xbb3   :  { %11453 = vst [vmem:[#allocation41_spill] sm:$0xff] %v10206_v26 }
 0xbb4   :  { %v3583_v1 = vpop.xlane.xlu0 %3582 }
 0xbb5   :  { %v10208_v7 = vadd.f32 %v3583_v1, %v2028_v25  ;;  %v11460_v25 = vld [vmem:[#allocation71_spill] sm:$0xff] }
 0xbb7   :  { %11454 = vst [vmem:[#allocation112_spill] sm:$0xff] %v10208_v7 }
 0xbb8   :  { %v3586_v44 = vpop.xlane.xlu0 %3585 }
 0xbb9   :  { %v10210_v47 = vadd.f32 %v3586_v44, %v2031_v2 }
 0xbbb   :  { %11455 = vst [vmem:[#allocation39_spill] sm:$0xff] %v10210_v47  ;;  %v11490_v47 = vld [vmem:[#allocation54_spill] sm:$0xff] }
 0xbbc   :  { %v3589_v42 = vpop.xlane.xlu0 %3588 }
 0xbbd   :  { %v10212_v52 = vadd.f32 %v3589_v42, %v2034_v45  ;;  %v11464_v42 = vld [vmem:[#allocation78_spill] sm:$0xff] }
 0xbbf   :  { %11456 = vst [vmem:[#allocation45_spill] sm:$0xff] %v10212_v52 }
 0xbc0   :  { %v3592_v19 = vpop.xlane.xlu0 %3591 }
 0xbc1   :  { %v10214_v36 = vadd.f32 %v3592_v19, %v2037_v46 }
 0xbc3   :  { %11457 = vst [vmem:[#allocation43_spill] sm:$0xff] %v10214_v36 }
 0xbc4   :  { %v3595_v31 = vpop.xlane.xlu0 %3594 }
 0xbc5   :  { %v10216_v15 = vadd.f32 %v3595_v31, %v2040_v29  ;;  %v11462_v29 = vld [vmem:[#allocation75_spill] sm:$0xff]  ;;  %v11465_v31 = vld [vmem:[#allocation25_spill] sm:$0xff] }
 0xbc7   :  { %11458 = vst [vmem:[#allocation7_spill] sm:$0xff] %v10216_v15  ;;  %v11486_v15 = vld [vmem:[#allocation52_spill] sm:$0xff] }
 0xbc8   :  { %v3598_v37 = vpop.xlane.xlu0 %3597 }
 0xbc9   :  { %v10218_v48 = vadd.f32 %v3598_v37, %v2043_v10  ;;  %v1993_v37 = vmul.f32 %v11465_v31, %v11465_v31 }
 0xbcb   :  { %11459 = vst [vmem:[#allocation47_spill] sm:$0xff] %v10218_v48 }
 0xc0c   :  { %v6740_v16 = vpop.f32.mrb[94].mxu1 }
 0xc0d   :  { %v5049_v58 = vsub.f32 %v11417_v35, %v6740_v16  ;;  %v5241_v54 = vadd.f32 %v6740_v16, %v11460_v25  ;;  %v4889_v13 = vpop.f32.mrb[95].mxu1  ;;  %v11463_v35 = vld [vmem:[#allocation92_spill] sm:$0xff]  ;;  %v11466_v25 = vld [vmem:[#allocation79_spill] sm:$0xff] }
 0xc0e   :  { %v5048_v2 = vsub.f32 %v11416_v30, %v4889_v13  ;;  %v5240_v45 = vadd.f32 %v4889_v13, %v11461_v38  ;;  %v3548_v44 = vmul.f32 %v11463_v35, %v11463_v35  ;;  %v11467_v38 = vld [vmem:[#allocation30_spill] sm:$0xff] }
 0xc0f   :  { %v5081_v39 = vmul.f32 %v5049_v58, %v5049_v58 }
 0xc10   :  { %v5080_v59 = vmul.f32 %v5048_v2, %v5048_v2  ;;  %v5272_v46 = vpack.c.bf16 %v5241_v54, %v5240_v45  ;;  %v10224_v41 = vpop.f32.mrb[96].mxu1  ;;  %v3626_v2 = vsel %vm635_vm2, %v3548_v44, 0.0  ;;  %v1994_v45 = vmul.f32 %v11467_v38, %v11467_v38  ;;  %v11473_v38 = vld [vmem:[#allocation31_spill] sm:$0xff] }
 0xc11   :  { %v5243_v56 = vadd.f32 %v10224_v41, %v11462_v29  ;;  %v10228_v10 = vpop.f32.mrb[97].mxu1  ;;  %v5115_v1 = vsel %vm635_vm2, %v5081_v39, 0.0  ;;  %v11468_v39 = vld [vmem:[#allocation38_spill] sm:$0xff]  ;;  %v11469_v29 = vld [vmem:[#allocation95_spill] sm:$0xff] }
 0xc12   :  { %v5242_v30 = vadd.f32 %v10228_v10, %v11464_v42  ;;  %5116 = vadd.xlane.f32.xlu1 %v5115_v1  ;;  %6788 = vmatprep.mubr.msk.bf16.mxu0 %vm635_vm2, %v5272_v46  ;;  %v5112_v19 = vsel %vm635_vm2, %v5080_v59, 0.0  ;;  %v2071_v46 = vsel %vm635_vm2, %v1993_v37, 0.0  ;;  %v2074_v31 = vsel %vm635_vm2, %v1994_v45, 0.0 }
 0xc13   :  { %5113 = vadd.xlane.f32.xlu0 %v5112_v19 }
 0xc14   :  { %v5273_v16 = vpack.c.bf16 %v5243_v56, %v5242_v30  ;;  %v10239_v58 = vpop.f32.mrb[98].mxu1  ;;  %v3549_v56 = vmul.f32 %v11469_v29, %v11469_v29  ;;  %v11470_v30 = vld [vmem:[#allocation42_spill] sm:$0xff] }
 0xc15   :  { %v5245_v54 = vadd.f32 %v10239_v58, %v11466_v25  ;;  %v10243_v13 = vpop.f32.mrb[99].mxu1  ;;  %v11471_v25 = vld [vmem:[#allocation94_spill] sm:$0xff] }
 0xc16   :  { %v5244_v59 = vadd.f32 %v10243_v13, %v11468_v39  ;;  %3627 = vadd.xlane.f32.xlu1 %v3626_v2  ;;  %6789 = vmatmul.mubr.msk.bf16.vlgmr.msra.gmra.mrb[132].mxu0 %vm635_vm2, %v5273_v16  ;;  %v3550_v2 = vmul.f32 %v11471_v25, %v11471_v25  ;;  %v11472_v16 = vld [vmem:[#allocation46_spill] sm:$0xff]  ;;  %v1995_v39 = vmul.f32 %v11473_v38, %v11473_v38 }
 0xc17   :  { %2072 = vadd.xlane.f32.xlu0 %v2071_v46 }
 0xc18   :  { %v5274_v1 = vpack.c.bf16 %v5245_v54, %v5244_v59  ;;  %v10254_v42 = vpop.f32.mrb[100].mxu1  ;;  %v3629_v54 = vsel %vm635_vm2, %v3549_v56, 0.0  ;;  %v3632_v57 = vsel %vm635_vm2, %v3550_v2, 0.0 }
 0xc19   :  { %v5247_v44 = vadd.f32 %v10254_v42, %v11470_v30  ;;  %v10258_v19 = vpop.f32.mrb[101].mxu1  ;;  %v11474_v30 = vld [vmem:[#allocation6_spill] sm:$0xff] }
 0xc1a   :  { %v5246_v37 = vadd.f32 %v10258_v19, %v11472_v16  ;;  %2075 = vadd.xlane.f32.xlu1 %v2074_v31  ;;  %6792 = vmatprep.mubr.msk.bf16.mxu0 %vm635_vm2, %v5274_v1  ;;  %v11475_v16 = vld [vmem:[#allocation32_spill] sm:$0xff]  ;;  %v11476_v1 = vld [vmem:[#allocation10_spill] sm:$0xff] }
 0xc1b   :  { %3630 = vadd.xlane.f32.xlu0 %v3629_v54  ;;  %v1996_v31 = vmul.f32 %v11475_v16, %v11475_v16 }
 0xc1c   :  { %v5275_v59 = vpack.c.bf16 %v5247_v44, %v5246_v37  ;;  %v10269_v46 = vpop.f32.mrb[102].mxu1  ;;  %v2077_v44 = vsel %vm635_vm2, %v1995_v39, 0.0  ;;  %v11477_v37 = vld [vmem:[#allocation97_spill] sm:$0xff] }
 0xc1d   :  { %v5249_v45 = vadd.f32 %v10269_v46, %v11474_v30  ;;  %v10273_v12 = vpop.f32.mrb[103].mxu1  ;;  %v3551_v54 = vmul.f32 %v11477_v37, %v11477_v37  ;;  %v2080_v16 = vsel %vm635_vm2, %v1996_v31, 0.0 }
 0xc1e   :  { %v5248_v56 = vadd.f32 %v10273_v12, %v11476_v1  ;;  %3633 = vadd.xlane.f32.xlu1 %v3632_v57  ;;  %6793 = vmatmul.mubr.msk.bf16.gmra.mrb[136].mxu0 %vm635_vm2, %v5275_v59  ;;  %v11479_v1 = vld [vmem:[#allocation96_spill] sm:$0xff]  ;;  %v11480_v59 = vld [vmem:[#allocation49_spill] sm:$0xff] }
 0xc1f   :  { %2078 = vadd.xlane.f32.xlu0 %v2077_v44  ;;  %v3552_v57 = vmul.f32 %v11479_v1, %v11479_v1 }
 0xc20   :  { %v5276_v38 = vpack.c.bf16 %v5249_v45, %v5248_v56  ;;  %v10284_v30 = vpop.f32.mrb[104].mxu1  ;;  %v3635_v45 = vsel %vm635_vm2, %v3551_v54, 0.0  ;;  %v11481_v56 = vld [vmem:[#allocation29_spill] sm:$0xff] }
 0xc21   :  { %v5251_v2 = vadd.f32 %v10284_v30, %v11478_v23  ;;  %v10288_v27 = vpop.f32.mrb[105].mxu1  ;;  %v1997_v44 = vmul.f32 %v11481_v56, %v11481_v56  ;;  %v3638_v48 = vsel %vm635_vm2, %v3552_v57, 0.0 }
 0xc22   :  { %v5250_v39 = vadd.f32 %v10288_v27, %v11480_v59  ;;  %2081 = vadd.xlane.f32.xlu1 %v2080_v16  ;;  %6796 = vmatprep.mubr.msk.bf16.mxu0 %vm635_vm2, %v5276_v38  ;;  %v11483_v59 = vld [vmem:[#allocation34_spill] sm:$0xff]  ;;  %v11484_v38 = vld [vmem:[#allocation51_spill] sm:$0xff] }
 0xc23   :  { %3636 = vadd.xlane.f32.xlu0 %v3635_v45  ;;  %v1998_v16 = vmul.f32 %v11483_v59, %v11483_v59 }
 0xc24   :  { %v5277_v23 = vpack.c.bf16 %v5251_v2, %v5250_v39  ;;  %v10299_v62 = vpop.f32.mrb[106].mxu1  ;;  %v2083_v2 = vsel %vm635_vm2, %v1997_v44, 0.0  ;;  %v11485_v39 = vld [vmem:[#allocation99_spill] sm:$0xff] }
 0xc25   :  { %v5253_v31 = vadd.f32 %v10299_v62, %v11482_v18  ;;  %v10303_v11 = vpop.f32.mrb[107].mxu1  ;;  %v3553_v45 = vmul.f32 %v11485_v39, %v11485_v39  ;;  %v2086_v59 = vsel %vm635_vm2, %v1998_v16, 0.0  ;;  %v5051_v16 = vsub.f32 %v11419_v9, %v10224_v41 }
 0xc26   :  { %v5252_v54 = vadd.f32 %v10303_v11, %v11484_v38  ;;  %3639 = vadd.xlane.f32.xlu1 %v3638_v48  ;;  %6797 = vmatmul.mubr.msk.bf16.gmra.mrb[140].mxu0 %vm635_vm2, %v5277_v23  ;;  %v11487_v38 = vld [vmem:[#allocation98_spill] sm:$0xff]  ;;  %v11488_v23 = vld [vmem:[#allocation53_spill] sm:$0xff] }
 0xc27   :  { %2084 = vadd.xlane.f32.xlu0 %v2083_v2  ;;  %v3554_v48 = vmul.f32 %v11487_v38, %v11487_v38 }
 0xc28   :  { %v5278_v18 = vpack.c.bf16 %v5253_v31, %v5252_v54  ;;  %v10314_v56 = vpop.f32.mrb[108].mxu1  ;;  %v3641_v31 = vsel %vm635_vm2, %v3553_v45, 0.0  ;;  %v11489_v54 = vld [vmem:[#allocation35_spill] sm:$0xff] }
 0xc29   :  { %v5255_v57 = vadd.f32 %v10314_v56, %v11486_v15  ;;  %v10318_v36 = vpop.f32.mrb[109].mxu1  ;;  %v1999_v2 = vmul.f32 %v11489_v54, %v11489_v54 }
 0xc2a   :  { %v5254_v44 = vadd.f32 %v10318_v36, %v11488_v23  ;;  %2087 = vadd.xlane.f32.xlu1 %v2086_v59  ;;  %6800 = vmatprep.mubr.msk.bf16.mxu0 %vm635_vm2, %v5278_v18  ;;  %v3644_v59 = vsel %vm635_vm2, %v3554_v48, 0.0  ;;  %v11491_v18 = vld [vmem:[#allocation36_spill] sm:$0xff]  ;;  %v11492_v23 = vld [vmem:[#allocation55_spill] sm:$0xff]  ;;  %v5050_v48 = vsub.f32 %v11418_v40, %v10228_v10  ;;  %v11496_v40 = vld [vmem:[#allocation33_spill] sm:$0xff] }
 0xc2b   :  { %3642 = vadd.xlane.f32.xlu0 %v3641_v31  ;;  %v2000_v45 = vmul.f32 %v11491_v18, %v11491_v18  ;;  %v5083_v31 = vmul.f32 %v5051_v16, %v5051_v16  ;;  %v11494_v18 = vld [vmem:[#allocation56_spill] sm:$0xff]  ;;  %v2001_v10 = vmul.f32 %v11496_v40, %v11496_v40 }
 0xc2c   :  { %v5279_v15 = vpack.c.bf16 %v5255_v57, %v5254_v44  ;;  %v10329_v52 = vpop.f32.mrb[110].mxu1  ;;  %v2089_v57 = vsel %vm635_vm2, %v1999_v2, 0.0  ;;  %v11493_v44 = vld [vmem:[#allocation101_spill] sm:$0xff]  ;;  %v6900_v2 = vld [vmem:[%s10833_s1 + $0x38] sm:$0xff]  }
 0xc2d   :  { %v5257_v7 = vadd.f32 %v10329_v52, %v11490_v47  ;;  %v10335_v26 = vpop.f32.mrb[111].mxu1  ;;  %v3555_v9 = vmul.f32 %v11493_v44, %v11493_v44  ;;  %6820 = vmatprep.subr.bf16.mxu1 %v6900_v2 }
 0xc2e   :  { %v5256_v54 = vadd.f32 %v10335_v26, %v11492_v23  ;;  %3645 = vadd.xlane.f32.xlu1 %v3644_v59  ;;  %6801 = vmatmul.mubr.msk.bf16.gmra.mrb[144].mxu0 %vm635_vm2, %v5279_v15  ;;  %v2092_v15 = vsel %vm635_vm2, %v2000_v45, 0.0  ;;  %v11495_v59 = vld [vmem:[#allocation57_spill] sm:$0xff]  ;;  %v5082_v45 = vmul.f32 %v5050_v48, %v5050_v48 }
 0xc2f   :  { %2090 = vadd.xlane.f32.xlu0 %v2089_v57  ;;  %v3647_v16 = vsel %vm635_vm2, %v3555_v9, 0.0  ;;  %6821 = vmatpush3.bf16.msra.mxu1 %v6900_v2 }
 0xc30   :  { %v5280_v47 = vpack.c.bf16 %v5257_v7, %v5256_v54  ;;  %v10346_v41 = vpop.f32.mrb[112].mxu1 }
 0xc31   :  { %v5259_v4 = vadd.f32 %v10346_v41, %v11494_v18  ;;  %v10352_v23 = vpop.f32.mrb[113].mxu1  ;;  %v5053_v18 = vsub.f32 %v11423_v32, %v10239_v58  ;;  %v11499_v58 = vld [vmem:[#allocation60_spill] sm:$0xff] }
 0xc32   :  { %v5258_v7 = vadd.f32 %v10352_v23, %v11495_v59  ;;  %2093 = vadd.xlane.f32.xlu1 %v2092_v15  ;;  %6804 = vmatprep.mubr.msk.bf16.mxu0 %vm635_vm2, %v5280_v47  ;;  %v5121_v47 = vsel %vm635_vm2, %v5083_v31, 0.0 }
 0xc33   :  { %3648 = vadd.xlane.f32.xlu0 %v3647_v16  ;;  %v5085_v32 = vmul.f32 %v5053_v18, %v5053_v18 }
 0xc34   :  { %v5281_v54 = vpack.c.bf16 %v5259_v4, %v5258_v7  ;;  %v10364_v57 = vpop.f32.mrb[114].mxu1  ;;  %v2095_v4 = vsel %vm635_vm2, %v2001_v10, 0.0 }
 0xc35   :  { %v5261_v15 = vadd.f32 %v10364_v57, %v11497_v22  ;;  %v4989_v59 = vpop.f32.mrb[115].mxu1  ;;  %v5052_v22 = vsub.f32 %v11421_v61, %v10243_v13  ;;  %v5055_v13 = vsub.f32 %v11425_v5, %v10254_v42  ;;  %v5054_v42 = vsub.f32 %v11424_v50, %v10258_v19 }
 0xc36   :  { %v5068_v9 = vsub.f32 %v11440_v33, %v4989_v59  ;;  %v5260_v40 = vadd.f32 %v4989_v59, %v11498_v21  ;;  %5122 = vadd.xlane.f32.xlu1 %v5121_v47  ;;  %6805 = vmatmul.mubr.msk.bf16.gmra.mrb[148].mxu0 %vm635_vm2, %v5281_v54  ;;  %v5118_v21 = vsel %vm635_vm2, %v5082_v45, 0.0  ;;  %v11500_v54 = vld [vmem:[#allocation61_spill] sm:$0xff] }
 0xc37   :  { %2096 = vadd.xlane.f32.xlu0 %v2095_v4  ;;  %v5084_v61 = vmul.f32 %v5052_v22, %v5052_v22  ;;  %v5087_v5 = vmul.f32 %v5055_v13, %v5055_v13 }
 0xc38   :  { %v5100_v48 = vmul.f32 %v5068_v9, %v5068_v9  ;;  %v5282_v2 = vpack.c.bf16 %v5261_v15, %v5260_v40  ;;  %v10375_v7 = vpop.f32.mrb[116].mxu1  ;;  %v11501_v9 = vld [vmem:[#allocation62_spill] sm:$0xff]  ;;  %v5127_v40 = vsel %vm635_vm2, %v5085_v32, 0.0 }
 0xc39   :  { %v5263_v31 = vadd.f32 %v10375_v7, %v11499_v58  ;;  %v4999_v33 = vpop.f32.mrb[117].mxu1 }
 0xc3a   :  { %v5070_v16 = vsub.f32 %v11442_v20, %v4999_v33  ;;  %v5262_v59 = vadd.f32 %v4999_v33, %v11500_v54  ;;  %5119 = vadd.xlane.f32.xlu1 %v5118_v21  ;;  %6808 = vmatprep.mubr.msk.bf16.mxu0 %vm635_vm2, %v5282_v2  ;;  %v5172_v10 = vsel %vm635_vm2, %v5100_v48, 0.0  ;;  %v11502_v2 = vld [vmem:[#allocation63_spill] sm:$0xff]  ;;  %v11503_v21 = vld [vmem:[#allocation64_spill] sm:$0xff] }
 0xc3b   :  { %5173 = vadd.xlane.f32.xlu0 %v5172_v10  ;;  %v6901_v54 = vld [vmem:[%s10833_s1 + $0x40] sm:$0xff]  }
 0xc3c   :  { %v5102_v18 = vmul.f32 %v5070_v16, %v5070_v16  ;;  %v5283_v15 = vpack.c.bf16 %v5263_v31, %v5262_v59  ;;  %v10386_v47 = vpop.f32.mrb[118].mxu1  ;;  %v5124_v16 = vsel %vm635_vm2, %v5084_v61, 0.0  ;;  %v11504_v10 = vld [vmem:[#allocation65_spill] sm:$0xff]  ;;  %6822 = vmatprep.subr.bf16.mxu1 %v6901_v54  ;;  %v5086_v61 = vmul.f32 %v5054_v42, %v5054_v42 }
 0xc3d   :  { %v5265_v45 = vadd.f32 %v10386_v47, %v11501_v9  ;;  %v5009_v20 = vpop.f32.mrb[119].mxu1  ;;  %6823 = vmatpush3.bf16.msra.mxu1 %v6901_v54  ;;  %v5057_v9 = vsub.f32 %v11427_v55, %v10269_v46  ;;  %v5056_v46 = vsub.f32 %v11426_v28, %v10273_v12  ;;  %v5059_v28 = vsub.f32 %v11429_v34, %v10284_v30 }
 0xc3e   :  { %v5072_v4 = vsub.f32 %v11469_v29, %v5009_v20  ;;  %v5264_v58 = vadd.f32 %v5009_v20, %v11502_v2  ;;  %5128 = vadd.xlane.f32.xlu1 %v5127_v40  ;;  %6809 = vmatmul.mubr.msk.bf16.gmra.mrb[152].mxu0 %vm635_vm2, %v5283_v15  ;;  %v5178_v48 = vsel %vm635_vm2, %v5102_v18, 0.0  ;;  %v5133_v40 = vsel %vm635_vm2, %v5087_v5, 0.0  ;;  %v11506_v2 = vld [vmem:[#allocation67_spill] sm:$0xff] }
 0xc3f   :  { %5179 = vadd.xlane.f32.xlu0 %v5178_v48  ;;  %v5089_v55 = vmul.f32 %v5057_v9, %v5057_v9  ;;  %v6902_v9 = vld [vmem:[%s10833_s1 + $0x48] sm:$0xff]   ;;  %v5061_v30 = vsub.f32 %v11433_v0, %v10299_v62  ;;  %v5062_v0 = vsub.f32 %v11434_v51, %v10318_v36  ;;  %v5064_v51 = vsub.f32 %v11436_v60, %v10335_v26 }
 0xc40   :  { %v5104_v22 = vmul.f32 %v5072_v4, %v5072_v4  ;;  %v5284_v31 = vpack.c.bf16 %v5265_v45, %v5264_v58  ;;  %v10397_v33 = vpop.f32.mrb[120].mxu1  ;;  %v11505_v45 = vld [vmem:[#allocation66_spill] sm:$0xff]  ;;  %6824 = vmatprep.subr.bf16.mxu1 %v6902_v9 }
 0xc41   :  { %v5267_v32 = vadd.f32 %v10397_v33, %v11503_v21  ;;  %v5019_v29 = vpop.f32.mrb[121].mxu1  ;;  %v11507_v21 = vld [vmem:[#allocation68_spill] sm:$0xff]  ;;  %v5139_v12 = vsel %vm635_vm2, %v5089_v55, 0.0  ;;  %6825 = vmatpush3.bf16.msra.mxu1 %v6902_v9  ;;  %v10507_v9 = vpop.xlane.xlu1 %3621 }
 0xc42   :  { %v5074_v59 = vsub.f32 %v11477_v37, %v5019_v29  ;;  %v5266_v18 = vadd.f32 %v5019_v29, %v11504_v10  ;;  %5125 = vadd.xlane.f32.xlu1 %v5124_v16  ;;  %6812 = vmatprep.mubr.msk.bf16.mxu0 %vm635_vm2, %v5284_v31  ;;  %v5184_v15 = vsel %vm635_vm2, %v5104_v22, 0.0  ;;  %v11508_v16 = vld [vmem:[#allocation69_spill] sm:$0xff] }
 0xc43   :  { %5185 = vadd.xlane.f32.xlu0 %v5184_v15  ;;  %v5088_v15 = vmul.f32 %v5056_v46, %v5056_v46 }
 0xc44   :  { %v5106_v50 = vmul.f32 %v5074_v59, %v5074_v59  ;;  %v5285_v19 = vpack.c.bf16 %v5267_v32, %v5266_v18  ;;  %v10411_v13 = vpop.f32.mrb[122].mxu1  ;;  %v5130_v32 = vsel %vm635_vm2, %v5086_v61, 0.0 }
 0xc45   :  { %v5269_v37 = vadd.f32 %v10411_v13, %v11505_v45  ;;  %v5029_v20 = vpop.f32.mrb[123].mxu1  ;;  %v5136_v61 = vsel %vm635_vm2, %v5088_v15, 0.0 }
 0xc46   :  { %v5076_v4 = vsub.f32 %v11485_v39, %v5029_v20  ;;  %v5268_v58 = vadd.f32 %v5029_v20, %v11506_v2  ;;  %5134 = vadd.xlane.f32.xlu1 %v5133_v40  ;;  %6813 = vmatmul.mubr.msk.bf16.gmra.mrb[156].mxu0 %vm635_vm2, %v5285_v19  ;;  %v5190_v48 = vsel %vm635_vm2, %v5106_v50, 0.0  ;;  %v5091_v50 = vmul.f32 %v5059_v28, %v5059_v28 }
 0xc47   :  { %5191 = vadd.xlane.f32.xlu0 %v5190_v48  ;;  %v5058_v19 = vsub.f32 %v11428_v49, %v10288_v27  ;;  %v5060_v49 = vsub.f32 %v11430_v6, %v10303_v11  ;;  %v5063_v40 = vsub.f32 %v11435_v14, %v10314_v56  ;;  %v6903_v6 = vld [vmem:[%s10833_s1 + $0x50] sm:$0xff]   ;;  %v5094_v11 = vmul.f32 %v5062_v0, %v5062_v0  ;;  %v10465_v48 = vpop.xlane.xlu0 %3600 }
 0xc48   :  { %v5108_v22 = vmul.f32 %v5076_v4, %v5076_v4  ;;  %v5286_v31 = vpack.c.bf16 %v5269_v37, %v5268_v58  ;;  %v10422_v42 = vpop.f32.mrb[124].mxu1  ;;  %v5145_v45 = vsel %vm635_vm2, %v5091_v50, 0.0  ;;  %v5093_v37 = vmul.f32 %v5061_v30, %v5061_v30  ;;  %6826 = vmatprep.subr.bf16.mxu1 %v6903_v6 }
 0xc49   :  { %v5271_v5 = vadd.f32 %v10422_v42, %v11507_v21  ;;  %v5039_v39 = vpop.f32.mrb[125].mxu1  ;;  %v5090_v34 = vmul.f32 %v5058_v19, %v5058_v19  ;;  %v5092_v20 = vmul.f32 %v5060_v49, %v5060_v49  ;;  %v5095_v2 = vmul.f32 %v5063_v40, %v5063_v40  ;;  %6827 = vmatpush3.bf16.msra.mxu1 %v6903_v6 }
 0xc4a   :  { %v5078_v29 = vsub.f32 %v11493_v44, %v5039_v39  ;;  %v5270_v54 = vadd.f32 %v5039_v39, %v11508_v16  ;;  %5131 = vadd.xlane.f32.xlu1 %v5130_v32  ;;  %6816 = vmatprep.mubr.msk.bf16.mxu0 %vm635_vm2, %v5286_v31  ;;  %v5196_v59 = vsel %vm635_vm2, %v5108_v22, 0.0  ;;  %v5151_v4 = vsel %vm635_vm2, %v5093_v37, 0.0  ;;  %v11510_v32 = vld [vmem:[#allocation100_spill] sm:$0xff] }
 0xc4b   :  { %5197 = vadd.xlane.f32.xlu0 %v5196_v59  ;;  %v5142_v27 = vsel %vm635_vm2, %v5090_v34, 0.0  ;;  %v5148_v62 = vsel %vm635_vm2, %v5092_v20, 0.0  ;;  %v5065_v58 = vsub.f32 %v11437_v63, %v10329_v52  ;;  %v5157_v14 = vsel %vm635_vm2, %v5095_v2, 0.0  ;;  %v10473_v21 = vpop.xlane.xlu0 %3603  ;;  %v10512_v34 = vpop.xlane.xlu1 %2069 }
 0xc4c   :  { %v5110_v10 = vmul.f32 %v5078_v29, %v5078_v29  ;;  %v5287_v18 = vpack.c.bf16 %v5271_v5, %v5270_v54  ;;  %v5154_v36 = vsel %vm635_vm2, %v5094_v11, 0.0  ;;  %v5096_v22 = vmul.f32 %v5064_v51, %v5064_v51 }
 0xc4d   :  { %v5097_v56 = vmul.f32 %v5065_v58, %v5065_v58  ;;  %v5067_v31 = vsub.f32 %v11439_v3, %v10346_v41  ;;  %v5066_v52 = vsub.f32 %v11438_v43, %v10352_v23  ;;  %v11509_v3 = vld [vmem:[#allocation90_spill] sm:$0xff]  ;;  %v3556_v29 = vmul.f32 %v11510_v32, %v11510_v32 }
 0xc4e   :  { %5140 = vadd.xlane.f32.xlu1 %v5139_v12  ;;  %6817 = vmatmul.mubr.msk.bf16.gmra.mrb[160].mxu0 %vm635_vm2, %v5287_v18  ;;  %v5202_v44 = vsel %vm635_vm2, %v5110_v10, 0.0  ;;  %v5160_v46 = vsel %vm635_vm2, %v5096_v22, 0.0  ;;  %v5069_v41 = vsub.f32 %v11509_v3, %v10364_v57  ;;  %v5071_v23 = vsub.f32 %v11463_v35, %v10375_v7 }
 0xc4f   :  { %5203 = vadd.xlane.f32.xlu0 %v5202_v44  ;;  %v5163_v55 = vsel %vm635_vm2, %v5097_v56, 0.0  ;;  %v5099_v63 = vmul.f32 %v5067_v31, %v5067_v31  ;;  %v5098_v60 = vmul.f32 %v5066_v52, %v5066_v52  ;;  %v10476_v5 = vpop.xlane.xlu0 %3606  ;;  %v3650_v16 = vsel %vm635_vm2, %v3556_v29, 0.0 }
 0xc50   :  { %v5101_v43 = vmul.f32 %v5069_v41, %v5069_v41  ;;  %v5103_v59 = vmul.f32 %v5071_v23, %v5071_v23  ;;  %v5073_v10 = vsub.f32 %v11471_v25, %v10386_v47  ;;  %v5075_v28 = vsub.f32 %v11479_v1, %v10397_v33 }
 0xc51   :  { %v5169_v26 = vsel %vm635_vm2, %v5099_v63, 0.0  ;;  %v5166_v39 = vsel %vm635_vm2, %v5098_v60, 0.0  ;;  %v5077_v12 = vsub.f32 %v11487_v38, %v10411_v13  ;;  %v5079_v47 = vsub.f32 %v11510_v32, %v10422_v42  ;;  %v11511_v63 = vld [vmem:[#allocation110_spill] sm:$0xff]  ;;  %v11513_v32 = vld [vmem:[#allocation111_spill] sm:$0xff] }
 0xc52   :  { %5137 = vadd.xlane.f32.xlu1 %v5136_v61  ;;  %v5175_v57 = vsel %vm635_vm2, %v5101_v43, 0.0  ;;  %v5105_v15 = vmul.f32 %v5073_v10, %v5073_v10  ;;  %v5181_v35 = vsel %vm635_vm2, %v5103_v59, 0.0  ;;  %v5107_v7 = vmul.f32 %v5075_v28, %v5075_v28  ;;  %v11514_v43 = vld [vmem:[#allocation41_spill] sm:$0xff] }
 0xc53   :  { %v10486_v54 = vpop.xlane.xlu0 %3609  ;;  %v5109_v25 = vmul.f32 %v5077_v12, %v5077_v12  ;;  %v5111_v33 = vmul.f32 %v5079_v47, %v5079_v47 }
 0xc54   :  { %v5187_v44 = vsel %vm635_vm2, %v5105_v15, 0.0  ;;  %v5193_v19 = vsel %vm635_vm2, %v5107_v7, 0.0  ;;  %v11515_v15 = vld [vmem:[#allocation112_spill] sm:$0xff]  ;;  %v11516_v7 = vld [vmem:[#allocation39_spill] sm:$0xff] }
 0xc55   :  { %v5199_v61 = vsel %vm635_vm2, %v5109_v25, 0.0  ;;  %v5205_v38 = vsel %vm635_vm2, %v5111_v33, 0.0  ;;  %v10555_v33 = vld [vmem:[%s10834_s2 + $0x10] ss:$0 sm:$0xff]  ;;  %vm5861_vm2 = vcmask 0  }
 0xc56   :  { %5146 = vadd.xlane.f32.xlu1 %v5145_v45 }
 0xc57   :  { %v10491_v18 = vpop.xlane.xlu0 %3612 }
 0xc5a   :  { %5143 = vadd.xlane.f32.xlu1 %v5142_v27 }
 0xc5b   :  { %v10499_v50 = vpop.xlane.xlu0 %3615 }
 0xc5e   :  { %5152 = vadd.xlane.f32.xlu1 %v5151_v4 }
 0xc5f   :  { %v10504_v1 = vpop.xlane.xlu0 %3618 }
 0xc62   :  { %5149 = vadd.xlane.f32.xlu1 %v5148_v62 }
 0xc63   :  { %v10510_v13 = vpop.xlane.xlu0 %2066 }
 0xc66   :  { %5158 = vadd.xlane.f32.xlu1 %v5157_v14 }
 0xc67   :  { %v10514_v30 = vpop.xlane.xlu0 %3624 }
 0xc6a   :  { %5155 = vadd.xlane.f32.xlu1 %v5154_v36 }
 0xc6e   :  { %5164 = vadd.xlane.f32.xlu1 %v5163_v55 }
 0xc72   :  { %5161 = vadd.xlane.f32.xlu1 %v5160_v46  ;;  %v11512_v46 = vld [vmem:[#allocation109_spill] sm:$0xff] }
 0xc76   :  { %5170 = vadd.xlane.f32.xlu1 %v5169_v26 }
 0xc7a   :  { %5167 = vadd.xlane.f32.xlu1 %v5166_v39 }
 0xc7e   :  { %3651 = vadd.xlane.f32.xlu1 %v3650_v16 }
 0xc82   :  { %5176 = vadd.xlane.f32.xlu1 %v5175_v57 }
 0xc86   :  { %5182 = vadd.xlane.f32.xlu1 %v5181_v35 }
 0xc8a   :  { %5188 = vadd.xlane.f32.xlu1 %v5187_v44 }
 0xc8e   :  { %5194 = vadd.xlane.f32.xlu1 %v5193_v19 }
 0xc92   :  { %5200 = vadd.xlane.f32.xlu1 %v5199_v61 }
 0xc96   :  { %5206 = vadd.xlane.f32.xlu1 %v5205_v38  ;;  %v11517_v38 = vld [vmem:[#allocation45_spill] sm:$0xff] }
 0xc9f   :  { %v5117_v42 = vpop.xlane.xlu1 %5116 }
 0xca0   :  { %v5209_v45 = vadd.f32 %v5117_v42, %v10194_v24  ;;  %v5114_v37 = vpop.xlane.xlu0 %5113 }
 0xca1   :  { %v5208_v49 = vadd.f32 %v5114_v37, %v10192_v8  ;;  %v11518_v37 = vld [vmem:[#allocation43_spill] sm:$0xff] }
 0xca3   :  { %v5824_v27 = vadd.f32 %v5209_v45, %v5208_v49  ;;  %v10518_v20 = vpop.xlane.xlu1 %3627 }
 0xca4   :  { %v10535_v14 = vpop.xlane.xlu0 %2072 }
 0xca7   :  { %v10520_v40 = vpop.xlane.xlu1 %2075 }
 0xca8   :  { %v10538_v55 = vpop.xlane.xlu0 %3630 }
 0xcab   :  { %v10522_v4 = vpop.xlane.xlu1 %3633 }
 0xcac   :  { %v10542_v39 = vpop.xlane.xlu0 %2078 }
 0xcaf   :  { %v10524_v2 = vpop.xlane.xlu1 %2081 }
 0xcb0   :  { %v10546_v59 = vpop.xlane.xlu0 %3636 }
 0xcb3   :  { %v10526_v0 = vpop.xlane.xlu1 %3639 }
 0xcb4   :  { %v10549_v35 = vpop.xlane.xlu0 %2084 }
 0xcb7   :  { %v10528_v62 = vpop.xlane.xlu1 %2087 }
 0xcb8   :  { %v10557_v61 = vpop.xlane.xlu0 %3642 }
 0xcbb   :  { %v10530_v6 = vpop.xlane.xlu1 %3645 }
 0xcbf   :  { %v10532_v11 = vpop.xlane.xlu1 %2093 }
 0xcc3   :  { %v5123_v24 = vpop.xlane.xlu1 %5122 }
 0xcc4   :  { %v5211_v56 = vadd.f32 %v5123_v24, %v10198_v53 }
 0xcc7   :  { %v5120_v58 = vpop.xlane.xlu1 %5119 }
 0xcc8   :  { %v5210_v8 = vadd.f32 %v5120_v58, %v10196_v17 }
 0xcca   :  { %v5825_v51 = vadd.f32 %v5824_v27, %v5210_v8 }
 0xccb   :  { %v5129_v36 = vpop.xlane.xlu1 %5128 }
 0xccc   :  { %v5826_v22 = vadd.f32 %v5825_v51, %v5211_v56  ;;  %v5213_v60 = vadd.f32 %v5129_v36, %v11512_v46 }
 0xccf   :  { %v5126_v31 = vpop.xlane.xlu1 %5125 }
 0xcd0   :  { %v5212_v52 = vadd.f32 %v5126_v31, %v11511_v63 }
 0xcd2   :  { %v5827_v26 = vadd.f32 %v5826_v22, %v5212_v52  ;;  %v10565_v52 = vpop.xlane.xlu0 %2090 }
 0xcd3   :  { %v5135_v3 = vpop.xlane.xlu1 %5134 }
 0xcd4   :  { %v5828_v41 = vadd.f32 %v5827_v26, %v5213_v60  ;;  %v5215_v53 = vadd.f32 %v5135_v3, %v11514_v43 }
 0xcd7   :  { %v5132_v17 = vpop.xlane.xlu1 %5131 }
 0xcd8   :  { %v5214_v29 = vadd.f32 %v5132_v17, %v11513_v32  ;;  %v11519_v32 = vld [vmem:[#allocation7_spill] sm:$0xff] }
 0xcda   :  { %v5829_v23 = vadd.f32 %v5828_v41, %v5214_v29 }
 0xcdb   :  { %v5141_v16 = vpop.xlane.xlu1 %5140 }
 0xcdc   :  { %v5830_v10 = vadd.f32 %v5829_v23, %v5215_v53  ;;  %v5217_v12 = vadd.f32 %v5141_v16, %v11516_v7  ;;  %v11520_v23 = vld [vmem:[#allocation47_spill] sm:$0xff] }
 0xcdf   :  { %v5138_v57 = vpop.xlane.xlu1 %5137 }
 0xce0   :  { %v5216_v28 = vadd.f32 %v5138_v57, %v11515_v15 }
 0xce2   :  { %v5831_v44 = vadd.f32 %v5830_v10, %v5216_v28 }
 0xce3   :  { %v5147_v25 = vpop.xlane.xlu1 %5146 }
 0xce4   :  { %v5832_v47 = vadd.f32 %v5831_v44, %v5217_v12  ;;  %v5219_v49 = vadd.f32 %v5147_v25, %v11518_v37  ;;  %v10572_v44 = vpop.xlane.xlu0 %3648 }
 0xce7   :  { %v5144_v19 = vpop.xlane.xlu1 %5143 }
 0xce8   :  { %v5218_v42 = vadd.f32 %v5144_v19, %v11517_v38 }
 0xce9   :  { %v6790_v45 = vpop.f32.mrb[132].mxu0 }
 0xcea   :  { %v5833_v27 = vadd.f32 %v5832_v47, %v5218_v42  ;;  %v5389_v24 = vadd.f32 %v6790_v45, %v10555_v33  ;;  %v5380_v58 = vpop.f32.mrb[133].mxu0  ;;  %v11521_v42 = vld [vmem:[#allocation102_spill] sm:$0xff] }
 0xceb   :  { %v5381_v8 = vadd.f32 %v10555_v33, %v5380_v58  ;;  %v6791_v56 = vpop.f32.mrb[134].mxu0  ;;  %v5153_v51 = vpop.xlane.xlu1 %5152  ;;  %v3667_v45 = vadd.f32 %v10465_v48, %v11521_v42 }
 0xcec   :  { %v5392_v36 = vadd.f32 %v6791_v56, %v10555_v33  ;;  %v5383_v22 = vpop.f32.mrb[135].mxu0  ;;  %v5834_v31 = vadd.f32 %v5833_v27, %v5219_v49  ;;  %v5509_v46 = vmax.f32 %v5389_v24, 0.0  ;;  %v5221_v16 = vadd.f32 %v5153_v51, %v11520_v23 }
 0xced   :  { %v5384_v63 = vadd.f32 %v10555_v33, %v5383_v22  ;;  %v5507_v26 = vmax.f32 %v5381_v8, 0.0  ;;  %v11522_v8 = vld [vmem:[#allocation103_spill] sm:$0xff] }
 0xcee   :  { %v5510_v60 = vmax.f32 %v5392_v36, 0.0  ;;  %v3668_v56 = vadd.f32 %v10473_v21, %v11522_v8 }
 0xcef   :  { %v5508_v3 = vmax.f32 %v5384_v63, 0.0  ;;  %v5150_v41 = vpop.xlane.xlu1 %5149  ;;  %v10581_v63 = vpop.xlane.xlu0 %2096 }
 0xcf0   :  { %v5540_v17 = vpack.c.bf16 %v5510_v60, %v5509_v46  ;;  %v5220_v29 = vadd.f32 %v5150_v41, %v11519_v32 }
 0xcf1   :  { %v5539_v43 = vpack.c.bf16 %v5508_v3, %v5507_v26  ;;  %v6794_v53 = vpop.f32.mrb[136].mxu0 }
 0xcf2   :  { %v5835_v10 = vadd.f32 %v5834_v31, %v5220_v29  ;;  %v5405_v57 = vadd.f32 %v6794_v53, %v10555_v33  ;;  %v5396_v15 = vpop.f32.mrb[137].mxu0  ;;  %v11523_v53 = vld [vmem:[#allocation104_spill] sm:$0xff] }
 0xcf3   :  { %v5397_v28 = vadd.f32 %v10555_v33, %v5396_v15  ;;  %v6795_v7 = vpop.f32.mrb[138].mxu0  ;;  %6828 = vmatprep.mubr.msk.bf16.mxu1 %vm394_vm1, %v5539_v43  ;;  %v5159_v12 = vpop.xlane.xlu1 %5158  ;;  %v3669_v23 = vadd.f32 %v10476_v5, %v11523_v53  ;;  %v11524_v5 = vld [vmem:[#allocation105_spill] sm:$0xff] }
 0xcf4   :  { %v5408_v25 = vadd.f32 %v6795_v7, %v10555_v33  ;;  %v5399_v47 = vpop.f32.mrb[139].mxu0  ;;  %6829 = vmatmul.mubr.msk.bf16.vlgmr.msra.gmra.mrb[128].mxu1 %vm394_vm1, %v5540_v17  ;;  %v5836_v19 = vadd.f32 %v5835_v10, %v5221_v16  ;;  %v5513_v37 = vmax.f32 %v5405_v57, 0.0  ;;  %v5223_v46 = vadd.f32 %v5159_v12, %v3668_v56  ;;  %v5174_v7 = vpop.xlane.xlu0 %5173 }
 0xcf5   :  { %v5400_v38 = vadd.f32 %v10555_v33, %v5399_v47  ;;  %v5511_v27 = vmax.f32 %v5397_v28, 0.0 }
 0xcf6   :  { %v5514_v49 = vmax.f32 %v5408_v25, 0.0 }
 0xcf7   :  { %v5512_v24 = vmax.f32 %v5400_v38, 0.0  ;;  %v5156_v58 = vpop.xlane.xlu1 %5155 }
 0xcf8   :  { %v5542_v51 = vpack.c.bf16 %v5514_v49, %v5513_v37  ;;  %v5222_v36 = vadd.f32 %v5156_v58, %v3667_v45 }
 0xcf9   :  { %v5541_v22 = vpack.c.bf16 %v5512_v24, %v5511_v27  ;;  %v6798_v31 = vpop.f32.mrb[140].mxu0  ;;  %v3670_v27 = vadd.f32 %v10486_v54, %v11524_v5 }
 0xcfa   :  { %v5837_v60 = vadd.f32 %v5836_v19, %v5222_v36  ;;  %v5421_v26 = vadd.f32 %v6798_v31, %v10555_v33  ;;  %v5412_v3 = vpop.f32.mrb[141].mxu0 }
 0xcfb   :  { %v5413_v48 = vadd.f32 %v10555_v33, %v5412_v3  ;;  %v6799_v41 = vpop.f32.mrb[142].mxu0  ;;  %6832 = vmatprep.mubr.msk.bf16.mxu1 %vm394_vm1, %v5541_v22  ;;  %v5165_v17 = vpop.xlane.xlu1 %5164 }
 0xcfc   :  { %v5424_v32 = vadd.f32 %v6799_v41, %v10555_v33  ;;  %v5415_v21 = vpop.f32.mrb[143].mxu0  ;;  %6833 = vmatmul.mubr.msk.bf16.gmra.mrb[132].mxu1 %vm394_vm1, %v5542_v51  ;;  %v5838_v29 = vadd.f32 %v5837_v60, %v5223_v46  ;;  %v5517_v16 = vmax.f32 %v5421_v26, 0.0  ;;  %v11525_v51 = vld [vmem:[#allocation106_spill] sm:$0xff]  ;;  %v5180_v22 = vpop.xlane.xlu0 %5179  ;;  %v5225_v31 = vadd.f32 %v5165_v17, %v3670_v27  ;;  %v11526_v41 = vld [vmem:[#allocation107_spill] sm:$0xff] }
 0xcfd   :  { %v5416_v43 = vadd.f32 %v10555_v33, %v5415_v21  ;;  %v5515_v57 = vmax.f32 %v5413_v48, 0.0  ;;  %v3671_v36 = vadd.f32 %v10491_v18, %v11525_v51  ;;  %v3672_v54 = vadd.f32 %v10499_v50, %v11526_v41 }
 0xcfe   :  { %v5518_v10 = vmax.f32 %v5424_v32, 0.0 }
 0xcff   :  { %v5516_v15 = vmax.f32 %v5416_v43, 0.0  ;;  %v5162_v28 = vpop.xlane.xlu1 %5161 }
 0xd00   :  { %v5544_v12 = vpack.c.bf16 %v5518_v10, %v5517_v16  ;;  %v5224_v25 = vadd.f32 %v5162_v28, %v3669_v23  ;;  %v11527_v28 = vld [vmem:[#allocation108_spill] sm:$0xff] }
 0xd01   :  { %v5543_v47 = vpack.c.bf16 %v5516_v15, %v5515_v57  ;;  %v6802_v19 = vpop.f32.mrb[144].mxu0  ;;  %v3673_v50 = vadd.f32 %v10504_v1, %v11527_v28  ;;  %v3675_v1 = vadd.f32 %v10514_v30, %v10512_v34  ;;  %v3677_v30 = vadd.f32 %v10538_v55, %v10520_v40 }
 0xd02   :  { %v5437_v38 = vadd.f32 %v6802_v19, %v10555_v33  ;;  %v5428_v42 = vpop.f32.mrb[145].mxu0  ;;  %v5839_v24 = vadd.f32 %v5838_v29, %v5224_v25  ;;  %v3679_v40 = vadd.f32 %v10546_v59, %v10524_v2  ;;  %v3681_v59 = vadd.f32 %v10557_v61, %v10528_v62 }
 0xd03   :  { %v5429_v45 = vadd.f32 %v10555_v33, %v5428_v42  ;;  %v6803_v37 = vpop.f32.mrb[146].mxu0  ;;  %6836 = vmatprep.mubr.msk.bf16.mxu1 %vm394_vm1, %v5543_v47  ;;  %v5171_v49 = vpop.xlane.xlu1 %5170  ;;  %v3674_v42 = vadd.f32 %v10507_v9, %v10510_v13  ;;  %v3683_v61 = vadd.f32 %v10572_v44, %v10532_v11 }
 0xd04   :  { %v5440_v58 = vadd.f32 %v6803_v37, %v10555_v33  ;;  %v5431_v8 = vpop.f32.mrb[147].mxu0  ;;  %6837 = vmatmul.mubr.msk.bf16.gmra.mrb[136].mxu1 %vm394_vm1, %v5544_v12  ;;  %v5521_v46 = vmax.f32 %v5437_v38, 0.0  ;;  %v5840_v21 = vadd.f32 %v5839_v24, %v5225_v31  ;;  %v5227_v23 = vadd.f32 %v5171_v49, %v3672_v54  ;;  %v5186_v12 = vpop.xlane.xlu0 %5185 }
 0xd05   :  { %v5432_v56 = vadd.f32 %v10555_v33, %v5431_v8  ;;  %v5519_v26 = vmax.f32 %v5429_v45, 0.0  ;;  %v5228_v45 = vadd.f32 %v5174_v7, %v3673_v50  ;;  %v3676_v31 = vadd.f32 %v10518_v20, %v10535_v14 }
 0xd06   :  { %v5522_v60 = vmax.f32 %v5440_v58, 0.0  ;;  %v3678_v14 = vadd.f32 %v10522_v4, %v10542_v39  ;;  %v3680_v4 = vadd.f32 %v10526_v0, %v10549_v35  ;;  %v3682_v0 = vadd.f32 %v10530_v6, %v10565_v52 }
 0xd07   :  { %v5520_v3 = vmax.f32 %v5432_v56, 0.0  ;;  %v5168_v48 = vpop.xlane.xlu1 %5167 }
 0xd08   :  { %v5546_v32 = vpack.c.bf16 %v5522_v60, %v5521_v46  ;;  %v5226_v29 = vadd.f32 %v5168_v48, %v3671_v36  ;;  %v5230_v46 = vadd.f32 %v5180_v22, %v3675_v1  ;;  %v5192_v60 = vpop.xlane.xlu0 %5191 }
 0xd09   :  { %v5545_v43 = vpack.c.bf16 %v5520_v3, %v5519_v26  ;;  %v6806_v53 = vpop.f32.mrb[148].mxu0  ;;  %v5234_v39 = vadd.f32 %v5192_v60, %v3679_v40 }
 0xd0a   :  { %v5841_v16 = vadd.f32 %v5840_v21, %v5226_v29  ;;  %v5453_v10 = vadd.f32 %v6806_v53, %v10555_v33  ;;  %v5444_v18 = vpop.f32.mrb[149].mxu0 }
 0xd0b   :  { %v5445_v17 = vadd.f32 %v10555_v33, %v5444_v18  ;;  %v6807_v57 = vpop.f32.mrb[150].mxu0  ;;  %6840 = vmatprep.mubr.msk.bf16.mxu1 %vm394_vm1, %v5545_v43  ;;  %v10606_v15 = vpop.xlane.xlu1 %3651 }
 0xd0c   :  { %v5842_v25 = vadd.f32 %v5841_v16, %v5227_v23  ;;  %v5456_v47 = vadd.f32 %v6807_v57, %v10555_v33  ;;  %v5447_v19 = vpop.f32.mrb[151].mxu0  ;;  %6841 = vmatmul.mubr.msk.bf16.gmra.mrb[140].mxu1 %vm394_vm1, %v5546_v32  ;;  %v5525_v37 = vmax.f32 %v5453_v10, 0.0  ;;  %v5232_v32 = vadd.f32 %v5186_v12, %v3677_v30 }
 0xd0d   :  { %v5448_v38 = vadd.f32 %v10555_v33, %v5447_v19  ;;  %v5523_v5 = vmax.f32 %v5445_v17, 0.0  ;;  %v5198_v17 = vpop.xlane.xlu0 %5197  ;;  %v3684_v6 = vadd.f32 %v10606_v15, %v10581_v63 }
 0xd0e   :  { %v5526_v49 = vmax.f32 %v5456_v47, 0.0  ;;  %v5843_v8 = vadd.f32 %v5842_v25, %v5228_v45 }
 0xd0f   :  { %v5524_v27 = vmax.f32 %v5448_v38, 0.0  ;;  %v5177_v24 = vpop.xlane.xlu1 %5176 }
 0xd10   :  { %v5548_v58 = vpack.c.bf16 %v5526_v49, %v5525_v37  ;;  %v5229_v56 = vadd.f32 %v5177_v24, %v3674_v42  ;;  %v5236_v49 = vadd.f32 %v5198_v17, %v3681_v59 }
 0xd11   :  { %v5547_v51 = vpack.c.bf16 %v5524_v27, %v5523_v5  ;;  %v6810_v36 = vpop.f32.mrb[152].mxu0  ;;  %v5204_v1 = vpop.xlane.xlu0 %5203 }
 0xd12   :  { %v5844_v9 = vadd.f32 %v5843_v8, %v5229_v56  ;;  %v5469_v13 = vadd.f32 %v6810_v36, %v10555_v33  ;;  %v5460_v7 = vpop.f32.mrb[153].mxu0  ;;  %v5238_v60 = vadd.f32 %v5204_v1, %v3683_v61 }
 0xd13   :  { %v5461_v26 = vadd.f32 %v10555_v33, %v5460_v7  ;;  %v6811_v3 = vpop.f32.mrb[154].mxu0  ;;  %6844 = vmatprep.mubr.msk.bf16.mxu1 %vm394_vm1, %v5547_v51  ;;  %v5183_v34 = vpop.xlane.xlu1 %5182 }
 0xd14   :  { %v5472_v48 = vadd.f32 %v6811_v3, %v10555_v33  ;;  %v5845_v41 = vadd.f32 %v5844_v9, %v5230_v46  ;;  %v5231_v54 = vadd.f32 %v5183_v34, %v3676_v31  ;;  %v5463_v20 = vpop.f32.mrb[155].mxu0  ;;  %6845 = vmatmul.mubr.msk.bf16.gmra.mrb[144].mxu1 %vm394_vm1, %v5548_v58  ;;  %v5529_v21 = vmax.f32 %v5469_v13, 0.0 }
 0xd15   :  { %v5464_v22 = vadd.f32 %v10555_v33, %v5463_v20  ;;  %v5527_v53 = vmax.f32 %v5461_v26, 0.0 }
 0xd16   :  { %v5530_v29 = vmax.f32 %v5472_v48, 0.0  ;;  %v5846_v43 = vadd.f32 %v5845_v41, %v5231_v54 }
 0xd17   :  { %v5528_v23 = vmax.f32 %v5464_v22, 0.0  ;;  %v5189_v16 = vpop.xlane.xlu1 %5188 }
 0xd18   :  { %v5550_v55 = vpack.c.bf16 %v5530_v29, %v5529_v21  ;;  %v5847_v10 = vadd.f32 %v5846_v43, %v5232_v32  ;;  %v5233_v18 = vadd.f32 %v5189_v16, %v3678_v14 }
 0xd19   :  { %v5549_v57 = vpack.c.bf16 %v5528_v23, %v5527_v53  ;;  %v6814_v28 = vpop.f32.mrb[156].mxu0 }
 0xd1a   :  { %v5848_v50 = vadd.f32 %v5847_v10, %v5233_v18  ;;  %v5485_v12 = vadd.f32 %v6814_v28, %v10555_v33  ;;  %v5476_v25 = vpop.f32.mrb[157].mxu0 }
 0xd1b   :  { %v5477_v47 = vadd.f32 %v10555_v33, %v5476_v25  ;;  %v6815_v19 = vpop.f32.mrb[158].mxu0  ;;  %6848 = vmatprep.mubr.msk.bf16.mxu1 %vm394_vm1, %v5549_v57  ;;  %v5195_v2 = vpop.xlane.xlu1 %5194 }
 0xd1c   :  { %v5488_v38 = vadd.f32 %v6815_v19, %v10555_v33  ;;  %v5849_v42 = vadd.f32 %v5848_v50, %v5234_v39  ;;  %v5235_v45 = vadd.f32 %v5195_v2, %v3680_v4  ;;  %v5479_v37 = vpop.f32.mrb[159].mxu0  ;;  %6849 = vmatmul.mubr.msk.bf16.gmra.mrb[148].mxu1 %vm394_vm1, %v5550_v55  ;;  %v5533_v5 = vmax.f32 %v5485_v12, 0.0 }
 0xd1d   :  { %v5480_v35 = vadd.f32 %v10555_v33, %v5479_v37  ;;  %v5531_v58 = vmax.f32 %v5477_v47, 0.0 }
 0xd1e   :  { %v5534_v27 = vmax.f32 %v5488_v38, 0.0  ;;  %v5850_v24 = vadd.f32 %v5849_v42, %v5235_v45 }
 0xd1f   :  { %v5532_v8 = vmax.f32 %v5480_v35, 0.0  ;;  %v5201_v62 = vpop.xlane.xlu1 %5200 }
 0xd20   :  { %v5552_v56 = vpack.c.bf16 %v5534_v27, %v5533_v5  ;;  %v5851_v51 = vadd.f32 %v5850_v24, %v5236_v49  ;;  %v5237_v36 = vadd.f32 %v5201_v62, %v3682_v0 }
 0xd21   :  { %v5551_v31 = vpack.c.bf16 %v5532_v8, %v5531_v58  ;;  %v6818_v46 = vpop.f32.mrb[160].mxu0 }
 0xd22   :  { %v5852_v52 = vadd.f32 %v5851_v51, %v5237_v36  ;;  %v5501_v9 = vadd.f32 %v6818_v46, %v10555_v33  ;;  %v5492_v13 = vpop.f32.mrb[161].mxu0 }
 0xd23   :  { %v5493_v7 = vadd.f32 %v10555_v33, %v5492_v13  ;;  %v6819_v26 = vpop.f32.mrb[162].mxu0  ;;  %6852 = vmatprep.mubr.msk.bf16.mxu1 %vm394_vm1, %v5551_v31  ;;  %v5207_v3 = vpop.xlane.xlu1 %5206 }
 0xd24   :  { %v5504_v11 = vadd.f32 %v6819_v26, %v10555_v33  ;;  %v5853_v44 = vadd.f32 %v5852_v52, %v5238_v60  ;;  %v5239_v34 = vadd.f32 %v5207_v3, %v3684_v6  ;;  %v5495_v30 = vpop.f32.mrb[163].mxu0  ;;  %6853 = vmatmul.mubr.msk.bf16.gmra.mrb[152].mxu1 %vm394_vm1, %v5552_v56  ;;  %v5537_v63 = vmax.f32 %v5501_v9, 0.0 }
 0xd25   :  { %v5496_v48 = vadd.f32 %v10555_v33, %v5495_v30  ;;  %v5535_v54 = vmax.f32 %v5493_v7, 0.0 }
 0xd26   :  { %v5538_v15 = vmax.f32 %v5504_v11, 0.0  ;;  %v5854_v41 = vadd.f32 %v5853_v44, %v5239_v34 }
 0xd27   :  { %v5536_v20 = vmax.f32 %v5496_v48, 0.0 }
 0xd28   :  { %v5554_v14 = vpack.c.bf16 %v5538_v15, %v5537_v63  ;;  %v5855_v22 = vrot.slane %v5854_v41, 4 }
 0xd29   :  { %v5553_v32 = vpack.c.bf16 %v5536_v20, %v5535_v54 }
 0xd2a   :  { %v5856_v21 = vadd.f32 %v5855_v22, %v5854_v41 }
 0xd2b   :  { %6856 = vmatprep.mubr.msk.bf16.mxu1 %vm394_vm1, %v5553_v32 }
 0xd2c   :  { %v5857_v29 = vrot.slane %v5856_v21, 2  ;;  %6857 = vmatmul.mubr.msk.bf16.gmra.mrb[156].mxu1 %vm394_vm1, %v5554_v14 }
 0xd2e   :  { %v5858_v43 = vadd.f32 %v5857_v29, %v5856_v21 }
 0xd30   :  { %v5859_v53 = vrot.slane %v5858_v43, 1 }
 0xd32   :  { %v5860_v23 = vadd.f32 %v5859_v53, %v5858_v43 }
 0xd34   :  { %5862 = vst.msk [vmem:[#allocation2] sm:$0x1] %vm5861_vm2, %v5860_v23 }
 0xd35   :  { %6915 = shalt.err (!%p6912_p4)
}
 0xd36   :  { %s6916_s15 = scalar_lea.hbm %s10836_s4, 16 }
 0xd37   :  { %p6917_p5 = scmp.ne.s32.totalorder %s10836_s4, %s6916_s15  ;;  %p6920_p6 = scmp.lt.u32.totalorder %s6916_s15, %s10836_s4 }
 0xd39   :  { %p6922_p7 = pnand %p6920_p6, %p6917_p5 }
 0xd3b   :  { %6925 = shalt.err (!%p6922_p7)
}
 0xd3c   :  { %5874 = dma.vmem_to_hbm [thread:$0]  %s5872_s11, 16, %s10836_s4, [#allocation3]   ;;  %v10670_v33 = vld [vmem:[%s10834_s2 + $0x18] ss:$0 sm:$0xff] }
 0xdc7   :  { %v6830_v16 = vpop.f32.mrb[128].mxu1 }
 0xdc8   :  { %v5674_v40 = vadd.f32 %v6830_v16, %v10670_v33  ;;  %v5665_v55 = vpop.f32.mrb[129].mxu1 }
 0xdc9   :  { %v5666_v10 = vadd.f32 %v10670_v33, %v5665_v55  ;;  %v6831_v18 = vpop.f32.mrb[130].mxu1 }
 0xdca   :  { %5794 = vst.msk [vmem:[%s10835_s3 + $0x10] sm:$0xff] %vm108_vm0, %v5674_v40  ;;  %v5677_v17 = vadd.f32 %v6831_v18, %v10670_v33  ;;  %v5668_v57 = vpop.f32.mrb[131].mxu1 }
 0xdcb   :  { %5792 = vst.msk [vmem:[%s10835_s3] sm:$0xff] %vm108_vm0, %v5666_v10  ;;  %v5669_v28 = vadd.f32 %v10670_v33, %v5668_v57 }
 0xdcc   :  { %5795 = vst.msk [vmem:[%s10835_s3 + $0x18] sm:$0xff] %vm108_vm0, %v5677_v17 }
 0xdcd   :  { %5793 = vst.msk [vmem:[%s10835_s3 + $0x8] sm:$0xff] %vm108_vm0, %v5669_v28 }
 0xdcf   :  { %v6834_v4 = vpop.f32.mrb[132].mxu1 }
 0xdd0   :  { %v5690_v39 = vadd.f32 %v6834_v4, %v10670_v33  ;;  %v5681_v50 = vpop.f32.mrb[133].mxu1 }
 0xdd1   :  { %v5682_v12 = vadd.f32 %v10670_v33, %v5681_v50  ;;  %v6835_v25 = vpop.f32.mrb[134].mxu1 }
 0xdd2   :  { %5798 = vst.msk [vmem:[%s10835_s3 + $0x30] sm:$0xff] %vm108_vm0, %v5690_v39  ;;  %v5693_v47 = vadd.f32 %v6835_v25, %v10670_v33  ;;  %v5684_v19 = vpop.f32.mrb[135].mxu1 }
 0xdd3   :  { %5796 = vst.msk [vmem:[%s10835_s3 + $0x20] sm:$0xff] %vm108_vm0, %v5682_v12  ;;  %v5685_v2 = vadd.f32 %v10670_v33, %v5684_v19 }
 0xdd4   :  { %5799 = vst.msk [vmem:[%s10835_s3 + $0x38] sm:$0xff] %vm108_vm0, %v5693_v47 }
 0xdd5   :  { %5797 = vst.msk [vmem:[%s10835_s3 + $0x28] sm:$0xff] %vm108_vm0, %v5685_v2 }
 0xdd7   :  { %v6838_v59 = vpop.f32.mrb[136].mxu1 }
 0xdd8   :  { %v5706_v38 = vadd.f32 %v6838_v59, %v10670_v33  ;;  %v5697_v42 = vpop.f32.mrb[137].mxu1 }
 0xdd9   :  { %v5698_v45 = vadd.f32 %v10670_v33, %v5697_v42  ;;  %v6839_v37 = vpop.f32.mrb[138].mxu1 }
 0xdda   :  { %5802 = vst.msk [vmem:[%s10835_s3 + $0x50] sm:$0xff] %vm108_vm0, %v5706_v38  ;;  %v5709_v0 = vadd.f32 %v6839_v37, %v10670_v33  ;;  %v5700_v35 = vpop.f32.mrb[139].mxu1 }
 0xddb   :  { %5800 = vst.msk [vmem:[%s10835_s3 + $0x40] sm:$0xff] %vm108_vm0, %v5698_v45  ;;  %v5701_v49 = vadd.f32 %v10670_v33, %v5700_v35 }
 0xddc   :  { %5803 = vst.msk [vmem:[%s10835_s3 + $0x58] sm:$0xff] %vm108_vm0, %v5709_v0 }
 0xddd   :  { %5801 = vst.msk [vmem:[%s10835_s3 + $0x48] sm:$0xff] %vm108_vm0, %v5701_v49 }
 0xddf   :  { %v6842_v5 = vpop.f32.mrb[140].mxu1 }
 0xde0   :  { %v5722_v27 = vadd.f32 %v6842_v5, %v10670_v33  ;;  %v5713_v24 = vpop.f32.mrb[141].mxu1 }
 0xde1   :  { %v5714_v1 = vadd.f32 %v10670_v33, %v5713_v24  ;;  %v6843_v58 = vpop.f32.mrb[142].mxu1 }
 0xde2   :  { %5806 = vst.msk [vmem:[%s10835_s3 + $0x70] sm:$0xff] %vm108_vm0, %v5722_v27  ;;  %v5725_v8 = vadd.f32 %v6843_v58, %v10670_v33  ;;  %v5716_v62 = vpop.f32.mrb[143].mxu1 }
 0xde3   :  { %5804 = vst.msk [vmem:[%s10835_s3 + $0x60] sm:$0xff] %vm108_vm0, %v5714_v1  ;;  %v5717_v61 = vadd.f32 %v10670_v33, %v5716_v62 }
 0xde4   :  { %5807 = vst.msk [vmem:[%s10835_s3 + $0x78] sm:$0xff] %vm108_vm0, %v5725_v8 }
 0xde5   :  { %5805 = vst.msk [vmem:[%s10835_s3 + $0x68] sm:$0xff] %vm108_vm0, %v5717_v61 }
 0xde7   :  { %v6846_v56 = vpop.f32.mrb[144].mxu1 }
 0xde8   :  { %v5738_v51 = vadd.f32 %v6846_v56, %v10670_v33  ;;  %v5729_v36 = vpop.f32.mrb[145].mxu1 }
 0xde9   :  { %v5730_v31 = vadd.f32 %v10670_v33, %v5729_v36  ;;  %v6847_v46 = vpop.f32.mrb[146].mxu1 }
 0xdea   :  { %5810 = vst.msk [vmem:[%s10835_s3 + $0x90] sm:$0xff] %vm108_vm0, %v5738_v51  ;;  %v5741_v60 = vadd.f32 %v6847_v46, %v10670_v33  ;;  %v5732_v6 = vpop.f32.mrb[147].mxu1 }
 0xdeb   :  { %5808 = vst.msk [vmem:[%s10835_s3 + $0x80] sm:$0xff] %vm108_vm0, %v5730_v31  ;;  %v5733_v52 = vadd.f32 %v10670_v33, %v5732_v6 }
 0xdec   :  { %5811 = vst.msk [vmem:[%s10835_s3 + $0x98] sm:$0xff] %vm108_vm0, %v5741_v60 }
 0xded   :  { %5809 = vst.msk [vmem:[%s10835_s3 + $0x88] sm:$0xff] %vm108_vm0, %v5733_v52 }
 0xdef   :  { %v6850_v9 = vpop.f32.mrb[148].mxu1 }
 0xdf0   :  { %v5754_v13 = vadd.f32 %v6850_v9, %v10670_v33  ;;  %v5745_v7 = vpop.f32.mrb[149].mxu1 }
 0xdf1   :  { %v5746_v26 = vadd.f32 %v10670_v33, %v5745_v7  ;;  %v6851_v3 = vpop.f32.mrb[150].mxu1 }
 0xdf2   :  { %5814 = vst.msk [vmem:[%s10835_s3 + $0xb0] sm:$0xff] %vm108_vm0, %v5754_v13  ;;  %v5757_v11 = vadd.f32 %v6851_v3, %v10670_v33  ;;  %v5748_v44 = vpop.f32.mrb[151].mxu1 }
 0xdf3   :  { %5812 = vst.msk [vmem:[%s10835_s3 + $0xa0] sm:$0xff] %vm108_vm0, %v5746_v26  ;;  %v5749_v34 = vadd.f32 %v10670_v33, %v5748_v44 }
 0xdf4   :  { %5815 = vst.msk [vmem:[%s10835_s3 + $0xb8] sm:$0xff] %vm108_vm0, %v5757_v11 }
 0xdf5   :  { %5813 = vst.msk [vmem:[%s10835_s3 + $0xa8] sm:$0xff] %vm108_vm0, %v5749_v34 }
 0xdf7   :  { %v6854_v30 = vpop.f32.mrb[152].mxu1 }
 0xdf8   :  { %v5770_v48 = vadd.f32 %v6854_v30, %v10670_v33  ;;  %v5761_v63 = vpop.f32.mrb[153].mxu1 }
 0xdf9   :  { %v5762_v15 = vadd.f32 %v10670_v33, %v5761_v63  ;;  %v6855_v41 = vpop.f32.mrb[154].mxu1 }
 0xdfa   :  { %5818 = vst.msk [vmem:[%s10835_s3 + $0xd0] sm:$0xff] %vm108_vm0, %v5770_v48  ;;  %v5773_v54 = vadd.f32 %v6855_v41, %v10670_v33  ;;  %v5764_v20 = vpop.f32.mrb[155].mxu1 }
 0xdfb   :  { %5816 = vst.msk [vmem:[%s10835_s3 + $0xc0] sm:$0xff] %vm108_vm0, %v5762_v15  ;;  %v5765_v14 = vadd.f32 %v10670_v33, %v5764_v20 }
 0xdfc   :  { %5819 = vst.msk [vmem:[%s10835_s3 + $0xd8] sm:$0xff] %vm108_vm0, %v5773_v54 }
 0xdfd   :  { %5817 = vst.msk [vmem:[%s10835_s3 + $0xc8] sm:$0xff] %vm108_vm0, %v5765_v14 }
 0xdff   :  { %v6858_v22 = vpop.f32.mrb[156].mxu1 }
 0xe00   :  { %v5786_v32 = vadd.f32 %v6858_v22, %v10670_v33  ;;  %v5777_v21 = vpop.f32.mrb[157].mxu1 }
 0xe01   :  { %v5778_v29 = vadd.f32 %v10670_v33, %v5777_v21  ;;  %v6859_v43 = vpop.f32.mrb[158].mxu1 }
 0xe02   :  { %5822 = vst.msk [vmem:[%s10835_s3 + $0xf0] sm:$0xff] %vm108_vm0, %v5786_v32  ;;  %v5789_v53 = vadd.f32 %v6859_v43, %v10670_v33  ;;  %v5780_v23 = vpop.f32.mrb[159].mxu1 }
 0xe03   :  { %5820 = vst.msk [vmem:[%s10835_s3 + $0xe0] sm:$0xff] %vm108_vm0, %v5778_v29  ;;  %v5781_v16 = vadd.f32 %v10670_v33, %v5780_v23 }
 0xe04   :  { %5823 = vst.msk [vmem:[%s10835_s3 + $0xf8] sm:$0xff] %vm108_vm0, %v5789_v53 }
 0xe05   :  { %5821 = vst.msk [vmem:[%s10835_s3 + $0xe8] sm:$0xff] %vm108_vm0, %v5781_v16 }
 0xe06   :  { %6926 = dma.done.wait [#allocation3], 16  }
 0xe07   :  { %6927 = vsyncadd [#allocation3], 4294967280 }
 0xe08   :  { %5880 = vsyncpa [#allocation3], 1 }

</bundles_post_ra>
